<compile_context>
chip_gen: v7x
topology: tpu7x:2x2x1
jax: 0.10.0
libtpu: 0.0.40
codegen_flags: <defaults>
</compile_context>

<pallas_src>
import functools

import jax
import jax.numpy as jnp
from jax.experimental import pallas as pl
from jax.experimental.pallas import tpu as pltpu


# ------------------------------ in-kernel helpers ------------------------------

def _zshift_rows(x, d):
    """Zero-fill shift along axis 0: out[n] = x[n - d], 0 outside [0, N).  d static."""
    n = x.shape[0]
    if d == 0:
        return x
    if abs(d) >= n:
        return jnp.zeros_like(x)
    z = jnp.zeros((abs(d),) + x.shape[1:], x.dtype)
    if d > 0:
        return jnp.concatenate([z, x[: n - d]], axis=0)
    return jnp.concatenate([x[-d:], z], axis=0)


def _gelu_exact(x):
    """Exact (erf) GELU; erf via A&S 7.1.26 (|err| <= 1.5e-7), built only from ops
    with guaranteed Mosaic lowerings (abs/exp/mul/add/where)."""
    z = x * 0.7071067811865476
    a = jnp.abs(z)
    t = 1.0 / (1.0 + 0.3275911 * a)
    poly = t * (0.254829592 + t * (-0.284496736 + t * (1.421413741 +
               t * (-1.453152027 + t * 1.061405429))))
    erf_a = 1.0 - poly * jnp.exp(-a * a)
    erf = jnp.where(z < 0.0, -erf_a, erf_a)
    return 0.5 * x * (1.0 + erf)


# -------------------------------- fused kernel ---------------------------------

def _shifted_block_kernel(x_ref, wcol_ref, lng_ref, lnb_ref, w1_ref, b1_ref,
                          wdw_ref, bdw_ref, w2_ref, b2_ref, o_ref,
                          *, H, W, shift_size, pad, eps):
    """One batch image per grid step.  Everything is kept as flattened (N, ch)
    VMEM tiles (channels on lanes); the torch pad/chunk/roll/narrow shifts and the
    3x3 conv taps become in-kernel zero-fill row shifts + iota masks."""
    N = H * W
    C = x_ref.shape[-1]
    hidden = w1_ref.shape[-1]

    x = x_ref[0].astype(jnp.float32)               # (N, C): attention output / residual
    wcol = wcol_ref[...]                           # (N, 1) int32: each token's W coord

    # LayerNorm (biased variance, eps inside rsqrt -- matches torch.nn.LayerNorm)
    mean = jnp.mean(x, axis=-1, keepdims=True)
    var = jnp.mean((x - mean) ** 2, axis=-1, keepdims=True)
    y = (x - mean) * jax.lax.rsqrt(var + eps)
    y = y * lng_ref[...].astype(jnp.float32) + lnb_ref[...].astype(jnp.float32)

    # shift #1: channel chunk k rolled by s = k - pad along H.  pad+roll+crop of the
    # image == zero-fill shift by s rows, which in flattened (N, C) form is a
    # zero-fill token shift by s*W (row validity == index-range validity, no mask).
    c_chunk = C // shift_size
    cidx = jax.lax.broadcasted_iota(jnp.int32, (N, C), 1)
    y_sh = jnp.zeros_like(y)
    for k in range(shift_size):
        s = k - pad
        in_chunk = (cidx >= k * c_chunk) & (cidx < (k + 1) * c_chunk)
        y_sh = jnp.where(in_chunk, _zshift_rows(y, s * W), y_sh)

    # fc1
    h = jnp.dot(y_sh, w1_ref[...].astype(jnp.float32),
                preferred_element_type=jnp.float32) + b1_ref[...].astype(jnp.float32)

    # depthwise 3x3 conv (stride 1, zero pad 1) + exact GELU, on flattened tokens:
    # tap (dh, dw) reads h[n + dh*W + dw]; the wcol mask kills row-crossing reads,
    # the zero-fill shift kills out-of-image reads.
    wdw = wdw_ref[...].astype(jnp.float32)         # (9, hidden): row = kh*3 + kw
    acc = jnp.broadcast_to(bdw_ref[...].astype(jnp.float32), (N, hidden))
    for dh in (-1, 0, 1):
        for dw in (-1, 0, 1):
            tap = _zshift_rows(h, -(dh * W + dw))
            w_ok = ((wcol + dw) >= 0) & ((wcol + dw) < W)
            r = (dh + 1) * 3 + (dw + 1)
            acc = acc + jnp.where(w_ok, tap, 0.0) * wdw[r:r + 1, :]
    g = _gelu_exact(acc)                            # (N, hidden)

    # shift #2: channel chunk k rolled by s = k - pad along W == zero-fill token
    # shift by s plus a same-row validity mask.
    h_chunk = hidden // shift_size
    hidx = jax.lax.broadcasted_iota(jnp.int32, (N, hidden), 1)
    g_sh = jnp.zeros_like(g)
    for k in range(shift_size):
        s = k - pad
        in_chunk = (hidx >= k * h_chunk) & (hidx < (k + 1) * h_chunk)
        w_ok = ((wcol - s) >= 0) & ((wcol - s) < W)
        g_sh = jnp.where(in_chunk & w_ok, _zshift_rows(g, s), g_sh)

    # fc2 + bias + residual (drop / drop_path are identities at p = 0.0)
    out = jnp.dot(g_sh, w2_ref[...].astype(jnp.float32),
                  preferred_element_type=jnp.float32)
    out = out + b2_ref[...].astype(jnp.float32) + x
    o_ref[0] = out.astype(o_ref.dtype)


# ----------------------------------- wrapper ------------------------------------

def shifted_block_forward(params, x, H, W):
    """shiftedBlock.forward for tokens x of shape (B, N, C), N == H*W."""
    B, N, C = x.shape
    assert N == H * W
    hidden = params["w1"].shape[1]
    shift_size, pad = params["shift_size"], params["pad"]
    assert C % shift_size == 0 and hidden % shift_size == 0   # equal torch.chunk split

    # TODO(synk): BiLevelRoutingAttention definition not provided -> identity.
    attn_out = x

    # Per-token W coordinate (n % W), precomputed host-side so the kernel needs no
    # vector integer div/mod.
    wcol = (jnp.arange(N, dtype=jnp.int32) % W).reshape(N, 1)

    flops = B * N * (4 * C * hidden + 18 * hidden + 10 * C)
    transcendentals = B * N * (2 * hidden + 1)          # gelu exp+recip, LN rsqrt
    bytes_accessed = 4 * (2 * B * N * C + N + 2 * C + C * hidden + hidden
                          + 9 * hidden + hidden + hidden * C + C)

    kernel = functools.partial(_shifted_block_kernel, H=H, W=W,
                               shift_size=shift_size, pad=pad, eps=1e-5)
    bcast = lambda b: (0, 0)   # weights: same block every grid step

    # Per-step working set < 1 MiB -> comfortably inside the scoped-VMEM default on
    # v5e / v6e / v7x, so no vmem_limit_bytes override is needed at these sizes.
    return pl.pallas_call(
        kernel,
        out_shape=jax.ShapeDtypeStruct((B, N, C), x.dtype),
        grid=(B,),                                       # even-size parallel axis: feeds both v7x TCs
        in_specs=[
            pl.BlockSpec((1, N, C), lambda b: (b, 0, 0)),   # attention output / residual
            pl.BlockSpec((N, 1), bcast),                    # token W coordinates
            pl.BlockSpec((1, C), bcast),                    # LN gamma
            pl.BlockSpec((1, C), bcast),                    # LN beta
            pl.BlockSpec((C, hidden), bcast),               # fc1 weight
            pl.BlockSpec((1, hidden), bcast),               # fc1 bias
            pl.BlockSpec((9, hidden), bcast),               # dwconv weight (3*3, hidden)
            pl.BlockSpec((1, hidden), bcast),               # dwconv bias
            pl.BlockSpec((hidden, C), bcast),               # fc2 weight
            pl.BlockSpec((1, C), bcast),                    # fc2 bias
        ],
        out_specs=pl.BlockSpec((1, N, C), lambda b: (b, 0, 0)),
        compiler_params=pltpu.CompilerParams(dimension_semantics=("parallel",)),
        cost_estimate=pl.CostEstimate(flops=flops, transcendentals=transcendentals,
                                      bytes_accessed=bytes_accessed),
    )(attn_out, wcol,
      params["ln_g"].reshape(1, C), params["ln_b"].reshape(1, C),
      params["w1"], params["b1"].reshape(1, hidden),
      params["wdw"].reshape(9, hidden), params["bdw"].reshape(1, hidden),
      params["w2"], params["b2"].reshape(1, C))


# ------------------------- pure-JAX reference (verification) --------------------

def _reference_forward(params, x, H, W):
    """Literal NHWC mirror of the PyTorch module (attention treated as identity)."""
    B, N, C = x.shape
    hidden = params["w1"].shape[1]
    ss, pad = params["shift_size"], params["pad"]

    def shift(tokens, axis):        # mirrors pad / chunk / roll / cat / narrow
        Ch = tokens.shape[-1]
        img = tokens.reshape(B, H, W, Ch)
        img = jnp.pad(img, ((0, 0), (pad, pad), (pad, pad), (0, 0)))
        chunks = jnp.split(img, ss, axis=3)
        rolled = [jnp.roll(c, s, axis=axis)
                  for c, s in zip(chunks, range(-pad, pad + 1))]
        img = jnp.concatenate(rolled, axis=3)[:, pad:pad + H, pad:pad + W, :]
        return img.reshape(B, N, Ch)

    mean = jnp.mean(x, axis=-1, keepdims=True)
    var = jnp.mean((x - mean) ** 2, axis=-1, keepdims=True)
    ln = (x - mean) / jnp.sqrt(var + 1e-5) * params["ln_g"] + params["ln_b"]

    h = shift(ln, axis=1) @ params["w1"] + params["b1"]
    img = h.reshape(B, H, W, hidden)
    imgp = jnp.pad(img, ((0, 0), (1, 1), (1, 1), (0, 0)))
    conv = jnp.zeros_like(img)
    for kh in range(3):
        for kw in range(3):
            conv = conv + imgp[:, kh:kh + H, kw:kw + W, :] * params["wdw"][kh, kw]
    act = jax.nn.gelu(conv + params["bdw"], approximate=False)
    out = shift(act.reshape(B, N, hidden), axis=2) @ params["w2"] + params["b2"]
    return x + out


# ------------------------------------- main --------------------------------------

if __name__ == "__main__":
    key = jax.random.PRNGKey(0)
    B, H, W = 2, 16, 16
    dim = 10                        # divisible by shift_size = 5
    mlp_ratio = 2.0
    hidden = int(dim * mlp_ratio)   # 20, also divisible by 5
    N = H * W
    shift_size = 5
    pad = shift_size // 2

    k1, k2, k3, k4 = jax.random.split(key, 4)
    params = {
        "ln_g": jnp.ones((dim,), jnp.float32),     # LayerNorm init: weight=1, bias=0
        "ln_b": jnp.zeros((dim,), jnp.float32),
        "w1": 0.02 * jax.random.normal(k1, (dim, hidden), jnp.float32),
        "b1": jnp.zeros((hidden,), jnp.float32),
        "wdw": (2.0 / 9.0) ** 0.5 * jax.random.normal(k2, (3, 3, hidden), jnp.float32),
        "bdw": jnp.zeros((hidden,), jnp.float32),
        "w2": 0.02 * jax.random.normal(k3, (hidden, dim), jnp.float32),
        "b2": jnp.zeros((dim,), jnp.float32),
        "shift_size": shift_size,
        "pad": pad,
    }
    x = jax.random.normal(k4, (B, N, dim), jnp.float32)

    out = jax.block_until_ready(shifted_block_forward(params, x, H, W))
    assert out.shape == (B, N, dim) and out.dtype == jnp.float32

    ref = jax.block_until_ready(_reference_forward(params, x, H, W))
    abs_err = float(jnp.max(jnp.abs(out - ref)))
    mlp_mag = float(jnp.max(jnp.abs(ref - x)))
    # Tolerance allows for MXU default-precision matmul differences vs XLA while
    # still catching any shift / conv / mask logic error (which would be O(mlp_mag)).
    assert abs_err <= 1e-4 + 0.05 * mlp_mag, (abs_err, mlp_mag)

    print("KERNEL_OK")
</pallas_src>

<mosaic_0001>
module attributes {stable_mosaic.version = 11 : i64} {
  func.func @_shifted_block_kernel(%arg0: i32, %arg1: memref<1x256x10xf32, #tpu.memory_space<vmem>>, %arg2: memref<256x1xi32, #tpu.memory_space<vmem>>, %arg3: memref<1x10xf32, #tpu.memory_space<vmem>>, %arg4: memref<1x10xf32, #tpu.memory_space<vmem>>, %arg5: memref<10x20xf32, #tpu.memory_space<vmem>>, %arg6: memref<1x20xf32, #tpu.memory_space<vmem>>, %arg7: memref<9x20xf32, #tpu.memory_space<vmem>>, %arg8: memref<1x20xf32, #tpu.memory_space<vmem>>, %arg9: memref<20x10xf32, #tpu.memory_space<vmem>>, %arg10: memref<1x10xf32, #tpu.memory_space<vmem>>, %arg11: memref<1x256x10xf32, #tpu.memory_space<vmem>>) attributes {dimension_semantics = [#tpu.dimension_semantics<parallel>], iteration_bounds = array<i64: 2>, scalar_prefetch = 0 : i64, scratch_operands = 0 : i64, tpu.core_type = #tpu.core_type<tc>, window_params = [{transform_indices = @transform_0, window_bounds = array<i64: 1, 256, 10>}, {pipeline_mode = #tpu.pipeline_mode<synchronous>, transform_indices = @transform_1, window_bounds = array<i64: 256, 1>}, {pipeline_mode = #tpu.pipeline_mode<synchronous>, transform_indices = @transform_2, window_bounds = array<i64: 1, 10>}, {pipeline_mode = #tpu.pipeline_mode<synchronous>, transform_indices = @transform_3, window_bounds = array<i64: 1, 10>}, {pipeline_mode = #tpu.pipeline_mode<synchronous>, transform_indices = @transform_4, window_bounds = array<i64: 10, 20>}, {pipeline_mode = #tpu.pipeline_mode<synchronous>, transform_indices = @transform_5, window_bounds = array<i64: 1, 20>}, {pipeline_mode = #tpu.pipeline_mode<synchronous>, transform_indices = @transform_6, window_bounds = array<i64: 9, 20>}, {pipeline_mode = #tpu.pipeline_mode<synchronous>, transform_indices = @transform_7, window_bounds = array<i64: 1, 20>}, {pipeline_mode = #tpu.pipeline_mode<synchronous>, transform_indices = @transform_8, window_bounds = array<i64: 20, 10>}, {pipeline_mode = #tpu.pipeline_mode<synchronous>, transform_indices = @transform_9, window_bounds = array<i64: 1, 10>}, {transform_indices = @transform_10, window_bounds = array<i64: 1, 256, 10>}]} {
    %c0 = arith.constant 0 : index
    %c0_0 = arith.constant 0 : index
    %c0_1 = arith.constant 0 : index
    %0 = vector.load %arg1[%c0, %c0_0, %c0_1] : memref<1x256x10xf32, #tpu.memory_space<vmem>>, vector<1x256x10xf32>
    %1 = vector.shape_cast %0 : vector<1x256x10xf32> to vector<256x10xf32>
    %c0_2 = arith.constant 0 : index
    %c0_3 = arith.constant 0 : index
    %2 = vector.load %arg2[%c0_2, %c0_3] : memref<256x1xi32, #tpu.memory_space<vmem>>, vector<256x1xi32>
    %cst = arith.constant dense<0.000000e+00> : vector<256xf32>
    %3 = vector.multi_reduction <add>, %1, %cst [1] : vector<256x10xf32> to vector<256xf32>
    %4 = vector.shape_cast %3 : vector<256xf32> to vector<256x1xf32>
    %cst_4 = arith.constant 1.000000e+01 : f32
    %5 = vector.broadcast %cst_4 : f32 to vector<256x1xf32>
    %6 = arith.divf %4, %5 : vector<256x1xf32>
    %7 = vector.broadcast %6 : vector<256x1xf32> to vector<256x10xf32>
    %8 = arith.subf %1, %7 : vector<256x10xf32>
    %9 = arith.mulf %8, %8 : vector<256x10xf32>
    %cst_5 = arith.constant dense<0.000000e+00> : vector<256xf32>
    %10 = vector.multi_reduction <add>, %9, %cst_5 [1] : vector<256x10xf32> to vector<256xf32>
    %11 = vector.shape_cast %10 : vector<256xf32> to vector<256x1xf32>
    %cst_6 = arith.constant 1.000000e+01 : f32
    %12 = vector.broadcast %cst_6 : f32 to vector<256x1xf32>
    %13 = arith.divf %11, %12 : vector<256x1xf32>
    %14 = vector.broadcast %6 : vector<256x1xf32> to vector<256x10xf32>
    %15 = arith.subf %1, %14 : vector<256x10xf32>
    %cst_7 = arith.constant 9.99999974E-6 : f32
    %16 = vector.broadcast %cst_7 : f32 to vector<256x1xf32>
    %17 = arith.addf %13, %16 : vector<256x1xf32>
    %18 = math.rsqrt %17 : vector<256x1xf32>
    %19 = vector.broadcast %18 : vector<256x1xf32> to vector<256x10xf32>
    %20 = arith.mulf %15, %19 : vector<256x10xf32>
    %c0_8 = arith.constant 0 : index
    %c0_9 = arith.constant 0 : index
    %21 = vector.load %arg3[%c0_8, %c0_9] : memref<1x10xf32, #tpu.memory_space<vmem>>, vector<1x10xf32>
    %22 = vector.broadcast %21 : vector<1x10xf32> to vector<256x10xf32>
    %23 = arith.mulf %20, %22 : vector<256x10xf32>
    %c0_10 = arith.constant 0 : index
    %c0_11 = arith.constant 0 : index
    %24 = vector.load %arg4[%c0_10, %c0_11] : memref<1x10xf32, #tpu.memory_space<vmem>>, vector<1x10xf32>
    %25 = vector.broadcast %24 : vector<1x10xf32> to vector<256x10xf32>
    %26 = arith.addf %23, %25 : vector<256x10xf32>
    %27 = tpu.iota {dimensions = array<i32: 1>} : vector<256x10xi32>
    %cst_12 = arith.constant 0.000000e+00 : f32
    %28 = vector.broadcast %cst_12 : f32 to vector<256x10xf32>
    %c0_i32 = arith.constant 0 : i32
    %29 = vector.broadcast %c0_i32 : i32 to vector<256x10xi32>
    %30 = arith.cmpi sge, %27, %29 : vector<256x10xi32>
    %c2_i32 = arith.constant 2 : i32
    %31 = vector.broadcast %c2_i32 : i32 to vector<256x10xi32>
    %32 = arith.cmpi slt, %27, %31 : vector<256x10xi32>
    %33 = arith.andi %30, %32 : vector<256x10xi1>
    %cst_13 = arith.constant 0.000000e+00 : f32
    %34 = vector.broadcast %cst_13 : f32 to vector<32x10xf32>
    %35 = vector.extract_strided_slice %26 {offsets = [32, 0], sizes = [224, 10], strides = [1, 1]} : vector<256x10xf32> to vector<224x10xf32>
    %36 = tpu.concatenate %35, %34 in 0 : vector<224x10xf32>, vector<32x10xf32> -> vector<256x10xf32>
    %37 = arith.select %33, %36, %28 : vector<256x10xi1>, vector<256x10xf32>
    %c2_i32_14 = arith.constant 2 : i32
    %38 = vector.broadcast %c2_i32_14 : i32 to vector<256x10xi32>
    %39 = arith.cmpi sge, %27, %38 : vector<256x10xi32>
    %c4_i32 = arith.constant 4 : i32
    %40 = vector.broadcast %c4_i32 : i32 to vector<256x10xi32>
    %41 = arith.cmpi slt, %27, %40 : vector<256x10xi32>
    %42 = arith.andi %39, %41 : vector<256x10xi1>
    %cst_15 = arith.constant 0.000000e+00 : f32
    %43 = vector.broadcast %cst_15 : f32 to vector<16x10xf32>
    %44 = vector.extract_strided_slice %26 {offsets = [16, 0], sizes = [240, 10], strides = [1, 1]} : vector<256x10xf32> to vector<240x10xf32>
    %45 = tpu.concatenate %44, %43 in 0 : vector<240x10xf32>, vector<16x10xf32> -> vector<256x10xf32>
    %46 = arith.select %42, %45, %37 : vector<256x10xi1>, vector<256x10xf32>
    %c4_i32_16 = arith.constant 4 : i32
    %47 = vector.broadcast %c4_i32_16 : i32 to vector<256x10xi32>
    %48 = arith.cmpi sge, %27, %47 : vector<256x10xi32>
    %c6_i32 = arith.constant 6 : i32
    %49 = vector.broadcast %c6_i32 : i32 to vector<256x10xi32>
    %50 = arith.cmpi slt, %27, %49 : vector<256x10xi32>
    %51 = arith.andi %48, %50 : vector<256x10xi1>
    %52 = arith.select %51, %26, %46 : vector<256x10xi1>, vector<256x10xf32>
    %c6_i32_17 = arith.constant 6 : i32
    %53 = vector.broadcast %c6_i32_17 : i32 to vector<256x10xi32>
    %54 = arith.cmpi sge, %27, %53 : vector<256x10xi32>
    %c8_i32 = arith.constant 8 : i32
    %55 = vector.broadcast %c8_i32 : i32 to vector<256x10xi32>
    %56 = arith.cmpi slt, %27, %55 : vector<256x10xi32>
    %57 = arith.andi %54, %56 : vector<256x10xi1>
    %cst_18 = arith.constant 0.000000e+00 : f32
    %58 = vector.broadcast %cst_18 : f32 to vector<16x10xf32>
    %59 = vector.extract_strided_slice %26 {offsets = [0, 0], sizes = [240, 10], strides = [1, 1]} : vector<256x10xf32> to vector<240x10xf32>
    %60 = tpu.concatenate %58, %59 in 0 : vector<16x10xf32>, vector<240x10xf32> -> vector<256x10xf32>
    %61 = arith.select %57, %60, %52 : vector<256x10xi1>, vector<256x10xf32>
    %c8_i32_19 = arith.constant 8 : i32
    %62 = vector.broadcast %c8_i32_19 : i32 to vector<256x10xi32>
    %63 = arith.cmpi sge, %27, %62 : vector<256x10xi32>
    %c10_i32 = arith.constant 10 : i32
    %64 = vector.broadcast %c10_i32 : i32 to vector<256x10xi32>
    %65 = arith.cmpi slt, %27, %64 : vector<256x10xi32>
    %66 = arith.andi %63, %65 : vector<256x10xi1>
    %cst_20 = arith.constant 0.000000e+00 : f32
    %67 = vector.broadcast %cst_20 : f32 to vector<32x10xf32>
    %68 = vector.extract_strided_slice %26 {offsets = [0, 0], sizes = [224, 10], strides = [1, 1]} : vector<256x10xf32> to vector<224x10xf32>
    %69 = tpu.concatenate %67, %68 in 0 : vector<32x10xf32>, vector<224x10xf32> -> vector<256x10xf32>
    %70 = arith.select %66, %69, %61 : vector<256x10xi1>, vector<256x10xf32>
    %c0_21 = arith.constant 0 : index
    %c0_22 = arith.constant 0 : index
    %71 = vector.load %arg5[%c0_21, %c0_22] : memref<10x20xf32, #tpu.memory_space<vmem>>, vector<10x20xf32>
    %cst_23 = arith.constant dense<0.000000e+00> : vector<256x20xf32>
    %72 = tpu.matmul %70, %71, %cst_23 {dimension_numbers = #tpu.dot_dimension_numbers<[1], [0], [0], [1], [0, 0, 1, 1], [], []>} : vector<256x10xf32>, vector<10x20xf32>, vector<256x20xf32> -> vector<256x20xf32>
    %c0_24 = arith.constant 0 : index
    %c0_25 = arith.constant 0 : index
    %73 = vector.load %arg6[%c0_24, %c0_25] : memref<1x20xf32, #tpu.memory_space<vmem>>, vector<1x20xf32>
    %74 = vector.broadcast %73 : vector<1x20xf32> to vector<256x20xf32>
    %75 = arith.addf %72, %74 : vector<256x20xf32>
    %c0_26 = arith.constant 0 : index
    %c0_27 = arith.constant 0 : index
    %76 = vector.load %arg7[%c0_26, %c0_27] : memref<9x20xf32, #tpu.memory_space<vmem>>, vector<9x20xf32>
    %c0_28 = arith.constant 0 : index
    %c0_29 = arith.constant 0 : index
    %77 = vector.load %arg8[%c0_28, %c0_29] : memref<1x20xf32, #tpu.memory_space<vmem>>, vector<1x20xf32>
    %78 = vector.shape_cast %77 : vector<1x20xf32> to vector<1x20xf32>
    %79 = vector.broadcast %78 : vector<1x20xf32> to vector<256x20xf32>
    %cst_30 = arith.constant 0.000000e+00 : f32
    %80 = vector.broadcast %cst_30 : f32 to vector<17x20xf32>
    %81 = vector.extract_strided_slice %75 {offsets = [0, 0], sizes = [239, 20], strides = [1, 1]} : vector<256x20xf32> to vector<239x20xf32>
    %82 = tpu.concatenate %80, %81 in 0 : vector<17x20xf32>, vector<239x20xf32> -> vector<256x20xf32>
    %c-1_i32 = arith.constant -1 : i32
    %83 = vector.broadcast %c-1_i32 : i32 to vector<256x1xi32>
    %84 = arith.addi %2, %83 : vector<256x1xi32>
    %c0_i32_31 = arith.constant 0 : i32
    %85 = vector.broadcast %c0_i32_31 : i32 to vector<256x1xi32>
    %86 = arith.cmpi sge, %84, %85 : vector<256x1xi32>
    %c-1_i32_32 = arith.constant -1 : i32
    %87 = vector.broadcast %c-1_i32_32 : i32 to vector<256x1xi32>
    %88 = arith.addi %2, %87 : vector<256x1xi32>
    %c16_i32 = arith.constant 16 : i32
    %89 = vector.broadcast %c16_i32 : i32 to vector<256x1xi32>
    %90 = arith.cmpi slt, %88, %89 : vector<256x1xi32>
    %91 = arith.andi %86, %90 : vector<256x1xi1>
    %cst_33 = arith.constant 0.000000e+00 : f32
    %92 = vector.shape_cast %91 : vector<256x1xi1> to vector<256x1xi1>
    %93 = vector.broadcast %92 : vector<256x1xi1> to vector<256x20xi1>
    %94 = vector.broadcast %cst_33 : f32 to vector<256x20xf32>
    %95 = arith.select %93, %82, %94 : vector<256x20xi1>, vector<256x20xf32>
    %96 = vector.extract_strided_slice %76 {offsets = [0, 0], sizes = [1, 20], strides = [1, 1]} : vector<9x20xf32> to vector<1x20xf32>
    %97 = vector.broadcast %96 : vector<1x20xf32> to vector<256x20xf32>
    %98 = arith.mulf %95, %97 : vector<256x20xf32>
    %99 = arith.addf %79, %98 : vector<256x20xf32>
    %cst_34 = arith.constant 0.000000e+00 : f32
    %100 = vector.broadcast %cst_34 : f32 to vector<16x20xf32>
    %101 = vector.extract_strided_slice %75 {offsets = [0, 0], sizes = [240, 20], strides = [1, 1]} : vector<256x20xf32> to vector<240x20xf32>
    %102 = tpu.concatenate %100, %101 in 0 : vector<16x20xf32>, vector<240x20xf32> -> vector<256x20xf32>
    %c0_i32_35 = arith.constant 0 : i32
    %103 = vector.broadcast %c0_i32_35 : i32 to vector<256x1xi32>
    %104 = arith.addi %2, %103 : vector<256x1xi32>
    %c0_i32_36 = arith.constant 0 : i32
    %105 = vector.broadcast %c0_i32_36 : i32 to vector<256x1xi32>
    %106 = arith.cmpi sge, %104, %105 : vector<256x1xi32>
    %c0_i32_37 = arith.constant 0 : i32
    %107 = vector.broadcast %c0_i32_37 : i32 to vector<256x1xi32>
    %108 = arith.addi %2, %107 : vector<256x1xi32>
    %c16_i32_38 = arith.constant 16 : i32
    %109 = vector.broadcast %c16_i32_38 : i32 to vector<256x1xi32>
    %110 = arith.cmpi slt, %108, %109 : vector<256x1xi32>
    %111 = arith.andi %106, %110 : vector<256x1xi1>
    %cst_39 = arith.constant 0.000000e+00 : f32
    %112 = vector.shape_cast %111 : vector<256x1xi1> to vector<256x1xi1>
    %113 = vector.broadcast %112 : vector<256x1xi1> to vector<256x20xi1>
    %114 = vector.broadcast %cst_39 : f32 to vector<256x20xf32>
    %115 = arith.select %113, %102, %114 : vector<256x20xi1>, vector<256x20xf32>
    %116 = vector.extract_strided_slice %76 {offsets = [1, 0], sizes = [1, 20], strides = [1, 1]} : vector<9x20xf32> to vector<1x20xf32>
    %117 = vector.broadcast %116 : vector<1x20xf32> to vector<256x20xf32>
    %118 = arith.mulf %115, %117 : vector<256x20xf32>
    %119 = arith.addf %99, %118 : vector<256x20xf32>
    %cst_40 = arith.constant 0.000000e+00 : f32
    %120 = vector.broadcast %cst_40 : f32 to vector<15x20xf32>
    %121 = vector.extract_strided_slice %75 {offsets = [0, 0], sizes = [241, 20], strides = [1, 1]} : vector<256x20xf32> to vector<241x20xf32>
    %122 = tpu.concatenate %120, %121 in 0 : vector<15x20xf32>, vector<241x20xf32> -> vector<256x20xf32>
    %c1_i32 = arith.constant 1 : i32
    %123 = vector.broadcast %c1_i32 : i32 to vector<256x1xi32>
    %124 = arith.addi %2, %123 : vector<256x1xi32>
    %c0_i32_41 = arith.constant 0 : i32
    %125 = vector.broadcast %c0_i32_41 : i32 to vector<256x1xi32>
    %126 = arith.cmpi sge, %124, %125 : vector<256x1xi32>
    %c1_i32_42 = arith.constant 1 : i32
    %127 = vector.broadcast %c1_i32_42 : i32 to vector<256x1xi32>
    %128 = arith.addi %2, %127 : vector<256x1xi32>
    %c16_i32_43 = arith.constant 16 : i32
    %129 = vector.broadcast %c16_i32_43 : i32 to vector<256x1xi32>
    %130 = arith.cmpi slt, %128, %129 : vector<256x1xi32>
    %131 = arith.andi %126, %130 : vector<256x1xi1>
    %cst_44 = arith.constant 0.000000e+00 : f32
    %132 = vector.shape_cast %131 : vector<256x1xi1> to vector<256x1xi1>
    %133 = vector.broadcast %132 : vector<256x1xi1> to vector<256x20xi1>
    %134 = vector.broadcast %cst_44 : f32 to vector<256x20xf32>
    %135 = arith.select %133, %122, %134 : vector<256x20xi1>, vector<256x20xf32>
    %136 = vector.extract_strided_slice %76 {offsets = [2, 0], sizes = [1, 20], strides = [1, 1]} : vector<9x20xf32> to vector<1x20xf32>
    %137 = vector.broadcast %136 : vector<1x20xf32> to vector<256x20xf32>
    %138 = arith.mulf %135, %137 : vector<256x20xf32>
    %139 = arith.addf %119, %138 : vector<256x20xf32>
    %cst_45 = arith.constant 0.000000e+00 : f32
    %140 = vector.broadcast %cst_45 : f32 to vector<1x20xf32>
    %141 = vector.extract_strided_slice %75 {offsets = [0, 0], sizes = [255, 20], strides = [1, 1]} : vector<256x20xf32> to vector<255x20xf32>
    %142 = tpu.concatenate %140, %141 in 0 : vector<1x20xf32>, vector<255x20xf32> -> vector<256x20xf32>
    %c-1_i32_46 = arith.constant -1 : i32
    %143 = vector.broadcast %c-1_i32_46 : i32 to vector<256x1xi32>
    %144 = arith.addi %2, %143 : vector<256x1xi32>
    %c0_i32_47 = arith.constant 0 : i32
    %145 = vector.broadcast %c0_i32_47 : i32 to vector<256x1xi32>
    %146 = arith.cmpi sge, %144, %145 : vector<256x1xi32>
    %c-1_i32_48 = arith.constant -1 : i32
    %147 = vector.broadcast %c-1_i32_48 : i32 to vector<256x1xi32>
    %148 = arith.addi %2, %147 : vector<256x1xi32>
    %c16_i32_49 = arith.constant 16 : i32
    %149 = vector.broadcast %c16_i32_49 : i32 to vector<256x1xi32>
    %150 = arith.cmpi slt, %148, %149 : vector<256x1xi32>
    %151 = arith.andi %146, %150 : vector<256x1xi1>
    %cst_50 = arith.constant 0.000000e+00 : f32
    %152 = vector.shape_cast %151 : vector<256x1xi1> to vector<256x1xi1>
    %153 = vector.broadcast %152 : vector<256x1xi1> to vector<256x20xi1>
    %154 = vector.broadcast %cst_50 : f32 to vector<256x20xf32>
    %155 = arith.select %153, %142, %154 : vector<256x20xi1>, vector<256x20xf32>
    %156 = vector.extract_strided_slice %76 {offsets = [3, 0], sizes = [1, 20], strides = [1, 1]} : vector<9x20xf32> to vector<1x20xf32>
    %157 = vector.broadcast %156 : vector<1x20xf32> to vector<256x20xf32>
    %158 = arith.mulf %155, %157 : vector<256x20xf32>
    %159 = arith.addf %139, %158 : vector<256x20xf32>
    %c0_i32_51 = arith.constant 0 : i32
    %160 = vector.broadcast %c0_i32_51 : i32 to vector<256x1xi32>
    %161 = arith.addi %2, %160 : vector<256x1xi32>
    %c0_i32_52 = arith.constant 0 : i32
    %162 = vector.broadcast %c0_i32_52 : i32 to vector<256x1xi32>
    %163 = arith.cmpi sge, %161, %162 : vector<256x1xi32>
    %c0_i32_53 = arith.constant 0 : i32
    %164 = vector.broadcast %c0_i32_53 : i32 to vector<256x1xi32>
    %165 = arith.addi %2, %164 : vector<256x1xi32>
    %c16_i32_54 = arith.constant 16 : i32
    %166 = vector.broadcast %c16_i32_54 : i32 to vector<256x1xi32>
    %167 = arith.cmpi slt, %165, %166 : vector<256x1xi32>
    %168 = arith.andi %163, %167 : vector<256x1xi1>
    %cst_55 = arith.constant 0.000000e+00 : f32
    %169 = vector.shape_cast %168 : vector<256x1xi1> to vector<256x1xi1>
    %170 = vector.broadcast %169 : vector<256x1xi1> to vector<256x20xi1>
    %171 = vector.broadcast %cst_55 : f32 to vector<256x20xf32>
    %172 = arith.select %170, %75, %171 : vector<256x20xi1>, vector<256x20xf32>
    %173 = vector.extract_strided_slice %76 {offsets = [4, 0], sizes = [1, 20], strides = [1, 1]} : vector<9x20xf32> to vector<1x20xf32>
    %174 = vector.broadcast %173 : vector<1x20xf32> to vector<256x20xf32>
    %175 = arith.mulf %172, %174 : vector<256x20xf32>
    %176 = arith.addf %159, %175 : vector<256x20xf32>
    %cst_56 = arith.constant 0.000000e+00 : f32
    %177 = vector.broadcast %cst_56 : f32 to vector<1x20xf32>
    %178 = vector.extract_strided_slice %75 {offsets = [1, 0], sizes = [255, 20], strides = [1, 1]} : vector<256x20xf32> to vector<255x20xf32>
    %179 = tpu.concatenate %178, %177 in 0 : vector<255x20xf32>, vector<1x20xf32> -> vector<256x20xf32>
    %c1_i32_57 = arith.constant 1 : i32
    %180 = vector.broadcast %c1_i32_57 : i32 to vector<256x1xi32>
    %181 = arith.addi %2, %180 : vector<256x1xi32>
    %c0_i32_58 = arith.constant 0 : i32
    %182 = vector.broadcast %c0_i32_58 : i32 to vector<256x1xi32>
    %183 = arith.cmpi sge, %181, %182 : vector<256x1xi32>
    %c1_i32_59 = arith.constant 1 : i32
    %184 = vector.broadcast %c1_i32_59 : i32 to vector<256x1xi32>
    %185 = arith.addi %2, %184 : vector<256x1xi32>
    %c16_i32_60 = arith.constant 16 : i32
    %186 = vector.broadcast %c16_i32_60 : i32 to vector<256x1xi32>
    %187 = arith.cmpi slt, %185, %186 : vector<256x1xi32>
    %188 = arith.andi %183, %187 : vector<256x1xi1>
    %cst_61 = arith.constant 0.000000e+00 : f32
    %189 = vector.shape_cast %188 : vector<256x1xi1> to vector<256x1xi1>
    %190 = vector.broadcast %189 : vector<256x1xi1> to vector<256x20xi1>
    %191 = vector.broadcast %cst_61 : f32 to vector<256x20xf32>
    %192 = arith.select %190, %179, %191 : vector<256x20xi1>, vector<256x20xf32>
    %193 = vector.extract_strided_slice %76 {offsets = [5, 0], sizes = [1, 20], strides = [1, 1]} : vector<9x20xf32> to vector<1x20xf32>
    %194 = vector.broadcast %193 : vector<1x20xf32> to vector<256x20xf32>
    %195 = arith.mulf %192, %194 : vector<256x20xf32>
    %196 = arith.addf %176, %195 : vector<256x20xf32>
    %cst_62 = arith.constant 0.000000e+00 : f32
    %197 = vector.broadcast %cst_62 : f32 to vector<15x20xf32>
    %198 = vector.extract_strided_slice %75 {offsets = [15, 0], sizes = [241, 20], strides = [1, 1]} : vector<256x20xf32> to vector<241x20xf32>
    %199 = tpu.concatenate %198, %197 in 0 : vector<241x20xf32>, vector<15x20xf32> -> vector<256x20xf32>
    %c-1_i32_63 = arith.constant -1 : i32
    %200 = vector.broadcast %c-1_i32_63 : i32 to vector<256x1xi32>
    %201 = arith.addi %2, %200 : vector<256x1xi32>
    %c0_i32_64 = arith.constant 0 : i32
    %202 = vector.broadcast %c0_i32_64 : i32 to vector<256x1xi32>
    %203 = arith.cmpi sge, %201, %202 : vector<256x1xi32>
    %c-1_i32_65 = arith.constant -1 : i32
    %204 = vector.broadcast %c-1_i32_65 : i32 to vector<256x1xi32>
    %205 = arith.addi %2, %204 : vector<256x1xi32>
    %c16_i32_66 = arith.constant 16 : i32
    %206 = vector.broadcast %c16_i32_66 : i32 to vector<256x1xi32>
    %207 = arith.cmpi slt, %205, %206 : vector<256x1xi32>
    %208 = arith.andi %203, %207 : vector<256x1xi1>
    %cst_67 = arith.constant 0.000000e+00 : f32
    %209 = vector.shape_cast %208 : vector<256x1xi1> to vector<256x1xi1>
    %210 = vector.broadcast %209 : vector<256x1xi1> to vector<256x20xi1>
    %211 = vector.broadcast %cst_67 : f32 to vector<256x20xf32>
    %212 = arith.select %210, %199, %211 : vector<256x20xi1>, vector<256x20xf32>
    %213 = vector.extract_strided_slice %76 {offsets = [6, 0], sizes = [1, 20], strides = [1, 1]} : vector<9x20xf32> to vector<1x20xf32>
    %214 = vector.broadcast %213 : vector<1x20xf32> to vector<256x20xf32>
    %215 = arith.mulf %212, %214 : vector<256x20xf32>
    %216 = arith.addf %196, %215 : vector<256x20xf32>
    %cst_68 = arith.constant 0.000000e+00 : f32
    %217 = vector.broadcast %cst_68 : f32 to vector<16x20xf32>
    %218 = vector.extract_strided_slice %75 {offsets = [16, 0], sizes = [240, 20], strides = [1, 1]} : vector<256x20xf32> to vector<240x20xf32>
    %219 = tpu.concatenate %218, %217 in 0 : vector<240x20xf32>, vector<16x20xf32> -> vector<256x20xf32>
    %c0_i32_69 = arith.constant 0 : i32
    %220 = vector.broadcast %c0_i32_69 : i32 to vector<256x1xi32>
    %221 = arith.addi %2, %220 : vector<256x1xi32>
    %c0_i32_70 = arith.constant 0 : i32
    %222 = vector.broadcast %c0_i32_70 : i32 to vector<256x1xi32>
    %223 = arith.cmpi sge, %221, %222 : vector<256x1xi32>
    %c0_i32_71 = arith.constant 0 : i32
    %224 = vector.broadcast %c0_i32_71 : i32 to vector<256x1xi32>
    %225 = arith.addi %2, %224 : vector<256x1xi32>
    %c16_i32_72 = arith.constant 16 : i32
    %226 = vector.broadcast %c16_i32_72 : i32 to vector<256x1xi32>
    %227 = arith.cmpi slt, %225, %226 : vector<256x1xi32>
    %228 = arith.andi %223, %227 : vector<256x1xi1>
    %cst_73 = arith.constant 0.000000e+00 : f32
    %229 = vector.shape_cast %228 : vector<256x1xi1> to vector<256x1xi1>
    %230 = vector.broadcast %229 : vector<256x1xi1> to vector<256x20xi1>
    %231 = vector.broadcast %cst_73 : f32 to vector<256x20xf32>
    %232 = arith.select %230, %219, %231 : vector<256x20xi1>, vector<256x20xf32>
    %233 = vector.extract_strided_slice %76 {offsets = [7, 0], sizes = [1, 20], strides = [1, 1]} : vector<9x20xf32> to vector<1x20xf32>
    %234 = vector.broadcast %233 : vector<1x20xf32> to vector<256x20xf32>
    %235 = arith.mulf %232, %234 : vector<256x20xf32>
    %236 = arith.addf %216, %235 : vector<256x20xf32>
    %cst_74 = arith.constant 0.000000e+00 : f32
    %237 = vector.broadcast %cst_74 : f32 to vector<17x20xf32>
    %238 = vector.extract_strided_slice %75 {offsets = [17, 0], sizes = [239, 20], strides = [1, 1]} : vector<256x20xf32> to vector<239x20xf32>
    %239 = tpu.concatenate %238, %237 in 0 : vector<239x20xf32>, vector<17x20xf32> -> vector<256x20xf32>
    %c1_i32_75 = arith.constant 1 : i32
    %240 = vector.broadcast %c1_i32_75 : i32 to vector<256x1xi32>
    %241 = arith.addi %2, %240 : vector<256x1xi32>
    %c0_i32_76 = arith.constant 0 : i32
    %242 = vector.broadcast %c0_i32_76 : i32 to vector<256x1xi32>
    %243 = arith.cmpi sge, %241, %242 : vector<256x1xi32>
    %c1_i32_77 = arith.constant 1 : i32
    %244 = vector.broadcast %c1_i32_77 : i32 to vector<256x1xi32>
    %245 = arith.addi %2, %244 : vector<256x1xi32>
    %c16_i32_78 = arith.constant 16 : i32
    %246 = vector.broadcast %c16_i32_78 : i32 to vector<256x1xi32>
    %247 = arith.cmpi slt, %245, %246 : vector<256x1xi32>
    %248 = arith.andi %243, %247 : vector<256x1xi1>
    %cst_79 = arith.constant 0.000000e+00 : f32
    %249 = vector.shape_cast %248 : vector<256x1xi1> to vector<256x1xi1>
    %250 = vector.broadcast %249 : vector<256x1xi1> to vector<256x20xi1>
    %251 = vector.broadcast %cst_79 : f32 to vector<256x20xf32>
    %252 = arith.select %250, %239, %251 : vector<256x20xi1>, vector<256x20xf32>
    %253 = vector.extract_strided_slice %76 {offsets = [8, 0], sizes = [1, 20], strides = [1, 1]} : vector<9x20xf32> to vector<1x20xf32>
    %254 = vector.broadcast %253 : vector<1x20xf32> to vector<256x20xf32>
    %255 = arith.mulf %252, %254 : vector<256x20xf32>
    %256 = arith.addf %236, %255 : vector<256x20xf32>
    %cst_80 = arith.constant 0.707106769 : f32
    %257 = vector.broadcast %cst_80 : f32 to vector<256x20xf32>
    %258 = arith.mulf %256, %257 : vector<256x20xf32>
    %259 = math.absf %258 : vector<256x20xf32>
    %cst_81 = arith.constant 0.327591091 : f32
    %260 = vector.broadcast %cst_81 : f32 to vector<256x20xf32>
    %261 = arith.mulf %260, %259 : vector<256x20xf32>
    %cst_82 = arith.constant 1.000000e+00 : f32
    %262 = vector.broadcast %cst_82 : f32 to vector<256x20xf32>
    %263 = arith.addf %262, %261 : vector<256x20xf32>
    %cst_83 = arith.constant 1.000000e+00 : f32
    %264 = vector.broadcast %cst_83 : f32 to vector<256x20xf32>
    %265 = arith.divf %264, %263 : vector<256x20xf32>
    %cst_84 = arith.constant 1.06140542 : f32
    %266 = vector.broadcast %cst_84 : f32 to vector<256x20xf32>
    %267 = arith.mulf %265, %266 : vector<256x20xf32>
    %cst_85 = arith.constant -1.45315206 : f32
    %268 = vector.broadcast %cst_85 : f32 to vector<256x20xf32>
    %269 = arith.addf %268, %267 : vector<256x20xf32>
    %270 = arith.mulf %265, %269 : vector<256x20xf32>
    %cst_86 = arith.constant 1.42141378 : f32
    %271 = vector.broadcast %cst_86 : f32 to vector<256x20xf32>
    %272 = arith.addf %271, %270 : vector<256x20xf32>
    %273 = arith.mulf %265, %272 : vector<256x20xf32>
    %cst_87 = arith.constant -0.284496725 : f32
    %274 = vector.broadcast %cst_87 : f32 to vector<256x20xf32>
    %275 = arith.addf %274, %273 : vector<256x20xf32>
    %276 = arith.mulf %265, %275 : vector<256x20xf32>
    %cst_88 = arith.constant 0.254829586 : f32
    %277 = vector.broadcast %cst_88 : f32 to vector<256x20xf32>
    %278 = arith.addf %277, %276 : vector<256x20xf32>
    %279 = arith.mulf %265, %278 : vector<256x20xf32>
    %cst_89 = arith.constant 0.000000e+00 : f32
    %280 = vector.broadcast %cst_89 : f32 to vector<256x20xf32>
    %281 = arith.subf %280, %259 : vector<256x20xf32>
    %282 = arith.mulf %281, %259 : vector<256x20xf32>
    %283 = math.exp %282 : vector<256x20xf32>
    %284 = arith.mulf %279, %283 : vector<256x20xf32>
    %cst_90 = arith.constant 1.000000e+00 : f32
    %285 = vector.broadcast %cst_90 : f32 to vector<256x20xf32>
    %286 = arith.subf %285, %284 : vector<256x20xf32>
    %cst_91 = arith.constant 0.000000e+00 : f32
    %287 = vector.broadcast %cst_91 : f32 to vector<256x20xf32>
    %288 = arith.cmpf olt, %258, %287 : vector<256x20xf32>
    %cst_92 = arith.constant 0.000000e+00 : f32
    %289 = vector.broadcast %cst_92 : f32 to vector<256x20xf32>
    %290 = arith.subf %289, %286 : vector<256x20xf32>
    %291 = arith.select %288, %290, %286 : vector<256x20xi1>, vector<256x20xf32>
    %cst_93 = arith.constant 5.000000e-01 : f32
    %292 = vector.broadcast %cst_93 : f32 to vector<256x20xf32>
    %293 = arith.mulf %292, %256 : vector<256x20xf32>
    %cst_94 = arith.constant 1.000000e+00 : f32
    %294 = vector.broadcast %cst_94 : f32 to vector<256x20xf32>
    %295 = arith.addf %294, %291 : vector<256x20xf32>
    %296 = arith.mulf %293, %295 : vector<256x20xf32>
    %297 = tpu.iota {dimensions = array<i32: 1>} : vector<256x20xi32>
    %cst_95 = arith.constant 0.000000e+00 : f32
    %298 = vector.broadcast %cst_95 : f32 to vector<256x20xf32>
    %c0_i32_96 = arith.constant 0 : i32
    %299 = vector.broadcast %c0_i32_96 : i32 to vector<256x20xi32>
    %300 = arith.cmpi sge, %297, %299 : vector<256x20xi32>
    %c4_i32_97 = arith.constant 4 : i32
    %301 = vector.broadcast %c4_i32_97 : i32 to vector<256x20xi32>
    %302 = arith.cmpi slt, %297, %301 : vector<256x20xi32>
    %303 = arith.andi %300, %302 : vector<256x20xi1>
    %c-2_i32 = arith.constant -2 : i32
    %304 = vector.broadcast %c-2_i32 : i32 to vector<256x1xi32>
    %305 = arith.subi %2, %304 : vector<256x1xi32>
    %c0_i32_98 = arith.constant 0 : i32
    %306 = vector.broadcast %c0_i32_98 : i32 to vector<256x1xi32>
    %307 = arith.cmpi sge, %305, %306 : vector<256x1xi32>
    %c-2_i32_99 = arith.constant -2 : i32
    %308 = vector.broadcast %c-2_i32_99 : i32 to vector<256x1xi32>
    %309 = arith.subi %2, %308 : vector<256x1xi32>
    %c16_i32_100 = arith.constant 16 : i32
    %310 = vector.broadcast %c16_i32_100 : i32 to vector<256x1xi32>
    %311 = arith.cmpi slt, %309, %310 : vector<256x1xi32>
    %312 = arith.andi %307, %311 : vector<256x1xi1>
    %313 = vector.broadcast %312 : vector<256x1xi1> to vector<256x20xi1>
    %314 = arith.andi %303, %313 : vector<256x20xi1>
    %cst_101 = arith.constant 0.000000e+00 : f32
    %315 = vector.broadcast %cst_101 : f32 to vector<2x20xf32>
    %316 = vector.extract_strided_slice %296 {offsets = [2, 0], sizes = [254, 20], strides = [1, 1]} : vector<256x20xf32> to vector<254x20xf32>
    %317 = tpu.concatenate %316, %315 in 0 : vector<254x20xf32>, vector<2x20xf32> -> vector<256x20xf32>
    %318 = arith.select %314, %317, %298 : vector<256x20xi1>, vector<256x20xf32>
    %c4_i32_102 = arith.constant 4 : i32
    %319 = vector.broadcast %c4_i32_102 : i32 to vector<256x20xi32>
    %320 = arith.cmpi sge, %297, %319 : vector<256x20xi32>
    %c8_i32_103 = arith.constant 8 : i32
    %321 = vector.broadcast %c8_i32_103 : i32 to vector<256x20xi32>
    %322 = arith.cmpi slt, %297, %321 : vector<256x20xi32>
    %323 = arith.andi %320, %322 : vector<256x20xi1>
    %c-1_i32_104 = arith.constant -1 : i32
    %324 = vector.broadcast %c-1_i32_104 : i32 to vector<256x1xi32>
    %325 = arith.subi %2, %324 : vector<256x1xi32>
    %c0_i32_105 = arith.constant 0 : i32
    %326 = vector.broadcast %c0_i32_105 : i32 to vector<256x1xi32>
    %327 = arith.cmpi sge, %325, %326 : vector<256x1xi32>
    %c-1_i32_106 = arith.constant -1 : i32
    %328 = vector.broadcast %c-1_i32_106 : i32 to vector<256x1xi32>
    %329 = arith.subi %2, %328 : vector<256x1xi32>
    %c16_i32_107 = arith.constant 16 : i32
    %330 = vector.broadcast %c16_i32_107 : i32 to vector<256x1xi32>
    %331 = arith.cmpi slt, %329, %330 : vector<256x1xi32>
    %332 = arith.andi %327, %331 : vector<256x1xi1>
    %333 = vector.broadcast %332 : vector<256x1xi1> to vector<256x20xi1>
    %334 = arith.andi %323, %333 : vector<256x20xi1>
    %cst_108 = arith.constant 0.000000e+00 : f32
    %335 = vector.broadcast %cst_108 : f32 to vector<1x20xf32>
    %336 = vector.extract_strided_slice %296 {offsets = [1, 0], sizes = [255, 20], strides = [1, 1]} : vector<256x20xf32> to vector<255x20xf32>
    %337 = tpu.concatenate %336, %335 in 0 : vector<255x20xf32>, vector<1x20xf32> -> vector<256x20xf32>
    %338 = arith.select %334, %337, %318 : vector<256x20xi1>, vector<256x20xf32>
    %c8_i32_109 = arith.constant 8 : i32
    %339 = vector.broadcast %c8_i32_109 : i32 to vector<256x20xi32>
    %340 = arith.cmpi sge, %297, %339 : vector<256x20xi32>
    %c12_i32 = arith.constant 12 : i32
    %341 = vector.broadcast %c12_i32 : i32 to vector<256x20xi32>
    %342 = arith.cmpi slt, %297, %341 : vector<256x20xi32>
    %343 = arith.andi %340, %342 : vector<256x20xi1>
    %c0_i32_110 = arith.constant 0 : i32
    %344 = vector.broadcast %c0_i32_110 : i32 to vector<256x1xi32>
    %345 = arith.subi %2, %344 : vector<256x1xi32>
    %c0_i32_111 = arith.constant 0 : i32
    %346 = vector.broadcast %c0_i32_111 : i32 to vector<256x1xi32>
    %347 = arith.cmpi sge, %345, %346 : vector<256x1xi32>
    %c0_i32_112 = arith.constant 0 : i32
    %348 = vector.broadcast %c0_i32_112 : i32 to vector<256x1xi32>
    %349 = arith.subi %2, %348 : vector<256x1xi32>
    %c16_i32_113 = arith.constant 16 : i32
    %350 = vector.broadcast %c16_i32_113 : i32 to vector<256x1xi32>
    %351 = arith.cmpi slt, %349, %350 : vector<256x1xi32>
    %352 = arith.andi %347, %351 : vector<256x1xi1>
    %353 = vector.broadcast %352 : vector<256x1xi1> to vector<256x20xi1>
    %354 = arith.andi %343, %353 : vector<256x20xi1>
    %355 = arith.select %354, %296, %338 : vector<256x20xi1>, vector<256x20xf32>
    %c12_i32_114 = arith.constant 12 : i32
    %356 = vector.broadcast %c12_i32_114 : i32 to vector<256x20xi32>
    %357 = arith.cmpi sge, %297, %356 : vector<256x20xi32>
    %c16_i32_115 = arith.constant 16 : i32
    %358 = vector.broadcast %c16_i32_115 : i32 to vector<256x20xi32>
    %359 = arith.cmpi slt, %297, %358 : vector<256x20xi32>
    %360 = arith.andi %357, %359 : vector<256x20xi1>
    %c1_i32_116 = arith.constant 1 : i32
    %361 = vector.broadcast %c1_i32_116 : i32 to vector<256x1xi32>
    %362 = arith.subi %2, %361 : vector<256x1xi32>
    %c0_i32_117 = arith.constant 0 : i32
    %363 = vector.broadcast %c0_i32_117 : i32 to vector<256x1xi32>
    %364 = arith.cmpi sge, %362, %363 : vector<256x1xi32>
    %c1_i32_118 = arith.constant 1 : i32
    %365 = vector.broadcast %c1_i32_118 : i32 to vector<256x1xi32>
    %366 = arith.subi %2, %365 : vector<256x1xi32>
    %c16_i32_119 = arith.constant 16 : i32
    %367 = vector.broadcast %c16_i32_119 : i32 to vector<256x1xi32>
    %368 = arith.cmpi slt, %366, %367 : vector<256x1xi32>
    %369 = arith.andi %364, %368 : vector<256x1xi1>
    %370 = vector.broadcast %369 : vector<256x1xi1> to vector<256x20xi1>
    %371 = arith.andi %360, %370 : vector<256x20xi1>
    %cst_120 = arith.constant 0.000000e+00 : f32
    %372 = vector.broadcast %cst_120 : f32 to vector<1x20xf32>
    %373 = vector.extract_strided_slice %296 {offsets = [0, 0], sizes = [255, 20], strides = [1, 1]} : vector<256x20xf32> to vector<255x20xf32>
    %374 = tpu.concatenate %372, %373 in 0 : vector<1x20xf32>, vector<255x20xf32> -> vector<256x20xf32>
    %375 = arith.select %371, %374, %355 : vector<256x20xi1>, vector<256x20xf32>
    %c16_i32_121 = arith.constant 16 : i32
    %376 = vector.broadcast %c16_i32_121 : i32 to vector<256x20xi32>
    %377 = arith.cmpi sge, %297, %376 : vector<256x20xi32>
    %c20_i32 = arith.constant 20 : i32
    %378 = vector.broadcast %c20_i32 : i32 to vector<256x20xi32>
    %379 = arith.cmpi slt, %297, %378 : vector<256x20xi32>
    %380 = arith.andi %377, %379 : vector<256x20xi1>
    %c2_i32_122 = arith.constant 2 : i32
    %381 = vector.broadcast %c2_i32_122 : i32 to vector<256x1xi32>
    %382 = arith.subi %2, %381 : vector<256x1xi32>
    %c0_i32_123 = arith.constant 0 : i32
    %383 = vector.broadcast %c0_i32_123 : i32 to vector<256x1xi32>
    %384 = arith.cmpi sge, %382, %383 : vector<256x1xi32>
    %c2_i32_124 = arith.constant 2 : i32
    %385 = vector.broadcast %c2_i32_124 : i32 to vector<256x1xi32>
    %386 = arith.subi %2, %385 : vector<256x1xi32>
    %c16_i32_125 = arith.constant 16 : i32
    %387 = vector.broadcast %c16_i32_125 : i32 to vector<256x1xi32>
    %388 = arith.cmpi slt, %386, %387 : vector<256x1xi32>
    %389 = arith.andi %384, %388 : vector<256x1xi1>
    %390 = vector.broadcast %389 : vector<256x1xi1> to vector<256x20xi1>
    %391 = arith.andi %380, %390 : vector<256x20xi1>
    %cst_126 = arith.constant 0.000000e+00 : f32
    %392 = vector.broadcast %cst_126 : f32 to vector<2x20xf32>
    %393 = vector.extract_strided_slice %296 {offsets = [0, 0], sizes = [254, 20], strides = [1, 1]} : vector<256x20xf32> to vector<254x20xf32>
    %394 = tpu.concatenate %392, %393 in 0 : vector<2x20xf32>, vector<254x20xf32> -> vector<256x20xf32>
    %395 = arith.select %391, %394, %375 : vector<256x20xi1>, vector<256x20xf32>
    %c0_127 = arith.constant 0 : index
    %c0_128 = arith.constant 0 : index
    %396 = vector.load %arg9[%c0_127, %c0_128] : memref<20x10xf32, #tpu.memory_space<vmem>>, vector<20x10xf32>
    %cst_129 = arith.constant dense<0.000000e+00> : vector<256x10xf32>
    %397 = tpu.matmul %395, %396, %cst_129 {dimension_numbers = #tpu.dot_dimension_numbers<[1], [0], [0], [1], [0, 0, 1, 1], [], []>} : vector<256x20xf32>, vector<20x10xf32>, vector<256x10xf32> -> vector<256x10xf32>
    %c0_130 = arith.constant 0 : index
    %c0_131 = arith.constant 0 : index
    %398 = vector.load %arg10[%c0_130, %c0_131] : memref<1x10xf32, #tpu.memory_space<vmem>>, vector<1x10xf32>
    %399 = vector.broadcast %398 : vector<1x10xf32> to vector<256x10xf32>
    %400 = arith.addf %397, %399 : vector<256x10xf32>
    %401 = arith.addf %400, %1 : vector<256x10xf32>
    %c0_132 = arith.constant 0 : index
    %c0_133 = arith.constant 0 : index
    %c0_134 = arith.constant 0 : index
    %402 = vector.load %arg11[%c0_132, %c0_133, %c0_134] : memref<1x256x10xf32, #tpu.memory_space<vmem>>, vector<1x256x10xf32>
    %403 = vector.shape_cast %402 : vector<1x256x10xf32> to vector<256x10xf32>
    %404 = vector.shape_cast %401 : vector<256x10xf32> to vector<1x256x10xf32>
    tpu.vector_store %arg11[%c0_132, %c0_133, %c0_134], %404 {strides = array<i32>} : memref<1x256x10xf32, #tpu.memory_space<vmem>>, vector<1x256x10xf32>,
    return
  }
  func.func @transform_0(%arg0: i32) -> (i32, i32, i32) {
    %c0_i32 = arith.constant 0 : i32
    %c0_i32_0 = arith.constant 0 : i32
    %c0_i32_1 = arith.constant 0 : i32
    return %arg0, %c0_i32, %c0_i32_0 : i32, i32, i32
  }
  func.func @transform_1(%arg0: i32) -> (i32, i32) {
    %c0_i32 = arith.constant 0 : i32
    %c0_i32_0 = arith.constant 0 : i32
    %c0_i32_1 = arith.constant 0 : i32
    return %c0_i32, %c0_i32_0 : i32, i32
  }
  func.func @transform_2(%arg0: i32) -> (i32, i32) {
    %c0_i32 = arith.constant 0 : i32
    %c0_i32_0 = arith.constant 0 : i32
    %c0_i32_1 = arith.constant 0 : i32
    return %c0_i32, %c0_i32_0 : i32, i32
  }
  func.func @transform_3(%arg0: i32) -> (i32, i32) {
    %c0_i32 = arith.constant 0 : i32
    %c0_i32_0 = arith.constant 0 : i32
    %c0_i32_1 = arith.constant 0 : i32
    return %c0_i32, %c0_i32_0 : i32, i32
  }
  func.func @transform_4(%arg0: i32) -> (i32, i32) {
    %c0_i32 = arith.constant 0 : i32
    %c0_i32_0 = arith.constant 0 : i32
    %c0_i32_1 = arith.constant 0 : i32
    return %c0_i32, %c0_i32_0 : i32, i32
  }
  func.func @transform_5(%arg0: i32) -> (i32, i32) {
    %c0_i32 = arith.constant 0 : i32
    %c0_i32_0 = arith.constant 0 : i32
    %c0_i32_1 = arith.constant 0 : i32
    return %c0_i32, %c0_i32_0 : i32, i32
  }
  func.func @transform_6(%arg0: i32) -> (i32, i32) {
    %c0_i32 = arith.constant 0 : i32
    %c0_i32_0 = arith.constant 0 : i32
    %c0_i32_1 = arith.constant 0 : i32
    return %c0_i32, %c0_i32_0 : i32, i32
  }
  func.func @transform_7(%arg0: i32) -> (i32, i32) {
    %c0_i32 = arith.constant 0 : i32
    %c0_i32_0 = arith.constant 0 : i32
    %c0_i32_1 = arith.constant 0 : i32
    return %c0_i32, %c0_i32_0 : i32, i32
  }
  func.func @transform_8(%arg0: i32) -> (i32, i32) {
    %c0_i32 = arith.constant 0 : i32
    %c0_i32_0 = arith.constant 0 : i32
    %c0_i32_1 = arith.constant 0 : i32
    return %c0_i32, %c0_i32_0 : i32, i32
  }
  func.func @transform_9(%arg0: i32) -> (i32, i32) {
    %c0_i32 = arith.constant 0 : i32
    %c0_i32_0 = arith.constant 0 : i32
    %c0_i32_1 = arith.constant 0 : i32
    return %c0_i32, %c0_i32_0 : i32, i32
  }
  func.func @transform_10(%arg0: i32) -> (i32, i32, i32) {
    %c0_i32 = arith.constant 0 : i32
    %c0_i32_0 = arith.constant 0 : i32
    %c0_i32_1 = arith.constant 0 : i32
    return %arg0, %c0_i32, %c0_i32_0 : i32, i32, i32
  }
}

</mosaic_0001>

<bundles_post_ra>
// kernel: tpu_custom_call.1
= control target key start
LH: loop header
LB: loop body
LE: loop exit
PB: predicated region body
PF: predicated region fallthrough
CT: control target
= control target key end

     0   :  { %s7368_s13 = smov 0   ;;  %s15595_s0 = inlined_call_operand.vmem [shape: f32[2,256,10], index: 0, kind: input, shape index: {}]   ;;  %s15596_s1 = inlined_call_operand.vmem [shape: s32[256,1], index: 1, kind: input, shape index: {}]   ;;  %s15597_s2 = inlined_call_operand.vmem [shape: f32[1,10], index: 2, kind: input, shape index: {}]   ;;  %s15598_s3 = inlined_call_operand.vmem [shape: f32[1,10], index: 3, kind: input, shape index: {}]   ;;  %s15599_s4 = inlined_call_operand.vmem [shape: f32[10,20], index: 4, kind: input, shape index: {}]   ;;  %s15600_s5 = inlined_call_operand.vmem [shape: f32[1,20], index: 5, kind: input, shape index: {}]   ;;  %s15601_s6 = inlined_call_operand.vmem [shape: f32[9,20], index: 6, kind: input, shape index: {}]   ;;  %s15602_s7 = inlined_call_operand.vmem [shape: f32[1,20], index: 7, kind: input, shape index: {}]   ;;  %s15603_s8 = inlined_call_operand.vmem [shape: f32[20,10], index: 8, kind: input, shape index: {}]   ;;  %s15604_s9 = inlined_call_operand.vmem [shape: f32[1,10], index: 9, kind: input, shape index: {}]   ;;  %s15605_s10 = inlined_call_operand.vmem [shape: f32[2,256,10], index: 10, kind: output, shape index: {}]  }
   0x1 LB: > { %s6598_s14 = sadd.s32 4294967295, %s7309_s13   ;;  %p6602_p0 = scmp.ge.s32.totalorder %s7309_s13, 1  ;;  %s7309_s13 = sphi %s7368_s13, %s20_s13  }
   0x2   : > { %p312_p1 = scmp.lt.s32.totalorder %s7309_s13, 3 }
   0x4   : > { %p313_p2 = pnand %p6602_p0, %p312_p1 }
   0x6   : > { %316 = sbr.rel (%p313_p2) target bundleno = 1582 (0x62e), region = 60 }
   0xd   : > { %p350_p3 = scmp.lt.s32.totalorder %s6598_s14, 1  ;;  %vm15632_vm0 = vcmask 80896   ;;  %vm15626_vm1 = vcmask 1041408   ;;  %vm7312_vm2 = vmmov 1  }
   0xe   : > { %vm6987_vm3 = vmpackc.low %vm15626_vm1, %vm7312_vm2 }
   0xf   : > { %s17856_s14 = smov (!%p350_p3, %s6598_s14), 1 }
  0x10   : > { %s6809_s15 = sshll.u32 %s17856_s14, 8 }
  0x11   : > { %s7384_s18 = scalar_lea.vmem %s15595_s0, %s6809_s15  ;;  %s15463_s27 = scalar_lea.vmem %s15605_s10, %s6809_s15 }
  0x12   : > { %v7387_v0 = vld [vmem:[%s7384_s18] sm:$0xff]  ;;  %v7390_v1 = vld [vmem:[%s7384_s18 + $0x10] sm:$0xff]  ;;  %v7393_v2 = vld [vmem:[%s7384_s18 + $0x8] sm:$0xff] }
  0x13   : > { %v425_v3 = vsel %vm15632_vm0, %v7387_v0, 0.0  ;;  %v431_v4 = vsel %vm15632_vm0, %v7390_v1, 0.0  ;;  %v7400_v5 = vld [vmem:[%s7384_s18 + $0x18] sm:$0xff]  ;;  %v428_v6 = vsel %vm15632_vm0, %v7393_v2, 0.0  ;;  %v7407_v8 = vld [vmem:[%s7384_s18 + $0x20] sm:$0xff]  ;;  %v7410_v9 = vld [vmem:[%s7384_s18 + $0x28] sm:$0xff] }
  0x14   : > { %426 = vadd.xlane.f32.xlu0 %v425_v3  ;;  %432 = vadd.xlane.f32.xlu1 %v431_v4  ;;  %v434_v7 = vsel %vm15632_vm0, %v7400_v5, 0.0  ;;  %v437_v10 = vsel %vm15632_vm0, %v7407_v8, 0.0  ;;  %v440_v11 = vsel %vm15632_vm0, %v7410_v9, 0.0  ;;  %v7417_v12 = vld [vmem:[%s7384_s18 + $0x30] sm:$0xff]  ;;  %v7420_v13 = vld [vmem:[%s7384_s18 + $0x38] sm:$0xff]  ;;  %v7427_v16 = vld [vmem:[%s7384_s18 + $0x40] sm:$0xff] }
  0x15   : > { %v443_v14 = vsel %vm15632_vm0, %v7417_v12, 0.0  ;;  %v446_v15 = vsel %vm15632_vm0, %v7420_v13, 0.0  ;;  %v7430_v17 = vld [vmem:[%s7384_s18 + $0x48] sm:$0xff]  ;;  %v449_v18 = vsel %vm15632_vm0, %v7427_v16, 0.0  ;;  %v7437_v20 = vld [vmem:[%s7384_s18 + $0x50] sm:$0xff]  ;;  %v7440_v21 = vld [vmem:[%s7384_s18 + $0x58] sm:$0xff] }
  0x16   : > { %v452_v19 = vsel %vm15632_vm0, %v7430_v17, 0.0  ;;  %v455_v22 = vsel %vm15632_vm0, %v7437_v20, 0.0  ;;  %v458_v23 = vsel %vm15632_vm0, %v7440_v21, 0.0  ;;  %v7447_v24 = vld [vmem:[%s7384_s18 + $0x60] sm:$0xff]  ;;  %v7450_v25 = vld [vmem:[%s7384_s18 + $0x68] sm:$0xff]  ;;  %v7457_v28 = vld [vmem:[%s7384_s18 + $0x70] sm:$0xff] }
  0x17   : > { %v461_v26 = vsel %vm15632_vm0, %v7447_v24, 0.0  ;;  %v464_v27 = vsel %vm15632_vm0, %v7450_v25, 0.0  ;;  %v7460_v29 = vld [vmem:[%s7384_s18 + $0x78] sm:$0xff]  ;;  %v467_v30 = vsel %vm15632_vm0, %v7457_v28, 0.0  ;;  %v7467_v32 = vld [vmem:[%s7384_s18 + $0x80] sm:$0xff]  ;;  %v7470_v33 = vld [vmem:[%s7384_s18 + $0x88] sm:$0xff] }
  0x18   : > { %429 = vadd.xlane.f32.xlu0 %v428_v6  ;;  %435 = vadd.xlane.f32.xlu1 %v434_v7  ;;  %v470_v31 = vsel %vm15632_vm0, %v7460_v29, 0.0  ;;  %v473_v34 = vsel %vm15632_vm0, %v7467_v32, 0.0  ;;  %v476_v35 = vsel %vm15632_vm0, %v7470_v33, 0.0  ;;  %v7477_v36 = vld [vmem:[%s7384_s18 + $0x90] sm:$0xff]  ;;  %v7480_v37 = vld [vmem:[%s7384_s18 + $0x98] sm:$0xff]  ;;  %v7487_v40 = vld [vmem:[%s7384_s18 + $0xa0] sm:$0xff] }
  0x19   : > { %v479_v38 = vsel %vm15632_vm0, %v7477_v36, 0.0  ;;  %v482_v39 = vsel %vm15632_vm0, %v7480_v37, 0.0  ;;  %v7490_v41 = vld [vmem:[%s7384_s18 + $0xa8] sm:$0xff]  ;;  %v485_v42 = vsel %vm15632_vm0, %v7487_v40, 0.0  ;;  %v7497_v44 = vld [vmem:[%s7384_s18 + $0xb0] sm:$0xff]  ;;  %v7500_v45 = vld [vmem:[%s7384_s18 + $0xb8] sm:$0xff] }
  0x1a   : > { %v488_v43 = vsel %vm15632_vm0, %v7490_v41, 0.0  ;;  %v491_v46 = vsel %vm15632_vm0, %v7497_v44, 0.0  ;;  %v494_v47 = vsel %vm15632_vm0, %v7500_v45, 0.0  ;;  %v7507_v48 = vld [vmem:[%s7384_s18 + $0xc0] sm:$0xff]  ;;  %v7510_v49 = vld [vmem:[%s7384_s18 + $0xc8] sm:$0xff]  ;;  %v7517_v52 = vld [vmem:[%s7384_s18 + $0xd0] sm:$0xff] }
  0x1b   : > { %v497_v50 = vsel %vm15632_vm0, %v7507_v48, 0.0  ;;  %v500_v51 = vsel %vm15632_vm0, %v7510_v49, 0.0  ;;  %v7520_v53 = vld [vmem:[%s7384_s18 + $0xd8] sm:$0xff]  ;;  %v503_v54 = vsel %vm15632_vm0, %v7517_v52, 0.0  ;;  %v7527_v56 = vld [vmem:[%s7384_s18 + $0xe0] sm:$0xff]  ;;  %v7530_v57 = vld [vmem:[%s7384_s18 + $0xe8] sm:$0xff] }
  0x1c   : > { %438 = vadd.xlane.f32.xlu0 %v437_v10  ;;  %441 = vadd.xlane.f32.xlu1 %v440_v11  ;;  %v506_v55 = vsel %vm15632_vm0, %v7520_v53, 0.0  ;;  %v509_v58 = vsel %vm15632_vm0, %v7527_v56, 0.0  ;;  %v512_v59 = vsel %vm15632_vm0, %v7530_v57, 0.0  ;;  %v7537_v60 = vld [vmem:[%s7384_s18 + $0xf0] sm:$0xff]  ;;  %v7540_v61 = vld [vmem:[%s7384_s18 + $0xf8] sm:$0xff]  ;;  %v15619_v3 = vmov 0  }
  0x1d   : > { %v515_v62 = vsel %vm15632_vm0, %v7537_v60, 0.0  ;;  %v518_v63 = vsel %vm15632_vm0, %v7540_v61, 0.0  ;;  %7007 = vset.pattern.permute.xlu1 %v15619_v3  ;;  %7006 = vset.pattern.permute.xlu0 %v15619_v3 }
  0x20   : > { %444 = vadd.xlane.f32.xlu0 %v443_v14  ;;  %447 = vadd.xlane.f32.xlu1 %v446_v15 }
  0x24   : > { %450 = vadd.xlane.f32.xlu0 %v449_v18  ;;  %453 = vadd.xlane.f32.xlu1 %v452_v19 }
  0x28   : > { %456 = vadd.xlane.f32.xlu0 %v455_v22  ;;  %459 = vadd.xlane.f32.xlu1 %v458_v23 }
  0x2c   : > { %462 = vadd.xlane.f32.xlu0 %v461_v26  ;;  %465 = vadd.xlane.f32.xlu1 %v464_v27 }
  0x30   : > { %468 = vadd.xlane.f32.xlu0 %v467_v30  ;;  %471 = vadd.xlane.f32.xlu1 %v470_v31 }
  0x34   : > { %474 = vadd.xlane.f32.xlu0 %v473_v34  ;;  %477 = vadd.xlane.f32.xlu1 %v476_v35 }
  0x38   : > { %480 = vadd.xlane.f32.xlu0 %v479_v38  ;;  %483 = vadd.xlane.f32.xlu1 %v482_v39 }
  0x3c   : > { %486 = vadd.xlane.f32.xlu0 %v485_v42  ;;  %489 = vadd.xlane.f32.xlu1 %v488_v43 }
  0x40   : > { %492 = vadd.xlane.f32.xlu0 %v491_v46  ;;  %495 = vadd.xlane.f32.xlu1 %v494_v47 }
  0x44   : > { %498 = vadd.xlane.f32.xlu0 %v497_v50  ;;  %501 = vadd.xlane.f32.xlu1 %v500_v51 }
  0x48   : > { %504 = vadd.xlane.f32.xlu0 %v503_v54  ;;  %507 = vadd.xlane.f32.xlu1 %v506_v55 }
  0x4c   : > { %510 = vadd.xlane.f32.xlu0 %v509_v58  ;;  %513 = vadd.xlane.f32.xlu1 %v512_v59 }
  0x50   : > { %516 = vadd.xlane.f32.xlu0 %v515_v62  ;;  %519 = vadd.xlane.f32.xlu1 %v518_v63 }
  0xa1   : > { %v427_v4 = vpop.xlane.xlu0 %426  ;;  %v433_v6 = vpop.xlane.xlu1 %432 }
  0xa2   : > { %v522_v7 = vmul.f32 0.1, %v427_v4  ;;  %v524_v10 = vmul.f32 0.1, %v433_v6 }
  0xa4   : > { %v7549_v11 = vsub.f32 %v7387_v0, %v522_v7  ;;  %v7552_v14 = vsub.f32 %v7390_v1, %v524_v10 }
  0xa5   : > { %v430_v15 = vpop.xlane.xlu0 %429  ;;  %v436_v18 = vpop.xlane.xlu1 %435 }
  0xa6   : > { %v523_v19 = vmul.f32 0.1, %v430_v15  ;;  %v525_v22 = vmul.f32 0.1, %v436_v18  ;;  %v586_v23 = vmul.f32 %v7549_v11, %v7549_v11  ;;  %v588_v26 = vmul.f32 %v7552_v14, %v7552_v14 }
  0xa8   : > { %v7559_v27 = vsub.f32 %v7393_v2, %v523_v19  ;;  %v7562_v30 = vsub.f32 %v7400_v5, %v525_v22  ;;  %v618_v0 = vsel %vm15632_vm0, %v586_v23, 0.0  ;;  %v624_v34 = vsel %vm15632_vm0, %v588_v26, 0.0 }
  0xa9   : > { %619 = vadd.xlane.f32.xlu0 %v618_v0  ;;  %v439_v1 = vpop.xlane.xlu0 %438  ;;  %v442_v31 = vpop.xlane.xlu1 %441 }
  0xaa   : > { %v526_v35 = vmul.f32 0.1, %v439_v1  ;;  %v527_v38 = vmul.f32 0.1, %v442_v31  ;;  %v587_v39 = vmul.f32 %v7559_v27, %v7559_v27  ;;  %v589_v42 = vmul.f32 %v7562_v30, %v7562_v30 }
  0xac   : > { %v7571_v2 = vsub.f32 %v7407_v8, %v526_v35  ;;  %v7574_v5 = vsub.f32 %v7410_v9, %v527_v38  ;;  %v621_v43 = vsel %vm15632_vm0, %v587_v39, 0.0  ;;  %v627_v50 = vsel %vm15632_vm0, %v589_v42, 0.0 }
  0xad   : > { %625 = vadd.xlane.f32.xlu0 %v624_v34  ;;  %622 = vadd.xlane.f32.xlu1 %v621_v43  ;;  %v445_v46 = vpop.xlane.xlu0 %444  ;;  %v448_v47 = vpop.xlane.xlu1 %447 }
  0xae   : > { %v528_v51 = vmul.f32 0.1, %v445_v46  ;;  %v529_v54 = vmul.f32 0.1, %v448_v47  ;;  %v590_v55 = vmul.f32 %v7571_v2, %v7571_v2  ;;  %v591_v8 = vmul.f32 %v7574_v5, %v7574_v5 }
  0xb0   : > { %v7583_v58 = vsub.f32 %v7417_v12, %v528_v51  ;;  %v7586_v9 = vsub.f32 %v7420_v13, %v529_v54  ;;  %v630_v59 = vsel %vm15632_vm0, %v590_v55, 0.0  ;;  %v633_v4 = vsel %vm15632_vm0, %v591_v8, 0.0 }
  0xb1   : > { %628 = vadd.xlane.f32.xlu1 %v627_v50  ;;  %631 = vadd.xlane.f32.xlu0 %v630_v59  ;;  %v451_v62 = vpop.xlane.xlu0 %450  ;;  %v454_v63 = vpop.xlane.xlu1 %453 }
  0xb2   : > { %v530_v6 = vmul.f32 0.1, %v451_v62  ;;  %v531_v7 = vmul.f32 0.1, %v454_v63  ;;  %v592_v10 = vmul.f32 %v7583_v58, %v7583_v58  ;;  %v593_v12 = vmul.f32 %v7586_v9, %v7586_v9 }
  0xb4   : > { %v7595_v15 = vsub.f32 %v7427_v16, %v530_v6  ;;  %v7598_v13 = vsub.f32 %v7430_v17, %v531_v7  ;;  %v636_v18 = vsel %vm15632_vm0, %v592_v10, 0.0  ;;  %v639_v23 = vsel %vm15632_vm0, %v593_v12, 0.0 }
  0xb5   : > { %634 = vadd.xlane.f32.xlu1 %v633_v4  ;;  %637 = vadd.xlane.f32.xlu0 %v636_v18  ;;  %v457_v19 = vpop.xlane.xlu0 %456  ;;  %v460_v22 = vpop.xlane.xlu1 %459 }
  0xb6   : > { %16134 = vst [vmem:[#allocation2_spill] sm:$0xff] %v7598_v13  ;;  %v532_v26 = vmul.f32 0.1, %v457_v19  ;;  %v533_v0 = vmul.f32 0.1, %v460_v22  ;;  %v594_v1 = vmul.f32 %v7595_v15, %v7595_v15  ;;  %v595_v16 = vmul.f32 %v7598_v13, %v7598_v13 }
  0xb8   : > { %v7607_v31 = vsub.f32 %v7437_v20, %v532_v26  ;;  %v7610_v17 = vsub.f32 %v7440_v21, %v533_v0  ;;  %v642_v34 = vsel %vm15632_vm0, %v594_v1, 0.0  ;;  %v645_v39 = vsel %vm15632_vm0, %v595_v16, 0.0 }
  0xb9   : > { %640 = vadd.xlane.f32.xlu1 %v639_v23  ;;  %643 = vadd.xlane.f32.xlu0 %v642_v34  ;;  %v463_v35 = vpop.xlane.xlu0 %462  ;;  %v466_v38 = vpop.xlane.xlu1 %465 }
  0xba   : > { %16135 = vst [vmem:[#allocation3_spill] sm:$0xff] %v7607_v31  ;;  %16136 = vst [vmem:[#allocation4_spill] sm:$0xff] %v7610_v17  ;;  %v534_v42 = vmul.f32 0.1, %v463_v35  ;;  %v535_v43 = vmul.f32 0.1, %v466_v38  ;;  %v596_v46 = vmul.f32 %v7607_v31, %v7607_v31  ;;  %v597_v20 = vmul.f32 %v7610_v17, %v7610_v17 }
  0xbb   : > { %v16230_v17 = vmov 0 }
  0xbc   : > { %v7619_v47 = vsub.f32 %v7447_v24, %v534_v42  ;;  %v7622_v21 = vsub.f32 %v7450_v25, %v535_v43  ;;  %v648_v50 = vsel %vm15632_vm0, %v596_v46, 0.0  ;;  %v651_v55 = vsel %vm15632_vm0, %v597_v20, 0.0 }
  0xbd   : > { %646 = vadd.xlane.f32.xlu1 %v645_v39  ;;  %649 = vadd.xlane.f32.xlu0 %v648_v50  ;;  %v469_v51 = vpop.xlane.xlu0 %468  ;;  %v472_v54 = vpop.xlane.xlu1 %471 }
  0xbe   : > { %16137 = vst [vmem:[#allocation5_spill] sm:$0xff] %v7619_v47  ;;  %16138 = vst [vmem:[#allocation6_spill] sm:$0xff] %v7622_v21  ;;  %v536_v8 = vmul.f32 0.1, %v469_v51  ;;  %v537_v59 = vmul.f32 0.1, %v472_v54  ;;  %v598_v62 = vmul.f32 %v7619_v47, %v7619_v47  ;;  %v599_v24 = vmul.f32 %v7622_v21, %v7622_v21 }
  0xbf   : > { %v16226_v47 = vmov 0 }
  0xc0   : > { %v7631_v63 = vsub.f32 %v7457_v28, %v536_v8  ;;  %v7634_v25 = vsub.f32 %v7460_v29, %v537_v59  ;;  %v654_v4 = vsel %vm15632_vm0, %v598_v62, 0.0  ;;  %v657_v10 = vsel %vm15632_vm0, %v599_v24, 0.0 }
  0xc1   : > { %652 = vadd.xlane.f32.xlu1 %v651_v55  ;;  %655 = vadd.xlane.f32.xlu0 %v654_v4  ;;  %v475_v6 = vpop.xlane.xlu0 %474  ;;  %v478_v7 = vpop.xlane.xlu1 %477 }
  0xc2   : > { %16139 = vst [vmem:[#allocation7_spill] sm:$0xff] %v7631_v63  ;;  %16140 = vst [vmem:[#allocation8_spill] sm:$0xff] %v7634_v25  ;;  %v538_v12 = vmul.f32 0.1, %v475_v6  ;;  %v539_v18 = vmul.f32 0.1, %v478_v7  ;;  %v600_v19 = vmul.f32 %v7631_v63, %v7631_v63  ;;  %v601_v28 = vmul.f32 %v7634_v25, %v7634_v25 }
  0xc4   : > { %v7643_v22 = vsub.f32 %v7467_v32, %v538_v12  ;;  %v7646_v29 = vsub.f32 %v7470_v33, %v539_v18  ;;  %v660_v23 = vsel %vm15632_vm0, %v600_v19, 0.0  ;;  %v663_v1 = vsel %vm15632_vm0, %v601_v28, 0.0 }
  0xc5   : > { %658 = vadd.xlane.f32.xlu1 %v657_v10  ;;  %661 = vadd.xlane.f32.xlu0 %v660_v23  ;;  %v481_v26 = vpop.xlane.xlu0 %480  ;;  %v484_v0 = vpop.xlane.xlu1 %483 }
  0xc6   : > { %16141 = vst [vmem:[#allocation9_spill] sm:$0xff] %v7643_v22  ;;  %16142 = vst [vmem:[#allocation10_spill] sm:$0xff] %v7646_v29  ;;  %v540_v16 = vmul.f32 0.1, %v481_v26  ;;  %v541_v34 = vmul.f32 0.1, %v484_v0  ;;  %v602_v35 = vmul.f32 %v7643_v22, %v7643_v22  ;;  %v603_v32 = vmul.f32 %v7646_v29, %v7646_v29 }
  0xc7   : > { %v16196_v22 = vmov 0 }
  0xc8   : > { %v7655_v38 = vsub.f32 %v7477_v36, %v540_v16  ;;  %v7658_v33 = vsub.f32 %v7480_v37, %v541_v34  ;;  %v666_v39 = vsel %vm15632_vm0, %v602_v35, 0.0  ;;  %v669_v46 = vsel %vm15632_vm0, %v603_v32, 0.0 }
  0xc9   : > { %664 = vadd.xlane.f32.xlu1 %v663_v1  ;;  %667 = vadd.xlane.f32.xlu0 %v666_v39  ;;  %v487_v42 = vpop.xlane.xlu0 %486  ;;  %v490_v43 = vpop.xlane.xlu1 %489 }
  0xca   : > { %16143 = vst [vmem:[#allocation11_spill] sm:$0xff] %v7655_v38  ;;  %16144 = vst [vmem:[#allocation12_spill] sm:$0xff] %v7658_v33  ;;  %v542_v20 = vmul.f32 0.1, %v487_v42  ;;  %v543_v50 = vmul.f32 0.1, %v490_v43  ;;  %v604_v51 = vmul.f32 %v7655_v38, %v7655_v38  ;;  %v605_v36 = vmul.f32 %v7658_v33, %v7658_v33 }
  0xcb   : > { %v1092_v43 = vld [vmem:[%s15599_s4 + $0x8] sm:$0x3]  ;;  %v16193_v33 = vmov 0  ;;  %v414_v38 = vld [vmem:[%s15596_s1 + $0xb0] sm:$0xff] }
  0xcc   : > { %v7667_v54 = vsub.f32 %v7487_v40, %v542_v20  ;;  %v7670_v37 = vsub.f32 %v7490_v41, %v543_v50  ;;  %v672_v55 = vsel %vm15632_vm0, %v604_v51, 0.0  ;;  %v675_v62 = vsel %vm15632_vm0, %v605_v36, 0.0 }
  0xcd   : > { %670 = vadd.xlane.f32.xlu1 %v669_v46  ;;  %673 = vadd.xlane.f32.xlu0 %v672_v55  ;;  %v493_v8 = vpop.xlane.xlu0 %492  ;;  %v496_v59 = vpop.xlane.xlu1 %495  ;;  %v1577_v25 = vadd.s32 4294967295, %v414_v38 }
  0xce   : > { %16145 = vst [vmem:[#allocation13_spill] sm:$0xff] %v7667_v54  ;;  %16146 = vst [vmem:[#allocation14_spill] sm:$0xff] %v7670_v37  ;;  %v544_v24 = vmul.f32 0.1, %v493_v8  ;;  %v545_v4 = vmul.f32 0.1, %v496_v59  ;;  %v606_v6 = vmul.f32 %v7667_v54, %v7667_v54  ;;  %v607_v40 = vmul.f32 %v7670_v37, %v7670_v37 }
  0xcf   : > { %v412_v54 = vld [vmem:[%s15596_s1 + $0xa0] sm:$0xff] }
  0xd0   : > { %v7679_v7 = vsub.f32 %v7497_v44, %v544_v24  ;;  %v7682_v41 = vsub.f32 %v7500_v45, %v545_v4  ;;  %v678_v10 = vsel %vm15632_vm0, %v606_v6, 0.0  ;;  %v681_v19 = vsel %vm15632_vm0, %v607_v40, 0.0 }
  0xd1   : > { %676 = vadd.xlane.f32.xlu1 %v675_v62  ;;  %679 = vadd.xlane.f32.xlu0 %v678_v10  ;;  %v499_v12 = vpop.xlane.xlu0 %498  ;;  %v502_v18 = vpop.xlane.xlu1 %501 }
  0xd2   : > { %16147 = vst [vmem:[#allocation15_spill] sm:$0xff] %v7679_v7  ;;  %16148 = vst [vmem:[#allocation16_spill] sm:$0xff] %v7682_v41  ;;  %v546_v28 = vmul.f32 0.1, %v499_v12  ;;  %v547_v23 = vmul.f32 0.1, %v502_v18  ;;  %v608_v26 = vmul.f32 %v7679_v7, %v7679_v7  ;;  %v609_v44 = vmul.f32 %v7682_v41, %v7682_v41 }
  0xd4   : > { %v7691_v0 = vsub.f32 %v7507_v48, %v546_v28  ;;  %v7694_v45 = vsub.f32 %v7510_v49, %v547_v23  ;;  %v684_v1 = vsel %vm15632_vm0, %v608_v26, 0.0  ;;  %v687_v35 = vsel %vm15632_vm0, %v609_v44, 0.0  ;;  %v1091_v49 = vld [vmem:[%s15599_s4] sm:$0xff]  ;;  %v7744_v44 = vld [vmem:[%s15596_s1 + $0x8] sm:$0xff] }
  0xd5   : > { %682 = vadd.xlane.f32.xlu1 %v681_v19  ;;  %685 = vadd.xlane.f32.xlu0 %v684_v1  ;;  %v505_v16 = vpop.xlane.xlu0 %504  ;;  %v508_v34 = vpop.xlane.xlu1 %507  ;;  %v6986_v8 = vpack.c.bf16 %v1092_v43, %v1091_v49  ;;  %v7750_v1 = vld [vmem:[%s15596_s1 + $0x10] sm:$0xff]  ;;  %v7774_v49 = vld [vmem:[%s15596_s1 + $0x20] sm:$0xff] }
  0xd6   : > { %16149 = vst [vmem:[#allocation17_spill] sm:$0xff] %v7691_v0  ;;  %16150 = vst [vmem:[#allocation18_spill] sm:$0xff] %v7694_v45  ;;  %v548_v32 = vmul.f32 0.1, %v505_v16  ;;  %v549_v39 = vmul.f32 0.1, %v508_v34  ;;  %v610_v42 = vmul.f32 %v7691_v0, %v7691_v0  ;;  %v611_v48 = vmul.f32 %v7694_v45, %v7694_v45 }
  0xd7   : > { %6988 = vmatprep.subr.msk.bf16.mxu0 %vm6987_vm3, %v6986_v8  ;;  %v7755_v16 = vld [vmem:[%s15596_s1] sm:$0xff]  ;;  %v1557_v34 = vadd.s32 4294967295, %v7750_v1 }
  0xd8   : > { %v7709_v46 = vsub.f32 %v7517_v52, %v548_v32  ;;  %v7712_v20 = vsub.f32 %v7520_v53, %v549_v39  ;;  %v690_v50 = vsel %vm15632_vm0, %v610_v42, 0.0  ;;  %v693_v55 = vsel %vm15632_vm0, %v611_v48, 0.0  ;;  %6991 = vmatpush3.bf16.msk.msra.mxu0 %vm6987_vm3, %v6986_v8  ;;  %v7762_v32 = vld [vmem:[%s15596_s1 + $0x18] sm:$0xff]  ;;  %v7767_v39 = vld [vmem:[%s15596_s1 + $0x48] sm:$0xff]  ;;  %v7982_v45 = vld [vmem:[%s15596_s1 + $0x80] sm:$0xff] }
  0xd9   : > { %688 = vadd.xlane.f32.xlu1 %v687_v35  ;;  %691 = vadd.xlane.f32.xlu0 %v690_v50  ;;  %v511_v51 = vpop.xlane.xlu0 %510  ;;  %v514_v36 = vpop.xlane.xlu1 %513  ;;  %v1555_v35 = vadd.s32 4294967295, %v7755_v16  ;;  %vm1589_vm7 = vcmp.ge.s32.totalorder %v1557_v34, 0  ;;  %vm1621_vm8 = vcmp.lt.s32.totalorder %v1557_v34, 16  ;;  %v1558_v42 = vadd.s32 4294967295, %v7762_v32  ;;  %v7782_v50 = vld [vmem:[%s15596_s1 + $0x58] sm:$0xff] }
  0xda   : > { %16151 = vst [vmem:[#allocation19_spill] sm:$0xff] %v7709_v46  ;;  %16152 = vst [vmem:[#allocation20_spill] sm:$0xff] %v7712_v20  ;;  %v550_v59 = vmul.f32 0.1, %v511_v51  ;;  %v551_v62 = vmul.f32 0.1, %v514_v36  ;;  %v612_v24 = vmul.f32 %v7709_v46, %v7709_v46  ;;  %v613_v52 = vmul.f32 %v7712_v20, %v7712_v20 }
  0xdb   : > { %vm1587_vm9 = vcmp.ge.s32.totalorder %v1555_v35, 0  ;;  %vm1619_vm10 = vcmp.lt.s32.totalorder %v1555_v35, 16  ;;  %v1564_v48 = vadd.s32 4294967295, %v7767_v39  ;;  %vm1653_vm11 = vmand %vm1589_vm7, %vm1621_vm8  ;;  %vm1590_vm13 = vcmp.ge.s32.totalorder %v1558_v42, 0  ;;  %v7852_v35 = vld [vmem:[%s15596_s1 + $0xa8] sm:$0xff] }
  0xdc   : > { %v7722_v53 = vsub.f32 %v7527_v56, %v550_v59  ;;  %v7725_v4 = vsub.f32 %v7530_v57, %v551_v62  ;;  %v696_v6 = vsel %vm15632_vm0, %v612_v24, 0.0  ;;  %v699_v12 = vsel %vm15632_vm0, %v613_v52, 0.0  ;;  %vm1651_vm12 = vmand %vm1587_vm9, %vm1619_vm10  ;;  %v7798_v59 = vld [vmem:[%s15596_s1 + $0x68] sm:$0xff] }
  0xdd   : > { %694 = vadd.xlane.f32.xlu1 %v693_v55  ;;  %697 = vadd.xlane.f32.xlu0 %v696_v6  ;;  %v517_v40 = vpop.xlane.xlu0 %516  ;;  %vm1622_vm14 = vcmp.lt.s32.totalorder %v1558_v42, 16  ;;  %v1559_v51 = vadd.s32 4294967295, %v7774_v49  ;;  %vm1596_vm15 = vcmp.ge.s32.totalorder %v1564_v48, 0  ;;  %vm1628_vm2 = vcmp.lt.s32.totalorder %v1564_v48, 16  ;;  %v7790_v55 = vld [vmem:[%s15596_s1 + $0x28] sm:$0xff] }
  0xde   : > { %16153 = vst [vmem:[#allocation21_spill] sm:$0xff] %v7722_v53  ;;  %16154 = vst [vmem:[#allocation22_spill] sm:$0xff] %v7725_v4  ;;  %v552_v10 = vmul.f32 0.1, %v517_v40  ;;  %v614_v18 = vmul.f32 %v7722_v53, %v7722_v53  ;;  %v615_v19 = vmul.f32 %v7725_v4, %v7725_v4  ;;  %v1566_v36 = vadd.s32 4294967295, %v7782_v50  ;;  %v7813_v40 = vld [vmem:[%s15596_s1 + $0x78] sm:$0xff] }
  0xdf   : > { %v7793_v8 = vsel %vm1653_vm11, 1, %v15619_v3  ;;  %v7801_v62 = vsel %vm1651_vm12, 1, %v15619_v3  ;;  %vm1654_vm3 = vmand %vm1590_vm13, %vm1622_vm14  ;;  %v1560_v24 = vadd.s32 4294967295, %v7790_v55  ;;  %v1568_v52 = vadd.s32 4294967295, %v7798_v59 }
  0xe0   : > { %v7734_v56 = vsub.f32 %v7537_v60, %v552_v10  ;;  %v702_v57 = vsel %vm15632_vm0, %v614_v18, 0.0  ;;  %v705_v28 = vsel %vm15632_vm0, %v615_v19, 0.0  ;;  %v1556_v60 = vadd.s32 4294967295, %v7744_v44  ;;  %16157 = vst [vmem:[#allocation25_spill] sm:$0xff] %v7793_v8  ;;  %16158 = vst [vmem:[#allocation26_spill] sm:$0xff] %v7801_v62  ;;  %v7827_v19 = vld [vmem:[%s15596_s1 + $0x88] sm:$0xff] }
  0xe1   : > { %700 = vadd.xlane.f32.xlu1 %v699_v12  ;;  %703 = vadd.xlane.f32.xlu0 %v702_v57  ;;  %vm1598_vm7 = vcmp.ge.s32.totalorder %v1566_v36, 0  ;;  %vm1630_vm8 = vcmp.lt.s32.totalorder %v1566_v36, 16  ;;  %v7808_v6 = vsel %vm1654_vm3, 1, %v15619_v3  ;;  %vm1592_vm11 = vcmp.ge.s32.totalorder %v1560_v24, 0 }
  0xe2   : > { %16155 = vst [vmem:[#allocation23_spill] sm:$0xff] %v7734_v56  ;;  %v616_v23 = vmul.f32 %v7734_v56, %v7734_v56  ;;  %vm1588_vm4 = vcmp.ge.s32.totalorder %v1556_v60, 0  ;;  %vm1620_vm5 = vcmp.lt.s32.totalorder %v1556_v60, 16  ;;  %16159 = vst [vmem:[#allocation27_spill] sm:$0xff] %v7808_v6  ;;  %vm1624_vm12 = vcmp.lt.s32.totalorder %v1560_v24, 16  ;;  %v7870_v24 = vld [vmem:[%s15596_s1 + $0xc8] sm:$0xff] }
  0xe3   : > { %vm1652_vm6 = vmand %vm1588_vm4, %vm1620_vm5  ;;  %vm1591_vm5 = vcmp.ge.s32.totalorder %v1559_v51, 0  ;;  %vm1600_vm13 = vcmp.ge.s32.totalorder %v1568_v52, 0  ;;  %vm1632_vm14 = vcmp.lt.s32.totalorder %v1568_v52, 16  ;;  %v1570_v12 = vadd.s32 4294967295, %v7813_v40  ;;  %v7875_v52 = vld [vmem:[%s15596_s1 + $0xd8] sm:$0xff] }
  0xe4   : > { %v708_v26 = vsel %vm15632_vm0, %v616_v23, 0.0  ;;  %v7777_v43 = vsel %vm1652_vm6, 1, %v15619_v3  ;;  %vm1660_vm4 = vmand %vm1596_vm15, %vm1628_vm2  ;;  %vm1623_vm6 = vcmp.lt.s32.totalorder %v1559_v51, 16  ;;  %v1576_v48 = vadd.s32 4294967295, %v7852_v35  ;;  %v7862_v51 = vld [vmem:[%s15596_s1 + $0xb8] sm:$0xff] }
  0xe5   : > { %706 = vadd.xlane.f32.xlu1 %v705_v28  ;;  %709 = vadd.xlane.f32.xlu0 %v708_v26  ;;  %16156 = vst [vmem:[#allocation24_spill] sm:$0xff] %v7777_v43  ;;  %v7816_v10 = vsel %vm1660_vm4, 1, %v15619_v3  ;;  %vm1655_vm9 = vmand %vm1591_vm5, %vm1623_vm6  ;;  %vm1602_vm3 = vcmp.ge.s32.totalorder %v1570_v12, 0  ;;  %vm1634_vm4 = vcmp.lt.s32.totalorder %v1570_v12, 16  ;;  %v1572_v28 = vadd.s32 4294967295, %v7827_v19  ;;  %v7841_v26 = vld [vmem:[%s15596_s1 + $0x98] sm:$0xff] }
  0xe6   : > { %16160 = vst [vmem:[#allocation28_spill] sm:$0xff] %v7816_v10  ;;  %vm1662_vm10 = vmand %vm1598_vm7, %vm1630_vm8  ;;  %v7822_v18 = vsel %vm1655_vm9, 1, %v15619_v3  ;;  %v1574_v34 = vadd.s32 4294967295, %v7841_v26  ;;  %v1578_v12 = vadd.s32 4294967295, %v7862_v51  ;;  %v16175_v56 = vmov 0  }
  0xe7   : > { %16161 = vst [vmem:[#allocation29_spill] sm:$0xff] %v7822_v18  ;;  %v7830_v57 = vsel %vm1662_vm10, 1, %v15619_v3  ;;  %vm1656_vm15 = vmand %vm1592_vm11, %vm1624_vm12  ;;  %vm1604_vm6 = vcmp.ge.s32.totalorder %v1572_v28, 0  ;;  %vm1636_vm7 = vcmp.lt.s32.totalorder %v1572_v28, 16  ;;  %vm1608_vm12 = vcmp.ge.s32.totalorder %v1576_v48, 0 }
  0xe8   : > { %16162 = vst [vmem:[#allocation30_spill] sm:$0xff] %v7830_v57  ;;  %vm1664_vm2 = vmand %vm1600_vm13, %vm1632_vm14  ;;  %v7836_v23 = vsel %vm1656_vm15, 1, %v15619_v3  ;;  %vm1606_vm9 = vcmp.ge.s32.totalorder %v1574_v34, 0  ;;  %vm1638_vm10 = vcmp.lt.s32.totalorder %v1574_v34, 16  ;;  %vm1640_vm13 = vcmp.lt.s32.totalorder %v1576_v48, 16  ;;  %v7883_v34 = vld [vmem:[%s15596_s1 + $0xe8] sm:$0xff] }
  0xe9   : > { %16163 = vst [vmem:[#allocation31_spill] sm:$0xff] %v7836_v23  ;;  %v7844_v60 = vsel %vm1664_vm2, 1, %v15619_v3  ;;  %vm1666_vm5 = vmand %vm1602_vm3, %vm1634_vm4  ;;  %v1580_v28 = vadd.s32 4294967295, %v7870_v24  ;;  %vm1610_vm15 = vcmp.ge.s32.totalorder %v1578_v12, 0  ;;  %vm1642_vm2 = vcmp.lt.s32.totalorder %v1578_v12, 16  ;;  %v7903_v12 = vld [vmem:[%s15596_s1 + $0x30] sm:$0xff] }
  0xea   : > { %16164 = vst [vmem:[#allocation32_spill] sm:$0xff] %v7844_v60  ;;  %v7855_v42 = vsel %vm1666_vm5, 1, %v15619_v3  ;;  %vm1668_vm8 = vmand %vm1604_vm6, %vm1636_vm7  ;;  %v1584_v48 = vadd.s32 4294967295, %v7883_v34  ;;  %v1571_v37 = vadd.s32 4294967295, %v7982_v45  ;;  %v16234_v20 = vmov 0 }
  0xeb   : > { %16165 = vst [vmem:[#allocation33_spill] sm:$0xff] %v7855_v42  ;;  %16166 = vst [vmem:[#allocation34_spill] sm:$0xff] %v7862_v51  ;;  %v7865_v36 = vsel %vm1668_vm8, 1, %v15619_v3  ;;  %vm1612_vm3 = vcmp.ge.s32.totalorder %v1580_v28, 0  ;;  %vm1644_vm4 = vcmp.lt.s32.totalorder %v1580_v28, 16 }
  0xec   : > { %16167 = vst [vmem:[#allocation35_spill] sm:$0xff] %v7865_v36  ;;  %vm1670_vm11 = vmand %vm1606_vm9, %vm1638_vm10  ;;  %vm1616_vm9 = vcmp.ge.s32.totalorder %v1584_v48, 0  ;;  %vm1648_vm10 = vcmp.lt.s32.totalorder %v1584_v48, 16  ;;  %v1561_v48 = vadd.s32 4294967295, %v7903_v12 }
  0xed   : > { %vm1672_vm14 = vmand %vm1608_vm12, %vm1640_vm13 }
  0xee   : > { %vm1674_vm7 = vmand %vm1610_vm15, %vm1642_vm2  ;;  %vm1940_vm15 = vcmp.ge.s32.totalorder %v7744_v44, 0  ;;  %vm1972_vm2 = vcmp.lt.s32.totalorder %v7744_v44, 16 }
  0xef   : > { %vm1676_vm8 = vmand %vm1612_vm3, %vm1644_vm4  ;;  %v7907_v28 = vsel %vm1674_vm7, 1, %v15619_v3  ;;  %vm1942_vm3 = vcmp.ge.s32.totalorder %v7762_v32, 0  ;;  %vm1974_vm4 = vcmp.lt.s32.totalorder %v7762_v32, 16  ;;  %vm1976_vm7 = vcmp.lt.s32.totalorder %v7790_v55, 16 }
  0xf0   : > { %16170 = vst [vmem:[#allocation38_spill] sm:$0xff] %v7907_v28  ;;  %vm7909_vm12 = vmand %vm1616_vm9, %vm1648_vm10  ;;  %vm1625_vm9 = vcmp.lt.s32.totalorder %v1561_v48, 16 }
  0xf1   : > { %v7949_v4 = vsel %vm7909_vm12, 1, %v16175_v56  ;;  %vm7973_vm12 = vmand %vm1942_vm3, %vm1974_vm4  ;;  %vm1980_vm3 = vcmp.lt.s32.totalorder %v7767_v39, 16 }
  0xf2   : > { %16176 = vst [vmem:[#allocation41_spill] sm:$0xff] %v7949_v4 }
  0xf6   : > { %1719 = vperm.xlu1 %7007, %v7777_v43  }
  0xfa   : > { %1722 = vperm.xlu1 %7007, %v7793_v8   ;;  %v1582_v8 = vadd.s32 4294967295, %v7875_v52 }
  0xfb   : > { %1716 = vperm.xlu0 %7006, %v7801_v62  }
  0xfc   : > { %vm1614_vm5 = vcmp.ge.s32.totalorder %v1582_v8, 0  ;;  %vm1646_vm6 = vcmp.lt.s32.totalorder %v1582_v8, 16 }
  0xfe   : > { %1725 = vperm.xlu1 %7007, %v7808_v6   ;;  %v7935_v6 = vld [vmem:[%s15596_s1 + $0x50] sm:$0xff] }
  0xff   : > { %1743 = vperm.xlu0 %7006, %v7816_v10   ;;  %v1565_v8 = vadd.s32 4294967295, %v7935_v6 }
 0x102   : > { %1728 = vperm.xlu1 %7007, %v7822_v18   ;;  %v7886_v18 = vsel %vm1670_vm11, 1, %v15619_v3  ;;  %vm1678_vm11 = vmand %vm1614_vm5, %vm1646_vm6  ;;  %vm1944_vm6 = vcmp.ge.s32.totalorder %v7790_v55, 0 }
 0x103   : > { %1749 = vperm.xlu0 %7006, %v7830_v57   ;;  %16168 = vst [vmem:[#allocation36_spill] sm:$0xff] %v7886_v18  ;;  %v7925_v57 = vsel %vm1676_vm8, 1, %v15619_v3  ;;  %v7928_v10 = vsel %vm1678_vm11, 1, %v15619_v3  ;;  %vm1593_vm8 = vcmp.ge.s32.totalorder %v1561_v48, 0  ;;  %vm7969_vm11 = vmand %vm1940_vm15, %vm1972_vm2  ;;  %vm1948_vm2 = vcmp.ge.s32.totalorder %v7767_v39, 0 }
 0x104   : > { %16173 = vst [vmem:[#allocation39_spill] sm:$0xff] %v7925_v57  ;;  %16174 = vst [vmem:[#allocation40_spill] sm:$0xff] %v7928_v10  ;;  %v16191_v48 = vmov 0 }
 0x105   : > { %vm7997_vm15 = vmand %vm1944_vm6, %vm1976_vm7 }
 0x106   : > { %1731 = vperm.xlu1 %7007, %v7836_v23   ;;  %vm8008_vm4 = vmand %vm1593_vm8, %vm1625_vm9  ;;  %vm1982_vm9 = vcmp.lt.s32.totalorder %v7782_v50, 16  ;;  %v8147_v53 = vsel %vm7997_vm15, 1, %v16175_v56 }
 0x107   : > { %1755 = vperm.xlu0 %7006, %v7844_v60   ;;  %v7917_v60 = vld [vmem:[%s15596_s1 + $0x38] sm:$0xff] }
 0x108   : > { %v1562_v23 = vadd.s32 4294967295, %v7917_v60  ;;  %vm1946_vm10 = vcmp.ge.s32.totalorder %v7917_v60, 0 }
 0x10a   : > { %vm1626_vm1 = vcmp.lt.s32.totalorder %v1562_v23, 16 }
 0x10b   : > { %1761 = vperm.xlu0 %7006, %v7855_v42   ;;  %v7897_v42 = vsel %vm1672_vm14, 1, %v15619_v3  ;;  %v7944_v3 = vld [vmem:[%s15596_s1 + $0x60] sm:$0xff] }
 0x10c   : > { %16169 = vst [vmem:[#allocation37_spill] sm:$0xff] %v7897_v42  ;;  %v1567_v46 = vadd.s32 4294967295, %v7944_v3 }
 0x10f   : > { %1767 = vperm.xlu0 %7006, %v7865_v36   ;;  %v7893_v36 = vld [vmem:[%s15596_s1 + $0xf8] sm:$0xff] }
 0x110   : > { %v1586_v62 = vadd.s32 4294967295, %v7893_v36 }
 0x112   : > { %vm1618_vm13 = vcmp.ge.s32.totalorder %v1586_v62, 0  ;;  %vm1650_vm14 = vcmp.lt.s32.totalorder %v1586_v62, 16  ;;  %v7965_v62 = vld [vmem:[%s15596_s1 + $0x70] sm:$0xff] }
 0x113   : > { %1773 = vperm.xlu0 %7006, %v7886_v18   ;;  %v520_v18 = vpop.xlane.xlu1 %519  ;;  %vm7953_vm5 = vmand %vm1618_vm13, %vm1650_vm14  ;;  %vm1978_vm13 = vcmp.lt.s32.totalorder %v7917_v60, 16  ;;  %vm1594_vm14 = vcmp.ge.s32.totalorder %v1562_v23, 0 }
 0x114   : > { %v553_v43 = vmul.f32 0.1, %v520_v18  ;;  %v7991_v41 = vsel %vm7953_vm5, 1, %v16175_v56  ;;  %v1569_v18 = vadd.s32 4294967295, %v7965_v62  ;;  %vm8018_vm7 = vmand %vm1946_vm10, %vm1978_vm13  ;;  %vm16198_vm5 = vcmp.ge.s32.totalorder %v7782_v50, 0 }
 0x115   : > { %16184 = vst [vmem:[#allocation43_spill] sm:$0xff] %v7991_v41  ;;  %vm8024_vm8 = vmand %vm1594_vm14, %vm1626_vm1  ;;  %vm1631_vm1 = vcmp.lt.s32.totalorder %v1567_v46, 16 }
 0x116   : > { %v7986_v0 = vsub.f32 %v7540_v61, %v553_v43  ;;  %v410_v61 = vld [vmem:[%s15596_s1 + $0x90] sm:$0xff]  ;;  %v16187_v43 = vmov 0  ;;  %v16192_v48 = vsel %vm8024_vm8, 4294967295, %v16191_v48  ;;  %vm8035_vm10 = vmand %vm1948_vm2, %vm1980_vm3  ;;  %vm16202_vm8 = vcmp.ge.s32.totalorder %v1565_v8, 0 }
 0x117   : > { %1779 = vperm.xlu0 %7006, %v7897_v42   ;;  %v7922_v42 = vld [vmem:[%s15596_s1 + $0x40] sm:$0xff]  ;;  %v16188_v43 = vsel %vm8008_vm4, 4294967295, %v16187_v43  ;;  %v16194_v33 = vsel %vm8035_vm10, 4294967295, %v16193_v33  ;;  %v1573_v23 = vadd.s32 4294967295, %v410_v61  ;;  %vm8059_vm6 = vmand %vm16198_vm5, %vm1982_vm9  ;;  %v16199_v61 = vmov 0 }
 0x118   : > { %16183 = vst [vmem:[#allocation42_spill] sm:$0xff] %v7986_v0  ;;  %v617_v29 = vmul.f32 %v7986_v0, %v7986_v0  ;;  %v16200_v61 = vsel %vm8059_vm6, 4294967295, %v16199_v61  ;;  %vm16201_vm10 = vcmp.lt.s32.totalorder %v1565_v8, 16  ;;  %v416_v0 = vld [vmem:[%s15596_s1 + $0xc0] sm:$0xff]  ;;  %vm16205_vm5 = vcmp.lt.s32.totalorder %v7798_v59, 16 }
 0x119   : > { %vm16206_vm9 = vcmp.ge.s32.totalorder %v7798_v59, 0  ;;  %vm16224_vm4 = vcmp.lt.s32.totalorder %v1571_v37, 16  ;;  %vm16236_vm15 = vnez %v16188_v43  ;;  %v16247_v43 = vmov 0 }
 0x11a   : > { %vm8078_vm14 = vmand %vm16206_vm9, %vm16205_vm5  ;;  %vm16212_vm5 = vcmask 80896   ;;  %vm16213_vm9 = vcmp.lt.s32.totalorder %v7813_v40, 16  ;;  %v8164_v7 = vsel %vm16236_vm15, 1, %v16175_v56 }
 0x11b   : > { %1785 = vperm.xlu0 %7006, %v7907_v28   ;;  %v1563_v28 = vadd.s32 4294967295, %v7922_v42  ;;  %v711_v63 = vsel %vm16212_vm5, %v617_v29, 0.0  ;;  %v1579_v29 = vadd.s32 4294967295, %v416_v0  ;;  %v420_v0 = vld [vmem:[%s15596_s1 + $0xe0] sm:$0xff]  ;;  %16237 = vst [vmem:[#allocation44_spill] sm:$0xff] %v8164_v7  ;;  %vm16246_vm5 = vcmp.ge.s32.totalorder %v7862_v51, 0 }
 0x11d   : > { %vm1627_vm0 = vcmp.lt.s32.totalorder %v1563_v28, 16  ;;  %vm16195_vm2 = vcmp.ge.s32.totalorder %v1563_v28, 0  ;;  %v16203_v28 = vmov 0 }
 0x11e   : > { %vm8049_vm3 = vmand %vm16195_vm2, %vm1627_vm0  ;;  %vm16209_vm2 = vcmp.ge.s32.totalorder %v1567_v46, 0  ;;  %v16219_v46 = vmov 0 }
 0x11f   : > { %1791 = vperm.xlu0 %7006, %v7925_v57   ;;  %v16189_v57 = vmov 0  ;;  %v16197_v22 = vsel %vm8049_vm3, 4294967295, %v16196_v22  ;;  %vm8084_vm13 = vmand %vm16209_vm2, %vm1631_vm1  ;;  %vm16217_vm1 = vcmp.lt.s32.totalorder %v7827_v19, 16  ;;  %vm16218_vm2 = vcmp.ge.s32.totalorder %v7827_v19, 0 }
 0x120   : > { %v16190_v57 = vsel %vm8018_vm7, 4294967295, %v16189_v57  ;;  %vm8065_vm7 = vmand %vm16202_vm8, %vm16201_vm10  ;;  %vm1633_vm8 = vcmp.lt.s32.totalorder %v1569_v18, 16  ;;  %vm16214_vm10 = vcmp.ge.s32.totalorder %v7813_v40, 0 }
 0x121   : > { %v16204_v28 = vsel %vm8065_vm7, 4294967295, %v16203_v28  ;;  %vm8096_vm0 = vmand %vm16214_vm10, %vm16213_vm9  ;;  %vm16221_vm10 = vcmp.ge.s32.totalorder %v1569_v18, 0  ;;  %v2036_v18 = vsel %vm7969_vm11, 1, %v16175_v56  ;;  %vm16232_vm11 = vcmp.lt.s32.totalorder %v1573_v23, 16 }
 0x122   : > { %vm8104_vm7 = vmand %vm16218_vm2, %vm16217_vm1  ;;  %vm16225_vm1 = vcmp.ge.s32.totalorder %v1571_v37, 0  ;;  %v2038_v37 = vsel %vm7973_vm12, 1, %v16175_v56  ;;  %v8275_v8 = vsel %vm8096_vm0, 1, %v16175_v56 }
 0x123   : > { %1797 = vperm.xlu0 %7006, %v7928_v10   ;;  %v1575_v10 = vadd.s32 4294967295, %v412_v54  ;;  %v16220_v46 = vsel %vm8104_vm7, 4294967295, %v16219_v46  ;;  %vm8115_vm9 = vmand %vm16221_vm10, %vm1633_vm8  ;;  %vm16229_vm8 = vcmp.ge.s32.totalorder %v7841_v26, 0  ;;  %vm16233_vm7 = vcmp.ge.s32.totalorder %v1573_v23, 0 }
 0x124   : > { %vm8121_vm2 = vmand %vm16225_vm1, %vm16224_vm4  ;;  %vm16228_vm4 = vcmp.lt.s32.totalorder %v7841_v26, 16  ;;  %v16240_v23 = vmov 0  ;;  %vm16245_vm1 = vcmp.lt.s32.totalorder %v7862_v51, 16  ;;  %v16254_v51 = vmov 0 }
 0x125   : > { %v16227_v47 = vsel %vm8121_vm2, 4294967295, %v16226_v47  ;;  %vm1639_vm6 = vcmp.lt.s32.totalorder %v1575_v10, 16  ;;  %vm8140_vm10 = vmand %vm16229_vm8, %vm16228_vm4  ;;  %vm16239_vm8 = vcmp.ge.s32.totalorder %v7852_v35, 0  ;;  %vm16242_vm12 = vcmp.ge.s32.totalorder %v1575_v10, 0 }
 0x126   : > { %v16231_v17 = vsel %vm8140_vm10, 4294967295, %v16230_v17  ;;  %vm8151_vm3 = vmand %vm16233_vm7, %vm16232_vm11  ;;  %vm16238_vm7 = vcmp.lt.s32.totalorder %v7852_v35, 16  ;;  %vm1643_vm10 = vcmp.lt.s32.totalorder %v1579_v29, 16  ;;  %v16278_v54 = vmov 0 }
 0x127   : > { %1803 = vperm.xlu0 %7006, %v7949_v4   ;;  %v418_v4 = vld [vmem:[%s15596_s1 + $0xd0] sm:$0xff]  ;;  %v16235_v20 = vsel %vm8151_vm3, 4294967295, %v16234_v20  ;;  %vm8170_vm11 = vmand %vm16239_vm8, %vm16238_vm7  ;;  %vm1611_vm3 = vcmp.ge.s32.totalorder %v1579_v29, 0  ;;  %vm16249_vm7 = vnez %v16190_v57  ;;  %vm16253_vm8 = vcmp.ge.s32.totalorder %v1577_v25, 0 }
 0x128   : > { %v1581_v31 = vadd.s32 4294967295, %v418_v4  ;;  %v16241_v23 = vsel %vm8170_vm11, 4294967295, %v16240_v23  ;;  %vm8176_vm4 = vmand %vm16242_vm12, %vm1639_vm6  ;;  %v16243_v4 = vmov 0  ;;  %v8191_v13 = vsel %vm16249_vm7, 1, %v16175_v56 }
 0x129   : > { %v16244_v4 = vsel %vm8176_vm4, 4294967295, %v16243_v4  ;;  %vm8184_vm15 = vmand %vm16246_vm5, %vm16245_vm1  ;;  %vm16250_vm6 = vnez %v16192_v48  ;;  %vm16252_vm12 = vcmp.lt.s32.totalorder %v1577_v25, 16  ;;  %vm1998_vm1 = vcmp.lt.s32.totalorder %v7875_v52, 16 }
 0x12a   : > { %712 = vadd.xlane.f32.xlu1 %v711_v63  ;;  %v422_v63 = vld [vmem:[%s15596_s1 + $0xf0] sm:$0xff]  ;;  %v16248_v43 = vsel %vm8184_vm15, 4294967295, %v16247_v43  ;;  %v8196_v10 = vsel %vm16250_vm6, 1, %v16175_v56  ;;  %vm8200_vm4 = vmand %vm16253_vm8, %vm16252_vm12  ;;  %vm16256_vm15 = vnez %v16194_v33  ;;  %vm16257_vm7 = vcmp.lt.s32.totalorder %v7870_v24, 16 }
 0x12b   : > { %1809 = vperm.xlu0 %7006, %v7991_v41   ;;  %v1583_v41 = vadd.s32 4294967295, %v420_v0  ;;  %16251 = vst [vmem:[#allocation45_spill] sm:$0xff] %v8196_v10  ;;  %v16255_v51 = vsel %vm8200_vm4, 4294967295, %v16254_v51  ;;  %v8209_v57 = vsel %vm16256_vm15, 1, %v16175_v56  ;;  %vm16258_vm6 = vcmp.ge.s32.totalorder %v7870_v24, 0  ;;  %vm8226_vm15 = vmand %vm1611_vm3, %vm1643_vm10 }
 0x12c   : > { %vm8215_vm11 = vmand %vm16258_vm6, %vm16257_vm7  ;;  %vm1968_vm12 = vcmp.ge.s32.totalorder %v7883_v34, 0  ;;  %vm2000_vm8 = vcmp.lt.s32.totalorder %v7883_v34, 16  ;;  %v1585_v25 = vadd.s32 4294967295, %v422_v63  ;;  %vm16261_vm5 = vnez %v16197_v22 }
 0x12d   : > { %v8224_v29 = vsel %vm16261_vm5, 1, %v16175_v56  ;;  %vm1645_vm2 = vcmp.lt.s32.totalorder %v1581_v31, 16  ;;  %v2387_v24 = vadd.s32 1, %v7744_v44  ;;  %vm16265_vm7 = vnez %v16200_v61 }
 0x12e   : > { %16262 = vst [vmem:[#allocation46_spill] sm:$0xff] %v8224_v29  ;;  %v8234_v0 = vsel %vm16265_vm7, 1, %v16175_v56  ;;  %vm16266_vm6 = vnez %v16204_v28  ;;  %vm16268_vm3 = vcmp.ge.s32.totalorder %v7875_v52, 0  ;;  %vm1615_vm5 = vcmp.ge.s32.totalorder %v1583_v41, 0  ;;  %vm8254_vm7 = vmand %vm1968_vm12, %vm2000_vm8 }
 0x12f   : > { %2071 = vperm.xlu0 %7006, %v2036_v18   ;;  %v8239_v22 = vsel %vm16266_vm6, 1, %v16175_v56  ;;  %vm8243_vm10 = vmand %vm16268_vm3, %vm1998_vm1  ;;  %vm1647_vm4 = vcmp.lt.s32.totalorder %v1583_v41, 16  ;;  %v8250_v44 = vsel %vm8078_vm14, 1, %v16175_v56  ;;  %vm2002_vm1 = vcmp.lt.s32.totalorder %v7893_v36, 16 }
 0x130   : > { %16267 = vst [vmem:[#allocation47_spill] sm:$0xff] %v8239_v22  ;;  %v2389_v52 = vadd.s32 1, %v7762_v32  ;;  %v8264_v41 = vsel %vm8084_vm13, 1, %v16175_v56  ;;  %v15652_v28 = vlaneseq  ;;  %vm16274_vm14 = vcmp.ge.s32.totalorder %v1581_v31, 0  ;;  %vm8282_vm13 = vmand %vm1615_vm5, %vm1647_vm4 }
 0x131   : > { %16273 = vst [vmem:[#allocation48_spill] sm:$0xff] %v8264_v41  ;;  %vm8268_vm3 = vmand %vm16274_vm14, %vm1645_vm2  ;;  %v16275_v34 = vmov 0  ;;  %vm1617_vm12 = vcmp.ge.s32.totalorder %v1585_v25, 0  ;;  %vm1649_vm8 = vcmp.lt.s32.totalorder %v1585_v25, 16  ;;  %vm16277_vm6 = vnez %v16220_v46 }
 0x132   : > { %v16276_v34 = vsel %vm8268_vm3, 4294967295, %v16275_v34  ;;  %v8280_v32 = vsel %vm16277_vm6, 1, %v16175_v56  ;;  %v16279_v54 = vsel %vm8282_vm13, 4294967295, %v16278_v54  ;;  %vm2451_vm14 = vcmp.lt.s32.totalorder %v2387_v24, 16  ;;  %vm8311_vm13 = vmand %vm1617_vm12, %vm1649_vm8 }
 0x133   : > { %2077 = vperm.xlu0 %7006, %v2038_v37   ;;  %v8289_v31 = vsel %vm8115_vm9, 1, %v16175_v56  ;;  %vm16281_vm0 = vnez %v16227_v47  ;;  %vm16283_vm4 = vcmp.ge.s32.totalorder %v7893_v36, 0  ;;  %vm1971_vm2 = vcmp.lt.s32.totalorder %v7755_v16, 16 }
 0x134   : > { %16280 = vst [vmem:[#allocation49_spill] sm:$0xff] %v8289_v31  ;;  %v8294_v38 = vsel %vm16281_vm0, 1, %v16175_v56  ;;  %vm8300_vm5 = vmand %vm16283_vm4, %vm2002_vm1  ;;  %vm16286_vm9 = vnez %v16231_v17  ;;  %vm2421_vm0 = vcmp.ge.s32.totalorder %v2389_v52, 0  ;;  %vm2453_vm3 = vcmp.lt.s32.totalorder %v2389_v52, 16 }
 0x135   : > { %16282 = vst [vmem:[#allocation50_spill] sm:$0xff] %v8294_v38  ;;  %v8309_v21 = vsel %vm16286_vm9, 1, %v16175_v56  ;;  %v2391_v36 = vadd.s32 1, %v7790_v55  ;;  %vm16289_vm1 = vnez %v16235_v20  ;;  %v8322_v37 = vand.u32 127, %v15652_v28 }
 0x136   : > { %v8319_v18 = vsel %vm16289_vm1, 1, %v16175_v56  ;;  %vm16292_vm4 = vcmp.ge.s32.totalorder %v2387_v24, 0  ;;  %vm1973_vm8 = vcmp.lt.s32.totalorder %v7750_v1, 16  ;;  %v620_v25 = vpop.xlane.xlu0 %619  ;;  %vm16295_vm9 = vnez %v16241_v23 }
 0x137   : > { %16290 = vst [vmem:[#allocation51_spill] sm:$0xff] %v8319_v18  ;;  %16291 = vst [vmem:[#allocation52_spill] sm:$0xff] %v8322_v37  ;;  %v8334_v55 = vsel %vm16295_vm9, 1, %v16175_v56  ;;  %vm16296_vm1 = vnez %v16244_v4  ;;  %vm16301_vm9 = vcmp.ge.s32.totalorder %v7755_v16, 0  ;;  %v714_v4 = vmul.f32 0.1, %v620_v25  ;;  %2083 = vperm.xlu0 %7006, %v8147_v53  }
 0x138   : > { %vm8325_vm6 = vmand %vm16292_vm4, %vm2451_vm14  ;;  %v8339_v20 = vsel %vm16296_vm1, 1, %v16175_v56  ;;  %vm16298_vm14 = vnez %v16248_v43  ;;  %vm16299_vm4 = vnez %v16255_v51  ;;  %v8363_v43 = vsel %vm8215_vm11, 1, %v16175_v56 }
 0x139   : > { %16297 = vst [vmem:[#allocation53_spill] sm:$0xff] %v8339_v20  ;;  %v8344_v24 = vsel %vm16298_vm14, 1, %v16175_v56  ;;  %v8349_v28 = vsel %vm16299_vm4, 1, %v16175_v56  ;;  %vm8355_vm12 = vmand %vm16301_vm9, %vm1971_vm2  ;;  %v8368_v51 = vsel %vm8226_vm15, 1, %v16175_v56  ;;  %v8373_v16 = vsel %vm8243_vm10, 1, %v16175_v56 }
 0x13a   : > { %16300 = vst [vmem:[#allocation54_spill] sm:$0xff] %v8349_v28  ;;  %16304 = vst [vmem:[#allocation55_spill] sm:$0xff] %v8368_v51  ;;  %v8380_v53 = vsel %vm8254_vm7, 1, %v16175_v56  ;;  %vm16306_vm11 = vcmp.ge.s32.totalorder %v7750_v1, 0  ;;  %vm2423_vm15 = vcmp.ge.s32.totalorder %v2391_v36, 0  ;;  %vm2455_vm14 = vcmp.lt.s32.totalorder %v2391_v36, 16  ;;  %v623_v25 = vpop.xlane.xlu1 %622 }
 0x13b   : > { %vm2485_vm2 = vmand %vm2421_vm0, %vm2453_vm3  ;;  %16305 = vst [vmem:[#allocation56_spill] sm:$0xff] %v8380_v53  ;;  %v2393_v33 = vadd.s32 1, %v7917_v60  ;;  %v746_v63 = vadd.f32 1e-05, %v714_v4  ;;  %vm16309_vm10 = vnez %v16276_v34  ;;  %vm16311_vm7 = vnez %v16279_v54  ;;  %v626_v53 = vpop.xlane.xlu0 %625  ;;  %1734 = vperm.xlu1 %7007, %v8164_v7   ;;  %2089 = vperm.xlu0 %7006, %v8191_v13  }
 0x13c   : > { %vm8384_vm1 = vmand %vm16306_vm11, %vm1973_vm8  ;;  %v8392_v52 = vsel %vm16309_vm10, 1, %v16175_v56  ;;  %v8397_v61 = vsel %vm16311_vm7, 1, %v16175_v56  ;;  %v8402_v1 = vsel %vm8300_vm5, 1, %v16175_v56  ;;  %v8407_v60 = vsel %vm8311_vm13, 1, %v16175_v56 }
 0x13d   : > { %16310 = vst [vmem:[#allocation57_spill] sm:$0xff] %v8392_v52  ;;  %16312 = vst [vmem:[#allocation58_spill] sm:$0xff] %v8397_v61  ;;  %v8412_v34 = vsel %vm8325_vm6, 1, %v16175_v56  ;;  %v8417_v54 = vsel %vm8355_vm12, 1, %v16175_v56  ;;  %v8420_v46 = vsel %vm2485_vm2, 1, %v16175_v56  ;;  %v8427_v47 = vsel %vm8384_vm1, 1, %v16175_v56 }
 0x13e   : > { %16313 = vst [vmem:[#allocation59_spill] sm:$0xff] %v8402_v1  ;;  %16314 = vst [vmem:[#allocation60_spill] sm:$0xff] %v8407_v60  ;;  %v715_v4 = vmul.f32 0.1, %v623_v25  ;;  %v716_v1 = vmul.f32 0.1, %v626_v53  ;;  %7008 = vrsqrt.f32 %v746_v63  ;;  %v629_v25 = vpop.xlane.xlu1 %628 }
 0x13f   : > { %16315 = vst [vmem:[#allocation61_spill] sm:$0xff] %v8427_v47  ;;  %vm2487_vm3 = vmand %vm2423_vm15, %vm2455_vm14  ;;  %v2395_v17 = vadd.s32 1, %v7767_v39  ;;  %vm1943_vm13 = vcmp.ge.s32.totalorder %v7774_v49, 0  ;;  %vm1975_vm5 = vcmp.lt.s32.totalorder %v7774_v49, 16  ;;  %vm2425_vm6 = vcmp.ge.s32.totalorder %v2393_v33, 0  ;;  %v632_v48 = vpop.xlane.xlu0 %631  ;;  %1737 = vperm.xlu1 %7007, %v8196_v10   ;;  %2095 = vperm.xlu0 %7006, %v8209_v57  }
 0x140   : > { %v2397_v23 = vadd.s32 1, %v7782_v50  ;;  %v747_v53 = vadd.f32 1e-05, %v715_v4  ;;  %v748_v13 = vadd.f32 1e-05, %v716_v1  ;;  %vm2457_vm0 = vcmp.lt.s32.totalorder %v2393_v33, 16  ;;  %vm8447_vm4 = vmand %vm1943_vm13, %vm1975_vm5 }
 0x141   : > { %v8436_v7 = vsel %vm2487_vm3, 1, %v16175_v56  ;;  %vm1945_vm12 = vcmp.ge.s32.totalorder %v7903_v12, 0  ;;  %vm1977_vm8 = vcmp.lt.s32.totalorder %v7903_v12, 16  ;;  %v2399_v39 = vadd.s32 1, %v7798_v59  ;;  %vm8453_vm11 = vmand %vm2425_vm6, %vm2457_vm0 }
 0x142   : > { %v717_v36 = vmul.f32 0.1, %v629_v25  ;;  %v718_v47 = vmul.f32 0.1, %v632_v48  ;;  %vm2427_vm9 = vcmp.ge.s32.totalorder %v2395_v17, 0  ;;  %vm2459_vm2 = vcmp.lt.s32.totalorder %v2395_v17, 16  ;;  %vm8463_vm10 = vmand %vm1945_vm12, %vm1977_vm8  ;;  %v635_v33 = vpop.xlane.xlu1 %634 }
 0x143   : > { %7010 = vrsqrt.f32 %v748_v13  ;;  %vm1947_vm1 = vcmp.ge.s32.totalorder %v7922_v42, 0  ;;  %vm1979_vm15 = vcmp.lt.s32.totalorder %v7922_v42, 16  ;;  %vm2429_vm14 = vcmp.ge.s32.totalorder %v2397_v23, 0  ;;  %v638_v1 = vpop.xlane.xlu0 %637  ;;  %vm8467_vm3 = vmand %vm2427_vm9, %vm2459_vm2  ;;  %1740 = vperm.xlu1 %7007, %v8224_v29   ;;  %2101 = vperm.xlu0 %7006, %v8234_v0  }
 0x144   : > { %7012 = vrsqrt.f32 %v747_v53  ;;  %v749_v49 = vadd.f32 1e-05, %v717_v36  ;;  %v750_v57 = vadd.f32 1e-05, %v718_v47  ;;  %vm2461_vm7 = vcmp.lt.s32.totalorder %v2397_v23, 16  ;;  %vm8480_vm0 = vmand %vm1947_vm1, %vm1979_vm15 }
 0x145   : > { %vm1949_vm13 = vcmp.ge.s32.totalorder %v7935_v6, 0  ;;  %vm1981_vm5 = vcmp.lt.s32.totalorder %v7935_v6, 16  ;;  %vm2431_vm6 = vcmp.ge.s32.totalorder %v2399_v39, 0  ;;  %v2401_v47 = vadd.s32 1, %v7813_v40  ;;  %vm8486_vm8 = vmand %vm2429_vm14, %vm2461_vm7 }
 0x146   : > { %7014 = vrsqrt.f32 %v749_v49  ;;  %v719_v12 = vmul.f32 0.1, %v635_v33  ;;  %v720_v17 = vmul.f32 0.1, %v638_v1  ;;  %vm2463_vm12 = vcmp.lt.s32.totalorder %v2399_v39, 16  ;;  %vm8507_vm1 = vmand %vm1949_vm13, %vm1981_vm5 }
 0x147   : > { %7016 = vrsqrt.f32 %v750_v57  ;;  %vm1951_vm9 = vcmp.ge.s32.totalorder %v7944_v3, 0  ;;  %vm1983_vm2 = vcmp.lt.s32.totalorder %v7944_v3, 16  ;;  %v2403_v0 = vadd.s32 1, %v7827_v19  ;;  %v641_v19 = vpop.xlane.xlu1 %640  ;;  %v644_v36 = vpop.xlane.xlu0 %643  ;;  %1746 = vperm.xlu1 %7007, %v8239_v22   ;;  %2107 = vperm.xlu0 %7006, %v8250_v44  }
 0x148   : > { %v751_v13 = vadd.f32 1e-05, %v719_v12  ;;  %v752_v42 = vadd.f32 1e-05, %v720_v17  ;;  %v8496_v25 = vsel %vm8447_vm4, 1, %v16175_v56  ;;  %v8501_v23 = vsel %vm8453_vm11, 1, %v16175_v56  ;;  %vm8517_vm4 = vmand %vm2431_vm6, %vm2463_vm12  ;;  %v7009_v6 = vpop.eup %7008 }
 0x149   : > { %v8514_v50 = vsel %vm8463_vm10, 1, %v16175_v56  ;;  %vm2433_vm11 = vcmp.ge.s32.totalorder %v2401_v47, 0  ;;  %vm2465_vm15 = vcmp.lt.s32.totalorder %v2401_v47, 16  ;;  %vm1953_vm14 = vcmp.ge.s32.totalorder %v7965_v62, 0  ;;  %vm8528_vm10 = vmand %vm1951_vm9, %vm1983_vm2  ;;  %v8559_v17 = vld [vmem:[%s15597_s2] ss:$0 sm:$0xff] }
 0x14a   : > { %7018 = vrsqrt.f32 %v751_v13  ;;  %v721_v49 = vmul.f32 0.1, %v641_v19  ;;  %v722_v57 = vmul.f32 0.1, %v644_v36  ;;  %vm1985_vm7 = vcmp.lt.s32.totalorder %v7965_v62, 16  ;;  %vm8552_vm9 = vmand %vm2433_vm11, %vm2465_vm15 }
 0x14b   : > { %7020 = vrsqrt.f32 %v752_v42  ;;  %vm953_vm13 = vcmp.ge.s32.totalorder %v8322_v37, 2  ;;  %vm15664_vm5 = vcmp.lt.s32.totalorder %v8322_v37, 4  ;;  %v8538_v63 = vsel %vm8467_vm3, 1, %v16175_v56  ;;  %v647_v53 = vpop.xlane.xlu1 %646  ;;  %v650_v13 = vpop.xlane.xlu0 %649  ;;  %vm8584_vm2 = vmand %vm1953_vm14, %vm1985_vm7  ;;  %1752 = vperm.xlu1 %7007, %v8264_v41   ;;  %2113 = vperm.xlu0 %7006, %v8275_v8   ;;  %v8629_v19 = vld [vmem:[%s15598_s3] ss:$0 sm:$0xff] }
 0x14c   : > { %vm2435_vm6 = vcmp.ge.s32.totalorder %v2403_v0, 0  ;;  %vm2467_vm12 = vcmp.lt.s32.totalorder %v2403_v0, 16  ;;  %v753_v44 = vadd.f32 1e-05, %v721_v49  ;;  %v754_v3 = vadd.f32 1e-05, %v722_v57 }
 0x14d   : > { %v8543_v33 = vsel %vm8480_vm0, 1, %v16175_v56  ;;  %v8548_v1 = vsel %vm8486_vm8, 1, %v16175_v56  ;;  %v7011_v12 = vpop.eup %7010  ;;  %v810_v42 = vmul.f32 %v7009_v6, %v7549_v11  ;;  %vm15668_vm3 = vcmp.lt.s32.totalorder %v8322_v37, 2  ;;  %vm8594_vm11 = vmand %vm2435_vm6, %vm2467_vm12 }
 0x14e   : > { %vm15666_vm0 = vcmp.ge.s32.totalorder %v8322_v37, 4  ;;  %vm987_vm8 = vcmp.lt.s32.totalorder %v8322_v37, 6  ;;  %v8568_v47 = vsel %vm8507_vm1, 1, %v16175_v56  ;;  %v8573_v40 = vsel %vm8517_vm4, 1, %v16175_v56  ;;  %v7013_v48 = vpop.eup %7012 }
 0x14f   : > { %16336 = vst [vmem:[#allocation62_spill] sm:$0xff] %v8573_v40  ;;  %v8578_v11 = vsel %vm8528_vm10, 1, %v16175_v56  ;;  %7022 = vrsqrt.f32 %v753_v44  ;;  %v723_v36 = vmul.f32 0.1, %v647_v53  ;;  %v724_v6 = vmul.f32 0.1, %v650_v13  ;;  %v656_v53 = vpop.xlane.xlu0 %655  ;;  %1758 = vperm.xlu1 %7007, %v8289_v31   ;;  %2119 = vperm.xlu0 %7006, %v8280_v32  }
 0x150   : > { %vm1021_vm1 = vcmp.ge.s32.totalorder %v8322_v37, 6  ;;  %vm15667_vm4 = vcmp.lt.s32.totalorder %v8322_v37, 8  ;;  %vm1955_vm15 = vcmp.ge.s32.totalorder %v7982_v45, 0  ;;  %v812_v59 = vmul.f32 %v7011_v12, %v7552_v14  ;;  %v7015_v49 = vpop.eup %7014  ;;  %v653_v12 = vpop.xlane.xlu1 %652 }
 0x151   : > { %7024 = vrsqrt.f32 %v754_v3  ;;  %vm15665_vm14 = vcmp.ge.s32.totalorder %v8322_v37, 8  ;;  %vm1057_vm10 = vcmp.lt.s32.totalorder %v8322_v37, 10  ;;  %vm1987_vm7 = vcmp.lt.s32.totalorder %v7982_v45, 16  ;;  %v7017_v44 = vpop.eup %7016 }
 0x152   : > { %v8604_v8 = vadd.s32 1, %v7841_v26  ;;  %v755_v0 = vadd.f32 1e-05, %v723_v36  ;;  %v756_v57 = vadd.f32 1e-05, %v724_v6  ;;  %v8609_v39 = vsel %vm8552_vm9, 1, %v16175_v56  ;;  %vm8638_vm6 = vmand %vm1955_vm15, %vm1987_vm7 }
 0x153   : > { %16341 = vst [vmem:[#allocation63_spill] sm:$0xff] %v8609_v39  ;;  %v8614_v14 = vsel %vm8584_vm2, 1, %v16175_v56  ;;  %v811_v3 = vmul.f32 %v7013_v48, %v7559_v27  ;;  %v849_v26 = vmul.f32 %v8559_v17, %v810_v42  ;;  %v8621_v13 = vsel %vm8594_vm11, 1, %v16175_v56  ;;  %1764 = vperm.xlu1 %7007, %v8294_v38   ;;  %2125 = vperm.xlu0 %7006, %v8309_v21   ;;  %vm8667_vm2 = vmand %vm953_vm13, %vm15664_vm5 }
 0x154   : > { %16342 = vst [vmem:[#allocation64_spill] sm:$0xff] %v8621_v13  ;;  %v8624_v4 = vadd.s32 1, %v7852_v35  ;;  %v814_v36 = vmul.f32 %v7017_v44, %v7571_v2  ;;  %7026 = vrsqrt.f32 %v755_v0  ;;  %v725_v27 = vmul.f32 0.1, %v653_v12  ;;  %v7019_v2 = vpop.eup %7018  ;;  %v659_v12 = vpop.xlane.xlu1 %658  ;;  %vm8684_vm13 = vmand %vm15666_vm0, %vm987_vm8 }
 0x155   : > { %v726_v48 = vmul.f32 0.1, %v656_v53  ;;  %7028 = vrsqrt.f32 %v756_v57  ;;  %v851_v42 = vmul.f32 %v8559_v17, %v812_v59  ;;  %vm2437_vm12 = vcmp.ge.s32.totalorder %v8604_v8, 0  ;;  %v7021_v44 = vpop.eup %7020  ;;  %v662_v53 = vpop.xlane.xlu0 %661  ;;  %vm8699_vm8 = vmand %vm1021_vm1, %vm15667_vm4 }
 0x156   : > { %vm2469_vm9 = vcmp.lt.s32.totalorder %v8604_v8, 16  ;;  %v813_v6 = vmul.f32 %v7015_v49, %v7562_v30  ;;  %v853_v32 = vmul.f32 %v8559_v17, %v814_v36  ;;  %v757_v62 = vadd.f32 1e-05, %v725_v27  ;;  %vm8710_vm11 = vmand %vm15665_vm14, %vm1057_vm10 }
 0x157   : > { %v758_v0 = vadd.f32 1e-05, %v726_v48  ;;  %v815_v45 = vmul.f32 %v7019_v2, %v7574_v5  ;;  %v8649_v57 = vadd.f32 %v8629_v19, %v849_v26  ;;  %v850_v59 = vmul.f32 %v8559_v17, %v811_v3  ;;  %1770 = vperm.xlu1 %7007, %v8319_v18   ;;  %2131 = vperm.xlu0 %7006, %v8334_v55   ;;  %vm8743_vm15 = vmand %vm2437_vm12, %vm2469_vm9 }
 0x158   : > { %v8655_v31 = vsel %vm8638_vm6, 1, %v16175_v56  ;;  %v8658_v30 = vadd.f32 %v8629_v19, %v853_v32  ;;  %v816_v49 = vmul.f32 %v7021_v44, %v7583_v58  ;;  %7030 = vrsqrt.f32 %v757_v62  ;;  %v665_v44 = vpop.xlane.xlu1 %664 }
 0x159   : > { %v727_v36 = vmul.f32 0.1, %v659_v12  ;;  %v854_v3 = vmul.f32 %v8559_v17, %v815_v45  ;;  %7032 = vrsqrt.f32 %v758_v0  ;;  %v728_v26 = vmul.f32 0.1, %v662_v53  ;;  %v7023_v27 = vpop.eup %7022  ;;  %v668_v45 = vpop.xlane.xlu0 %667 }
 0x15a   : > { %v8673_v58 = vadd.f32 %v8629_v19, %v851_v42  ;;  %v852_v48 = vmul.f32 %v8559_v17, %v813_v6  ;;  %v855_v21 = vmul.f32 %v8559_v17, %v816_v49  ;;  %v925_v2 = vsel %vm15668_vm3, %v8658_v30, 0.0 }
 0x15b   : > { %v759_v35 = vadd.f32 1e-05, %v727_v36  ;;  %v7025_v42 = vpop.eup %7024  ;;  %v8689_v62 = vadd.f32 %v8629_v19, %v854_v3  ;;  %v817_v6 = vmul.f32 %v7023_v27, %v7586_v9  ;;  %v760_v0 = vadd.f32 1e-05, %v728_v26  ;;  %1776 = vperm.xlu1 %7007, %v8339_v20   ;;  %2137 = vperm.xlu0 %7006, %v8344_v24  }
 0x15c   : > { %v956_v12 = vsel %vm8667_vm2, %v8673_v58, %v925_v2  ;;  %v818_v49 = vmul.f32 %v7025_v42, %v7595_v15  ;;  %v729_v36 = vmul.f32 0.1, %v665_v44  ;;  %v8715_v3 = vadd.f32 %v8629_v19, %v850_v59  ;;  %v671_v38 = vpop.xlane.xlu1 %670 }
 0x15d   : > { %7034 = vrsqrt.f32 %v759_v35  ;;  %v8718_v26 = vadd.f32 %v8629_v19, %v855_v21  ;;  %v730_v15 = vmul.f32 0.1, %v668_v45  ;;  %v989_v55 = vsel %vm8684_vm13, %v8649_v57, %v956_v12  ;;  %v16353_v21 = vld [vmem:[#allocation2_spill] sm:$0xff]  ;;  %v674_v12 = vpop.xlane.xlu0 %673 }
 0x15e   : > { %7036 = vrsqrt.f32 %v760_v0  ;;  %v7027_v27 = vpop.eup %7026  ;;  %v856_v35 = vmul.f32 %v8559_v17, %v817_v6  ;;  %v761_v2 = vadd.f32 1e-05, %v729_v36  ;;  %v1024_v42 = vsel %vm8699_vm8, 0.0, %v989_v55  ;;  %v16354_v36 = vld [vmem:[#allocation3_spill] sm:$0xff] }
 0x15f   : > { %v926_v59 = vsel %vm15668_vm3, %v8689_v62, 0.0  ;;  %v7029_v44 = vpop.eup %7028  ;;  %v819_v18 = vmul.f32 %v7027_v27, %v16353_v21  ;;  %v762_v0 = vadd.f32 1e-05, %v730_v15  ;;  %v1059_v45 = vsel %vm8710_vm11, 0.0, %v1024_v42  ;;  %v16358_v27 = vld [vmem:[#allocation34_spill] sm:$0xff]  ;;  %1782 = vperm.xlu1 %7007, %v8349_v28   ;;  %2143 = vperm.xlu0 %7006, %v8363_v43  }
 0x160   : > { %v8733_v41 = vadd.f32 %v8629_v19, %v852_v48  ;;  %v857_v6 = vmul.f32 %v8559_v17, %v818_v49  ;;  %v820_v55 = vmul.f32 %v7029_v44, %v16354_v36  ;;  %7038 = vrsqrt.f32 %v761_v2 }
 0x161   : > { %vm16355_vm1 = vcmask 80896   ;;  %v731_v22 = vmul.f32 0.1, %v671_v38  ;;  %7040 = vrsqrt.f32 %v762_v0  ;;  %v732_v48 = vmul.f32 0.1, %v674_v12  ;;  %v677_v12 = vpop.xlane.xlu1 %676  ;;  %v680_v36 = vpop.xlane.xlu0 %679 }
 0x162   : > { %6884 = vmatprep.mubr.msk.f32.mxu0 %vm16355_vm1, %v1059_v45  ;;  %v957_v49 = vsel %vm8667_vm2, %v8733_v41, %v926_v59  ;;  %v8752_v38 = vadd.s32 1, %v16358_v27  ;;  %v7031_v2 = vpop.eup %7030  ;;  %v8755_v42 = vadd.f32 %v8629_v19, %v856_v35  ;;  %v927_v24 = vsel %vm15668_vm3, %v8718_v26, 0.0  ;;  %vm16361_vm10 = vmmov %vm16355_vm1 }
 0x163   : > { %v763_v8 = vadd.f32 1e-05, %v731_v22  ;;  %v990_v44 = vsel %vm8684_vm13, %v8715_v3, %v957_v49  ;;  %v7033_v21 = vpop.eup %7032  ;;  %v858_v0 = vmul.f32 %v8559_v17, %v819_v18  ;;  %v764_v59 = vadd.f32 1e-05, %v732_v48  ;;  %v16360_v48 = vld [vmem:[#allocation4_spill] sm:$0xff]  ;;  %1788 = vperm.xlu1 %7007, %v8368_v51   ;;  %vm16365_vm7 = vmmov %vm16355_vm1  ;;  %2149 = vperm.xlu0 %7006, %v8373_v16   ;;  %v9538_v51 = vld [vmem:[%s15596_s1 + $0x18] sm:$0xff] }
 0x164   : > { %v1025_v45 = vsel %vm8699_vm8, 0.0, %v990_v44  ;;  %v8769_v22 = vsel %vm8743_vm15, 1, %v16175_v56  ;;  %v8772_v35 = vadd.f32 %v8629_v19, %v857_v6  ;;  %v859_v49 = vmul.f32 %v8559_v17, %v820_v55  ;;  %v16362_v55 = vld [vmem:[#allocation5_spill] sm:$0xff]  ;;  %vm16368_vm6 = vmmov %vm16355_vm1 }
 0x165   : > { %16359 = vst [vmem:[#allocation2_spill] sm:$0xff] %v8769_v22  ;;  %7042 = vrsqrt.f32 %v763_v8  ;;  %v1060_v18 = vsel %vm8710_vm11, 0.0, %v1025_v45  ;;  %v821_v27 = vmul.f32 %v7031_v2, %v16360_v48  ;;  %v733_v44 = vmul.f32 0.1, %v677_v12  ;;  %vm16371_vm12 = vmmov %vm16355_vm1 }
 0x166   : > { %7044 = vrsqrt.f32 %v764_v59  ;;  %6885 = vmatmul.mubr.msk.f32.vlgmr.msra.gmra.mrb[0].mxu0 %vm16361_vm10, %v1060_v18  ;;  %v958_v15 = vsel %vm8667_vm2, %v8658_v30, %v927_v24  ;;  %v822_v8 = vmul.f32 %v7033_v21, %v16362_v55  ;;  %v734_v28 = vmul.f32 0.1, %v680_v36  ;;  %v16363_v18 = vld [vmem:[#allocation6_spill] sm:$0xff]  ;;  %v683_v21 = vpop.xlane.xlu1 %682  ;;  %v686_v55 = vpop.xlane.xlu0 %685  ;;  %v16364_v36 = vld [vmem:[#allocation7_spill] sm:$0xff]  ;;  %vm16375_vm9 = vmmov %vm16355_vm1 }
 0x167   : > { %v7035_v6 = vpop.eup %7034  ;;  %v991_v45 = vsel %vm8684_vm13, %v8673_v58, %v958_v15  ;;  %v928_v2 = vsel %vm15668_vm3, %v8755_v42, 0.0  ;;  %v8792_v12 = vadd.f32 %v8629_v19, %v858_v0  ;;  %v765_v48 = vadd.f32 1e-05, %v733_v44  ;;  %1794 = vperm.xlu1 %7007, %v8392_v52   ;;  %vm16378_vm15 = vmmov %vm16355_vm1 }
 0x168   : > { %v7037_v59 = vpop.eup %7036  ;;  %v823_v24 = vmul.f32 %v7035_v6, %v16363_v18  ;;  %v1026_v43 = vsel %vm8699_vm8, %v8649_v57, %v991_v45  ;;  %v8799_v15 = vadd.f32 %v8629_v19, %v859_v49  ;;  %v766_v10 = vadd.f32 1e-05, %v734_v28  ;;  %v16366_v18 = vld [vmem:[#allocation8_spill] sm:$0xff]  ;;  %vm16379_vm10 = vmmov %vm16355_vm1 }
 0x169   : > { %v824_v20 = vmul.f32 %v7037_v59, %v16364_v36  ;;  %v1061_v29 = vsel %vm8710_vm11, 0.0, %v1026_v43  ;;  %v860_v0 = vmul.f32 %v8559_v17, %v821_v27  ;;  %7046 = vrsqrt.f32 %v765_v48 }
 0x16a   : > { %6887 = vmatprep.mubr.msk.f32.mxu0 %vm16365_vm7, %v1061_v29  ;;  %v959_v44 = vsel %vm8667_vm2, %v8689_v62, %v928_v2  ;;  %v735_v6 = vmul.f32 0.1, %v683_v21  ;;  %v7039_v49 = vpop.eup %7038  ;;  %v861_v45 = vmul.f32 %v8559_v17, %v822_v8  ;;  %7048 = vrsqrt.f32 %v766_v10  ;;  %v689_v8 = vpop.xlane.xlu1 %688  ;;  %v16367_v21 = vld [vmem:[#allocation9_spill] sm:$0xff]  ;;  %vm16381_vm7 = vmmov %vm16355_vm1 }
 0x16b   : > { %v992_v28 = vsel %vm8684_vm13, %v8733_v41, %v959_v44  ;;  %v929_v27 = vsel %vm15668_vm3, %v8772_v35, 0.0  ;;  %v7041_v29 = vpop.eup %7040  ;;  %v862_v59 = vmul.f32 %v8559_v17, %v823_v24  ;;  %v825_v2 = vmul.f32 %v7039_v49, %v16366_v18  ;;  %v692_v10 = vpop.xlane.xlu0 %691  ;;  %1800 = vperm.xlu1 %7007, %v8397_v61  }
 0x16c   : > { %v1027_v16 = vsel %vm8699_vm8, %v8715_v3, %v992_v28  ;;  %v767_v48 = vadd.f32 1e-05, %v735_v6  ;;  %v863_v43 = vmul.f32 %v8559_v17, %v824_v20  ;;  %v826_v36 = vmul.f32 %v7041_v29, %v16367_v21  ;;  %v16369_v28 = vld [vmem:[#allocation56_spill] sm:$0xff] }
 0x16d   : > { %v1062_v44 = vsel %vm8710_vm11, 0.0, %v1027_v16  ;;  %v960_v24 = vsel %vm8667_vm2, %v8718_v26, %v929_v27  ;;  %v864_v49 = vmul.f32 %v8559_v17, %v825_v2  ;;  %v736_v6 = vmul.f32 0.1, %v686_v55  ;;  %2155 = vperm.xlu0 %7006, %v16369_v28   ;;  %v16370_v28 = vld [vmem:[#allocation10_spill] sm:$0xff] }
 0x16e   : > { %6888 = vmatmul.mubr.msk.f32.gmra.mrb[2].mxu0 %vm16368_vm6, %v1062_v44  ;;  %7050 = vrsqrt.f32 %v767_v48  ;;  %v993_v20 = vsel %vm8684_vm13, %v8658_v30, %v960_v24  ;;  %v8838_v18 = vadd.f32 %v8629_v19, %v860_v0  ;;  %v930_v2 = vsel %vm15668_vm3, %v8792_v12, 0.0 }
 0x16f   : > { %v7043_v29 = vpop.eup %7042  ;;  %v1028_v27 = vsel %vm8699_vm8, %v8673_v58, %v993_v20  ;;  %v737_v16 = vmul.f32 0.1, %v689_v8  ;;  %v8847_v21 = vadd.f32 %v8629_v19, %v861_v45  ;;  %v8850_v55 = vadd.f32 %v8629_v19, %v862_v59  ;;  %v698_v24 = vpop.xlane.xlu0 %697  ;;  %1806 = vperm.xlu1 %7007, %v8407_v60  }
 0x170   : > { %v7045_v48 = vpop.eup %7044  ;;  %v1063_v0 = vsel %vm8710_vm11, %v8649_v57, %v1028_v27  ;;  %v768_v44 = vadd.f32 1e-05, %v736_v6  ;;  %v8856_v20 = vadd.f32 %v8629_v19, %v863_v43  ;;  %v827_v52 = vmul.f32 %v7043_v29, %v16370_v28  ;;  %v16372_v29 = vld [vmem:[#allocation59_spill] sm:$0xff] }
 0x171   : > { %6890 = vmatprep.mubr.msk.f32.mxu0 %vm16371_vm12, %v1063_v0  ;;  %v961_v45 = vsel %vm8667_vm2, %v8755_v42, %v930_v2  ;;  %v769_v8 = vadd.f32 1e-05, %v737_v16  ;;  %v8865_v59 = vadd.f32 %v8629_v19, %v864_v49  ;;  %v865_v57 = vmul.f32 %v8559_v17, %v826_v36  ;;  %2161 = vperm.xlu0 %7006, %v16372_v29   ;;  %v16373_v27 = vld [vmem:[#allocation11_spill] sm:$0xff]  ;;  %v695_v16 = vpop.xlane.xlu1 %694 }
 0x172   : > { %v994_v43 = vsel %vm8684_vm13, %v8689_v62, %v961_v45  ;;  %v931_v6 = vsel %vm15668_vm3, %v8799_v15, 0.0  ;;  %v828_v2 = vmul.f32 %v7045_v48, %v16373_v27  ;;  %7052 = vrsqrt.f32 %v768_v44 }
 0x173   : > { %v1029_v49 = vsel %vm8699_vm8, %v8733_v41, %v994_v43  ;;  %v962_v36 = vsel %vm8667_vm2, %v8772_v35, %v931_v6  ;;  %v7047_v0 = vpop.eup %7046  ;;  %7054 = vrsqrt.f32 %v769_v8  ;;  %v738_v44 = vmul.f32 0.1, %v692_v10  ;;  %v16374_v43 = vld [vmem:[#allocation12_spill] sm:$0xff]  ;;  %2068 = vperm.xlu1 %7007, %v8417_v54  }
 0x174   : > { %v1064_v28 = vsel %vm8710_vm11, %v8715_v3, %v1029_v49  ;;  %v995_v48 = vsel %vm8684_vm13, %v8718_v26, %v962_v36  ;;  %v7049_v45 = vpop.eup %7048  ;;  %v866_v29 = vmul.f32 %v8559_v17, %v827_v52  ;;  %v829_v27 = vmul.f32 %v7047_v0, %v16374_v43  ;;  %v704_v36 = vpop.xlane.xlu0 %703  ;;  %v16376_v0 = vld [vmem:[#allocation13_spill] sm:$0xff] }
 0x175   : > { %6891 = vmatmul.mubr.msk.f32.gmra.mrb[4].mxu0 %vm16375_vm9, %v1064_v28  ;;  %v1030_v6 = vsel %vm8699_vm8, %v8658_v30, %v995_v48  ;;  %v932_v3 = vsel %vm15668_vm3, %v8838_v18, 0.0  ;;  %v8899_v8 = vadd.f32 %v8629_v19, %v865_v57  ;;  %v770_v10 = vadd.f32 1e-05, %v738_v44  ;;  %2550 = vperm.xlu0 %7006, %v8412_v34   ;;  %vm16385_vm9 = vmmov %vm16355_vm1 }
 0x176   : > { %v1065_v52 = vsel %vm8710_vm11, %v8673_v58, %v1030_v6  ;;  %v963_v49 = vsel %vm8667_vm2, %v8792_v12, %v932_v3  ;;  %v830_v28 = vmul.f32 %v7049_v45, %v16376_v0  ;;  %v739_v48 = vmul.f32 0.1, %v695_v16 }
 0x177   : > { %6893 = vmatprep.mubr.msk.f32.mxu0 %vm16355_vm1, %v1065_v52  ;;  %v996_v57 = vsel %vm8684_vm13, %v8755_v42, %v963_v49  ;;  %v933_v58 = vsel %vm15668_vm3, %v8847_v21, 0.0  ;;  %v867_v43 = vmul.f32 %v8559_v17, %v828_v2  ;;  %7056 = vrsqrt.f32 %v770_v10  ;;  %v701_v2 = vpop.xlane.xlu1 %700  ;;  %v16377_v10 = vld [vmem:[#allocation14_spill] sm:$0xff] }
 0x178   : > { %v7051_v44 = vpop.eup %7050  ;;  %v1031_v6 = vsel %vm8699_vm8, %v8689_v62, %v996_v57  ;;  %v964_v45 = vsel %vm8667_vm2, %v8799_v15, %v933_v58  ;;  %v8924_v3 = vadd.f32 %v8629_v19, %v866_v29  ;;  %v868_v16 = vmul.f32 %v8559_v17, %v829_v27 }
 0x179   : > { %v1066_v52 = vsel %vm8710_vm11, %v8733_v41, %v1031_v6  ;;  %v771_v49 = vadd.f32 1e-05, %v739_v48  ;;  %v831_v0 = vmul.f32 %v7051_v44, %v16377_v10  ;;  %v997_v57 = vsel %vm8684_vm13, %v8772_v35, %v964_v45  ;;  %2556 = vperm.xlu0 %7006, %v8420_v46  }
 0x17a   : > { %6894 = vmatmul.mubr.msk.f32.gmra.mrb[6].mxu0 %vm16378_vm15, %v1066_v52  ;;  %v740_v29 = vmul.f32 0.1, %v698_v24  ;;  %v934_v27 = vsel %vm15668_vm3, %v8850_v55, 0.0  ;;  %v869_v41 = vmul.f32 %v8559_v17, %v830_v28  ;;  %v1032_v54 = vsel %vm8699_vm8, %v8718_v26, %v997_v57  ;;  %v710_v28 = vpop.xlane.xlu0 %709  ;;  %v16380_v57 = vld [vmem:[#allocation61_spill] sm:$0xff] }
 0x17b   : > { %7058 = vrsqrt.f32 %v771_v49  ;;  %v965_v48 = vsel %vm8667_vm2, %v8838_v18, %v934_v27  ;;  %v1067_v24 = vsel %vm8710_vm11, %v8658_v30, %v1032_v54  ;;  %v741_v6 = vmul.f32 0.1, %v701_v2  ;;  %2074 = vperm.xlu1 %7007, %v16380_v57  }
 0x17c   : > { %v772_v58 = vadd.f32 1e-05, %v740_v29  ;;  %v998_v44 = vsel %vm8684_vm13, %v8792_v12, %v965_v48  ;;  %v7053_v45 = vpop.eup %7052  ;;  %v8954_v52 = vadd.f32 %v8629_v19, %v867_v43  ;;  %v8957_v49 = vadd.f32 %v8629_v19, %v868_v16  ;;  %6896 = vmatprep.mubr.msk.f32.mxu0 %vm16379_vm10, %v1067_v24  ;;  %v707_v24 = vpop.xlane.xlu1 %706 }
 0x17d   : > { %v1033_v30 = vsel %vm8699_vm8, %v8755_v42, %v998_v44  ;;  %v935_v10 = vsel %vm15668_vm3, %v8856_v20, 0.0  ;;  %v7055_v2 = vpop.eup %7054  ;;  %v870_v29 = vmul.f32 %v8559_v17, %v831_v0  ;;  %v773_v16 = vadd.f32 1e-05, %v741_v6  ;;  %2562 = vperm.xlu0 %7006, %v8436_v7  }
 0x17e   : > { %7060 = vrsqrt.f32 %v772_v58  ;;  %v1068_v43 = vsel %vm8710_vm11, %v8689_v62, %v1033_v30  ;;  %v8973_v27 = vadd.f32 %v8629_v19, %v869_v41  ;;  %v966_v54 = vsel %vm8667_vm2, %v8847_v21, %v935_v10  ;;  %v16382_v58 = vld [vmem:[#allocation15_spill] sm:$0xff]  ;;  %v8989_v6 = vpop.permute.xlu0 %1716 }
 0x17f   : > { %6897 = vmatmul.mubr.msk.f32.gmra.mrb[8].mxu0 %vm16381_vm7, %v1068_v43  ;;  %v742_v48 = vmul.f32 0.1, %v704_v36  ;;  %v936_v0 = vsel %vm15668_vm3, %v8865_v59, 0.0  ;;  %v832_v62 = vmul.f32 %v7053_v45, %v16382_v58  ;;  %7062 = vrsqrt.f32 %v773_v16  ;;  %v8994_v36 = vld [vmem:[%s15596_s1 + $0x90] sm:$0xff]  ;;  %2080 = vperm.xlu1 %7007, %v8496_v25   ;;  %vm16388_vm7 = vmmov %vm16355_vm1 }
 0x180   : > { %v999_v41 = vsel %vm8684_vm13, %v8799_v15, %v966_v54  ;;  %v967_v44 = vsel %vm8667_vm2, %v8850_v55, %v936_v0  ;;  %vm1957_vm6 = vcmp.ge.s32.totalorder %v8994_v36, 0  ;;  %vm1989_vm12 = vcmp.lt.s32.totalorder %v8994_v36, 16  ;;  %v16383_v45 = vld [vmem:[#allocation16_spill] sm:$0xff] }
 0x181   : > { %v833_v30 = vmul.f32 %v7055_v2, %v16383_v45  ;;  %v1034_v10 = vsel %vm8699_vm8, %v8772_v35, %v999_v41  ;;  %v774_v57 = vadd.f32 1e-05, %v742_v48  ;;  %v1000_v43 = vsel %vm8684_vm13, %v8838_v18, %v967_v44  ;;  %v7057_v16 = vpop.eup %7056  ;;  %2568 = vperm.xlu0 %7006, %v8501_v23   ;;  %v16384_v48 = vld [vmem:[#allocation17_spill] sm:$0xff] }
 0x182   : > { %v9007_v54 = vadd.f32 %v8629_v19, %v870_v29  ;;  %v1069_v0 = vsel %vm8710_vm11, %v8718_v26, %v1034_v10  ;;  %v1035_v2 = vsel %vm8699_vm8, %v8792_v12, %v1000_v43  ;;  %v743_v58 = vmul.f32 0.1, %v707_v24  ;;  %v9031_v10 = vpop.permute.xlu0 %1743 }
 0x183   : > { %v834_v41 = vmul.f32 %v7057_v16, %v16384_v48  ;;  %6899 = vmatprep.mubr.msk.f32.mxu0 %vm16385_vm9, %v1069_v0  ;;  %7064 = vrsqrt.f32 %v774_v57  ;;  %v1070_v25 = vsel %vm8710_vm11, %v8755_v42, %v1035_v2  ;;  %v937_v26 = vsel %vm15668_vm3, %v8899_v8, 0.0  ;;  %16386 = vst [vmem:[#allocation3_spill] sm:$0xff] %v9031_v10  ;;  %2086 = vperm.xlu1 %7007, %v8514_v50   ;;  %vm16391_vm9 = vmmov %vm16355_vm1 }
 0x184   : > { %6900 = vmatmul.mubr.msk.f32.gmra.mrb[10].mxu0 %vm16355_vm1, %v1070_v25  ;;  %v775_v29 = vadd.f32 1e-05, %v743_v58  ;;  %v968_v24 = vsel %vm8667_vm2, %v8856_v20, %v937_v26  ;;  %v744_v44 = vmul.f32 0.1, %v710_v28  ;;  %v938_v45 = vsel %vm15668_vm3, %v8924_v3, 0.0  ;;  %v16387_v28 = vld [vmem:[#allocation18_spill] sm:$0xff]  ;;  %vm9113_vm1 = vmand %vm1957_vm6, %vm1989_vm12 }
 0x185   : > { %v7059_v57 = vpop.eup %7058  ;;  %v871_v42 = vmul.f32 %v8559_v17, %v832_v62  ;;  %v872_v43 = vmul.f32 %v8559_v17, %v833_v30  ;;  %v1001_v16 = vsel %vm8684_vm13, %v8847_v21, %v968_v24  ;;  %v969_v0 = vsel %vm8667_vm2, %v8865_v59, %v938_v45  ;;  %2574 = vperm.xlu0 %7006, %v8538_v63   ;;  %vm16397_vm6 = vmmov %vm16388_vm7 }
 0x186   : > { %v835_v2 = vmul.f32 %v7059_v57, %v16387_v28  ;;  %7066 = vrsqrt.f32 %v775_v29  ;;  %v1036_v58 = vsel %vm8699_vm8, %v8799_v15, %v1001_v16  ;;  %v776_v62 = vadd.f32 1e-05, %v744_v44  ;;  %v9067_v24 = vpop.permute.xlu0 %1749  ;;  %v16390_v44 = vld [vmem:[#allocation19_spill] sm:$0xff] }
 0x187   : > { %v873_v30 = vmul.f32 %v8559_v17, %v834_v41  ;;  %v1071_v48 = vsel %vm8710_vm11, %v8772_v35, %v1036_v58  ;;  %v1002_v50 = vsel %vm8684_vm13, %v8850_v55, %v969_v0  ;;  %v939_v25 = vsel %vm15668_vm3, %v8954_v52, 0.0  ;;  %16389 = vst [vmem:[#allocation34_spill] sm:$0xff] %v9067_v24  ;;  %2092 = vperm.xlu1 %7007, %v8543_v33   ;;  %v9094_v33 = vld [vmem:[%s15596_s1 + $0xc8] sm:$0xff] }
 0x188   : > { %vm2439_vm15 = vcmp.ge.s32.totalorder %v8624_v4, 0  ;;  %vm2471_vm10 = vcmp.lt.s32.totalorder %v8624_v4, 16  ;;  %v7061_v26 = vpop.eup %7060  ;;  %v874_v29 = vmul.f32 %v8559_v17, %v835_v2  ;;  %6902 = vmatprep.mubr.msk.f32.mxu0 %vm16388_vm7, %v1071_v48  ;;  %7068 = vrsqrt.f32 %v776_v62  ;;  %v16392_v48 = vld [vmem:[#allocation20_spill] sm:$0xff] }
 0x189   : > { %v1037_v35 = vsel %vm8699_vm8, %v8838_v18, %v1002_v50  ;;  %v970_v41 = vsel %vm8667_vm2, %v8899_v8, %v939_v25  ;;  %v836_v45 = vmul.f32 %v7061_v26, %v16390_v44  ;;  %v940_v0 = vsel %vm15668_vm3, %v8957_v49, 0.0  ;;  %v7063_v28 = vpop.eup %7062  ;;  %2580 = vperm.xlu0 %7006, %v8548_v1  }
 0x18a   : > { %v1072_v57 = vsel %vm8710_vm11, %v8792_v12, %v1037_v35  ;;  %v1003_v16 = vsel %vm8684_vm13, %v8856_v20, %v970_v41  ;;  %v9081_v2 = vadd.f32 %v8629_v19, %v871_v42  ;;  %v971_v58 = vsel %vm8667_vm2, %v8924_v3, %v940_v0 }
 0x18b   : > { %6903 = vmatmul.mubr.msk.f32.gmra.mrb[12].mxu0 %vm16391_vm9, %v1072_v57  ;;  %v1038_v12 = vsel %vm8699_vm8, %v8847_v21, %v1003_v16  ;;  %v9097_v42 = vadd.s32 1, %v9094_v33  ;;  %v9100_v62 = vadd.f32 %v8629_v19, %v872_v43  ;;  %v837_v50 = vmul.f32 %v7063_v28, %v16392_v48  ;;  %v9130_v57 = vpop.permute.xlu0 %1755  ;;  %2098 = vperm.xlu1 %7007, %v8568_v47  }
 0x18c   : > { %v1073_v25 = vsel %vm8710_vm11, %v8799_v15, %v1038_v12  ;;  %v1004_v26 = vsel %vm8684_vm13, %v8865_v59, %v971_v58  ;;  %v9118_v43 = vadd.f32 %v8629_v19, %v873_v30  ;;  %v941_v41 = vsel %vm15668_vm3, %v8973_v27, 0.0  ;;  %16395 = vst [vmem:[#allocation4_spill] sm:$0xff] %v9130_v57  ;;  %v16396_v58 = vld [vmem:[#allocation21_spill] sm:$0xff] }
 0x18d   : > { %6905 = vmatprep.mubr.msk.f32.mxu0 %vm16388_vm7, %v1073_v25  ;;  %v1039_v15 = vsel %vm8699_vm8, %v8850_v55, %v1004_v26  ;;  %v942_v44 = vsel %vm15668_vm3, %v9007_v54, 0.0  ;;  %v7065_v16 = vpop.eup %7064  ;;  %v9133_v30 = vadd.f32 %v8629_v19, %v874_v29  ;;  %v875_v0 = vmul.f32 %v8559_v17, %v836_v45  ;;  %2586 = vperm.xlu0 %7006, %v8573_v40  }
 0x18e   : > { %v1074_v28 = vsel %vm8710_vm11, %v8838_v18, %v1039_v15  ;;  %v972_v12 = vsel %vm8667_vm2, %v8954_v52, %v941_v41  ;;  %v838_v48 = vmul.f32 %v7065_v16, %v16396_v58  ;;  %v973_v45 = vsel %vm8667_vm2, %v8957_v49, %v942_v44 }
 0x18f   : > { %6906 = vmatmul.mubr.msk.f32.gmra.mrb[14].mxu0 %vm16397_vm6, %v1074_v28  ;;  %v1005_v29 = vsel %vm8684_vm13, %v8899_v8, %v972_v12  ;;  %v9155_v18 = vsel %vm9113_vm1, 1, %v16175_v56  ;;  %v876_v47 = vmul.f32 %v8559_v17, %v837_v50  ;;  %v1006_v26 = vsel %vm8684_vm13, %v8924_v3, %v973_v45  ;;  %v9177_v28 = vpop.permute.xlu0 %1761  ;;  %v9182_v12 = vld [vmem:[%s15596_s1 + $0xa0] sm:$0xff]  ;;  %vm16400_vm1 = vmmov %vm16397_vm6  ;;  %2104 = vperm.xlu1 %7007, %v8578_v11  }
 0x190   : > { %v1040_v25 = vsel %vm8699_vm8, %v8856_v20, %v1005_v29  ;;  %v943_v15 = vsel %vm15668_vm3, %v9081_v2, 0.0  ;;  %v7067_v41 = vpop.eup %7066  ;;  %v877_v44 = vmul.f32 %v8559_v17, %v838_v48  ;;  %v1041_v50 = vsel %vm8699_vm8, %v8865_v59, %v1006_v26  ;;  %16398 = vst [vmem:[#allocation5_spill] sm:$0xff] %v9177_v28  ;;  %vm16401_vm6 = vmmov %vm16400_vm1 }
 0x191   : > { %v1075_v35 = vsel %vm8710_vm11, %v8847_v21, %v1040_v25  ;;  %v974_v16 = vsel %vm8667_vm2, %v8973_v27, %v943_v15  ;;  %vm1959_vm12 = vcmp.ge.s32.totalorder %v9182_v12, 0  ;;  %vm1991_vm9 = vcmp.lt.s32.totalorder %v9182_v12, 16  ;;  %v16399_v21 = vld [vmem:[#allocation22_spill] sm:$0xff]  ;;  %2592 = vperm.xlu0 %7006, %v8609_v39   ;;  %v16404_v15 = vld [vmem:[#allocation23_spill] sm:$0xff] }
 0x192   : > { %v839_v58 = vmul.f32 %v7067_v41, %v16399_v21  ;;  %6908 = vmatprep.mubr.msk.f32.mxu0 %vm16400_vm1, %v1075_v35  ;;  %v1076_v48 = vsel %vm8710_vm11, %v8850_v55, %v1041_v50  ;;  %v1007_v29 = vsel %vm8684_vm13, %v8954_v52, %v974_v16  ;;  %vm2441_vm7 = vcmp.ge.s32.totalorder %v8752_v38, 0  ;;  %v7069_v45 = vpop.eup %7068  ;;  %vm9211_vm1 = vmand %vm2439_vm15, %vm2471_vm10 }
 0x193   : > { %v9197_v25 = vadd.f32 %v8629_v19, %v875_v0  ;;  %6909 = vmatmul.mubr.msk.f32.gmra.mrb[16].mxu0 %vm16401_vm6, %v1076_v48  ;;  %v1042_v26 = vsel %vm8699_vm8, %v8899_v8, %v1007_v29  ;;  %v944_v55 = vsel %vm15668_vm3, %v9100_v62, 0.0  ;;  %vm2473_vm6 = vcmp.lt.s32.totalorder %v8752_v38, 16  ;;  %2110 = vperm.xlu1 %7007, %v8614_v14  }
 0x194   : > { %v878_v0 = vmul.f32 %v8559_v17, %v839_v58  ;;  %v840_v41 = vmul.f32 %v7069_v45, %v16404_v15  ;;  %v1077_v35 = vsel %vm8710_vm11, %v8856_v20, %v1042_v26  ;;  %v975_v50 = vsel %vm8667_vm2, %v9007_v54, %v944_v55  ;;  %v9237_v58 = vpop.permute.xlu0 %1767 }
 0x195   : > { %v9225_v4 = vadd.f32 %v8629_v19, %v876_v47  ;;  %vm16405_vm15 = vcmask 80896   ;;  %v1008_v16 = vsel %vm8684_vm13, %v8957_v49, %v975_v50  ;;  %v945_v21 = vsel %vm15668_vm3, %v9118_v43, 0.0  ;;  %16406 = vst [vmem:[#allocation6_spill] sm:$0xff] %v9237_v58  ;;  %v9242_v47 = vld [vmem:[%s15596_s1 + $0xb0] sm:$0xff]  ;;  %2598 = vperm.xlu0 %7006, %v8621_v13  }
 0x196   : > { %6911 = vmatprep.mubr.msk.f32.mxu0 %vm16405_vm15, %v1077_v35  ;;  %v946_v20 = vsel %vm15668_vm3, %v9133_v30, 0.0  ;;  %vm1961_vm10 = vcmp.ge.s32.totalorder %v9242_v47, 0  ;;  %vm1993_vm15 = vcmp.lt.s32.totalorder %v9242_v47, 16  ;;  %v9247_v48 = vadd.f32 %v8629_v19, %v877_v44 }
 0x197   : > { %v1043_v29 = vsel %vm8699_vm8, %v8924_v3, %v1008_v16  ;;  %v976_v45 = vsel %vm8667_vm2, %v9081_v2, %v945_v21  ;;  %v9259_v26 = vsel %vm9211_vm1, 1, %v16175_v56  ;;  %v9262_v55 = vadd.f32 %v8629_v19, %v878_v0  ;;  %2116 = vperm.xlu1 %7007, %v8655_v31  }
 0x198   : > { %16407 = vst [vmem:[#allocation7_spill] sm:$0xff] %v9259_v26  ;;  %v1078_v44 = vsel %vm8710_vm11, %v8865_v59, %v1043_v29  ;;  %v1009_v15 = vsel %vm8684_vm13, %v8973_v27, %v976_v45  ;;  %v977_v14 = vsel %vm8667_vm2, %v9100_v62, %v946_v20  ;;  %v879_v11 = vmul.f32 %v8559_v17, %v840_v41  ;;  %v9297_v21 = vpop.permute.xlu0 %1773 }
 0x199   : > { %vm16408_vm1 = vcmask 80896   ;;  %v1044_v0 = vsel %vm8699_vm8, %v8954_v52, %v1009_v15  ;;  %v1010_v59 = vsel %vm8684_vm13, %v9007_v54, %v977_v14  ;;  %v947_v35 = vsel %vm15668_vm3, %v9197_v25, 0.0  ;;  %16409 = vst [vmem:[#allocation8_spill] sm:$0xff] %v9297_v21  ;;  %2604 = vperm.xlu0 %7006, %v8769_v22  }
 0x19a   : > { %6912 = vmatmul.mubr.msk.f32.gmra.mrb[18].mxu0 %vm16408_vm1, %v1078_v44  ;;  %v1079_v50 = vsel %vm8710_vm11, %v8899_v8, %v1044_v0  ;;  %v1045_v17 = vsel %vm8699_vm8, %v8957_v49, %v1010_v59  ;;  %v978_v41 = vsel %vm8667_vm2, %v9118_v43, %v947_v35  ;;  %v948_v16 = vsel %vm15668_vm3, %v9225_v4, 0.0 }
 0x19b   : > { %6914 = vmatprep.mubr.msk.f32.mxu0 %vm16408_vm1, %v1079_v50  ;;  %v1080_v8 = vsel %vm8710_vm11, %v8924_v3, %v1045_v17  ;;  %v1011_v20 = vsel %vm8684_vm13, %v9081_v2, %v978_v41  ;;  %v979_v29 = vsel %vm8667_vm2, %v9133_v30, %v948_v16  ;;  %v949_v45 = vsel %vm15668_vm3, %v9247_v48, 0.0  ;;  %2122 = vperm.xlu1 %7007, %v9155_v18  }
 0x19c   : > { %v1046_v44 = vsel %vm8699_vm8, %v8973_v27, %v1011_v20  ;;  %v1012_v3 = vsel %vm8684_vm13, %v9100_v62, %v979_v29  ;;  %v980_v15 = vsel %vm8667_vm2, %v9197_v25, %v949_v45  ;;  %vm2443_vm1 = vcmp.ge.s32.totalorder %v9097_v42, 0  ;;  %v9358_v16 = vpop.permute.xlu0 %1779  ;;  %v9483_v45 = vld [vmem:[%s15596_s1 + $0x8] sm:$0xff] }
 0x19d   : > { %vm16410_vm5 = vcmask 80896   ;;  %v1081_v31 = vsel %vm8710_vm11, %v8954_v52, %v1046_v44  ;;  %v1047_v14 = vsel %vm8699_vm8, %v9007_v54, %v1012_v3  ;;  %v1013_v0 = vsel %vm8684_vm13, %v9118_v43, %v980_v15  ;;  %16414 = vst [vmem:[#allocation9_spill] sm:$0xff] %v9358_v16  ;;  %2610 = vperm.xlu0 %7006, %v9259_v26   ;;  %v9586_v16 = vld [vmem:[%s15596_s1 + $0x38] sm:$0xff] }
 0x19e   : > { %6915 = vmatmul.mubr.msk.f32.gmra.mrb[20].mxu0 %vm16410_vm5, %v1080_v8  ;;  %v950_v59 = vsel %vm15668_vm3, %v9262_v55, 0.0  ;;  %vm9341_vm5 = vmand %vm1959_vm12, %vm1991_vm9  ;;  %vm16413_vm14 = vcmask 80896   ;;  %v1082_v52 = vsel %vm8710_vm11, %v8957_v49, %v1047_v14  ;;  %v1048_v50 = vsel %vm8699_vm8, %v9081_v2, %v1013_v0 }
 0x19f   : > { %6917 = vmatprep.mubr.msk.f32.mxu0 %vm16413_vm14, %v1081_v31  ;;  %v981_v17 = vsel %vm8667_vm2, %v9225_v4, %v950_v59  ;;  %v9356_v41 = vadd.f32 %v8629_v19, %v879_v11  ;;  %vm2505_vm14 = vmand %vm2441_vm7, %vm2473_vm6  ;;  %v1083_v49 = vsel %vm8710_vm11, %v8973_v27, %v1048_v50  ;;  %vm2475_vm12 = vcmp.lt.s32.totalorder %v9097_v42, 16  ;;  %v9375_v19 = vld [vmem:[%s15596_s1 + $0xd8] sm:$0xff]  ;;  %v9419_v31 = vld [vmem:[%s15596_s1 + $0xc0] sm:$0xff] }
 0x1a0   : > { %v1014_v8 = vsel %vm8684_vm13, %v9133_v30, %v981_v17  ;;  %v2413_v38 = vadd.s32 1, %v9375_v19  ;;  %v2055_v18 = vsel %vm9341_vm5, 1, %v16175_v56  ;;  %vm16415_vm9 = vcmask 80896   ;;  %vm9399_vm7 = vmand %vm1961_vm10, %vm1993_vm15  ;;  %v9410_v15 = vpop.permute.xlu0 %1785  ;;  %v9431_v42 = vld [vmem:[%s15596_s1 + $0xe8] sm:$0xff]  ;;  %v9458_v17 = vld [vmem:[%s15596_s1 + $0xf8] sm:$0xff] }
 0x1a1   : > { %v1049_v11 = vsel %vm8699_vm8, %v9100_v62, %v1014_v8  ;;  %v951_v27 = vsel %vm15668_vm3, %v9356_v41, 0.0  ;;  %v9393_v29 = vsel %vm2505_vm14, 1, %v16175_v56  ;;  %vm16419_vm6 = vmmov %vm16415_vm9  ;;  %16420 = vst [vmem:[#allocation10_spill] sm:$0xff] %v9410_v15  ;;  %vm1963_vm15 = vcmp.ge.s32.totalorder %v9419_v31, 0  ;;  %2128 = vperm.xlu1 %7007, %v2055_v18   ;;  %v9473_v18 = vld [vmem:[%s15596_s1 + $0xe0] sm:$0xff] }
 0x1a2   : > { %6918 = vmatmul.mubr.msk.f32.gmra.mrb[22].mxu0 %vm16415_vm9, %v1082_v52  ;;  %v982_v20 = vsel %vm8667_vm2, %v9247_v48, %v951_v27  ;;  %16416 = vst [vmem:[#allocation56_spill] sm:$0xff] %v9393_v29  ;;  %v1084_v44 = vsel %vm8710_vm11, %v9007_v54, %v1049_v11  ;;  %vm2507_vm10 = vmand %vm2443_vm1, %vm2475_vm12  ;;  %vm1995_vm5 = vcmp.lt.s32.totalorder %v9419_v31, 16  ;;  %v9423_v54 = vpop.permute.xlu1 %1719  ;;  %vm2445_vm14 = vcmp.ge.s32.totalorder %v2413_v38, 0  ;;  %2616 = vperm.xlu0 %7006, %v9393_v29  }
 0x1a3   : > { %6920 = vmatprep.mubr.msk.f32.mxu0 %vm16419_vm6, %v1083_v49  ;;  %v1015_v3 = vsel %vm8684_vm13, %v9197_v25, %v982_v20  ;;  %vm2477_vm9 = vcmp.lt.s32.totalorder %v2413_v38, 16  ;;  %v2415_v0 = vadd.s32 1, %v9431_v42  ;;  %v2057_v35 = vsel %vm9399_vm7, 1, %v16175_v56  ;;  %vm16421_vm1 = vmmov %vm16419_vm6 }
 0x1a4   : > { %v1050_v14 = vsel %vm8699_vm8, %v9118_v43, %v1015_v3  ;;  %v9443_v52 = vsel %vm2507_vm10, 1, %v16175_v56  ;;  %vm2027_vm12 = vmand %vm1963_vm15, %vm1995_vm5  ;;  %v9446_v50 = vpop.permute.xlu0 %1791  ;;  %v2417_v49 = vadd.s32 1, %v9458_v17  ;;  %vm1967_vm5 = vcmp.ge.s32.totalorder %v9473_v18, 0 }
 0x1a5   : > { %v1085_v59 = vsel %vm8710_vm11, %v9081_v2, %v1050_v14  ;;  %16422 = vst [vmem:[#allocation59_spill] sm:$0xff] %v9443_v52  ;;  %vm16423_vm6 = vmmov %vm16421_vm1  ;;  %v9451_v2 = vld [vmem:[%s15596_s1 + $0xd0] sm:$0xff]  ;;  %2134 = vperm.xlu1 %7007, %v2057_v35   ;;  %vm2479_vm3 = vcmp.lt.s32.totalorder %v2415_v0, 16  ;;  %v2059_v8 = vsel %vm2027_vm12, 1, %v16175_v56  ;;  %v984_v20 = vsel %vm8667_vm2, %v9356_v41, 0.0 }
 0x1a6   : > { %6921 = vmatmul.mubr.msk.f32.gmra.mrb[24].mxu0 %vm16421_vm1, %v1084_v44  ;;  %16424 = vst [vmem:[#allocation11_spill] sm:$0xff] %v9446_v50  ;;  %vm2509_vm0 = vmand %vm2445_vm14, %vm2477_vm9  ;;  %vm1965_vm4 = vcmp.ge.s32.totalorder %v9451_v2, 0  ;;  %vm1997_vm7 = vcmp.lt.s32.totalorder %v9451_v2, 16  ;;  %vm2447_vm1 = vcmp.ge.s32.totalorder %v2415_v0, 0  ;;  %2622 = vperm.xlu0 %7006, %v9443_v52   ;;  %v9463_v38 = vpop.permute.xlu1 %1722  ;;  %vm1999_vm14 = vcmp.lt.s32.totalorder %v9473_v18, 16 }
 0x1a7   : > { %6923 = vmatprep.mubr.msk.f32.mxu0 %vm16423_vm6, %v1085_v59  ;;  %v9466_v11 = vsel %vm2509_vm0, 1, %v16175_v56  ;;  %vm2029_vm10 = vmand %vm1965_vm4, %vm1997_vm7  ;;  %vm2449_vm0 = vcmp.ge.s32.totalorder %v2417_v49, 0  ;;  %vm2481_vm9 = vcmp.lt.s32.totalorder %v2417_v49, 16  ;;  %v6646_v44 = vadd.s32 2, %v9483_v45 }
 0x1a8   : > { %16425 = vst [vmem:[#allocation12_spill] sm:$0xff] %v9466_v11  ;;  %v9468_v27 = vpop.permute.xlu0 %1797  ;;  %vm2511_vm15 = vmand %vm2447_vm1, %vm2479_vm3  ;;  %v1017_v3 = vsel %vm8684_vm13, %v9247_v48, %v984_v20  ;;  %v2061_v14 = vsel %vm2029_vm10, 1, %v16175_v56  ;;  %v1019_v59 = vsel %vm8684_vm13, %v9356_v41, 0.0  ;;  %v9518_v41 = vld [vmem:[%s15596_s1 + $0xf0] sm:$0xff]  ;;  %v6652_v21 = vadd.s32 2, %v9586_v16 }
 0x1a9   : > { %16426 = vst [vmem:[#allocation13_spill] sm:$0xff] %v9468_v27  ;;  %2140 = vperm.xlu1 %7007, %v2059_v8   ;;  %v1052_v0 = vsel %vm8699_vm8, %v9197_v25, %v1017_v3  ;;  %v9498_v35 = vsel %vm2511_vm15, 1, %v16175_v56  ;;  %vm9500_vm3 = vmand %vm1967_vm5, %vm1999_vm14  ;;  %vm1969_vm12 = vcmp.ge.s32.totalorder %v9518_v41, 0  ;;  %vm2001_vm6 = vcmp.lt.s32.totalorder %v9518_v41, 16  ;;  %v9567_v3 = vld [vmem:[%s15596_s1 + $0x28] sm:$0xff] }
 0x1aa   : > { %2628 = vperm.xlu0 %7006, %v9466_v11   ;;  %16427 = vst [vmem:[#allocation14_spill] sm:$0xff] %v9498_v35  ;;  %v9507_v8 = vsel %vm8710_vm11, %v9118_v43, %v1052_v0  ;;  %vm9511_vm4 = vmand %vm2449_vm0, %vm2481_vm9  ;;  %v9525_v43 = vld [vmem:[%s15596_s1] sm:$0xff]  ;;  %v9531_v60 = vsel %vm8699_vm8, %v9247_v48, %v1019_v59  ;;  %v9533_v61 = vpop.permute.xlu1 %1725  ;;  %vm4278_vm7 = vcmp.ge.s32.totalorder %v6646_v44, 0  ;;  %vm4310_vm1 = vcmp.lt.s32.totalorder %v6646_v44, 16  ;;  %v9561_v59 = vld [vmem:[%s15596_s1 + $0x10] sm:$0xff] }
 0x1ab   : > { %v2386_v0 = vadd.s32 1, %v9525_v43  ;;  %v2063_v48 = vsel %vm9500_vm3, 1, %v16175_v56  ;;  %v9552_v44 = vsel %vm9511_vm4, 1, %v16175_v56  ;;  %vm2033_vm10 = vmand %vm1969_vm12, %vm2001_vm6  ;;  %v2388_v49 = vadd.s32 1, %v9561_v59 }
 0x1ac   : > { %v9509_v20 = vpop.permute.xlu0 %1803  ;;  %16433 = vst [vmem:[#allocation15_spill] sm:$0xff] %v9552_v44  ;;  %vm4342_vm15 = vmand %vm4278_vm7, %vm4310_vm1  ;;  %v6650_v27 = vadd.s32 2, %v9567_v3  ;;  %v6670_v53 = vadd.s32 2, %v9094_v33 }
 0x1ad   : > { %16430 = vst [vmem:[#allocation61_spill] sm:$0xff] %v9509_v20  ;;  %2146 = vperm.xlu1 %7007, %v2061_v14   ;;  %v6648_v20 = vadd.s32 2, %v9538_v51  ;;  %vm2418_vm5 = vcmp.ge.s32.totalorder %v2386_v0, 0  ;;  %vm2450_vm14 = vcmp.lt.s32.totalorder %v2386_v0, 16  ;;  %v2065_v0 = vsel %vm2033_vm10, 1, %v16175_v56 }
 0x1ae   : > { %2634 = vperm.xlu0 %7006, %v9498_v35   ;;  %v4374_v50 = vsel %vm4342_vm15, 1, %v16175_v56  ;;  %vm2482_vm3 = vmand %vm2418_vm5, %vm2450_vm14  ;;  %vm2420_vm12 = vcmp.ge.s32.totalorder %v2388_v49, 0  ;;  %vm2452_vm6 = vcmp.lt.s32.totalorder %v2388_v49, 16  ;;  %vm4282_vm7 = vcmp.ge.s32.totalorder %v6650_v27, 0 }
 0x1af   : > { %vm4280_vm0 = vcmp.ge.s32.totalorder %v6648_v20, 0  ;;  %vm4312_vm9 = vcmp.lt.s32.totalorder %v6648_v20, 16  ;;  %v9580_v20 = vld [vmem:[%s15596_s1 + $0x20] sm:$0xff]  ;;  %vm4314_vm1 = vcmp.lt.s32.totalorder %v6650_v27, 16  ;;  %v9590_v49 = vsel %vm2482_vm3, 1, %v16175_v56  ;;  %vm2484_vm10 = vmand %vm2420_vm12, %vm2452_vm6  ;;  %v9598_v27 = vld [vmem:[%s15596_s1 + $0x30] sm:$0xff] }
 0x1b0   : > { %v9556_v14 = vpop.permute.xlu0 %1809  ;;  %vm4344_vm4 = vmand %vm4280_vm0, %vm4312_vm9  ;;  %vm4284_vm0 = vcmp.ge.s32.totalorder %v6652_v21, 0  ;;  %vm4316_vm9 = vcmp.lt.s32.totalorder %v6652_v21, 16  ;;  %v9616_v21 = vld [vmem:[%s15596_s1 + $0x40] sm:$0xff] }
 0x1b1   : > { %16434 = vst [vmem:[#allocation16_spill] sm:$0xff] %v9556_v14  ;;  %2152 = vperm.xlu1 %7007, %v2063_v48   ;;  %v9572_v14 = vpop.permute.xlu1 %1728  ;;  %v2390_v48 = vadd.s32 1, %v9580_v20  ;;  %v4376_v58 = vsel %vm4344_vm4, 1, %v16175_v56  ;;  %vm4346_vm15 = vmand %vm4282_vm7, %vm4314_vm1  ;;  %v2394_v11 = vadd.s32 1, %v9616_v21 }
 0x1b2   : > { %2640 = vperm.xlu0 %7006, %v9552_v44   ;;  %16435 = vst [vmem:[#allocation17_spill] sm:$0xff] %v9572_v14  ;;  %v4378_v35 = vsel %vm4346_vm15, 1, %v16175_v56  ;;  %vm4348_vm4 = vmand %vm4284_vm0, %vm4316_vm9 }
 0x1b3   : > { %vm2422_vm5 = vcmp.ge.s32.totalorder %v2390_v48, 0  ;;  %vm2454_vm14 = vcmp.lt.s32.totalorder %v2390_v48, 16  ;;  %v9608_v48 = vsel %vm2484_vm10, 1, %v16175_v56  ;;  %v4380_v29 = vsel %vm4348_vm4, 1, %v16175_v56 }
 0x1b4   : > { %v9575_v15 = vpop.permute.xlu0 %2071  ;;  %16439 = vst [vmem:[#allocation21_spill] sm:$0xff] %v9608_v48  ;;  %vm2486_vm3 = vmand %vm2422_vm5, %vm2454_vm14  ;;  %vm2426_vm5 = vcmp.ge.s32.totalorder %v2394_v11, 0  ;;  %vm2458_vm14 = vcmp.lt.s32.totalorder %v2394_v11, 16 }
 0x1b5   : > { %16436 = vst [vmem:[#allocation18_spill] sm:$0xff] %v9575_v15  ;;  %2158 = vperm.xlu1 %7007, %v2065_v0   ;;  %v2392_v0 = vadd.s32 1, %v9598_v27  ;;  %v9601_v44 = vpop.permute.xlu1 %1731 }
 0x1b6   : > { %4409 = vperm.xlu0 %7006, %v4374_v50   ;;  %16438 = vst [vmem:[#allocation20_spill] sm:$0xff] %v9601_v44  ;;  %v7219_v50 = vld [vmem:[%s15596_s1 + $0x48] sm:$0xff] }
 0x1b7   : > { %v6654_v57 = vadd.s32 2, %v7219_v50  ;;  %vm2424_vm12 = vcmp.ge.s32.totalorder %v2392_v0, 0  ;;  %vm2456_vm6 = vcmp.lt.s32.totalorder %v2392_v0, 16  ;;  %v7221_v50 = vld [vmem:[%s15596_s1 + $0x58] sm:$0xff]  ;;  %v9624_v0 = vsel %vm2486_vm3, 1, %v16175_v56  ;;  %vm2490_vm3 = vmand %vm2426_vm5, %vm2458_vm14 }
 0x1b8   : > { %v9593_v28 = vpop.permute.xlu0 %2077  ;;  %v6656_v52 = vadd.s32 2, %v7221_v50  ;;  %16441 = vst [vmem:[#allocation23_spill] sm:$0xff] %v9624_v0  ;;  %vm9627_vm10 = vmand %vm2424_vm12, %vm2456_vm6 }
 0x1b9   : > { %16437 = vst [vmem:[#allocation19_spill] sm:$0xff] %v9593_v28  ;;  %2547 = vperm.xlu1 %7007, %v9590_v49   ;;  %vm4286_vm7 = vcmp.ge.s32.totalorder %v6654_v57, 0  ;;  %vm4318_vm1 = vcmp.lt.s32.totalorder %v6654_v57, 16  ;;  %v9636_v57 = vld [vmem:[%s15596_s1 + $0x50] sm:$0xff]  ;;  %v9648_v11 = vsel %vm9627_vm10, 1, %v16175_v56 }
 0x1ba   : > { %4415 = vperm.xlu0 %7006, %v4376_v58   ;;  %v713_v58 = vpop.xlane.xlu1 %712  ;;  %vm4350_vm15 = vmand %vm4286_vm7, %vm4318_vm1  ;;  %vm4288_vm0 = vcmp.ge.s32.totalorder %v6656_v52, 0  ;;  %vm4320_vm9 = vcmp.lt.s32.totalorder %v6656_v52, 16  ;;  %16446 = vst [vmem:[#allocation67_spill] sm:$0xff] %v9648_v11  ;;  %v9656_v52 = vld [vmem:[%s15596_s1 + $0x60] sm:$0xff] }
 0x1bb   : > { %v745_v10 = vmul.f32 0.1, %v713_v58  ;;  %vm4352_vm4 = vmand %vm4288_vm0, %vm4320_vm9 }
 0x1bc   : > { %v9611_v24 = vpop.permute.xlu0 %2083 }
 0x1bd   : > { %16440 = vst [vmem:[#allocation22_spill] sm:$0xff] %v9611_v24  ;;  %2553 = vperm.xlu1 %7007, %v9608_v48   ;;  %v777_v22 = vadd.f32 1e-05, %v745_v10  ;;  %v7223_v10 = vld [vmem:[%s15596_s1 + $0x68] sm:$0xff] }
 0x1be   : > { %4421 = vperm.xlu0 %7006, %v4378_v35   ;;  %v2396_v35 = vadd.s32 1, %v9636_v57  ;;  %v9640_v58 = vpop.permute.xlu1 %1734  ;;  %v6658_v50 = vadd.s32 2, %v7223_v10 }
 0x1bf   : > { %16445 = vst [vmem:[#allocation66_spill] sm:$0xff] %v9640_v58  ;;  %7070 = vrsqrt.f32 %v777_v22  ;;  %v2398_v22 = vadd.s32 1, %v9656_v52  ;;  %v9672_v58 = vld [vmem:[%s15596_s1 + $0x70] sm:$0xff] }
 0x1c0   : > { %v9631_v13 = vpop.permute.xlu0 %2089  ;;  %vm2428_vm12 = vcmp.ge.s32.totalorder %v2396_v35, 0  ;;  %vm2460_vm6 = vcmp.lt.s32.totalorder %v2396_v35, 16  ;;  %vm4290_vm7 = vcmp.ge.s32.totalorder %v6658_v50, 0  ;;  %vm4322_vm1 = vcmp.lt.s32.totalorder %v6658_v50, 16 }
 0x1c1   : > { %16444 = vst [vmem:[#allocation65_spill] sm:$0xff] %v9631_v13  ;;  %2559 = vperm.xlu1 %7007, %v9624_v0   ;;  %v4382_v13 = vsel %vm4350_vm15, 1, %v16175_v56  ;;  %v9666_v35 = vsel %vm2490_vm3, 1, %v16175_v56  ;;  %vm2492_vm10 = vmand %vm2428_vm12, %vm2460_vm6  ;;  %vm2430_vm5 = vcmp.ge.s32.totalorder %v2398_v22, 0  ;;  %vm2462_vm14 = vcmp.lt.s32.totalorder %v2398_v22, 16 }
 0x1c2   : > { %4427 = vperm.xlu0 %7006, %v4380_v29   ;;  %v9660_v26 = vpop.permute.xlu1 %1737  ;;  %v7225_v29 = vld [vmem:[%s15596_s1 + $0x78] sm:$0xff]  ;;  %16449 = vst [vmem:[#allocation70_spill] sm:$0xff] %v9666_v35  ;;  %vm4354_vm15 = vmand %vm4290_vm7, %vm4322_vm1  ;;  %v9684_v39 = vsel %vm2492_vm10, 1, %v16175_v56 }
 0x1c3   : > { %16448 = vst [vmem:[#allocation69_spill] sm:$0xff] %v9660_v26  ;;  %v6660_v10 = vadd.s32 2, %v7225_v29  ;;  %v2400_v26 = vadd.s32 1, %v9672_v58  ;;  %vm9687_vm3 = vmand %vm2430_vm5, %vm2462_vm14 }
 0x1c4   : > { %v9651_v14 = vpop.permute.xlu0 %2095  ;;  %v9713_v48 = vsel %vm9687_vm3, 1, %v16175_v56 }
 0x1c5   : > { %16447 = vst [vmem:[#allocation68_spill] sm:$0xff] %v9651_v14  ;;  %2565 = vperm.xlu1 %7007, %v9648_v11   ;;  %v4384_v14 = vsel %vm4352_vm4, 1, %v16175_v56  ;;  %vm4292_vm0 = vcmp.ge.s32.totalorder %v6660_v10, 0  ;;  %vm4324_vm9 = vcmp.lt.s32.totalorder %v6660_v10, 16  ;;  %vm2432_vm4 = vcmp.ge.s32.totalorder %v2400_v26, 0 }
 0x1c6   : > { %4433 = vperm.xlu0 %7006, %v4382_v13   ;;  %v7227_v13 = vld [vmem:[%s15596_s1 + $0x88] sm:$0xff]  ;;  %v9681_v24 = vpop.permute.xlu1 %1740  ;;  %vm2464_vm12 = vcmp.lt.s32.totalorder %v2400_v26, 16  ;;  %vm9693_vm6 = vmand %vm4292_vm0, %vm4324_vm9 }
 0x1c7   : > { %v6662_v29 = vadd.s32 2, %v7227_v13  ;;  %16451 = vst [vmem:[#allocation72_spill] sm:$0xff] %v9681_v24  ;;  %v16457_v24 = vld [vmem:[#allocation42_spill] sm:$0xff]  ;;  %vm9717_vm10 = vmand %vm2432_vm4, %vm2464_vm12  ;;  %vm16463_vm12 = vcmp.lt.s32.totalorder %v8322_v37, 2 }
 0x1c8   : > { %v9675_v50 = vpop.permute.xlu0 %2101 }
 0x1c9   : > { %16450 = vst [vmem:[#allocation71_spill] sm:$0xff] %v9675_v50  ;;  %2571 = vperm.xlu1 %7007, %v9666_v35   ;;  %v4386_v50 = vsel %vm4354_vm15, 1, %v16175_v56  ;;  %v7071_v22 = vpop.eup %7070  ;;  %vm4294_vm7 = vcmp.ge.s32.totalorder %v6662_v29, 0  ;;  %vm4326_vm1 = vcmp.lt.s32.totalorder %v6662_v29, 16  ;;  %v9744_v29 = vsel %vm9717_vm10, 1, %v16175_v56 }
 0x1ca   : > { %4439 = vperm.xlu0 %7006, %v4384_v14   ;;  %v9700_v14 = vld [vmem:[%s15596_s1 + $0x80] sm:$0xff]  ;;  %v841_v0 = vmul.f32 %v7071_v22, %v16457_v24  ;;  %v9705_v44 = vpop.permute.xlu1 %1746  ;;  %v2404_v24 = vadd.s32 1, %v8994_v36  ;;  %vm4358_vm15 = vmand %vm4294_vm7, %vm4326_vm1  ;;  %v7231_v36 = vld [vmem:[%s15596_s1 + $0xa8] sm:$0xff] }
 0x1cb   : > { %v2402_v10 = vadd.s32 1, %v9700_v14  ;;  %16458 = vst [vmem:[#allocation42_spill] sm:$0xff] %v9705_v44  ;;  %v7230_v22 = vld [vmem:[%s15597_s2] ss:$0 sm:$0xff]  ;;  %v6666_v26 = vadd.s32 2, %v7231_v36 }
 0x1cc   : > { %v9691_v13 = vpop.permute.xlu0 %2107  ;;  %v880_v44 = vmul.f32 %v7230_v22, %v841_v0  ;;  %v7232_v0 = vld [vmem:[%s15598_s3] ss:$0 sm:$0xff]  ;;  %v4390_v22 = vsel %vm4358_vm15, 1, %v16175_v56  ;;  %vm2436_vm3 = vcmp.ge.s32.totalorder %v2404_v24, 0  ;;  %vm2468_vm4 = vcmp.lt.s32.totalorder %v2404_v24, 16 }
 0x1cd   : > { %16454 = vst [vmem:[#allocation73_spill] sm:$0xff] %v9691_v13  ;;  %2577 = vperm.xlu1 %7007, %v9684_v39   ;;  %v7229_v13 = vld [vmem:[%s15596_s1 + $0x98] sm:$0xff]  ;;  %vm2434_vm5 = vcmp.ge.s32.totalorder %v2402_v10, 0  ;;  %vm2466_vm14 = vcmp.lt.s32.totalorder %v2402_v10, 16  ;;  %vm4298_vm1 = vcmp.ge.s32.totalorder %v6666_v26, 0  ;;  %vm4330_vm10 = vcmp.lt.s32.totalorder %v6666_v26, 16 }
 0x1ce   : > { %v6664_v40 = vadd.s32 2, %v7229_v13  ;;  %4445 = vperm.xlu0 %7006, %v4386_v50   ;;  %v4388_v50 = vsel %vm9693_vm6, 1, %v16175_v56  ;;  %v9736_v13 = vpop.permute.xlu1 %1752  ;;  %v919_v35 = vadd.f32 %v7232_v0, %v880_v44  ;;  %vm9751_vm6 = vmand %vm2434_vm5, %vm2466_vm14  ;;  %v2406_v44 = vadd.s32 1, %v9182_v12 }
 0x1cf   : > { %16462 = vst [vmem:[#allocation75_spill] sm:$0xff] %v9736_v13  ;;  %vm4362_vm15 = vmand %vm4298_vm1, %vm4330_vm10  ;;  %v16474_v26 = vsel %vm8710_vm11, %v9197_v25, %v9531_v60  ;;  %vm4302_vm10 = vcmp.ge.s32.totalorder %v6670_v53, 0  ;;  %v2412_v60 = vadd.s32 1, %v9451_v2  ;;  %v6674_v25 = vadd.s32 2, %v9431_v42 }
 0x1d0   : > { %v9730_v11 = vpop.permute.xlu0 %2113  ;;  %vm4296_vm0 = vcmp.ge.s32.totalorder %v6664_v40, 0  ;;  %vm4328_vm9 = vcmp.lt.s32.totalorder %v6664_v40, 16  ;;  %v952_v36 = vsel %vm16463_vm12, %v919_v35, 0.0  ;;  %v985_v40 = vsel %vm8667_vm2, %v919_v35, 0.0 }
 0x1d1   : > { %16461 = vst [vmem:[#allocation74_spill] sm:$0xff] %v9730_v11  ;;  %2583 = vperm.xlu1 %7007, %v9713_v48   ;;  %v1020_v28 = vsel %vm8684_vm13, %v919_v35, 0.0  ;;  %v983_v0 = vsel %vm8667_vm2, %v9262_v55, %v952_v36  ;;  %vm4360_vm7 = vmand %vm4296_vm0, %vm4328_vm9  ;;  %v1018_v5 = vsel %vm8684_vm13, %v9262_v55, %v985_v40  ;;  %vm2438_vm5 = vcmp.ge.s32.totalorder %v2406_v44, 0 }
 0x1d2   : > { %4451 = vperm.xlu0 %7006, %v4388_v50   ;;  %v1055_v10 = vsel %vm8699_vm8, %v9262_v55, %v1020_v28  ;;  %v9769_v37 = vpop.permute.xlu1 %1758  ;;  %v1016_v35 = vsel %vm8684_vm13, %v9225_v4, %v983_v0  ;;  %v7233_v28 = vld [vmem:[%s15596_s1 + $0xb8] sm:$0xff]  ;;  %v9789_v0 = vsel %vm9751_vm6, 1, %v16175_v56  ;;  %v4392_v55 = vsel %vm4360_vm7, 1, %v16175_v56  ;;  %vm2500_vm2 = vmand %vm2436_vm3, %vm2468_vm4 }
 0x1d3   : > { %16467 = vst [vmem:[#allocation77_spill] sm:$0xff] %v9769_v37  ;;  %v1090_v36 = vsel %vm8710_vm11, %v9225_v4, %v1055_v10  ;;  %v1051_v37 = vsel %vm8699_vm8, %v9133_v30, %v1016_v35  ;;  %vm16468_vm13 = vcmask 80896   ;;  %vm2470_vm14 = vcmp.lt.s32.totalorder %v2406_v44, 16 }
 0x1d4   : > { %v9760_v50 = vpop.permute.xlu0 %2119  ;;  %v1086_v32 = vsel %vm8710_vm11, %v9100_v62, %v1051_v37  ;;  %v2408_v11 = vadd.s32 1, %v9242_v47  ;;  %vm16471_vm0 = vmmov %vm16468_vm13  ;;  %v9813_v62 = vsel %vm2500_vm2, 1, %v16175_v56  ;;  %v4394_v24 = vsel %vm4362_vm15, 1, %v16175_v56 }
 0x1d5   : > { %16466 = vst [vmem:[#allocation76_spill] sm:$0xff] %v9760_v50  ;;  %2589 = vperm.xlu1 %7007, %v9744_v29   ;;  %v6668_v50 = vadd.s32 2, %v7233_v28  ;;  %6924 = vmatmul.mubr.msk.f32.gmra.mrb[26].mxu0 %vm16468_vm13, %v1086_v32  ;;  %vm16472_vm4 = vmmov %vm16471_vm0  ;;  %vm4334_vm2 = vcmp.lt.s32.totalorder %v6670_v53, 16  ;;  %v6676_v42 = vadd.s32 2, %v9458_v17 }
 0x1d6   : > { %4457 = vperm.xlu0 %7006, %v4390_v22   ;;  %v1053_v22 = vsel %vm8699_vm8, %v9225_v4, %v1018_v5  ;;  %v9807_v37 = vpop.permute.xlu1 %1764  ;;  %6926 = vmatprep.mubr.msk.f32.mxu0 %vm16471_vm0, %v9507_v8  ;;  %vm2502_vm8 = vmand %vm2438_vm5, %vm2470_vm14  ;;  %vm2440_vm6 = vcmp.ge.s32.totalorder %v2408_v11, 0  ;;  %vm2472_vm7 = vcmp.lt.s32.totalorder %v2408_v11, 16  ;;  %v2410_v8 = vadd.s32 1, %v9419_v31 }
 0x1d7   : > { %16470 = vst [vmem:[#allocation79_spill] sm:$0xff] %v9807_v37  ;;  %vm4300_vm9 = vcmp.ge.s32.totalorder %v6668_v50, 0  ;;  %vm4332_vm3 = vcmp.lt.s32.totalorder %v6668_v50, 16  ;;  %v1088_v4 = vsel %vm8710_vm11, %v9133_v30, %v1053_v22  ;;  %vm16475_vm1 = vmmov %vm16471_vm0  ;;  %v6672_v30 = vadd.s32 2, %v9375_v19  ;;  %v16535_v37 = vld [vmem:[#allocation23_spill] sm:$0xff] }
 0x1d8   : > { %v9804_v40 = vpop.permute.xlu0 %2125  ;;  %vm4364_vm12 = vmand %vm4300_vm9, %vm4332_vm3  ;;  %v9832_v44 = vsel %vm2502_vm8, 1, %v16175_v56  ;;  %vm2442_vm14 = vcmp.ge.s32.totalorder %v2410_v8, 0  ;;  %vm2474_vm11 = vcmp.lt.s32.totalorder %v2410_v8, 16  ;;  %v2414_v5 = vadd.s32 1, %v9473_v18 }
 0x1d9   : > { %16469 = vst [vmem:[#allocation78_spill] sm:$0xff] %v9804_v40  ;;  %2595 = vperm.xlu1 %7007, %v9789_v0   ;;  %6927 = vmatmul.mubr.msk.f32.gmra.mrb[28].mxu0 %vm16472_vm4, %v1088_v4  ;;  %v4396_v10 = vsel %vm4364_vm12, 1, %v16175_v56  ;;  %vm2504_vm13 = vmand %vm2440_vm6, %vm2472_vm7  ;;  %vm4336_vm9 = vcmp.lt.s32.totalorder %v6672_v30, 16  ;;  %vm2444_vm4 = vcmp.ge.s32.totalorder %v2412_v60, 0  ;;  %vm2476_vm12 = vcmp.lt.s32.totalorder %v2412_v60, 16  ;;  %v16534_v40 = vld [vmem:[#allocation20_spill] sm:$0xff] }
 0x1da   : > { %4463 = vperm.xlu0 %7006, %v4392_v55   ;;  %v9822_v33 = vpop.permute.xlu1 %1770  ;;  %6929 = vmatprep.mubr.msk.f32.mxu0 %vm16475_vm1, %v16474_v26  ;;  %vm16477_vm15 = vmmov %vm16471_vm0  ;;  %vm4304_vm0 = vcmp.ge.s32.totalorder %v6672_v30, 0  ;;  %v9844_v19 = vsel %vm2504_vm13, 1, %v16175_v56  ;;  %vm4306_vm6 = vcmp.ge.s32.totalorder %v6674_v25, 0  ;;  %vm4338_vm7 = vcmp.lt.s32.totalorder %v6674_v25, 16 }
 0x1db   : > { %16473 = vst [vmem:[#allocation80_spill] sm:$0xff] %v9822_v33  ;;  %vm4366_vm5 = vmand %vm4302_vm10, %vm4334_vm2  ;;  %vm2446_vm2 = vcmp.ge.s32.totalorder %v2414_v5, 0  ;;  %vm2478_vm13 = vcmp.lt.s32.totalorder %v2414_v5, 16  ;;  %v2416_v22 = vadd.s32 1, %v9518_v41  ;;  %v6649_v5 = vadd.s32 2, %v9580_v20 }
 0x1dc   : > { %v9834_v50 = vpop.permute.xlu0 %2131  ;;  %v4398_v35 = vsel %vm4366_vm5, 1, %v16175_v56  ;;  %vm2506_vm3 = vmand %vm2442_vm14, %vm2474_vm11  ;;  %vm4340_vm5 = vcmp.lt.s32.totalorder %v6676_v42, 16 }
 0x1dd   : > { %2601 = vperm.xlu1 %7007, %v9813_v62   ;;  %16476 = vst [vmem:[#allocation81_spill] sm:$0xff] %v9834_v50  ;;  %6930 = vmatmul.mubr.msk.f32.gmra.mrb[30].mxu0 %vm16477_vm15, %v1090_v36  ;;  %vm4368_vm8 = vmand %vm4304_vm0, %vm4336_vm9  ;;  %v9855_v32 = vsel %vm2506_vm3, 1, %v16175_v56  ;;  %vm4308_vm15 = vcmp.ge.s32.totalorder %v6676_v42, 0  ;;  %vm2448_vm0 = vcmp.ge.s32.totalorder %v2416_v22, 0  ;;  %vm2480_vm9 = vcmp.lt.s32.totalorder %v2416_v22, 16 }
 0x1de   : > { %4469 = vperm.xlu0 %7006, %v4394_v24   ;;  %v9840_v9 = vpop.permute.xlu1 %1776  ;;  %v4400_v55 = vsel %vm4368_vm8, 1, %v16175_v56  ;;  %vm2508_vm1 = vmand %vm2444_vm4, %vm2476_vm12  ;;  %v6645_v24 = vadd.s32 2, %v9525_v43  ;;  %v6651_v22 = vadd.s32 2, %v9598_v27 }
 0x1df   : > { %16478 = vst [vmem:[#allocation82_spill] sm:$0xff] %v9840_v9  ;;  %vm4370_vm10 = vmand %vm4306_vm6, %vm4338_vm7  ;;  %v9863_v17 = vsel %vm2508_vm1, 1, %v16175_v56 }
 0x1e0   : > { %v9848_v36 = vpop.permute.xlu0 %2137  ;;  %16482 = vst [vmem:[#allocation86_spill] sm:$0xff] %v9863_v17  ;;  %v4402_v4 = vsel %vm4370_vm10, 1, %v16175_v56  ;;  %vm2510_vm14 = vmand %vm2446_vm2, %vm2478_vm13  ;;  %vm4277_vm8 = vcmp.ge.s32.totalorder %v6645_v24, 0  ;;  %vm4309_vm4 = vcmp.lt.s32.totalorder %v6645_v24, 16  ;;  %vm4281_vm10 = vcmp.ge.s32.totalorder %v6649_v5, 0 }
 0x1e1   : > { %2607 = vperm.xlu1 %7007, %v9832_v44   ;;  %16479 = vst [vmem:[#allocation83_spill] sm:$0xff] %v9848_v36  ;;  %vm4372_vm11 = vmand %vm4308_vm15, %vm4340_vm5  ;;  %v9873_v26 = vsel %vm2510_vm14, 1, %v16175_v56  ;;  %vm4313_vm2 = vcmp.lt.s32.totalorder %v6649_v5, 16  ;;  %vm4283_vm15 = vcmp.ge.s32.totalorder %v6651_v22, 0  ;;  %vm4315_vm5 = vcmp.lt.s32.totalorder %v6651_v22, 16  ;;  %v16522_v36 = vld [vmem:[#allocation30_spill] sm:$0xff] }
 0x1e2   : > { %4475 = vperm.xlu0 %7006, %v4396_v10   ;;  %v9851_v28 = vpop.permute.xlu1 %1782  ;;  %16485 = vst [vmem:[#allocation89_spill] sm:$0xff] %v9873_v26  ;;  %v4404_v30 = vsel %vm4372_vm11, 1, %v16175_v56  ;;  %vm2512_vm3 = vmand %vm2448_vm0, %vm2480_vm9  ;;  %v6647_v10 = vadd.s32 2, %v9561_v59  ;;  %v6742_v5 = vadd.s32 4294967294, %v9483_v45 }
 0x1e3   : > { %16480 = vst [vmem:[#allocation84_spill] sm:$0xff] %v9851_v28  ;;  %vm4341_vm12 = vmand %vm4277_vm8, %vm4309_vm4 }
 0x1e4   : > { %v9865_v53 = vpop.permute.xlu0 %2143  ;;  %vm4279_vm6 = vcmp.ge.s32.totalorder %v6647_v10, 0  ;;  %vm4311_vm7 = vcmp.lt.s32.totalorder %v6647_v10, 16  ;;  %v4373_v59 = vsel %vm4341_vm12, 1, %v16175_v56  ;;  %vm4345_vm13 = vmand %vm4281_vm10, %vm4313_vm2  ;;  %vm5728_vm4 = vcmp.ge.s32.totalorder %v6742_v5, 0 }
 0x1e5   : > { %2613 = vperm.xlu1 %7007, %v9844_v19   ;;  %16483 = vst [vmem:[#allocation87_spill] sm:$0xff] %v9865_v53  ;;  %vm4343_vm1 = vmand %vm4279_vm6, %vm4311_vm7  ;;  %v4377_v27 = vsel %vm4345_vm13, 1, %v16175_v56  ;;  %vm5760_vm12 = vcmp.lt.s32.totalorder %v6742_v5, 16 }
 0x1e6   : > { %4481 = vperm.xlu0 %7006, %v4398_v35   ;;  %v9860_v11 = vpop.permute.xlu1 %1788  ;;  %v9883_v35 = vsel %vm2512_vm3, 1, %v16175_v56  ;;  %v4375_v20 = vsel %vm4343_vm1, 1, %v16175_v56  ;;  %vm4347_vm14 = vmand %vm4283_vm15, %vm4315_vm5 }
 0x1e7   : > { %16481 = vst [vmem:[#allocation85_spill] sm:$0xff] %v9860_v11  ;;  %16488 = vst [vmem:[#allocation92_spill] sm:$0xff] %v9883_v35 }
 0x1e8   : > { %v9877_v60 = vpop.permute.xlu0 %2149  ;;  %vm5792_vm7 = vmand %vm5728_vm4, %vm5760_vm12 }
 0x1e9   : > { %2619 = vperm.xlu1 %7007, %v9855_v32   ;;  %16486 = vst [vmem:[#allocation90_spill] sm:$0xff] %v9877_v60 }
 0x1ea   : > { %4487 = vperm.xlu0 %7006, %v4400_v55   ;;  %v9870_v8 = vpop.permute.xlu1 %1794 }
 0x1eb   : > { %16484 = vst [vmem:[#allocation88_spill] sm:$0xff] %v9870_v8 }
 0x1ec   : > { %v9891_v55 = vpop.permute.xlu0 %2155 }
 0x1ed   : > { %2625 = vperm.xlu1 %7007, %v9863_v17   ;;  %16490 = vst [vmem:[#allocation94_spill] sm:$0xff] %v9891_v55 }
 0x1ee   : > { %4493 = vperm.xlu0 %7006, %v4402_v4   ;;  %v9880_v25 = vpop.permute.xlu1 %1800 }
 0x1ef   : > { %16487 = vst [vmem:[#allocation91_spill] sm:$0xff] %v9880_v25 }
 0x1f0   : > { %v9899_v24 = vpop.permute.xlu0 %2161 }
 0x1f1   : > { %2631 = vperm.xlu1 %7007, %v9873_v26   ;;  %16492 = vst [vmem:[#allocation96_spill] sm:$0xff] %v9899_v24  ;;  %v6675_v24 = vadd.s32 2, %v9518_v41 }
 0x1f2   : > { %4499 = vperm.xlu0 %7006, %v4404_v30   ;;  %v9887_v42 = vpop.permute.xlu1 %1806 }
 0x1f3   : > { %16489 = vst [vmem:[#allocation93_spill] sm:$0xff] %v9887_v42 }
 0x1f5   : > { %2637 = vperm.xlu1 %7007, %v9883_v35  }
 0x1f6   : > { %4891 = vperm.xlu0 %7006, %v8412_v34   ;;  %v9894_v4 = vpop.permute.xlu1 %2068  ;;  %v6653_v34 = vadd.s32 2, %v9616_v21  ;;  %v4379_v21 = vsel %vm4347_vm14, 1, %v16175_v56 }
 0x1f7   : > { %16491 = vst [vmem:[#allocation95_spill] sm:$0xff] %v9894_v4 }
 0x1f8   : > { %vm4285_vm11 = vcmp.ge.s32.totalorder %v6653_v34, 0  ;;  %vm4317_vm0 = vcmp.lt.s32.totalorder %v6653_v34, 16  ;;  %v16497_v34 = vld [vmem:[#allocation24_spill] sm:$0xff] }
 0x1f9   : > { %4406 = vperm.xlu1 %7007, %v4373_v59   ;;  %v9911_v59 = vpop.permute.xlu0 %2550  ;;  %vm4349_vm9 = vmand %vm4285_vm11, %vm4317_vm0 }
 0x1fa   : > { %4897 = vperm.xlu0 %7006, %v8420_v46   ;;  %v9901_v30 = vpop.permute.xlu1 %2074  ;;  %v6655_v46 = vadd.s32 2, %v9636_v57  ;;  %v4381_v45 = vsel %vm4349_vm9, 1, %v16175_v56 }
 0x1fb   : > { %16493 = vst [vmem:[#allocation97_spill] sm:$0xff] %v9901_v30 }
 0x1fc   : > { %vm4287_vm3 = vcmp.ge.s32.totalorder %v6655_v46, 0  ;;  %vm4319_vm8 = vcmp.lt.s32.totalorder %v6655_v46, 16  ;;  %v6661_v46 = vadd.s32 2, %v9700_v14 }
 0x1fd   : > { %4412 = vperm.xlu1 %7007, %v4375_v20   ;;  %vm4351_vm6 = vmand %vm4287_vm3, %vm4319_vm8  ;;  %v9919_v57 = vpop.permute.xlu0 %2556 }
 0x1fe   : > { %4903 = vperm.xlu0 %7006, %v8436_v7   ;;  %v9906_v10 = vpop.permute.xlu1 %2080  ;;  %v6657_v7 = vadd.s32 2, %v9656_v52  ;;  %v6744_v52 = vadd.s32 4294967294, %v9538_v51  ;;  %vm4293_vm9 = vcmp.ge.s32.totalorder %v6661_v46, 0  ;;  %vm4325_vm3 = vcmp.lt.s32.totalorder %v6661_v46, 16 }
 0x1ff   : > { %16494 = vst [vmem:[#allocation98_spill] sm:$0xff] %v9906_v10  ;;  %vm4357_vm8 = vmand %vm4293_vm9, %vm4325_vm3 }
 0x200   : > { %vm4289_vm1 = vcmp.ge.s32.totalorder %v6657_v7, 0  ;;  %vm4321_vm10 = vcmp.lt.s32.totalorder %v6657_v7, 16  ;;  %vm5730_vm5 = vcmp.ge.s32.totalorder %v6744_v52, 0  ;;  %vm5762_vm14 = vcmp.lt.s32.totalorder %v6744_v52, 16 }
 0x201   : > { %4418 = vperm.xlu1 %7007, %v4377_v27   ;;  %v4383_v27 = vsel %vm4351_vm6, 1, %v16175_v56  ;;  %vm4353_vm2 = vmand %vm4289_vm1, %vm4321_vm10  ;;  %v9931_v51 = vpop.permute.xlu0 %2562 }
 0x202   : > { %4909 = vperm.xlu0 %7006, %v8501_v23   ;;  %v9914_v22 = vpop.permute.xlu1 %2086  ;;  %v6659_v23 = vadd.s32 2, %v9672_v58  ;;  %v4385_v5 = vsel %vm4353_vm2, 1, %v16175_v56  ;;  %vm5794_vm0 = vmand %vm5730_vm5, %vm5762_vm14 }
 0x203   : > { %16495 = vst [vmem:[#allocation99_spill] sm:$0xff] %v9914_v22 }
 0x204   : > { %vm4291_vm13 = vcmp.ge.s32.totalorder %v6659_v23, 0  ;;  %vm4323_vm15 = vcmp.lt.s32.totalorder %v6659_v23, 16  ;;  %v16500_v23 = vld [vmem:[#allocation27_spill] sm:$0xff] }
 0x205   : > { %4424 = vperm.xlu1 %7007, %v4379_v21   ;;  %vm4355_vm11 = vmand %vm4291_vm13, %vm4323_vm15  ;;  %v7234_v21 = vld [vmem:[%s15596_s1 + $0x90] sm:$0xff] }
 0x206   : > { %4915 = vperm.xlu0 %7006, %v8538_v63   ;;  %v9921_v20 = vpop.permute.xlu1 %2092  ;;  %v5824_v63 = vsel %vm5792_vm7, 1, %v16175_v56  ;;  %v6663_v7 = vadd.s32 2, %v7234_v21  ;;  %v4387_v52 = vsel %vm4355_vm11, 1, %v16175_v56 }
 0x207   : > { %16496 = vst [vmem:[#allocation100_spill] sm:$0xff] %v9921_v20 }
 0x208   : > { %vm4295_vm4 = vcmp.ge.s32.totalorder %v6663_v7, 0  ;;  %vm4327_vm12 = vcmp.lt.s32.totalorder %v6663_v7, 16  ;;  %v16503_v7 = vld [vmem:[#allocation31_spill] sm:$0xff] }
 0x209   : > { %4430 = vperm.xlu1 %7007, %v4381_v45   ;;  %v6746_v45 = vadd.s32 4294967294, %v9567_v3  ;;  %v4389_v3 = vsel %vm4357_vm8, 1, %v16175_v56  ;;  %vm4359_vm1 = vmand %vm4295_vm4, %vm4327_vm12 }
 0x20a   : > { %5408 = vperm.xlu0 %7006, %v16497_v34   ;;  %v9928_v58 = vpop.permute.xlu1 %2098  ;;  %v5826_v34 = vsel %vm5794_vm0, 1, %v16175_v56 }
 0x20b   : > { %16498 = vst [vmem:[#allocation24_spill] sm:$0xff] %v9928_v58  ;;  %vm5732_vm6 = vcmp.ge.s32.totalorder %v6746_v45, 0  ;;  %vm5764_vm7 = vcmp.lt.s32.totalorder %v6746_v45, 16 }
 0x20c   : > { %vm5796_vm10 = vmand %vm5732_vm6, %vm5764_vm7 }
 0x20d   : > { %4436 = vperm.xlu1 %7007, %v4383_v27   ;;  %v6665_v27 = vadd.s32 2, %v9182_v12  ;;  %v6748_v12 = vadd.s32 4294967294, %v9586_v16  ;;  %v5828_v45 = vsel %vm5796_vm10, 1, %v16175_v56 }
 0x20e   : > { %5859 = vperm.xlu0 %7006, %v5824_v63   ;;  %v9936_v14 = vpop.permute.xlu1 %2104  ;;  %v9943_v63 = vpop.permute.xlu0 %2568 }
 0x20f   : > { %16499 = vst [vmem:[#allocation101_spill] sm:$0xff] %v9936_v14  ;;  %vm4297_vm2 = vcmp.ge.s32.totalorder %v6665_v27, 0  ;;  %vm4329_vm13 = vcmp.lt.s32.totalorder %v6665_v27, 16  ;;  %vm5734_vm11 = vcmp.ge.s32.totalorder %v6748_v12, 0  ;;  %vm5766_vm0 = vcmp.lt.s32.totalorder %v6748_v12, 16  ;;  %v16536_v14 = vld [vmem:[#allocation32_spill] sm:$0xff] }
 0x210   : > { %vm4361_vm15 = vmand %vm4297_vm2, %vm4329_vm13  ;;  %v6671_v27 = vadd.s32 2, %v9451_v2 }
 0x211   : > { %4442 = vperm.xlu1 %7007, %v4385_v5   ;;  %v6667_v5 = vadd.s32 2, %v9242_v47  ;;  %v4393_v16 = vsel %vm4361_vm15, 1, %v16175_v56  ;;  %vm5798_vm3 = vmand %vm5734_vm11, %vm5766_vm0  ;;  %vm4307_vm15 = vcmp.ge.s32.totalorder %v6675_v24, 0  ;;  %vm1812_vm11 = vcmp.eq.s32.totalorder %v9423_v54, 1 }
 0x212   : > { %5414 = vperm.xlu0 %7006, %v16500_v23   ;;  %v9945_v46 = vpop.permute.xlu1 %2110  ;;  %v4391_v23 = vsel %vm4359_vm1, 1, %v16175_v56  ;;  %v5830_v12 = vsel %vm5798_vm3, 1, %v16175_v56  ;;  %vm4303_vm6 = vcmp.ge.s32.totalorder %v6671_v27, 0  ;;  %vm4335_vm7 = vcmp.lt.s32.totalorder %v6671_v27, 16  ;;  %v1425_v27 = vld [vmem:[%s15601_s6] sm:$0xff] }
 0x213   : > { %16501 = vst [vmem:[#allocation27_spill] sm:$0xff] %v9945_v46  ;;  %vm4299_vm5 = vcmp.ge.s32.totalorder %v6667_v5, 0  ;;  %vm4331_vm14 = vcmp.lt.s32.totalorder %v6667_v5, 16  ;;  %vm4367_vm1 = vmand %vm4303_vm6, %vm4335_vm7  ;;  %vm1813_vm0 = vcmp.eq.s32.totalorder %v9463_v38, 1  ;;  %vm1814_vm3 = vcmp.eq.s32.totalorder %v9533_v61, 1 }
 0x214   : > { %vm4363_vm9 = vmand %vm4299_vm5, %vm4331_vm14  ;;  %vm4339_vm5 = vcmp.lt.s32.totalorder %v6675_v24, 16  ;;  %v10000_v24 = vld [vmem:[%s15602_s7] ss:$0 sm:$0xff]  ;;  %vm15990_vm6 = vcmask 1046528   ;;  %vm2643_vm7 = vcmp.eq.s32.totalorder %v9911_v59, 1 }
 0x215   : > { %4448 = vperm.xlu1 %7007, %v4387_v52   ;;  %v9954_v52 = vpop.permute.xlu0 %2574  ;;  %vm4371_vm14 = vmand %vm4307_vm15, %vm4339_vm5  ;;  %vm1816_vm5 = vcmp.eq.s32.totalorder %v16534_v40, 1 }
 0x216   : > { %5865 = vperm.xlu0 %7006, %v5826_v34   ;;  %v9949_v21 = vpop.permute.xlu1 %2116  ;;  %16504 = vst [vmem:[#allocation31_spill] sm:$0xff] %v9954_v52  ;;  %v6669_v34 = vadd.s32 2, %v9419_v31  ;;  %v16508_v31 = vld [vmem:[#allocation45_spill] sm:$0xff] }
 0x217   : > { %16502 = vst [vmem:[#allocation102_spill] sm:$0xff] %v9949_v21 }
 0x218   : > { %vm4301_vm8 = vcmp.ge.s32.totalorder %v6669_v34, 0  ;;  %vm4333_vm4 = vcmp.lt.s32.totalorder %v6669_v34, 16  ;;  %v6673_v34 = vadd.s32 2, %v9473_v18 }
 0x219   : > { %4454 = vperm.xlu1 %7007, %v4389_v3   ;;  %v9962_v3 = vpop.permute.xlu0 %2580  ;;  %vm4365_vm12 = vmand %vm4301_vm8, %vm4333_vm4  ;;  %vm15750_vm8 = vcmp.eq.s32.totalorder %v9575_v15, 1 }
 0x21a   : > { %5420 = vperm.xlu0 %7006, %v16503_v7   ;;  %v9958_v47 = vpop.permute.xlu1 %2122  ;;  %16506 = vst [vmem:[#allocation104_spill] sm:$0xff] %v9962_v3  ;;  %v4395_v7 = vsel %vm4363_vm9, 1, %v16175_v56  ;;  %vm4305_vm10 = vcmp.ge.s32.totalorder %v6673_v34, 0  ;;  %vm4337_vm2 = vcmp.lt.s32.totalorder %v6673_v34, 16  ;;  %vm1811_vm9 = vcmp.eq.s32.totalorder %v8989_v6, 1  ;;  %v16538_v3 = vld [vmem:[#allocation67_spill] sm:$0xff] }
 0x21b   : > { %16505 = vst [vmem:[#allocation103_spill] sm:$0xff] %v9958_v47  ;;  %vm4369_vm13 = vmand %vm4305_vm10, %vm4337_vm2  ;;  %vm15769_vm10 = vcmp.eq.s32.totalorder %v9901_v30, 1 }
 0x21d   : > { %4460 = vperm.xlu1 %7007, %v4391_v23   ;;  %v16509_v23 = vlaneseq  ;;  %v9974_v42 = vpop.permute.xlu0 %2586 }
 0x21e   : > { %5871 = vperm.xlu0 %7006, %v5828_v45   ;;  %16511 = vst [vmem:[#allocation106_spill] sm:$0xff] %v9974_v42 }
 0x21f   : > { %v1874_v45 = vshrl.u32 %v16509_v23, 7 }
 0x220   : > { %v9964_v5 = vpop.permute.xlu1 %2128 }
 0x221   : > { %4466 = vperm.xlu1 %7007, %v4393_v16   ;;  %16507 = vst [vmem:[#allocation105_spill] sm:$0xff] %v9964_v5  ;;  %v4397_v16 = vsel %vm4365_vm12, 1, %v16175_v56  ;;  %v2227_v55 = vsub.s32 1, %v1874_v45  ;;  %v9986_v34 = vpop.permute.xlu0 %2592  ;;  %v2914_v8 = vsub.s32 4, %v1874_v45  ;;  %v3120_v11 = vsub.s32 6, %v1874_v45 }
 0x222   : > { %5426 = vperm.xlu0 %7006, %v16508_v31   ;;  %v1875_v31 = vsub.s32 0, %v1874_v45  ;;  %16515 = vst [vmem:[#allocation108_spill] sm:$0xff] %v9986_v34  ;;  %v3218_v53 = vsub.s32 7, %v1874_v45  ;;  %vm15875_vm12 = vcmask 1040384  }
 0x223   : > { %v9992_v25 = vrot.slane %v1425_v27, %v2227_v55  ;;  %v10020_v28 = vrot.slane %v1425_v27, %v2914_v8 }
 0x224   : > { %v9971_v2 = vpop.permute.xlu1 %2134  ;;  %v9984_v23 = vrot.slane %v1425_v27, %v1875_v31 }
 0x225   : > { %4472 = vperm.xlu1 %7007, %v4395_v7   ;;  %16510 = vst [vmem:[#allocation45_spill] sm:$0xff] %v9971_v2  ;;  %v16513_v7 = vld [vmem:[#allocation28_spill] sm:$0xff]  ;;  %16517 = vst [vmem:[#allocation110_spill] sm:$0xff] %v9992_v25 }
 0x226   : > { %5877 = vperm.xlu0 %7006, %v5830_v12   ;;  %v4399_v12 = vsel %vm4367_vm1, 1, %v16175_v56  ;;  %16514 = vst [vmem:[#allocation28_spill] sm:$0xff] %v9984_v23  ;;  %v1877_v60 = vmul.f32 0.0, %v9984_v23  ;;  %16524 = vst [vmem:[#allocation115_spill] sm:$0xff] %v10020_v28  ;;  %vm15775_vm1 = vcmp.eq.s32.totalorder %v9894_v4, 1 }
 0x228   : > { %v9980_v18 = vpop.permute.xlu1 %2140 }
 0x229   : > { %4478 = vperm.xlu1 %7007, %v4397_v16   ;;  %16512 = vst [vmem:[#allocation107_spill] sm:$0xff] %v9980_v18  ;;  %v4401_v16 = vsel %vm4369_vm13, 1, %v16175_v56  ;;  %v1908_v18 = vadd.f32 %v10000_v24, %v1877_v60 }
 0x22a   : > { %5432 = vperm.xlu0 %7006, %v16513_v7   ;;  %v2707_v7 = vsub.s32 2, %v1874_v45 }
 0x22c   : > { %v9988_v41 = vpop.permute.xlu1 %2146  ;;  %v10006_v55 = vrot.slane %v1425_v27, %v2707_v7 }
 0x22d   : > { %4484 = vperm.xlu1 %7007, %v4399_v12   ;;  %16516 = vst [vmem:[#allocation109_spill] sm:$0xff] %v9988_v41  ;;  %v2814_v12 = vsub.s32 3, %v1874_v45  ;;  %v10004_v41 = vpop.permute.xlu0 %2598 }
 0x22e   : > { %4918 = vperm.xlu0 %7006, %v9684_v39   ;;  %v4403_v39 = vsel %vm4371_vm14, 1, %v16175_v56  ;;  %16519 = vst [vmem:[#allocation112_spill] sm:$0xff] %v10004_v41  ;;  %16520 = vst [vmem:[#allocation113_spill] sm:$0xff] %v10006_v55  ;;  %v2709_v5 = vmul.f32 0.0, %v10006_v55  ;;  %vm2645_vm14 = vcmp.eq.s32.totalorder %v9919_v57, 1 }
 0x22f   : > { %v10018_v7 = vrot.slane %v1425_v27, %v2814_v12 }
 0x230   : > { %v9995_v31 = vpop.permute.xlu1 %2152 }
 0x231   : > { %4490 = vperm.xlu1 %7007, %v4401_v16   ;;  %16518 = vst [vmem:[#allocation111_spill] sm:$0xff] %v9995_v31  ;;  %v2229_v16 = vmul.f32 0.0, %v9992_v25  ;;  %v3019_v31 = vsub.s32 5, %v1874_v45  ;;  %16523 = vst [vmem:[#allocation30_spill] sm:$0xff] %v10018_v7  ;;  %v10027_v45 = vrot.slane %v1425_v27, %v3120_v11  ;;  %v10042_v11 = vadd.s32 4294967294, %v9525_v43 }
 0x232   : > { %4921 = vperm.xlu0 %7006, %v8548_v1   ;;  %v10016_v1 = vld [vmem:[%s15600_s5] ss:$0 sm:$0xff] }
 0x233   : > { %v10022_v60 = vadd.f32 %v2229_v16, %v1908_v18  ;;  %v10025_v9 = vrot.slane %v1425_v27, %v3019_v31  ;;  %16526 = vst [vmem:[#allocation117_spill] sm:$0xff] %v10027_v45  ;;  %v16530_v16 = vld [vmem:[#allocation21_spill] sm:$0xff]  ;;  %vm5727_vm2 = vcmp.ge.s32.totalorder %v10042_v11, 0  ;;  %vm5759_vm15 = vcmp.lt.s32.totalorder %v10042_v11, 16 }
 0x234   : > { %v10010_v2 = vpop.permute.xlu1 %2158 }
 0x235   : > { %4496 = vperm.xlu1 %7007, %v4403_v39   ;;  %16521 = vst [vmem:[#allocation114_spill] sm:$0xff] %v10010_v2  ;;  %16525 = vst [vmem:[#allocation116_spill] sm:$0xff] %v10025_v9  ;;  %v10029_v39 = vrot.slane %v1425_v27, %v3218_v53  ;;  %v16529_v53 = vld [vmem:[#allocation19_spill] sm:$0xff]  ;;  %v16531_v27 = vld [vmem:[#allocation62_spill] sm:$0xff] }
 0x236   : > { %5438 = vperm.xlu0 %7006, %v16522_v36   ;;  %v10032_v36 = vpop.permute.xlu0 %2604  ;;  %vm15813_vm4 = vcmp.eq.s32.totalorder %v16529_v53, 1 }
 0x237   : > { %16527 = vst [vmem:[#allocation118_spill] sm:$0xff] %v10029_v39  ;;  %16528 = vst [vmem:[#allocation119_spill] sm:$0xff] %v10032_v36 }
 0x238   : > { %v10050_v31 = vpop.permute.xlu1 %2547 }
 0x239   : > { %v6886_v2 = vpop.f32.mrb[0].mxu0  ;;  %4888 = vperm.xlu1 %7007, %v9590_v49   ;;  %vm2642_vm13 = vcmp.eq.s32.totalorder %v10050_v31, 1 }
 0x23a   : > { %v10038_v8 = vadd.f32 %v6886_v2, %v10016_v1  ;;  %v1266_v18 = vpop.f32.mrb[1].mxu0  ;;  %4924 = vperm.xlu0 %7006, %v9713_v48   ;;  %v2741_v2 = vadd.f32 %v2709_v5, %v10022_v60  ;;  %v10062_v5 = vpop.permute.xlu0 %2610 }
 0x23b   : > { %v1267_v49 = vadd.f32 %v10016_v1, %v1266_v18  ;;  %16532 = vst [vmem:[#allocation21_spill] sm:$0xff] %v10062_v5 }
 0x23c   : > { %v2196_v43 = vsel %vm15813_vm4, %v10038_v8, 0.0  ;;  %v2294_v12 = vrot.slane %v10038_v8, 1  ;;  %v16533_v50 = vrot.slane %v10038_v8, 7 }
 0x23d   : > { %v1465_v48 = vrot.slane %v1267_v49, 7  ;;  %4894 = vperm.xlu1 %7007, %v16530_v16   ;;  %v2293_v18 = vrot.slane %v1267_v49, 1  ;;  %v2231_v16 = vmul.f32 %v9992_v25, %v2196_v43  ;;  %v2880_v41 = vsel %vm15775_vm1, %v1267_v49, 0.0 }
 0x23e   : > { %4927 = vperm.xlu0 %7006, %v16531_v27  }
 0x23f   : > { %v1467_v36 = vsel %vm15875_vm12, %v1465_v48, %v16533_v50  ;;  %v1554_v47 = vsel %vm15875_vm12, 0.0, %v1465_v48  ;;  %v2295_v43 = vsel %vm15990_vm6, %v2293_v18, %v2294_v12  ;;  %v2385_v46 = vsel %vm15990_vm6, 0.0, %v2293_v18 }
 0x240   : > { %v1843_v33 = vsel %vm1813_vm0, %v1554_v47, 0.0  ;;  %v1844_v27 = vsel %vm1814_vm3, %v1467_v36, 0.0  ;;  %v2780_v5 = vsel %vm1811_vm9, %v1554_v47, 0.0  ;;  %v2781_v48 = vsel %vm1812_vm11, %v1467_v36, 0.0 }
 0x241   : > { %v1879_v50 = vmul.f32 %v9984_v23, %v1844_v27  ;;  %v6889_v21 = vpop.f32.mrb[2].mxu0  ;;  %4900 = vperm.xlu1 %7007, %v16535_v37   ;;  %v1878_v34 = vmul.f32 %v9984_v23, %v1843_v33  ;;  %v2816_v47 = vmul.f32 %v10018_v7, %v2780_v5  ;;  %v2674_v13 = vsel %vm2643_vm7, %v2385_v46, 0.0 }
 0x242   : > { %v10089_v42 = vadd.f32 %v6889_v21, %v10016_v1  ;;  %v1276_v27 = vpop.f32.mrb[3].mxu0  ;;  %5444 = vperm.xlu0 %7006, %v16536_v14   ;;  %v2985_v37 = vsel %vm2642_vm13, %v2295_v43, 0.0  ;;  %v2881_v18 = vsel %vm15750_vm8, %v10038_v8, 0.0  ;;  %v2916_v21 = vmul.f32 %v10020_v28, %v2880_v41  ;;  %vm10126_vm8 = vmand %vm5727_vm2, %vm5759_vm15 }
 0x243   : > { %v1910_v36 = vadd.f32 %v10000_v24, %v1879_v50  ;;  %v10098_v33 = vadd.f32 %v10016_v1, %v1276_v27  ;;  %v2710_v5 = vmul.f32 %v10006_v55, %v2674_v13  ;;  %v2848_v14 = vadd.f32 %v2816_v47, %v2741_v2  ;;  %v10106_v50 = vpop.permute.xlu0 %2616  ;;  %v10115_v2 = vpop.permute.xlu1 %2553 }
 0x244   : > { %16537 = vst [vmem:[#allocation62_spill] sm:$0xff] %v10106_v50  ;;  %v2195_v46 = vsel %vm15769_vm10, %v1267_v49, 0.0  ;;  %v15752_v27 = vrot.slane %v10089_v42, 7  ;;  %v2817_v58 = vmul.f32 %v10018_v7, %v2781_v48  ;;  %v3021_v13 = vmul.f32 %v10025_v9, %v2985_v37 }
 0x245   : > { %v2262_v35 = vadd.f32 %v2231_v16, %v1910_v36  ;;  %4906 = vperm.xlu1 %7007, %v16538_v3   ;;  %v2742_v26 = vadd.f32 %v2710_v5, %v10022_v60  ;;  %v2948_v41 = vadd.f32 %v2916_v21, %v2848_v14  ;;  %v2917_v47 = vmul.f32 %v10020_v28, %v2881_v18 }
 0x246   : > { %4930 = vperm.xlu0 %7006, %v9744_v29   ;;  %v1468_v49 = vrot.slane %v10098_v33, 7  ;;  %v1909_v16 = vadd.f32 %v10000_v24, %v1878_v34  ;;  %v2296_v36 = vrot.slane %v10098_v33, 1  ;;  %v2230_v60 = vmul.f32 %v9992_v25, %v2195_v46  ;;  %v16542_v46 = vld [vmem:[#allocation70_spill] sm:$0xff] }
 0x247   : > { %v2849_v48 = vadd.f32 %v2817_v58, %v2742_v26  ;;  %v3053_v29 = vadd.f32 %v3021_v13, %v2948_v41  ;;  %v15751_v37 = vrot.slane %v10089_v42, 1  ;;  %v16541_v21 = vrot.slane %v10038_v8, 7  ;;  %v16543_v13 = vld [vmem:[#allocation63_spill] sm:$0xff] }
 0x248   : > { %v6892_v18 = vpop.f32.mrb[4].mxu0  ;;  %v1471_v34 = vsel %vm15875_vm12, %v1468_v49, %v15752_v27  ;;  %v2297_v11 = vsel %vm15990_vm6, %v2294_v12, %v2296_v36  ;;  %vm2644_vm2 = vcmp.eq.s32.totalorder %v10115_v2, 1  ;;  %v5823_v8 = vsel %vm10126_vm8, 1, %v16175_v56  ;;  %v16570_v2 = vld [vmem:[#allocation69_spill] sm:$0xff] }
 0x249   : > { %v10138_v5 = vsel %vm15875_vm12, %v16541_v21, %v1468_v49  ;;  %v1286_v14 = vpop.f32.mrb[5].mxu0  ;;  %4912 = vperm.xlu1 %7007, %v16542_v46   ;;  %v2949_v26 = vadd.f32 %v2917_v47, %v2849_v48  ;;  %v1846_v58 = vsel %vm1816_vm5, %v1471_v34, 0.0  ;;  %v2783_v41 = vsel %vm1814_vm3, %v1471_v34, 0.0  ;;  %v10151_v49 = vpop.permute.xlu0 %2622 }
 0x24a   : > { %4933 = vperm.xlu0 %7006, %v16543_v13   ;;  %16544 = vst [vmem:[#allocation20_spill] sm:$0xff] %v10151_v49  ;;  %v3088_v12 = vsel %vm1812_vm11, %v1471_v34, 0.0  ;;  %v3186_v47 = vsel %vm15775_vm1, %v10098_v33, 0.0  ;;  %v2261_v48 = vadd.f32 %v2230_v60, %v1909_v16  ;;  %v10161_v21 = vsel %vm15990_vm6, %v2296_v36, %v15751_v37  ;;  %v16545_v37 = vld [vmem:[#allocation26_spill] sm:$0xff] }
 0x24b   : > { %v2675_v46 = vsel %vm2644_vm2, %v2295_v43, 0.0  ;;  %v2676_v3 = vsel %vm2645_vm14, %v2297_v11, 0.0  ;;  %v2782_v54 = vsel %vm1813_vm0, %v10138_v5, 0.0  ;;  %v2882_v34 = vsel %vm15769_vm10, %v10098_v33, 0.0 }
 0x24c   : > { %v1881_v16 = vmul.f32 %v9984_v23, %v1846_v58  ;;  %v2819_v60 = vmul.f32 %v10018_v7, %v2783_v41  ;;  %v2711_v36 = vmul.f32 %v10006_v55, %v2675_v46  ;;  %v2712_v13 = vmul.f32 %v10006_v55, %v2676_v3  ;;  %v16546_v46 = vld [vmem:[#allocation33_spill] sm:$0xff] }
 0x24d   : > { %v10177_v43 = vpop.f32.mrb[6].mxu0  ;;  %5405 = vperm.xlu1 %7007, %v16545_v37   ;;  %v3123_v27 = vmul.f32 %v10027_v45, %v3088_v12  ;;  %v2818_v4 = vmul.f32 %v10018_v7, %v2782_v54  ;;  %v2986_v49 = vsel %vm2643_vm7, %v2297_v11, 0.0  ;;  %v3087_v58 = vsel %vm1811_vm9, %v10138_v5, 0.0  ;;  %v10202_v17 = vpop.permute.xlu0 %2628 }
 0x24e   : > { %v10187_v41 = vpop.f32.mrb[7].mxu0  ;;  %5450 = vperm.xlu0 %7006, %v16546_v46   ;;  %v2743_v3 = vadd.f32 %v2711_v36, %v2261_v48  ;;  %v2744_v50 = vadd.f32 %v2712_v13, %v2262_v35  ;;  %v2918_v56 = vmul.f32 %v10020_v28, %v2882_v34  ;;  %v3022_v37 = vmul.f32 %v10025_v9, %v2986_v49  ;;  %v10207_v35 = vld [vmem:[%s15601_s6 + $0x8] ss:$0 sm:$0xff]  ;;  %v16548_v46 = vld [vmem:[#allocation22_spill] sm:$0xff] }
 0x24f   : > { %v2987_v12 = vsel %vm2644_vm2, %v10161_v21, 0.0  ;;  %v3122_v11 = vmul.f32 %v10027_v45, %v3087_v58  ;;  %v10197_v54 = vadd.f32 %v6892_v18, %v10016_v1  ;;  %v10200_v6 = vadd.f32 %v10016_v1, %v1286_v14  ;;  %16547 = vst [vmem:[#allocation23_spill] sm:$0xff] %v10202_v17 }
 0x250   : > { %v2850_v49 = vadd.f32 %v2818_v4, %v2743_v3  ;;  %v10209_v48 = vadd.f32 %v2819_v60, %v2744_v50  ;;  %v3054_v34 = vadd.f32 %v3022_v37, %v2949_v26  ;;  %v3283_v36 = vsel %vm2642_vm13, %v10161_v21, 0.0  ;;  %v16549_v3 = vld [vmem:[#allocation17_spill] sm:$0xff] }
 0x251   : > { %5856 = vperm.xlu1 %7007, %v5823_v8   ;;  %v3220_v18 = vmul.f32 %v10029_v39, %v3186_v47  ;;  %v3154_v14 = vadd.f32 %v3122_v11, %v3053_v29  ;;  %v15758_v13 = vrot.slane %v10197_v54, 7  ;;  %vm15795_vm11 = vcmp.eq.s32.totalorder %v16548_v46, 1  ;;  %v16550_v37 = vld [vmem:[#allocation25_spill] sm:$0xff] }
 0x252   : > { %v10216_v58 = vpop.f32.mrb[8].mxu0  ;;  %4936 = vperm.xlu0 %7006, %v9789_v0   ;;  %v2950_v4 = vadd.f32 %v2918_v56, %v2850_v49  ;;  %v3023_v50 = vmul.f32 %v10025_v9, %v2987_v12  ;;  %v10221_v26 = vadd.f32 %v3123_v27, %v3054_v34  ;;  %v2198_v31 = vsel %vm15795_vm11, %v10089_v42, 0.0 }
 0x253   : > { %v10223_v60 = vpop.f32.mrb[9].mxu0  ;;  %v3251_v29 = vadd.f32 %v3220_v18, %v3154_v14  ;;  %v3317_v8 = vmul.f32 %v10207_v35, %v3283_v36  ;;  %v1472_v47 = vrot.slane %v10200_v6, 7  ;;  %vm1815_vm9 = vcmp.eq.s32.totalorder %v16549_v3, 1  ;;  %v16553_v36 = vld [vmem:[#allocation64_spill] sm:$0xff]  ;;  %v10254_v18 = vpop.permute.xlu0 %2634 }
 0x254   : > { %v2883_v56 = vsel %vm15813_vm4, %v10089_v42, 0.0  ;;  %v1912_v0 = vadd.f32 %v10000_v24, %v1881_v16  ;;  %v10235_v27 = vadd.f32 %v3023_v50, %v2950_v4  ;;  %v16552_v49 = vrot.slane %v10089_v42, 7  ;;  %16554 = vst [vmem:[#allocation67_spill] sm:$0xff] %v10254_v18 }
 0x255   : > { %5411 = vperm.xlu1 %7007, %v16550_v37   ;;  %v10238_v12 = vadd.f32 %v3317_v8, %v3251_v29  ;;  %v10243_v11 = vsel %vm15875_vm12, %v1472_v47, %v15758_v13  ;;  %v1845_v16 = vsel %vm1815_vm9, %v10138_v5, 0.0  ;;  %v2233_v14 = vmul.f32 %v9992_v25, %v2198_v31  ;;  %v10268_v8 = vpop.permute.xlu1 %2559 }
 0x256   : > { %v10248_v34 = vsel %vm15875_vm12, %v16552_v49, %v1472_v47  ;;  %4939 = vperm.xlu0 %7006, %v16553_v36   ;;  %vm16555_vm8 = vcmp.eq.s32.totalorder %v9575_v15, 1  ;;  %v1880_v50 = vmul.f32 %v9984_v23, %v1845_v16  ;;  %vm2647_vm13 = vcmp.eq.s32.totalorder %v9931_v51, 1  ;;  %v16559_v15 = vld [vmem:[#allocation35_spill] sm:$0xff] }
 0x257   : > { %16551 = vst [vmem:[#allocation32_spill] sm:$0xff] %v10238_v12  ;;  %v3187_v4 = vsel %vm16555_vm8, %v10089_v42, 0.0  ;;  %v10261_v29 = vpop.f32.mrb[10].mxu0  ;;  %vm15782_vm15 = vcmp.eq.s32.totalorder %v9906_v10, 1  ;;  %v10266_v5 = vmul.f32 0.70710677, %v10238_v12  ;;  %v2919_v31 = vmul.f32 %v10020_v28, %v2883_v56  ;;  %v10313_v12 = vpop.permute.xlu0 %2640 }
 0x258   : > { %16556 = vst [vmem:[#allocation70_spill] sm:$0xff] %v10261_v29  ;;  %v10270_v47 = vpop.f32.mrb[11].mxu0  ;;  %v1911_v37 = vadd.f32 %v10000_v24, %v1880_v50  ;;  %v2197_v49 = vsel %vm15782_vm15, %v10098_v33, 0.0  ;;  %v2264_v16 = vadd.f32 %v2233_v14, %v1912_v0  ;;  %v3221_v36 = vmul.f32 %v10029_v39, %v3187_v4  ;;  %16563 = vst [vmem:[#allocation17_spill] sm:$0xff] %v10313_v12 }
 0x259   : > { %16557 = vst [vmem:[#allocation63_spill] sm:$0xff] %v10266_v5  ;;  %16558 = vst [vmem:[#allocation26_spill] sm:$0xff] %v10270_v47  ;;  %v10279_v13 = vand.u32 2147483647, %v10266_v5  ;;  %v3188_v18 = vsel %vm15769_vm10, %v10200_v6, 0.0  ;;  %v2232_v17 = vmul.f32 %v9992_v25, %v2197_v49  ;;  %v2785_v56 = vsel %vm1816_vm5, %v10243_v11, 0.0 }
 0x25a   : > { %5456 = vperm.xlu0 %7006, %v16559_v15   ;;  %v2300_v33 = vrot.slane %v10200_v6, 1  ;;  %vm2646_vm8 = vcmp.eq.s32.totalorder %v10268_v8, 1  ;;  %v2784_v15 = vsel %vm1815_vm9, %v10248_v34, 0.0  ;;  %v3090_v49 = vsel %vm1814_vm3, %v10243_v11, 0.0 }
 0x25b   : > { %v3444_v14 = vmul.f32 0.3275911, %v10279_v13  ;;  %v2263_v4 = vadd.f32 %v2232_v17, %v1911_v37  ;;  %v2677_v50 = vsel %vm2646_vm8, %v10161_v21, 0.0  ;;  %v16560_v30 = vrot.slane %v10089_v42, 1 }
 0x25c   : > { %v16561_v5 = vrot.slane %v10197_v54, 1  ;;  %v2713_v37 = vmul.f32 %v10006_v55, %v2677_v50  ;;  %v2821_v47 = vmul.f32 %v10018_v7, %v2785_v56  ;;  %v3222_v61 = vmul.f32 %v10029_v39, %v3188_v18 }
 0x25d   : > { %v2301_v0 = vsel %vm15990_vm6, %v16560_v30, %v2300_v33  ;;  %v2884_v30 = vsel %vm15782_vm15, %v10200_v6, 0.0  ;;  %v2820_v50 = vmul.f32 %v10018_v7, %v2784_v15  ;;  %v2951_v56 = vadd.f32 %v2919_v31, %v10209_v48 }
 0x25e   : > { %v10308_v17 = vsel %vm15990_vm6, %v2300_v33, %v16561_v5  ;;  %v10311_v21 = vpop.f32.mrb[12].mxu0  ;;  %v2678_v42 = vsel %vm2647_vm13, %v2301_v0, 0.0  ;;  %4942 = vperm.xlu0 %7006, %v9813_v62   ;;  %v2745_v33 = vadd.f32 %v2713_v37, %v2263_v4  ;;  %v3476_v12 = vadd.f32 1.0, %v3444_v14 }
 0x25f   : > { %16562 = vst [vmem:[#allocation33_spill] sm:$0xff] %v10311_v21  ;;  %v10322_v29 = vpop.f32.mrb[13].mxu0  ;;  %v2714_v5 = vmul.f32 %v10006_v55, %v2678_v42  ;;  %v3125_v18 = vmul.f32 %v10027_v45, %v3090_v49  ;;  %v2988_v21 = vsel %vm2645_vm14, %v2301_v0, 0.0  ;;  %v2989_v20 = vsel %vm2646_vm8, %v10308_v17, 0.0 }
 0x260   : > { %16564 = vst [vmem:[#allocation25_spill] sm:$0xff] %v10322_v29  ;;  %v2852_v52 = vadd.f32 %v2820_v50, %v2745_v33  ;;  %v2920_v62 = vmul.f32 %v10020_v28, %v2884_v30  ;;  %v3024_v4 = vmul.f32 %v10025_v9, %v2988_v21  ;;  %v3025_v48 = vmul.f32 %v10025_v9, %v2989_v20  ;;  %v10351_v20 = vpop.permute.xlu0 %4409  ;;  %v16571_v50 = vld [vmem:[#allocation36_spill] sm:$0xff] }
 0x261   : > { %v2746_v29 = vadd.f32 %v2714_v5, %v2264_v16  ;;  %v3089_v31 = vsel %vm1813_vm0, %v10248_v34, 0.0  ;;  %v3252_v14 = vadd.f32 %v3221_v36, %v10221_v26  ;;  %v3284_v15 = vsel %vm2643_vm7, %v2301_v0, 0.0  ;;  %v16567_v16 = vld [vmem:[#allocation2_spill] sm:$0xff] }
 0x262   : > { %v10336_v37 = vpop.f32.mrb[14].mxu0  ;;  %4945 = vperm.xlu0 %7006, %v16567_v16   ;;  %v2952_v21 = vadd.f32 %v2920_v62, %v2852_v52  ;;  %v3056_v30 = vadd.f32 %v3024_v4, %v2951_v56  ;;  %v3124_v5 = vmul.f32 %v10027_v45, %v3089_v31  ;;  %16568 = vst [vmem:[#allocation2_spill] sm:$0xff] %v10351_v20  ;;  %v3285_v38 = vsel %vm2644_vm2, %v10308_v17, 0.0 }
 0x263   : > { %16565 = vst [vmem:[#allocation64_spill] sm:$0xff] %v10336_v37  ;;  %v10345_v49 = vpop.f32.mrb[15].mxu0  ;;  %v10348_v42 = vadd.f32 %v2821_v47, %v2746_v29  ;;  %v3318_v26 = vmul.f32 %v10207_v35, %v3284_v15  ;;  %v10359_v59 = vadd.f32 %v10177_v43, %v10016_v1  ;;  %v10363_v29 = vadd.f32 %v10016_v1, %v10187_v41 }
 0x264   : > { %16566 = vst [vmem:[#allocation35_spill] sm:$0xff] %v10345_v49  ;;  %7072 = vrcp.f32 %v3476_v12  ;;  %v10365_v52 = vadd.f32 %v3025_v48, %v2952_v21  ;;  %v3156_v47 = vadd.f32 %v3124_v5, %v10235_v27  ;;  %v10368_v36 = vadd.f32 %v3125_v18, %v3056_v30  ;;  %v10384_v62 = vpop.permute.xlu0 %4415  ;;  %v16577_v30 = vld [vmem:[#allocation7_spill] sm:$0xff]  ;;  %v16602_v49 = vld [vmem:[#allocation86_spill] sm:$0xff] }
 0x265   : > { %vm1818_vm0 = vcmp.eq.s32.totalorder %v16570_v2, 1  ;;  %v10373_v33 = vadd.f32 %v3318_v26, %v3252_v14  ;;  %v15770_v43 = vrot.slane %v10359_v59, 7  ;;  %v3319_v56 = vmul.f32 %v10207_v35, %v3285_v38  ;;  %16572 = vst [vmem:[#allocation69_spill] sm:$0xff] %v10384_v62  ;;  %v16576_v14 = vld [vmem:[#allocation66_spill] sm:$0xff] }
 0x266   : > { %v10370_v0 = vpop.f32.mrb[16].mxu0  ;;  %5462 = vperm.xlu0 %7006, %v16571_v50   ;;  %v1848_v41 = vsel %vm1818_vm0, %v10243_v11, 0.0  ;;  %v3253_v12 = vadd.f32 %v3222_v61, %v3156_v47  ;;  %v1476_v27 = vrot.slane %v10363_v29, 7  ;;  %v16575_v61 = vld [vmem:[#allocation65_spill] sm:$0xff]  ;;  %vm1817_vm7 = vcmp.eq.s32.totalorder %v16576_v14, 1 }
 0x267   : > { %16569 = vst [vmem:[#allocation120_spill] sm:$0xff] %v10370_v0  ;;  %v1883_v4 = vmul.f32 %v9984_v23, %v1848_v41  ;;  %v10392_v31 = vpop.f32.mrb[17].mxu0  ;;  %vm15808_vm3 = vcmp.eq.s32.totalorder %v16575_v61, 1  ;;  %v1847_v21 = vsel %vm1817_vm7, %v10248_v34, 0.0  ;;  %vm15786_vm2 = vcmp.eq.s32.totalorder %v9914_v22, 1 }
 0x268   : > { %v10382_v18 = vadd.f32 %v3319_v56, %v3253_v12  ;;  %v10390_v48 = vsel %vm15875_vm12, %v1476_v27, %v15770_v43  ;;  %16573 = vst [vmem:[#allocation36_spill] sm:$0xff] %v10392_v31  ;;  %v2200_v15 = vsel %vm15808_vm3, %v10197_v54, 0.0  ;;  %v2885_v38 = vsel %vm15795_vm11, %v10197_v54, 0.0  ;;  %v10418_v47 = vpop.permute.xlu0 %4421 }
 0x269   : > { %16578 = vst [vmem:[#allocation66_spill] sm:$0xff] %v10418_v47  ;;  %v2235_v50 = vmul.f32 %v9992_v25, %v2200_v15  ;;  %v3189_v34 = vsel %vm15813_vm4, %v10197_v54, 0.0  ;;  %v16579_v41 = vrot.slane %v10197_v54, 7  ;;  %v1882_v56 = vmul.f32 %v9984_v23, %v1847_v21 }
 0x26a   : > { %4948 = vperm.xlu0 %7006, %v9832_v44   ;;  %v10396_v11 = vmul.f32 0.70710677, %v10382_v18  ;;  %v1914_v44 = vadd.f32 %v10000_v24, %v1883_v4  ;;  %vm2649_vm10 = vcmp.eq.s32.totalorder %v9943_v63, 1  ;;  %v2199_v15 = vsel %vm15786_vm2, %v10200_v6, 0.0 }
 0x26b   : > { %v10427_v12 = vsel %vm15875_vm12, %v16579_v41, %v1476_v27  ;;  %v1913_v53 = vadd.f32 %v10000_v24, %v1882_v56  ;;  %v2234_v47 = vmul.f32 %v9992_v25, %v2199_v15  ;;  %v16580_v27 = vld [vmem:[#allocation37_spill] sm:$0xff]  ;;  %v2921_v21 = vmul.f32 %v10020_v28, %v2885_v38 }
 0x26c   : > { %16574 = vst [vmem:[#allocation121_spill] sm:$0xff] %v10396_v11  ;;  %v10404_v16 = vand.u32 2147483647, %v10396_v11  ;;  %v2266_v62 = vadd.f32 %v2235_v50, %v1914_v44  ;;  %v3223_v41 = vmul.f32 %v10029_v39, %v3189_v34  ;;  %v2787_v6 = vsel %vm1818_vm0, %v10390_v48, 0.0  ;;  %v10460_v56 = vpop.permute.xlu0 %4427 }
 0x26d   : > { %v2265_v20 = vadd.f32 %v2234_v47, %v1913_v53  ;;  %v15776_v31 = vrot.slane %v10359_v59, 1  ;;  %v3190_v44 = vsel %vm15782_vm15, %v10363_v29, 0.0  ;;  %v16581_v38 = vrot.slane %v10197_v54, 1  ;;  %16582 = vst [vmem:[#allocation7_spill] sm:$0xff] %v10460_v56 }
 0x26e   : > { %4951 = vperm.xlu0 %7006, %v16577_v30   ;;  %v10411_v5 = vpop.eup %7072  ;;  %v3446_v26 = vmul.f32 0.3275911, %v10404_v16  ;;  %v10431_v30 = vpop.permute.xlu1 %2565  ;;  %v2786_v53 = vsel %vm1817_vm7, %v10427_v12, 0.0  ;;  %v3091_v40 = vsel %vm1815_vm9, %v10427_v12, 0.0 }
 0x26f   : > { %v3572_v43 = vmul.f32 1.0614054, %v10411_v5  ;;  %vm2648_vm1 = vcmp.eq.s32.totalorder %v10431_v30, 1  ;;  %v2822_v10 = vmul.f32 %v10018_v7, %v2786_v53  ;;  %v16583_v53 = vld [vmem:[#allocation56_spill] sm:$0xff] }
 0x270   : > { %v3478_v4 = vadd.f32 1.0, %v3446_v26  ;;  %v2304_v26 = vrot.slane %v10363_v29, 1  ;;  %v2679_v34 = vsel %vm2648_vm1, %v10308_v17, 0.0  ;;  %v2823_v17 = vmul.f32 %v10018_v7, %v2787_v6 }
 0x271   : > { %v3604_v47 = vadd.f32 -1.4531521, %v3572_v43  ;;  %v2715_v15 = vmul.f32 %v10006_v55, %v2679_v34  ;;  %v2886_v43 = vsel %vm15786_vm2, %v10363_v29, 0.0 }
 0x272   : > { %5468 = vperm.xlu0 %7006, %v16580_v27   ;;  %7074 = vrcp.f32 %v3478_v4  ;;  %v2305_v50 = vsel %vm15990_vm6, %v16581_v38, %v2304_v26  ;;  %v10465_v4 = vsel %vm15990_vm6, %v2304_v26, %v15776_v31  ;;  %v2953_v38 = vadd.f32 %v2921_v21, %v10348_v42 }
 0x273   : > { %v2680_v54 = vsel %vm2649_vm10, %v2305_v50, 0.0  ;;  %v3092_v26 = vsel %vm1816_vm5, %v10390_v48, 0.0  ;;  %v2747_v31 = vadd.f32 %v2715_v15, %v2265_v20  ;;  %v2922_v6 = vmul.f32 %v10020_v28, %v2886_v43 }
 0x274   : > { %v2716_v27 = vmul.f32 %v10006_v55, %v2680_v54  ;;  %v2991_v54 = vsel %vm2648_vm1, %v10465_v4, 0.0  ;;  %v3254_v20 = vadd.f32 %v3223_v41, %v10368_v36  ;;  %v3286_v21 = vsel %vm2645_vm14, %v2305_v50, 0.0 }
 0x275   : > { %v2854_v42 = vadd.f32 %v2822_v10, %v2747_v31  ;;  %v3126_v43 = vmul.f32 %v10027_v45, %v3091_v40  ;;  %v3027_v3 = vmul.f32 %v10025_v9, %v2991_v54  ;;  %v3287_v36 = vsel %vm2646_vm8, %v10465_v4, 0.0  ;;  %v16586_v54 = vld [vmem:[#allocation38_spill] sm:$0xff]  ;;  %v16587_v40 = vld [vmem:[#allocation3_spill] sm:$0xff] }
 0x276   : > { %4954 = vperm.xlu0 %7006, %v9844_v19   ;;  %v2990_v19 = vsel %vm2647_vm13, %v2305_v50, 0.0  ;;  %v2748_v34 = vadd.f32 %v2716_v27, %v2266_v62  ;;  %v3127_v62 = vmul.f32 %v10027_v45, %v3092_v26  ;;  %v3320_v57 = vmul.f32 %v10207_v35, %v3286_v21 }
 0x277   : > { %v3026_v56 = vmul.f32 %v10025_v9, %v2990_v19  ;;  %v10499_v19 = vpop.permute.xlu0 %4433  ;;  %v2954_v10 = vadd.f32 %v2922_v6, %v2854_v42  ;;  %v3636_v41 = vmul.f32 %v10411_v5, %v3604_v47  ;;  %v3224_v50 = vmul.f32 %v10029_v39, %v3190_v44 }
 0x278   : > { %v10496_v15 = vadd.f32 %v2823_v17, %v2748_v34  ;;  %16584 = vst [vmem:[#allocation37_spill] sm:$0xff] %v10499_v19  ;;  %v3860_v26 = vsub.f32 0.0, %v10279_v13  ;;  %v10519_v6 = vadd.f32 %v3320_v57, %v3254_v20  ;;  %v3321_v47 = vmul.f32 %v10207_v35, %v3287_v36  ;;  %v16597_v19 = vld [vmem:[#allocation100_spill] sm:$0xff] }
 0x279   : > { %v3058_v27 = vadd.f32 %v3026_v56, %v2953_v38  ;;  %v3158_v56 = vadd.f32 %v3126_v43, %v10365_v52  ;;  %v10513_v38 = vpop.f32.mrb[18].mxu0  ;;  %v10517_v8 = vadd.f32 %v3027_v3, %v2954_v10  ;;  %v10525_v52 = vadd.f32 %v10216_v58, %v10016_v1 }
 0x27a   : > { %4957 = vperm.xlu0 %7006, %v16583_v53   ;;  %16585 = vst [vmem:[#allocation56_spill] sm:$0xff] %v10513_v38  ;;  %vm1820_vm5 = vcmp.eq.s32.totalorder %v16587_v40, 1  ;;  %v3668_v21 = vadd.f32 1.4214138, %v3636_v41  ;;  %v10544_v3 = vadd.f32 %v10016_v1, %v10223_v60  ;;  %v10553_v41 = vpop.f32.mrb[19].mxu0  ;;  %vm15806_vm15 = vcmp.eq.s32.totalorder %v16597_v19, 1 }
 0x27b   : > { %v10511_v17 = vadd.f32 %v3127_v62, %v3058_v27  ;;  %v3255_v42 = vadd.f32 %v3224_v50, %v3158_v56  ;;  %v3892_v62 = vmul.f32 %v3860_v26, %v10279_v13  ;;  %v1850_v27 = vsel %vm1820_vm5, %v10390_v48, 0.0  ;;  %v10535_v43 = vpop.permute.xlu0 %4439  ;;  %16591 = vst [vmem:[#allocation123_spill] sm:$0xff] %v10553_v41  ;;  %v16592_v50 = vld [vmem:[#allocation68_spill] sm:$0xff] }
 0x27c   : > { %v10506_v31 = vpop.eup %7074  ;;  %16589 = vst [vmem:[#allocation3_spill] sm:$0xff] %v10535_v43  ;;  %v15779_v10 = vrot.slane %v10525_v52, 7  ;;  %v3862_v13 = vsub.f32 0.0, %v10404_v16  ;;  %v3700_v36 = vmul.f32 %v10411_v5, %v3668_v21  ;;  %v1885_v57 = vmul.f32 %v9984_v23, %v1850_v27 }
 0x27d   : > { %v3574_v34 = vmul.f32 1.0614054, %v10506_v31  ;;  %v10528_v53 = vadd.f32 %v3321_v47, %v3255_v42  ;;  %vm15828_vm14 = vcmp.eq.s32.totalorder %v16592_v50, 1  ;;  %v3924_v56 = vmul.f32 1.442695, %v3892_v62  ;;  %v16594_v47 = vld [vmem:[#allocation72_spill] sm:$0xff] }
 0x27e   : > { %5474 = vperm.xlu0 %7006, %v16586_v54   ;;  %v2202_v60 = vsel %vm15828_vm14, %v10359_v59, 0.0  ;;  %vm1819_vm9 = vcmp.eq.s32.totalorder %v16594_v47, 1  ;;  %v3894_v21 = vmul.f32 %v3862_v13, %v10404_v16  ;;  %v2887_v62 = vsel %vm15808_vm3, %v10359_v59, 0.0  ;;  %v16598_v13 = vld [vmem:[#allocation39_spill] sm:$0xff] }
 0x27f   : > { %v3606_v44 = vadd.f32 -1.4531521, %v3574_v34  ;;  %16588 = vst [vmem:[#allocation38_spill] sm:$0xff] %v10528_v53  ;;  %v10539_v58 = vmul.f32 0.70710677, %v10528_v53  ;;  %v16593_v34 = vld [vmem:[#allocation59_spill] sm:$0xff]  ;;  %7076 = vpow2.f32 %v3924_v56  ;;  %v2237_v16 = vmul.f32 %v9992_v25, %v2202_v60 }
 0x280   : > { %v3732_v27 = vadd.f32 -0.28449672, %v3700_v36  ;;  %v10583_v38 = vmul.f32 0.70710677, %v10373_v33  ;;  %v2923_v36 = vmul.f32 %v10020_v28, %v2887_v62  ;;  %v1849_v62 = vsel %vm1819_vm9, %v10427_v12, 0.0 }
 0x281   : > { %v3638_v20 = vmul.f32 %v10506_v31, %v3606_v44  ;;  %16590 = vst [vmem:[#allocation122_spill] sm:$0xff] %v10539_v58  ;;  %v10550_v48 = vand.u32 2147483647, %v10539_v58  ;;  %v16595_v44 = vld [vmem:[#allocation31_spill] sm:$0xff]  ;;  %v2308_v0 = vrot.slane %v10544_v3, 1 }
 0x282   : > { %4960 = vperm.xlu0 %7006, %v9855_v32   ;;  %v1480_v32 = vrot.slane %v10544_v3, 7  ;;  %vm2651_vm8 = vcmp.eq.s32.totalorder %v16595_v44, 1  ;;  %16599 = vst [vmem:[#allocation72_spill] sm:$0xff] %v10583_v38  ;;  %v11059_v44 = vld [vmem:[%s15601_s6 + $0x8] ss:$0 sm:$0xff] }
 0x283   : > { %v3670_v26 = vadd.f32 1.4214138, %v3638_v20  ;;  %v3448_v54 = vmul.f32 0.3275911, %v10550_v48  ;;  %v10572_v20 = vpop.permute.xlu0 %4445 }
 0x284   : > { %v10564_v42 = vsel %vm15875_vm12, %v1480_v32, %v15779_v10  ;;  %16596 = vst [vmem:[#allocation59_spill] sm:$0xff] %v10572_v20  ;;  %v1916_v10 = vadd.f32 %v10000_v24, %v1885_v57  ;;  %v3192_v57 = vsel %vm15786_vm2, %v10544_v3, 0.0  ;;  %v10592_v20 = vpop.permute.xlu1 %2571 }
 0x285   : > { %v3480_v43 = vadd.f32 1.0, %v3448_v54  ;;  %v3702_v41 = vmul.f32 %v10506_v31, %v3670_v26  ;;  %v10589_v54 = vmul.f32 1.442695, %v3894_v21  ;;  %v16600_v26 = vrot.slane %v10359_v59, 7 }
 0x286   : > { %4963 = vperm.xlu0 %7006, %v16593_v34   ;;  %v3191_v34 = vsel %vm15795_vm11, %v10359_v59, 0.0  ;;  %v2201_v21 = vsel %vm15806_vm15, %v10363_v29, 0.0  ;;  %v3226_v46 = vmul.f32 %v10029_v39, %v3192_v57  ;;  %v2789_v12 = vsel %vm1820_vm5, %v10564_v42, 0.0 }
 0x287   : > { %7078 = vrcp.f32 %v3480_v43  ;;  %v3225_v56 = vmul.f32 %v10029_v39, %v3191_v34  ;;  %v10597_v60 = vsel %vm15875_vm12, %v16600_v26, %v1480_v32  ;;  %v3764_v43 = vmul.f32 %v10411_v5, %v3732_v27  ;;  %v10610_v26 = vpop.permute.xlu0 %4451 }
 0x288   : > { %v2268_v34 = vadd.f32 %v2237_v16, %v1916_v10  ;;  %v3734_v22 = vadd.f32 -0.28449672, %v3702_v41  ;;  %v15787_v32 = vrot.slane %v10525_v52, 1  ;;  %16601 = vst [vmem:[#allocation31_spill] sm:$0xff] %v10610_v26  ;;  %v2236_v29 = vmul.f32 %v9992_v25, %v2201_v21 }
 0x289   : > { %vm2650_vm2 = vcmp.eq.s32.totalorder %v10592_v20, 1  ;;  %v16603_v10 = vrot.slane %v10359_v59, 1  ;;  %v2788_v57 = vsel %vm1819_vm9, %v10597_v60, 0.0  ;;  %v2888_v21 = vsel %vm15806_vm15, %v10544_v3, 0.0  ;;  %v7077_v58 = vpop.eup %7076  ;;  %v10870_v20 = vld [vmem:[%s15600_s5] ss:$0 sm:$0xff] }
 0x28a   : > { %5480 = vperm.xlu0 %7006, %v16598_v13   ;;  %v1884_v13 = vmul.f32 %v9984_v23, %v1849_v62  ;;  %v10625_v16 = vsel %vm15990_vm6, %v2308_v0, %v15787_v32  ;;  %v2955_v32 = vadd.f32 %v2923_v36, %v10496_v15  ;;  %v2824_v26 = vmul.f32 %v10018_v7, %v2788_v57 }
 0x28b   : > { %v2309_v41 = vsel %vm15990_vm6, %v16603_v10, %v2308_v0  ;;  %v2825_v0 = vmul.f32 %v10018_v7, %v2789_v12  ;;  %v3093_v12 = vsel %vm1817_vm7, %v10597_v60, 0.0  ;;  %v2924_v2 = vmul.f32 %v10020_v28, %v2888_v21 }
 0x28c   : > { %v1915_v27 = vadd.f32 %v10000_v24, %v1884_v13  ;;  %v2682_v13 = vsel %vm2651_vm8, %v2309_v41, 0.0  ;;  %v2993_v15 = vsel %vm2650_vm2, %v10625_v16, 0.0  ;;  %v3256_v14 = vadd.f32 %v3225_v56, %v10511_v17 }
 0x28d   : > { %v2718_v10 = vmul.f32 %v10006_v55, %v2682_v13  ;;  %v3289_v51 = vsel %vm2648_vm1, %v10625_v16, 0.0  ;;  %v3796_v17 = vadd.f32 0.2548296, %v3764_v43  ;;  %v16611_v43 = vld [vmem:[#allocation89_spill] sm:$0xff]  ;;  %7080 = vpow2.f32 %v10589_v54  ;;  %v16619_v54 = vld [vmem:[#allocation14_spill] sm:$0xff] }
 0x28e   : > { %4966 = vperm.xlu0 %7006, %v16602_v49   ;;  %v2681_v49 = vsel %vm2650_vm2, %v10465_v4, 0.0  ;;  %v2267_v62 = vadd.f32 %v2236_v29, %v1915_v27  ;;  %v3094_v4 = vsel %vm1818_vm0, %v10564_v42, 0.0  ;;  %v16604_v27 = vld [vmem:[#allocation12_spill] sm:$0xff] }
 0x28f   : > { %v2717_v59 = vmul.f32 %v10006_v55, %v2681_v49  ;;  %v2992_v49 = vsel %vm2649_vm10, %v2309_v41, 0.0  ;;  %v2750_v37 = vadd.f32 %v2718_v10, %v2268_v34  ;;  %v3288_v34 = vsel %vm2647_vm13, %v2309_v41, 0.0 }
 0x290   : > { %v3028_v36 = vmul.f32 %v10025_v9, %v2992_v49  ;;  %v3129_v10 = vmul.f32 %v10027_v45, %v3094_v4  ;;  %v10669_v49 = vpop.f32.mrb[20].mxu0  ;;  %v3323_v4 = vmul.f32 %v10207_v35, %v3289_v51 }
 0x291   : > { %v2749_v29 = vadd.f32 %v2717_v59, %v2267_v62  ;;  %v10657_v62 = vpop.permute.xlu0 %4457  ;;  %v10659_v57 = vpop.eup %7078  ;;  %v3128_v59 = vmul.f32 %v10027_v45, %v3093_v12  ;;  %16606 = vst [vmem:[#allocation86_spill] sm:$0xff] %v10669_v49  ;;  %v16608_v12 = vld [vmem:[#allocation70_spill] sm:$0xff] }
 0x292   : > { %4969 = vperm.xlu0 %7006, %v16604_v27   ;;  %16605 = vst [vmem:[#allocation39_spill] sm:$0xff] %v10657_v62  ;;  %v3576_v21 = vmul.f32 1.0614054, %v10659_v57  ;;  %v10667_v27 = vadd.f32 %v2825_v0, %v2750_v37  ;;  %v3060_v53 = vadd.f32 %v3028_v36, %v2955_v32  ;;  %v16607_v62 = vld [vmem:[#allocation40_spill] sm:$0xff]  ;;  %v3322_v37 = vmul.f32 %v10207_v35, %v3288_v34  ;;  %v10707_v34 = vpop.f32.mrb[21].mxu0 }
 0x293   : > { %v2856_v13 = vadd.f32 %v2824_v26, %v2749_v29  ;;  %v3029_v26 = vmul.f32 %v10025_v9, %v2993_v15  ;;  %v3160_v29 = vadd.f32 %v3128_v59, %v10517_v8  ;;  %v16609_v8 = vld [vmem:[#allocation34_spill] sm:$0xff]  ;;  %16614 = vst [vmem:[#allocation70_spill] sm:$0xff] %v10707_v34 }
 0x294   : > { %v3608_v56 = vadd.f32 -1.4531521, %v3576_v21  ;;  %v10677_v41 = vadd.f32 %v3129_v10, %v3060_v53  ;;  %vm1822_vm13 = vcmp.eq.s32.totalorder %v16609_v8, 1  ;;  %v10688_v15 = vadd.f32 %v3322_v37, %v3256_v14  ;;  %v16616_v10 = vld [vmem:[#allocation71_spill] sm:$0xff] }
 0x295   : > { %v2956_v11 = vadd.f32 %v2924_v2, %v2856_v13  ;;  %v3257_v0 = vadd.f32 %v3226_v46, %v3160_v29  ;;  %v10685_v2 = vadd.f32 %v16608_v12, %v10016_v1  ;;  %v10690_v30 = vpop.permute.xlu0 %4463  ;;  %v3413_v53 = vand.u32 2147483647, %v10583_v38  ;;  %v16613_v46 = vld [vmem:[#allocation26_spill] sm:$0xff]  ;;  %v16621_v12 = vld [vmem:[#allocation32_spill] sm:$0xff] }
 0x296   : > { %5486 = vperm.xlu0 %7006, %v16607_v62   ;;  %16610 = vst [vmem:[#allocation12_spill] sm:$0xff] %v10690_v30  ;;  %v10699_v62 = vadd.f32 %v10016_v1, %v16613_v46  ;;  %v3828_v13 = vmul.f32 %v10411_v5, %v3796_v17  ;;  %v3640_v59 = vmul.f32 %v10659_v57, %v3608_v56  ;;  %v1852_v14 = vsel %vm1822_vm13, %v10564_v42, 0.0  ;;  %v16617_v1 = vld [vmem:[#allocation42_spill] sm:$0xff]  ;;  %v16618_v5 = vld [vmem:[#allocation24_spill] sm:$0xff] }
 0x297   : > { %v10680_v32 = vadd.f32 %v3029_v26, %v2956_v11  ;;  %v3766_v11 = vmul.f32 %v10506_v31, %v3734_v22  ;;  %v10695_v36 = vadd.f32 %v3323_v4, %v3257_v0  ;;  %v15796_v21 = vrot.slane %v10685_v2, 7  ;;  %v7081_v61 = vpop.eup %7080 }
 0x298   : > { %vm15851_vm1 = vcmp.eq.s32.totalorder %v16616_v10, 1  ;;  %vm1821_vm0 = vcmp.eq.s32.totalorder %v16617_v1, 1  ;;  %vm15821_vm7 = vcmp.eq.s32.totalorder %v16618_v5, 1  ;;  %v1887_v29 = vmul.f32 %v9984_v23, %v1852_v14 }
 0x299   : > { %16612 = vst [vmem:[#allocation40_spill] sm:$0xff] %v10695_v36  ;;  %v10710_v22 = vmul.f32 0.70710677, %v10695_v36  ;;  %v3798_v26 = vadd.f32 0.2548296, %v3766_v11  ;;  %v1484_v51 = vrot.slane %v10699_v62, 7  ;;  %v10722_v17 = vmul.f32 %v7077_v58, %v3828_v13  ;;  %v10724_v4 = vpop.permute.xlu0 %4469 }
 0x29a   : > { %4972 = vperm.xlu0 %7006, %v16611_v43   ;;  %v3445_v56 = vmul.f32 0.3275911, %v3413_v53  ;;  %v3861_v37 = vsub.f32 0.0, %v3413_v53  ;;  %v3672_v0 = vadd.f32 1.4214138, %v3640_v59  ;;  %16620 = vst [vmem:[#allocation89_spill] sm:$0xff] %v10724_v4  ;;  %v1918_v38 = vadd.f32 %v10000_v24, %v1887_v29 }
 0x29b   : > { %16615 = vst [vmem:[#allocation34_spill] sm:$0xff] %v10710_v22  ;;  %v10719_v42 = vand.u32 2147483647, %v10710_v22  ;;  %v10727_v43 = vmul.f32 0.5, %v16621_v12  ;;  %v10733_v11 = vsel %vm15875_vm12, %v1484_v51, %v15796_v21  ;;  %v16623_v14 = vrot.slane %v10525_v52, 7  ;;  %v16624_v13 = vld [vmem:[#allocation104_spill] sm:$0xff] }
 0x29c   : > { %vm2653_vm11 = vcmp.eq.s32.totalorder %v16624_v13, 1  ;;  %v10742_v59 = vmul.f32 0.70710677, %v10519_v6  ;;  %v2204_v12 = vsel %vm15851_vm1, %v10525_v52, 0.0  ;;  %v2889_v21 = vsel %vm15828_vm14, %v10525_v52, 0.0  ;;  %v16626_v4 = vld [vmem:[#allocation41_spill] sm:$0xff] }
 0x29d   : > { %16622 = vst [vmem:[#allocation26_spill] sm:$0xff] %v10727_v43  ;;  %v3450_v46 = vmul.f32 0.3275911, %v10719_v42  ;;  %v10738_v58 = vsel %vm15875_vm12, %v16623_v14, %v1484_v51  ;;  %v3830_v51 = vmul.f32 %v10506_v31, %v3798_v26  ;;  %v10754_v14 = vmul.f32 0.5, %v10373_v33  ;;  %v16659_v13 = vld [vmem:[#allocation77_spill] sm:$0xff] }
 0x29e   : > { %4975 = vperm.xlu0 %7006, %v16619_v54   ;;  %16625 = vst [vmem:[#allocation42_spill] sm:$0xff] %v10742_v59  ;;  %v3864_v54 = vsub.f32 0.0, %v10550_v48  ;;  %v3193_v30 = vsel %vm15808_vm3, %v10525_v52, 0.0  ;;  %v10761_v49 = vadd.f32 1.0, %v3445_v56  ;;  %v10763_v22 = vmul.f32 %v3861_v37, %v3413_v53  ;;  %v10776_v56 = vpop.permute.xlu1 %2577 }
 0x29f   : > { %16627 = vst [vmem:[#allocation14_spill] sm:$0xff] %v10754_v14  ;;  %v3704_v36 = vmul.f32 %v10659_v57, %v3672_v0  ;;  %v2925_v31 = vmul.f32 %v10020_v28, %v2889_v21  ;;  %v3482_v33 = vadd.f32 1.0, %v3450_v46  ;;  %v3194_v26 = vsel %vm15806_vm15, %v10699_v62, 0.0  ;;  %16628 = vst [vmem:[#allocation32_spill] sm:$0xff] %v10776_v56  ;;  %v10781_v21 = vpop.permute.xlu0 %4475  ;;  %v16630_v0 = vld [vmem:[#allocation92_spill] sm:$0xff] }
 0x2a0   : > { %v10772_v24 = vand.u32 2147483647, %v10742_v59  ;;  %v3896_v29 = vmul.f32 %v3864_v54, %v10550_v48  ;;  %v3227_v53 = vmul.f32 %v10029_v39, %v3193_v30  ;;  %v1851_v37 = vsel %vm1821_vm0, %v10597_v60, 0.0  ;;  %16629 = vst [vmem:[#allocation41_spill] sm:$0xff] %v10781_v21 }
 0x2a1   : > { %v10784_v46 = vmul.f32 %v7081_v61, %v3830_v51  ;;  %v2203_v48 = vsel %vm15821_vm7, %v10544_v3, 0.0  ;;  %v3736_v30 = vadd.f32 -0.28449672, %v3704_v36  ;;  %v3228_v34 = vmul.f32 %v10029_v39, %v3194_v26  ;;  %v10796_v61 = vld [vmem:[%s15602_s7] ss:$0 sm:$0xff] }
 0x2a2   : > { %5492 = vperm.xlu0 %7006, %v16626_v4   ;;  %v2239_v4 = vmul.f32 %v9992_v25, %v2204_v12  ;;  %v1886_v12 = vmul.f32 %v9984_v23, %v1851_v37  ;;  %v2312_v19 = vrot.slane %v10699_v62, 1  ;;  %v15807_v60 = vrot.slane %v10685_v2, 1 }
 0x2a3   : > { %7082 = vrcp.f32 %v3482_v33  ;;  %v2238_v37 = vmul.f32 %v9992_v25, %v2203_v48  ;;  %vm2652_vm15 = vcmp.eq.s32.totalorder %v10776_v56, 1  ;;  %v2790_v33 = vsel %vm1821_vm0, %v10738_v58, 0.0 }
 0x2a4   : > { %v2270_v54 = vadd.f32 %v2239_v4, %v1918_v38  ;;  %v1917_v51 = vadd.f32 %v10796_v61, %v1886_v12  ;;  %v16631_v38 = vrot.slane %v10525_v52, 1  ;;  %v10807_v36 = vsel %vm15990_vm6, %v2312_v19, %v15807_v60  ;;  %v16632_v60 = vld [vmem:[#allocation4_spill] sm:$0xff] }
 0x2a5   : > { %v2683_v4 = vsel %vm2652_vm15, %v10625_v16, 0.0  ;;  %v2791_v26 = vsel %vm1822_vm13, %v10733_v11, 0.0  ;;  %v2890_v48 = vsel %vm15821_vm7, %v10699_v62, 0.0  ;;  %vm1824_vm3 = vcmp.eq.s32.totalorder %v16632_v60, 1 }
 0x2a6   : > { %4978 = vperm.xlu0 %7006, %v16630_v0   ;;  %v2313_v3 = vsel %vm15990_vm6, %v16631_v38, %v2312_v19  ;;  %v2269_v52 = vadd.f32 %v2238_v37, %v1917_v51  ;;  %v2719_v12 = vmul.f32 %v10006_v55, %v2683_v4  ;;  %v3096_v19 = vsel %vm1820_vm5, %v10733_v11, 0.0 }
 0x2a7   : > { %v2684_v0 = vsel %vm2653_vm11, %v2313_v3, 0.0  ;;  %v2957_v38 = vadd.f32 %v2925_v31, %v10667_v27  ;;  %v2826_v37 = vmul.f32 %v10018_v7, %v2790_v33  ;;  %v2994_v4 = vsel %vm2651_vm8, %v2313_v3, 0.0  ;;  %v16633_v31 = vld [vmem:[#allocation63_spill] sm:$0xff] }
 0x2a8   : > { %v2720_v16 = vmul.f32 %v10006_v55, %v2684_v0  ;;  %v2751_v51 = vadd.f32 %v2719_v12, %v2269_v52  ;;  %v3095_v40 = vsel %vm1819_vm9, %v10738_v58, 0.0  ;;  %v2827_v0 = vmul.f32 %v10018_v7, %v2791_v26 }
 0x2a9   : > { %v2995_v14 = vsel %vm2652_vm15, %v10807_v36, 0.0  ;;  %v3030_v27 = vmul.f32 %v10025_v9, %v2994_v4  ;;  %vm4052_vm5 = vcmp.lt.f32.partialorder %v16633_v31, 0.0  ;;  %v2926_v33 = vmul.f32 %v10020_v28, %v2890_v48 }
 0x2aa   : > { %v2752_v21 = vadd.f32 %v2720_v16, %v2270_v54  ;;  %v2858_v52 = vadd.f32 %v2826_v37, %v2751_v51  ;;  %v3130_v12 = vmul.f32 %v10027_v45, %v3095_v40  ;;  %v3258_v59 = vadd.f32 %v3227_v53, %v10677_v41  ;;  %v16634_v16 = vld [vmem:[#allocation73_spill] sm:$0xff]  ;;  %v10856_v41 = vpop.f32.mrb[22].mxu0 }
 0x2ab   : > { %v3131_v47 = vmul.f32 %v10027_v45, %v3096_v19  ;;  %v3062_v54 = vadd.f32 %v3030_v27, %v2957_v38  ;;  %v3290_v26 = vsel %vm2649_vm10, %v2313_v3, 0.0  ;;  %vm15847_vm9 = vcmp.eq.s32.totalorder %v16634_v16, 1  ;;  %16635 = vst [vmem:[#allocation92_spill] sm:$0xff] %v10856_v41  ;;  %v16636_v37 = vld [vmem:[#allocation33_spill] sm:$0xff] }
 0x2ac   : > { %v10846_v43 = vadd.f32 %v2827_v0, %v2752_v21  ;;  %v2958_v4 = vadd.f32 %v2926_v33, %v2858_v52  ;;  %v3031_v56 = vmul.f32 %v10025_v9, %v2995_v14  ;;  %v3162_v51 = vadd.f32 %v3130_v12, %v10680_v32  ;;  %v16639_v27 = vld [vmem:[#allocation121_spill] sm:$0xff] }
 0x2ad   : > { %v3291_v48 = vsel %vm2650_vm2, %v10807_v36, 0.0  ;;  %v4022_v53 = vsub.f32 1.0, %v10784_v46  ;;  %v3932_v21 = vmul.f32 1.442695, %v3896_v29  ;;  %v10859_v19 = vadd.f32 %v3131_v47, %v3062_v54  ;;  %v10862_v3 = vpop.eup %7082  ;;  %v16637_v29 = vld [vmem:[#allocation75_spill] sm:$0xff]  ;;  %v16641_v12 = vld [vmem:[#allocation25_spill] sm:$0xff] }
 0x2ae   : > { %v3324_v63 = vmul.f32 %v10207_v35, %v3290_v26  ;;  %v10864_v38 = vadd.f32 %v3031_v56, %v2958_v4  ;;  %v3259_v14 = vadd.f32 %v3228_v34, %v3162_v51  ;;  %v3325_v32 = vmul.f32 %v10207_v35, %v3291_v48  ;;  %v10903_v4 = vpop.f32.mrb[23].mxu0  ;;  %v16644_v51 = vld [vmem:[#allocation101_spill] sm:$0xff] }
 0x2af   : > { %v10874_v46 = vadd.f32 %v10870_v20, %v16636_v37  ;;  %vm1823_vm10 = vcmp.eq.s32.totalorder %v16637_v29, 1  ;;  %v16638_v40 = vsub.f32 1.0, %v10722_v17  ;;  %v3926_v56 = vmul.f32 1.442695, %v10763_v22  ;;  %16643 = vst [vmem:[#allocation33_spill] sm:$0xff] %v10903_v4 }
 0x2b0   : > { %v10881_v34 = vmul.f32 0.5, %v10382_v18  ;;  %v10883_v35 = vadd.f32 %v3324_v63, %v3258_v59  ;;  %vm4054_vm2 = vcmp.lt.f32.partialorder %v16639_v27, 0.0  ;;  %v3768_v52 = vmul.f32 %v10659_v57, %v3736_v30 }
 0x2b1   : > { %v4084_v0 = vsub.f32 0.0, %v16638_v40  ;;  %v10887_v33 = vadd.f32 %v3325_v32, %v3259_v14  ;;  %v10891_v47 = vadd.f32 %v10870_v20, %v16641_v12  ;;  %v4086_v54 = vsub.f32 0.0, %v4022_v53 }
 0x2b2   : > { %v3863_v26 = vsub.f32 0.0, %v10772_v24  ;;  %7084 = vpow2.f32 %v3932_v21  ;;  %v1854_v18 = vsel %vm1824_vm3, %v10733_v11, 0.0  ;;  %v3578_v22 = vmul.f32 1.0614054, %v10862_v3 }
 0x2b3   : > { %16640 = vst [vmem:[#allocation4_spill] sm:$0xff] %v10887_v33  ;;  %7086 = vrcp.f32 %v10761_v49  ;;  %v10900_v59 = vmul.f32 0.70710677, %v10887_v33  ;;  %v15814_v30 = vrot.slane %v10874_v46, 7  ;;  %vm15838_vm4 = vcmp.eq.s32.totalorder %v16644_v51, 1  ;;  %v16684_v51 = vld [vmem:[#allocation6_spill] sm:$0xff] }
 0x2b4   : > { %v16645_v48 = vmov %v16638_v40  ;;  %7088 = vpow2.f32 %v3926_v56  ;;  %v3447_v11 = vmul.f32 0.3275911, %v10772_v24  ;;  %v10912_v49 = vmul.f32 0.5, %v10519_v6 }
 0x2b5   : > { %16642 = vst [vmem:[#allocation63_spill] sm:$0xff] %v10900_v59  ;;  %v4116_v21 = vsel %vm4052_vm5, %v4084_v0, %v16645_v48  ;;  %v3800_v63 = vadd.f32 0.2548296, %v3768_v52  ;;  %v1889_v14 = vmul.f32 %v9984_v23, %v1854_v18  ;;  %v10916_v32 = vand.u32 2147483647, %v10900_v59 }
 0x2b6   : > { %16646 = vst [vmem:[#allocation75_spill] sm:$0xff] %v10912_v49  ;;  %v1488_v37 = vrot.slane %v10891_v47, 7  ;;  %v4118_v17 = vsel %vm4054_vm2, %v4086_v54, %v4022_v53  ;;  %v3895_v31 = vmul.f32 %v3863_v26, %v10772_v24  ;;  %v10923_v40 = vmul.f32 0.70710677, %v10688_v15  ;;  %v16649_v24 = vld [vmem:[#allocation106_spill] sm:$0xff] }
 0x2b7   : > { %v2206_v6 = vsel %vm15847_vm9, %v10685_v2, 0.0  ;;  %v3610_v0 = vadd.f32 -1.4531521, %v3578_v22  ;;  %v3452_v56 = vmul.f32 0.3275911, %v10916_v32  ;;  %v16648_v27 = vrot.slane %v10685_v2, 7 }
 0x2b8   : > { %16647 = vst [vmem:[#allocation121_spill] sm:$0xff] %v10923_v40  ;;  %v10932_v52 = vsel %vm15875_vm12, %v1488_v37, %v15814_v30  ;;  %vm2655_vm5 = vcmp.eq.s32.totalorder %v16649_v24, 1  ;;  %v10940_v12 = vadd.f32 1.0, %v4116_v21  ;;  %v16650_v54 = vld [vmem:[#allocation38_spill] sm:$0xff]  ;;  %v2891_v18 = vsel %vm15851_vm1, %v10685_v2, 0.0  ;;  %v10956_v30 = vpop.permute.xlu0 %4481 }
 0x2b9   : > { %v10937_v53 = vsel %vm15875_vm12, %v16648_v27, %v1488_v37  ;;  %v10943_v26 = vmul.f32 0.5, %v16650_v54  ;;  %v3195_v22 = vsel %vm15828_vm14, %v10685_v2, 0.0  ;;  %v3832_v48 = vmul.f32 %v10659_v57, %v3800_v63  ;;  %16652 = vst [vmem:[#allocation106_spill] sm:$0xff] %v10956_v30  ;;  %v16653_v54 = vld [vmem:[#allocation15_spill] sm:$0xff] }
 0x2ba   : > { %v1920_v37 = vadd.f32 %v10796_v61, %v1889_v14  ;;  %v3484_v27 = vadd.f32 1.0, %v3452_v56  ;;  %v1853_v21 = vsel %vm1823_vm10, %v10738_v58, 0.0  ;;  %4981 = vperm.xlu0 %7006, %v16653_v54   ;;  %v10959_v49 = vadd.f32 1.0, %v4118_v17 }
 0x2bb   : > { %16651 = vst [vmem:[#allocation25_spill] sm:$0xff] %v10943_v26  ;;  %v10961_v4 = vadd.f32 1.0, %v3447_v11  ;;  %v10963_v41 = vmul.f32 1.442695, %v3895_v31  ;;  %v2241_v50 = vmul.f32 %v9992_v25, %v2206_v6  ;;  %v10967_v57 = vand.u32 2147483647, %v10923_v40  ;;  %v10976_v31 = vpop.permute.xlu1 %2583 }
 0x2bc   : > { %v3642_v63 = vmul.f32 %v10862_v3, %v3610_v0  ;;  %v2927_v14 = vmul.f32 %v10020_v28, %v2891_v18  ;;  %7090 = vrcp.f32 %v3484_v27  ;;  %v7085_v58 = vpop.eup %7084  ;;  %v3866_v56 = vsub.f32 0.0, %v10719_v42  ;;  %16654 = vst [vmem:[#allocation38_spill] sm:$0xff] %v10976_v31 }
 0x2bd   : > { %v3229_v17 = vmul.f32 %v10029_v39, %v3195_v22  ;;  %v3196_v11 = vsel %vm15821_vm7, %v10891_v47, 0.0  ;;  %v1888_v6 = vmul.f32 %v9984_v23, %v1853_v21  ;;  %v10979_v54 = vpop.eup %7086  ;;  %v10981_v30 = vmul.f32 %v7085_v58, %v3832_v48 }
 0x2be   : > { %16655 = vst [vmem:[#allocation15_spill] sm:$0xff] %v10979_v54  ;;  %v2205_v0 = vsel %vm15838_vm4, %v10699_v62, 0.0  ;;  %v2272_v18 = vadd.f32 %v2241_v50, %v1920_v37  ;;  %v2316_v27 = vrot.slane %v10891_v47, 1  ;;  %v10987_v22 = vpop.eup %7088  ;;  %v2793_v5 = vsel %vm1824_vm3, %v10932_v52, 0.0 }
 0x2bf   : > { %16656 = vst [vmem:[#allocation124_spill] sm:$0xff] %v10987_v22  ;;  %v1919_v40 = vadd.f32 %v10796_v61, %v1888_v6  ;;  %v2240_v21 = vmul.f32 %v9992_v25, %v2205_v0  ;;  %v15822_v48 = vrot.slane %v10874_v46, 1  ;;  %v3674_v58 = vadd.f32 1.4214138, %v3642_v63 }
 0x2c0   : > { %v3230_v54 = vmul.f32 %v10029_v39, %v3196_v11  ;;  %v16657_v62 = vrot.slane %v10685_v2, 1  ;;  %vm2654_vm2 = vcmp.eq.s32.totalorder %v10976_v31, 1  ;;  %v2792_v63 = vsel %vm1823_vm10, %v10937_v53, 0.0 }
 0x2c1   : > { %v2271_v37 = vadd.f32 %v2240_v21, %v1919_v40  ;;  %v11003_v22 = vsel %vm15990_vm6, %v2316_v27, %v15822_v48  ;;  %v2685_v6 = vsel %vm2654_vm2, %v10807_v36, 0.0  ;;  %v2829_v2 = vmul.f32 %v10018_v7, %v2793_v5 }
 0x2c2   : > { %v2317_v50 = vsel %vm15990_vm6, %v16657_v62, %v2316_v27  ;;  %v3098_v11 = vsel %vm1822_vm13, %v10932_v52, 0.0  ;;  %v2721_v0 = vmul.f32 %v10006_v55, %v2685_v6  ;;  %v2892_v36 = vsel %vm15838_vm4, %v10891_v47, 0.0  ;;  %v16658_v62 = vld [vmem:[#allocation5_spill] sm:$0xff] }
 0x2c3   : > { %v2686_v40 = vsel %vm2655_vm5, %v2317_v50, 0.0  ;;  %v2959_v21 = vadd.f32 %v2927_v14, %v10846_v43  ;;  %v2996_v5 = vsel %vm2653_vm11, %v2317_v50, 0.0  ;;  %vm1826_vm7 = vcmp.eq.s32.totalorder %v16658_v62, 1 }
 0x2c4   : > { %v2722_v27 = vmul.f32 %v10006_v55, %v2686_v40  ;;  %v2753_v8 = vadd.f32 %v2721_v0, %v2271_v37  ;;  %v2828_v48 = vmul.f32 %v10018_v7, %v2792_v63  ;;  %v3032_v59 = vmul.f32 %v10025_v9, %v2996_v5 }
 0x2c5   : > { %v3097_v6 = vsel %vm1821_vm0, %v10937_v53, 0.0  ;;  %v3133_v40 = vmul.f32 %v10027_v45, %v3098_v11  ;;  %v2997_v43 = vsel %vm2654_vm2, %v11003_v22, 0.0  ;;  %v2928_v63 = vmul.f32 %v10020_v28, %v2892_v36 }
 0x2c6   : > { %v2754_v33 = vadd.f32 %v2722_v27, %v2272_v18  ;;  %v3132_v14 = vmul.f32 %v10027_v45, %v3097_v6  ;;  %v11036_v26 = vpop.eup %7090  ;;  %v2860_v37 = vadd.f32 %v2828_v48, %v2753_v8  ;;  %v3064_v0 = vadd.f32 %v3032_v59, %v2959_v21  ;;  %v16660_v6 = vld [vmem:[#allocation74_spill] sm:$0xff] }
 0x2c7   : > { %v3260_v5 = vadd.f32 %v3229_v17, %v10859_v19  ;;  %vm1825_vm13 = vcmp.eq.s32.totalorder %v16659_v13, 1  ;;  %v3580_v1 = vmul.f32 1.0614054, %v11036_v26  ;;  %v3292_v27 = vsel %vm2651_vm8, %v2317_v50, 0.0  ;;  %v11054_v17 = vpop.f32.mrb[24].mxu0 }
 0x2c8   : > { %v11042_v11 = vadd.f32 %v2829_v2, %v2754_v33  ;;  %v3164_v18 = vadd.f32 %v3132_v14, %v10864_v38  ;;  %vm15874_vm0 = vcmp.eq.s32.totalorder %v16660_v6, 1  ;;  %v2960_v31 = vadd.f32 %v2928_v63, %v2860_v37  ;;  %16662 = vst [vmem:[#allocation5_spill] sm:$0xff] %v11054_v17 }
 0x2c9   : > { %v3033_v48 = vmul.f32 %v10025_v9, %v2997_v43  ;;  %v11049_v36 = vadd.f32 %v3133_v40, %v3064_v0  ;;  %v3293_v59 = vsel %vm2652_vm15, %v11003_v22, 0.0  ;;  %v3612_v33 = vadd.f32 -1.4531521, %v3580_v1  ;;  %v16663_v40 = vld [vmem:[#allocation64_spill] sm:$0xff]  ;;  %v16665_v0 = vld [vmem:[#allocation26_spill] sm:$0xff] }
 0x2ca   : > { %v3261_v2 = vadd.f32 %v3230_v54, %v3164_v18  ;;  %v3326_v38 = vmul.f32 %v11059_v44, %v3292_v27  ;;  %v3327_v50 = vmul.f32 %v11059_v44, %v3293_v59  ;;  %7092 = vrcp.f32 %v10961_v4  ;;  %v16667_v4 = vld [vmem:[#allocation122_spill] sm:$0xff] }
 0x2cb   : > { %v3898_v21 = vmul.f32 %v3866_v56, %v10719_v42  ;;  %v11065_v8 = vadd.f32 %v3033_v48, %v2960_v31  ;;  %v11069_v43 = vadd.f32 %v10870_v20, %v16663_v40  ;;  %v3706_v54 = vmul.f32 %v10862_v3, %v3674_v58  ;;  %v16668_v56 = vld [vmem:[#allocation35_spill] sm:$0xff] }
 0x2cc   : > { %v3865_v14 = vsub.f32 0.0, %v10967_v57  ;;  %v11073_v37 = vadd.f32 %v3326_v38, %v3260_v5  ;;  %v11075_v63 = vadd.f32 %v3327_v50, %v3261_v2  ;;  %v11079_v1 = vmul.f32 %v10940_v12, %v16665_v0  ;;  %v11115_v50 = vpop.f32.mrb[25].mxu0 }
 0x2cd   : > { %7094 = vpow2.f32 %v10963_v41  ;;  %v4024_v42 = vsub.f32 1.0, %v10981_v30  ;;  %vm4056_vm15 = vcmp.lt.f32.partialorder %v16667_v4, 0.0  ;;  %v11086_v31 = vadd.f32 %v10870_v20, %v16668_v56  ;;  %v16671_v30 = vld [vmem:[#allocation27_spill] sm:$0xff]  ;;  %16673 = vst [vmem:[#allocation35_spill] sm:$0xff] %v11115_v50 }
 0x2ce   : > { %16664 = vst [vmem:[#allocation77_spill] sm:$0xff] %v11075_v63  ;;  %16666 = vst [vmem:[#allocation32_spill] sm:$0xff] %v11079_v1  ;;  %v11090_v58 = vmul.f32 %v10959_v49, %v10881_v34  ;;  %v3644_v5 = vmul.f32 %v11036_v26, %v3612_v33  ;;  %v1856_v12 = vsel %vm1826_vm7, %v10932_v52, 0.0  ;;  %v11097_v41 = vmul.f32 0.70710677, %v11075_v63 }
 0x2cf   : > { %vm15850_vm8 = vcmp.eq.s32.totalorder %v16671_v30, 1  ;;  %v3449_v18 = vmul.f32 0.3275911, %v10967_v57  ;;  %v3936_v27 = vmul.f32 1.442695, %v3898_v21  ;;  %v11102_v48 = vmul.f32 0.5, %v10688_v15 }
 0x2d0   : > { %16669 = vst [vmem:[#allocation64_spill] sm:$0xff] %v11090_v58  ;;  %16670 = vst [vmem:[#allocation26_spill] sm:$0xff] %v11097_v41  ;;  %v15833_v34 = vrot.slane %v11069_v43, 7  ;;  %v3738_v49 = vadd.f32 -0.28449672, %v3706_v54  ;;  %v3897_v19 = vmul.f32 %v3865_v14, %v10967_v57  ;;  %v3868_v59 = vsub.f32 0.0, %v10916_v32 }
 0x2d1   : > { %16672 = vst [vmem:[#allocation122_spill] sm:$0xff] %v11102_v48  ;;  %v11108_v52 = vand.u32 2147483647, %v11097_v41  ;;  %v4088_v33 = vsub.f32 0.0, %v4024_v42  ;;  %v1891_v2 = vmul.f32 %v9984_v23, %v1856_v12  ;;  %v1492_v38 = vrot.slane %v11086_v31, 7  ;;  %v16674_v14 = vld [vmem:[#allocation108_spill] sm:$0xff] }
 0x2d2   : > { %v1855_v15 = vsel %vm1825_vm13, %v10937_v53, 0.0  ;;  %v3676_v21 = vadd.f32 1.4214138, %v3644_v5  ;;  %v2208_v57 = vsel %vm15874_vm0, %v10874_v46, 0.0  ;;  %v2893_v40 = vsel %vm15847_vm9, %v10874_v46, 0.0 }
 0x2d3   : > { %v3454_v54 = vmul.f32 0.3275911, %v11108_v52  ;;  %vm2657_vm14 = vcmp.eq.s32.totalorder %v16674_v14, 1  ;;  %v11126_v0 = vmul.f32 0.70710677, %v10883_v35  ;;  %v3197_v53 = vsel %vm15851_vm1, %v10874_v46, 0.0 }
 0x2d4   : > { %v11134_v56 = vsel %vm15875_vm12, %v1492_v38, %v15833_v34  ;;  %v16676_v5 = vrot.slane %v10874_v46, 7  ;;  %v3770_v48 = vmul.f32 %v10862_v3, %v3738_v49  ;;  %v3900_v1 = vmul.f32 %v3868_v59, %v10916_v32  ;;  %v11144_v17 = vpop.eup %7092  ;;  %v16678_v34 = vld [vmem:[#allocation40_spill] sm:$0xff] }
 0x2d5   : > { %16675 = vst [vmem:[#allocation125_spill] sm:$0xff] %v11126_v0  ;;  %v3486_v58 = vadd.f32 1.0, %v3454_v54  ;;  %v1890_v50 = vmul.f32 %v9984_v23, %v1855_v15  ;;  %16677 = vst [vmem:[#allocation126_spill] sm:$0xff] %v11144_v17  ;;  %v11146_v10 = vadd.f32 1.0, %v3449_v18  ;;  %v11148_v41 = vmul.f32 1.442695, %v3897_v19  ;;  %v11170_v15 = vpop.permute.xlu1 %2589 }
 0x2d6   : > { %v11139_v12 = vsel %vm15875_vm12, %v16676_v5, %v1492_v38  ;;  %v11151_v63 = vmul.f32 0.5, %v16678_v34  ;;  %v1922_v16 = vadd.f32 %v10796_v61, %v1891_v2  ;;  %v11154_v38 = vpop.permute.xlu0 %4487  ;;  %v16681_v5 = vld [vmem:[#allocation43_spill] sm:$0xff]  ;;  %v11159_v32 = vsel %vm4056_vm15, %v4088_v33, %v4024_v42 }
 0x2d7   : > { %16680 = vst [vmem:[#allocation127_spill] sm:$0xff] %v11154_v38  ;;  %5498 = vperm.xlu0 %7006, %v16681_v5   ;;  %7096 = vpow2.f32 %v3936_v27  ;;  %v3708_v49 = vmul.f32 %v11036_v26, %v3676_v21  ;;  %v2243_v18 = vmul.f32 %v9992_v25, %v2208_v57  ;;  %v11163_v19 = vpop.eup %7094  ;;  %v11166_v34 = vand.u32 2147483647, %v11126_v0 }
 0x2d8   : > { %16679 = vst [vmem:[#allocation40_spill] sm:$0xff] %v11151_v63  ;;  %16682 = vst [vmem:[#allocation43_spill] sm:$0xff] %v11163_v19  ;;  %v2929_v59 = vmul.f32 %v10020_v28, %v2893_v40  ;;  %v3231_v2 = vmul.f32 %v10029_v39, %v3197_v53  ;;  %7098 = vrcp.f32 %v3486_v58  ;;  %v3802_v4 = vadd.f32 0.2548296, %v3770_v48 }
 0x2d9   : > { %v11172_v42 = vmul.f32 1.442695, %v3900_v1  ;;  %v1921_v27 = vadd.f32 %v10796_v61, %v1890_v50  ;;  %v2207_v33 = vsel %vm15850_vm8, %v10891_v47, 0.0  ;;  %v3198_v21 = vsel %vm15838_vm4, %v11086_v31, 0.0 }
 0x2da   : > { %v2242_v57 = vmul.f32 %v9992_v25, %v2207_v33  ;;  %v2274_v40 = vadd.f32 %v2243_v18, %v1922_v16  ;;  %v2320_v58 = vrot.slane %v11086_v31, 1  ;;  %v3740_v54 = vadd.f32 -0.28449672, %v3708_v49 }
 0x2db   : > { %v2795_v1 = vsel %vm1826_vm7, %v11134_v56, 0.0  ;;  %v15836_v48 = vrot.slane %v11069_v43, 1  ;;  %vm2656_vm15 = vcmp.eq.s32.totalorder %v11170_v15, 1  ;;  %v16683_v47 = vrot.slane %v10874_v46, 1 }
 0x2dc   : > { %v2273_v50 = vadd.f32 %v2242_v57, %v1921_v27  ;;  %v2687_v16 = vsel %vm2656_vm15, %v11003_v22, 0.0  ;;  %v2794_v5 = vsel %vm1825_vm13, %v11139_v12, 0.0  ;;  %v3232_v49 = vmul.f32 %v10029_v39, %v3198_v21 }
 0x2dd   : > { %v2321_v53 = vsel %vm15990_vm6, %v16683_v47, %v2320_v58  ;;  %v11201_v18 = vsel %vm15990_vm6, %v2320_v58, %v15836_v48  ;;  %v2723_v27 = vmul.f32 %v10006_v55, %v2687_v16  ;;  %v3100_v22 = vsel %vm1824_vm3, %v11134_v56, 0.0 }
 0x2de   : > { %v2688_v46 = vsel %vm2657_vm14, %v2321_v53, 0.0  ;;  %v2894_v21 = vsel %vm15850_vm8, %v11086_v31, 0.0  ;;  %v2961_v57 = vadd.f32 %v2929_v59, %v11042_v11  ;;  %v2831_v58 = vmul.f32 %v10018_v7, %v2795_v1 }
 0x2df   : > { %v2724_v33 = vmul.f32 %v10006_v55, %v2688_v46  ;;  %v2755_v47 = vadd.f32 %v2723_v27, %v2273_v50  ;;  %v2830_v48 = vmul.f32 %v10018_v7, %v2794_v5  ;;  %v2998_v16 = vsel %vm2655_vm5, %v2321_v53, 0.0 }
 0x2e0   : > { %vm1828_vm4 = vcmp.eq.s32.totalorder %v16684_v51, 1  ;;  %v2999_v46 = vsel %vm2656_vm15, %v11201_v18, 0.0  ;;  %v3034_v38 = vmul.f32 %v10025_v9, %v2998_v16  ;;  %v3099_v11 = vsel %vm1823_vm10, %v11139_v12, 0.0 }
 0x2e1   : > { %v2756_v60 = vadd.f32 %v2724_v33, %v2274_v40  ;;  %v7097_v59 = vpop.eup %7096  ;;  %v3135_v1 = vmul.f32 %v10027_v45, %v3100_v22  ;;  %v2862_v50 = vadd.f32 %v2830_v48, %v2755_v47  ;;  %v2930_v5 = vmul.f32 %v10020_v28, %v2894_v21  ;;  %v16686_v21 = vld [vmem:[#allocation76_spill] sm:$0xff] }
 0x2e2   : > { %v3134_v27 = vmul.f32 %v10027_v45, %v3099_v11  ;;  %v11229_v0 = vpop.eup %7098  ;;  %v3035_v33 = vmul.f32 %v10025_v9, %v2999_v46  ;;  %v3066_v19 = vadd.f32 %v3034_v38, %v2961_v57  ;;  %v3262_v16 = vadd.f32 %v3231_v2, %v11049_v36 }
 0x2e3   : > { %v11231_v40 = vadd.f32 %v2831_v58, %v2756_v60  ;;  %v3582_v29 = vmul.f32 1.0614054, %v11229_v0  ;;  %v2962_v17 = vadd.f32 %v2930_v5, %v2862_v50  ;;  %v3294_v48 = vsel %vm2653_vm11, %v2321_v53, 0.0  ;;  %v16697_v58 = vld [vmem:[#allocation4_spill] sm:$0xff] }
 0x2e4   : > { %v3166_v63 = vadd.f32 %v3134_v27, %v11065_v8  ;;  %vm15873_vm3 = vcmp.eq.s32.totalorder %v16686_v21, 1  ;;  %v3834_v47 = vmul.f32 %v10862_v3, %v3802_v4  ;;  %v11241_v11 = vadd.f32 %v3135_v1, %v3066_v19  ;;  %v16688_v3 = vld [vmem:[#allocation120_spill] sm:$0xff] }
 0x2e5   : > { %v3295_v38 = vsel %vm2654_vm2, %v11201_v18, 0.0  ;;  %v3328_v36 = vmul.f32 %v11059_v44, %v3294_v48  ;;  %v3614_v2 = vadd.f32 -1.4531521, %v3582_v29  ;;  %v11247_v57 = vadd.f32 %v3035_v33, %v2962_v17  ;;  %v16691_v27 = vld [vmem:[#allocation36_spill] sm:$0xff] }
 0x2e6   : > { %v3263_v60 = vadd.f32 %v3232_v49, %v3166_v63  ;;  %v3329_v8 = vmul.f32 %v11059_v44, %v3295_v38  ;;  %v4184_v53 = vadd.f32 1.0, %v11159_v32  ;;  %v3451_v46 = vmul.f32 0.3275911, %v11166_v34  ;;  %v16690_v63 = vld [vmem:[#allocation79_spill] sm:$0xff] }
 0x2e7   : > { %v11252_v50 = vadd.f32 %v3328_v36, %v3262_v16  ;;  %v11256_v19 = vadd.f32 %v10870_v20, %v16688_v3  ;;  %v3772_v4 = vmul.f32 %v11036_v26, %v3740_v54  ;;  %v3646_v1 = vmul.f32 %v11229_v0, %v3614_v2 }
 0x2e8   : > { %v3870_v17 = vsub.f32 0.0, %v11108_v52  ;;  %v11261_v5 = vadd.f32 %v3329_v8, %v3263_v60  ;;  %vm1827_vm11 = vcmp.eq.s32.totalorder %v16690_v63, 1  ;;  %v11264_v49 = vmul.f32 %v7097_v59, %v3834_v47  ;;  %v16693_v59 = vld [vmem:[#allocation25_spill] sm:$0xff]  ;;  %v16696_v47 = vld [vmem:[#allocation102_spill] sm:$0xff] }
 0x2e9   : > { %v3867_v32 = vsub.f32 0.0, %v11166_v34  ;;  %7100 = vpow2.f32 %v11172_v42  ;;  %v11270_v33 = vadd.f32 %v10870_v20, %v16691_v27  ;;  %v3678_v54 = vadd.f32 1.4214138, %v3646_v1  ;;  %v7238_v1 = vld [vmem:[%s15596_s1 + $0x10] sm:$0xff] }
 0x2ea   : > { %16689 = vst [vmem:[#allocation6_spill] sm:$0xff] %v11261_v5  ;;  %7102 = vrcp.f32 %v11146_v10  ;;  %v1858_v16 = vsel %vm1828_vm4, %v11134_v56, 0.0  ;;  %v11277_v29 = vmul.f32 0.70710677, %v11261_v5  ;;  %v11280_v22 = vmul.f32 %v4184_v53, %v16693_v59  ;;  %v16709_v5 = vld [vmem:[#allocation29_spill] sm:$0xff] }
 0x2eb   : > { %7104 = vpow2.f32 %v11148_v41  ;;  %v11284_v42 = vmul.f32 0.5, %v10883_v35  ;;  %v15843_v48 = vrot.slane %v11256_v19, 7  ;;  %vm15870_vm10 = vcmp.eq.s32.totalorder %v16696_v47, 1 }
 0x2ec   : > { %16692 = vst [vmem:[#allocation104_spill] sm:$0xff] %v11277_v29  ;;  %16694 = vst [vmem:[#allocation38_spill] sm:$0xff] %v11280_v22  ;;  %v3804_v10 = vadd.f32 0.2548296, %v3772_v4  ;;  %v11289_v38 = vmul.f32 0.5, %v16697_v58  ;;  %v3902_v56 = vmul.f32 %v3870_v17, %v11108_v52  ;;  %v15848_v2 = vsub.f32 1.0, %v11264_v49 }
 0x2ed   : > { %16695 = vst [vmem:[#allocation120_spill] sm:$0xff] %v11284_v42  ;;  %v11293_v36 = vand.u32 2147483647, %v11277_v29  ;;  %v3899_v41 = vmul.f32 %v3867_v32, %v11166_v34  ;;  %v1893_v35 = vmul.f32 %v9984_v23, %v1858_v16  ;;  %v1496_v60 = vrot.slane %v11270_v33, 7  ;;  %v16700_v32 = vld [vmem:[#allocation112_spill] sm:$0xff] }
 0x2ee   : > { %16698 = vst [vmem:[#allocation36_spill] sm:$0xff] %v11289_v38  ;;  %v11299_v8 = vadd.f32 1.0, %v3451_v46  ;;  %v3710_v53 = vmul.f32 %v11229_v0, %v3678_v54  ;;  %v2210_v3 = vsel %vm15873_vm3, %v11069_v43, 0.0  ;;  %v11307_v4 = vmul.f32 0.70710677, %v11073_v37 }
 0x2ef   : > { %v3456_v52 = vmul.f32 0.3275911, %v11293_v36  ;;  %v2895_v34 = vsel %vm15874_vm0, %v11069_v43, 0.0  ;;  %v11315_v46 = vsel %vm15875_vm12, %v1496_v60, %v15843_v48  ;;  %v6743_v17 = vadd.s32 4294967294, %v7238_v1 }
 0x2f0   : > { %16699 = vst [vmem:[#allocation25_spill] sm:$0xff] %v11307_v4  ;;  %vm2659_vm2 = vcmp.eq.s32.totalorder %v16700_v32, 1  ;;  %v3836_v27 = vmul.f32 %v11036_v26, %v3804_v10  ;;  %v3944_v54 = vmul.f32 1.442695, %v3902_v56  ;;  %v3199_v59 = vsel %vm15847_vm9, %v11069_v43, 0.0 }
 0x2f1   : > { %v3488_v58 = vadd.f32 1.0, %v3456_v52  ;;  %v11327_v42 = vsub.f32 0.0, %v15848_v2  ;;  %v11329_v48 = vmul.f32 1.442695, %v3899_v41  ;;  %v1924_v22 = vadd.f32 %v10796_v61, %v1893_v35 }
 0x2f2   : > { %v3200_v1 = vsel %vm15850_vm8, %v11270_v33, 0.0  ;;  %v3742_v29 = vadd.f32 -0.28449672, %v3710_v53  ;;  %v2245_v26 = vmul.f32 %v9992_v25, %v2210_v3  ;;  %v1857_v10 = vsel %vm1827_vm11, %v11139_v12, 0.0  ;;  %v11351_v3 = vpop.permute.xlu1 %2595 }
 0x2f3   : > { %7106 = vrcp.f32 %v3488_v58  ;;  %v7101_v56 = vpop.eup %7100  ;;  %v11340_v52 = vand.u32 2147483647, %v11307_v4  ;;  %v2931_v41 = vmul.f32 %v10020_v28, %v2895_v34  ;;  %v3233_v35 = vmul.f32 %v10029_v39, %v3199_v59  ;;  %16703 = vst [vmem:[#allocation112_spill] sm:$0xff] %v11351_v3 }
 0x2f4   : > { %vm5729_vm9 = vcmp.ge.s32.totalorder %v6743_v17, 0  ;;  %v11344_v2 = vpop.eup %7102  ;;  %v11346_v30 = vmul.f32 %v7101_v56, %v3836_v27  ;;  %7108 = vpow2.f32 %v3944_v54  ;;  %v11349_v53 = vmul.f32 %v10029_v39, %v3200_v1 }
 0x2f5   : > { %16702 = vst [vmem:[#allocation4_spill] sm:$0xff] %v11344_v2  ;;  %vm5761_vm8 = vcmp.lt.s32.totalorder %v6743_v17, 16  ;;  %v11353_v12 = vpop.eup %7104  ;;  %v16705_v58 = vrot.slane %v11069_v43, 7  ;;  %v1892_v59 = vmul.f32 %v9984_v23, %v1857_v10  ;;  %v2209_v27 = vsel %vm15870_vm10, %v11086_v31, 0.0  ;;  %v16707_v31 = vld [vmem:[#allocation34_spill] sm:$0xff] }
 0x2f6   : > { %16704 = vst [vmem:[#allocation128_spill] sm:$0xff] %v11353_v12  ;;  %vm5793_vm1 = vmand %vm5729_vm9, %vm5761_vm8  ;;  %v2276_v54 = vadd.f32 %v2245_v26, %v1924_v22  ;;  %v3774_v1 = vmul.f32 %v11229_v0, %v3742_v29  ;;  %v2797_v17 = vsel %vm1828_vm4, %v11315_v46, 0.0  ;;  %v16706_v56 = vmov 0  }
 0x2f7   : > { %v11358_v34 = vsel %vm15875_vm12, %v16705_v58, %v1496_v60  ;;  %v5825_v16 = vsel %vm5793_vm1, 1, %v16706_v56  ;;  %v2324_v4 = vrot.slane %v11270_v33, 1  ;;  %v1923_v60 = vadd.f32 %v10796_v61, %v1892_v59 }
 0x2f8   : > { %5862 = vperm.xlu1 %7007, %v5825_v16   ;;  %v2244_v10 = vmul.f32 %v9992_v25, %v2209_v27  ;;  %v15855_v58 = vrot.slane %v11256_v19, 1  ;;  %vm2658_vm9 = vcmp.eq.s32.totalorder %v11351_v3, 1  ;;  %vm4058_vm8 = vcmp.lt.f32.partialorder %v16707_v31, 0.0 }
 0x2f9   : > { %v3102_v29 = vsel %vm1826_vm7, %v11315_v46, 0.0  ;;  %v16708_v22 = vrot.slane %v11069_v43, 1  ;;  %v2689_v16 = vsel %vm2658_vm9, %v11201_v18, 0.0  ;;  %v2796_v59 = vsel %vm1827_vm11, %v11358_v34, 0.0 }
 0x2fa   : > { %v2275_v27 = vadd.f32 %v2244_v10, %v1923_v60  ;;  %v11390_v12 = vsel %vm15990_vm6, %v2324_v4, %v15855_v58  ;;  %v2725_v43 = vmul.f32 %v10006_v55, %v2689_v16  ;;  %v2896_v18 = vsel %vm15870_vm10, %v11270_v33, 0.0 }
 0x2fb   : > { %v2325_v26 = vsel %vm15990_vm6, %v16708_v22, %v2324_v4  ;;  %v3806_v22 = vadd.f32 0.2548296, %v3774_v1  ;;  %v2963_v56 = vadd.f32 %v2931_v41, %v11231_v40  ;;  %v2833_v60 = vmul.f32 %v10018_v7, %v2797_v17  ;;  %v16710_v1 = vld [vmem:[#allocation8_spill] sm:$0xff] }
 0x2fc   : > { %v2690_v62 = vsel %vm2659_vm2, %v2325_v26, 0.0  ;;  %v2757_v10 = vadd.f32 %v2725_v43, %v2275_v27  ;;  %v2832_v4 = vmul.f32 %v10018_v7, %v2796_v59  ;;  %v3000_v58 = vsel %vm2657_vm14, %v2325_v26, 0.0  ;;  %5417 = vperm.xlu1 %7007, %v16709_v5  }
 0x2fd   : > { %v2726_v2 = vmul.f32 %v10006_v55, %v2690_v62  ;;  %v11405_v16 = vpop.eup %7106  ;;  %vm1830_vm1 = vcmp.eq.s32.totalorder %v16710_v1, 1  ;;  %v3137_v62 = vmul.f32 %v10027_v45, %v3102_v29  ;;  %v3001_v40 = vsel %vm2658_vm9, %v11390_v12, 0.0 }
 0x2fe   : > { %v3036_v41 = vmul.f32 %v10025_v9, %v3000_v58  ;;  %v3584_v17 = vmul.f32 1.0614054, %v11405_v16  ;;  %v2864_v59 = vadd.f32 %v2832_v4, %v2757_v10  ;;  %v2932_v27 = vmul.f32 %v10020_v28, %v2896_v18  ;;  %v7109_v43 = vpop.eup %7108 }
 0x2ff   : > { %v2758_v38 = vadd.f32 %v2726_v2, %v2276_v54  ;;  %v3101_v5 = vsel %vm1825_vm13, %v11358_v34, 0.0  ;;  %v3264_v54 = vadd.f32 %v3233_v35, %v11241_v11  ;;  %v3037_v58 = vmul.f32 %v10025_v9, %v3001_v40 }
 0x300   : > { %v3068_v29 = vadd.f32 %v3036_v41, %v2963_v56  ;;  %v3136_v2 = vmul.f32 %v10027_v45, %v3101_v5  ;;  %v3616_v3 = vadd.f32 -1.4531521, %v3584_v17  ;;  %v2964_v63 = vadd.f32 %v2932_v27, %v2864_v59  ;;  %v16711_v56 = vld [vmem:[#allocation78_spill] sm:$0xff]  ;;  %v16714_v41 = vld [vmem:[#allocation123_spill] sm:$0xff]  ;;  %v16715_v27 = vld [vmem:[#allocation80_spill] sm:$0xff] }
 0x301   : > { %v11418_v14 = vadd.f32 %v2833_v60, %v2758_v38  ;;  %v3296_v10 = vsel %vm2655_vm5, %v2325_v26, 0.0  ;;  %v3297_v13 = vsel %vm2656_vm15, %v11390_v12, 0.0  ;;  %vm15903_vm7 = vcmp.eq.s32.totalorder %v16711_v56, 1  ;;  %v16716_v5 = vld [vmem:[#allocation103_spill] sm:$0xff] }
 0x302   : > { %v3168_v18 = vadd.f32 %v3136_v2, %v11247_v57  ;;  %v11426_v4 = vadd.f32 %v3137_v62, %v3068_v29  ;;  %v3330_v38 = vmul.f32 %v11059_v44, %v3296_v10  ;;  %v16712_v11 = vsub.f32 1.0, %v11264_v49  ;;  %v16713_v57 = vld [vmem:[#allocation56_spill] sm:$0xff] }
 0x303   : > { %v3648_v24 = vmul.f32 %v11405_v16, %v3616_v3  ;;  %v11439_v26 = vadd.f32 %v3037_v58, %v2964_v63  ;;  %v11443_v60 = vadd.f32 %v10870_v20, %v16713_v57  ;;  %v3331_v62 = vmul.f32 %v11059_v44, %v3297_v13 }
 0x304   : > { %v4122_v35 = vsel %vm4058_vm8, %v11327_v42, %v16712_v11  ;;  %v3265_v15 = vadd.f32 %v11349_v53, %v3168_v18  ;;  %v11447_v40 = vadd.f32 %v3330_v38, %v3264_v54  ;;  %v11451_v49 = vadd.f32 %v10870_v20, %v16714_v41 }
 0x305   : > { %v3838_v42 = vmul.f32 %v11229_v0, %v3806_v22  ;;  %v3869_v3 = vsub.f32 0.0, %v11340_v52  ;;  %v3872_v63 = vsub.f32 0.0, %v11293_v36  ;;  %v15860_v31 = vrot.slane %v11443_v60, 7 }
 0x306   : > { %7110 = vrcp.f32 %v11299_v8  ;;  %v4028_v53 = vsub.f32 1.0, %v11346_v30  ;;  %v3680_v17 = vadd.f32 1.4214138, %v3648_v24  ;;  %v11459_v59 = vadd.f32 %v3331_v62, %v3265_v15  ;;  %v16718_v30 = vld [vmem:[#allocation63_spill] sm:$0xff] }
 0x307   : > { %vm1829_vm5 = vcmp.eq.s32.totalorder %v16715_v27, 1  ;;  %vm15886_vm13 = vcmp.eq.s32.totalorder %v16716_v5, 1  ;;  %v4186_v29 = vadd.f32 1.0, %v4122_v35  ;;  %v11464_v0 = vmul.f32 0.70710677, %v11252_v50  ;;  %v16720_v35 = vld [vmem:[#allocation40_spill] sm:$0xff] }
 0x308   : > { %v1860_v22 = vsel %vm1830_vm1, %v11315_v46, 0.0  ;;  %v1500_v2 = vrot.slane %v11451_v49, 7  ;;  %7112 = vpow2.f32 %v11329_v48  ;;  %vm4060_vm15 = vcmp.lt.f32.partialorder %v16718_v30, 0.0  ;;  %v16724_v15 = vld [vmem:[#allocation119_spill] sm:$0xff]  ;;  %v11534_v30 = vpop.permute.xlu1 %2601 }
 0x309   : > { %16717 = vst [vmem:[#allocation34_spill] sm:$0xff] %v11464_v0  ;;  %v3453_v8 = vmul.f32 0.3275911, %v11340_v52  ;;  %v11474_v54 = vmul.f32 0.70710677, %v11459_v59  ;;  %v3901_v58 = vmul.f32 %v3869_v3, %v11340_v52  ;;  %v11477_v10 = vmul.f32 %v7109_v43, %v3838_v42 }
 0x30a   : > { %v3904_v18 = vmul.f32 %v3872_v63, %v11293_v36  ;;  %v11483_v46 = vsel %vm15875_vm12, %v1500_v2, %v15860_v31  ;;  %v4092_v13 = vsub.f32 0.0, %v4028_v53  ;;  %v3712_v48 = vmul.f32 %v11405_v16, %v3680_v17  ;;  %v16723_v36 = vld [vmem:[#allocation77_spill] sm:$0xff] }
 0x30b   : > { %16719 = vst [vmem:[#allocation29_spill] sm:$0xff] %v11474_v54  ;;  %v1895_v38 = vmul.f32 %v9984_v23, %v1860_v22  ;;  %v11488_v11 = vand.u32 2147483647, %v11474_v54  ;;  %v11491_v24 = vmul.f32 %v4186_v29, %v16720_v35  ;;  %v11494_v52 = vmul.f32 0.5, %v11073_v37 }
 0x30c   : > { %v11497_v43 = vmul.f32 0.5, %v16723_v36  ;;  %v11500_v57 = vand.u32 2147483647, %v11464_v0  ;;  %vm2661_vm8 = vcmp.eq.s32.totalorder %v16724_v15, 1  ;;  %v11503_v62 = vadd.f32 1.0, %v3453_v8 }
 0x30d   : > { %16721 = vst [vmem:[#allocation8_spill] sm:$0xff] %v11491_v24  ;;  %16722 = vst [vmem:[#allocation56_spill] sm:$0xff] %v11494_v52  ;;  %v2212_v41 = vsel %vm15903_vm7, %v11256_v19, 0.0  ;;  %v2897_v42 = vsel %vm15873_vm3, %v11256_v19, 0.0  ;;  %v3458_v37 = vmul.f32 0.3275911, %v11488_v11  ;;  %v11520_v22 = vsel %vm4060_vm15, %v4092_v13, %v4028_v53 }
 0x30e   : > { %v11512_v3 = vmul.f32 1.442695, %v3901_v58  ;;  %v3948_v17 = vmul.f32 1.442695, %v3904_v18  ;;  %v3201_v29 = vsel %vm15874_vm0, %v11256_v19, 0.0  ;;  %v1926_v35 = vadd.f32 %v10796_v61, %v1895_v38 }
 0x30f   : > { %v3744_v8 = vadd.f32 -0.28449672, %v3712_v48  ;;  %v3490_v36 = vadd.f32 1.0, %v3458_v37  ;;  %v2247_v58 = vmul.f32 %v9992_v25, %v2212_v41  ;;  %v2933_v0 = vmul.f32 %v10020_v28, %v2897_v42 }
 0x310   : > { %v16725_v18 = vrot.slane %v11256_v19, 7  ;;  %v11531_v6 = vpop.eup %7110  ;;  %v3235_v53 = vmul.f32 %v10029_v39, %v3201_v29  ;;  %v1859_v13 = vsel %vm1829_vm5, %v11358_v34, 0.0  ;;  %v2211_v48 = vsel %vm15886_vm13, %v11270_v33, 0.0 }
 0x311   : > { %16726 = vst [vmem:[#allocation123_spill] sm:$0xff] %v11531_v6  ;;  %7114 = vrcp.f32 %v3490_v36  ;;  %v16727_v38 = vsub.f32 1.0, %v11477_v10  ;;  %v1894_v42 = vmul.f32 %v9984_v23, %v1859_v13  ;;  %v3776_v29 = vmul.f32 %v11405_v16, %v3744_v8 }
 0x312   : > { %v11529_v63 = vsel %vm15875_vm12, %v16725_v18, %v1500_v2  ;;  %7116 = vpow2.f32 %v3948_v17  ;;  %v3202_v2 = vsel %vm15870_vm10, %v11451_v49, 0.0  ;;  %v11550_v37 = vpop.eup %7112  ;;  %v2278_v34 = vadd.f32 %v2247_v58, %v1926_v35 }
 0x313   : > { %v11544_v41 = vsub.f32 0.0, %v16727_v38  ;;  %16728 = vst [vmem:[#allocation80_spill] sm:$0xff] %v11550_v37  ;;  %v2328_v36 = vrot.slane %v11451_v49, 1  ;;  %v15864_v33 = vrot.slane %v11443_v60, 1  ;;  %v2799_v18 = vsel %vm1830_vm1, %v11483_v46, 0.0 }
 0x314   : > { %v1925_v17 = vadd.f32 %v10796_v61, %v1894_v42  ;;  %v2246_v38 = vmul.f32 %v9992_v25, %v2211_v48  ;;  %vm2660_vm15 = vcmp.eq.s32.totalorder %v11534_v30, 1  ;;  %v16729_v13 = vrot.slane %v11256_v19, 1  ;;  %v16764_v30 = vld [vmem:[#allocation92_spill] sm:$0xff] }
 0x315   : > { %v11567_v8 = vsel %vm15990_vm6, %v2328_v36, %v15864_v33  ;;  %v2691_v35 = vsel %vm2660_vm15, %v11390_v12, 0.0  ;;  %v2798_v61 = vsel %vm1829_vm5, %v11529_v63, 0.0  ;;  %v3104_v58 = vsel %vm1828_vm4, %v11483_v46, 0.0 }
 0x316   : > { %v2329_v31 = vsel %vm15990_vm6, %v16729_v13, %v2328_v36  ;;  %v2277_v19 = vadd.f32 %v2246_v38, %v1925_v17  ;;  %v2727_v42 = vmul.f32 %v10006_v55, %v2691_v35  ;;  %v2898_v12 = vsel %vm15886_vm13, %v11451_v49, 0.0  ;;  %v16730_v35 = vld [vmem:[#allocation9_spill] sm:$0xff] }
 0x317   : > { %v2692_v48 = vsel %vm2661_vm8, %v2329_v31, 0.0  ;;  %v2965_v13 = vadd.f32 %v2933_v0, %v11418_v14  ;;  %v3002_v33 = vsel %vm2659_vm2, %v2329_v31, 0.0  ;;  %v2835_v51 = vmul.f32 %v10018_v7, %v2799_v18 }
 0x318   : > { %v2728_v36 = vmul.f32 %v10006_v55, %v2692_v48  ;;  %v2759_v47 = vadd.f32 %v2727_v42, %v2277_v19  ;;  %v2834_v17 = vmul.f32 %v10018_v7, %v2798_v61  ;;  %v3003_v38 = vsel %vm2660_vm15, %v11567_v8, 0.0 }
 0x319   : > { %vm1832_vm4 = vcmp.eq.s32.totalorder %v16730_v35, 1  ;;  %v3139_v48 = vmul.f32 %v10027_v45, %v3104_v58  ;;  %v2934_v37 = vmul.f32 %v10020_v28, %v2898_v12  ;;  %v3038_v14 = vmul.f32 %v10025_v9, %v3002_v33 }
 0x31a   : > { %v2760_v52 = vadd.f32 %v2728_v36, %v2278_v34  ;;  %v2866_v0 = vadd.f32 %v2834_v17, %v2759_v47  ;;  %v3103_v18 = vsel %vm1827_vm11, %v11529_v63, 0.0  ;;  %v3266_v61 = vadd.f32 %v3235_v53, %v11426_v4  ;;  %v16733_v47 = vld [vmem:[#allocation81_spill] sm:$0xff] }
 0x31b   : > { %v3298_v42 = vsel %vm2657_vm14, %v2329_v31, 0.0  ;;  %v11603_v6 = vpop.eup %7114  ;;  %v3039_v34 = vmul.f32 %v10025_v9, %v3003_v38  ;;  %v3070_v58 = vadd.f32 %v3038_v14, %v2965_v13  ;;  %v3138_v36 = vmul.f32 %v10027_v45, %v3103_v18  ;;  %v16735_v13 = vld [vmem:[#allocation86_spill] sm:$0xff] }
 0x31c   : > { %v11605_v54 = vadd.f32 %v2835_v51, %v2760_v52  ;;  %v7117_v33 = vpop.eup %7116  ;;  %vm15902_vm10 = vcmp.eq.s32.totalorder %v16733_v47, 1  ;;  %v3586_v24 = vmul.f32 1.0614054, %v11603_v6  ;;  %v2966_v12 = vadd.f32 %v2934_v37, %v2866_v0  ;;  %v16736_v0 = vld [vmem:[#allocation70_spill] sm:$0xff] }
 0x31d   : > { %v3299_v53 = vsel %vm2658_vm9, %v11567_v8, 0.0  ;;  %v3332_v31 = vmul.f32 %v11059_v44, %v3298_v42  ;;  %v3236_v52 = vmul.f32 %v10029_v39, %v3202_v2  ;;  %v3170_v51 = vadd.f32 %v3138_v36, %v11439_v26  ;;  %v16737_v36 = vld [vmem:[#allocation26_spill] sm:$0xff] }
 0x31e   : > { %v11617_v17 = vadd.f32 %v3139_v48, %v3070_v58  ;;  %v11621_v38 = vadd.f32 %v10870_v20, %v16735_v13  ;;  %v3455_v14 = vmul.f32 0.3275911, %v11500_v57  ;;  %v11624_v18 = vadd.f32 %v3039_v34, %v2966_v12 }
 0x31f   : > { %v11626_v37 = vadd.f32 %v3332_v31, %v3266_v61  ;;  %v11630_v19 = vadd.f32 %v10870_v20, %v16736_v0  ;;  %v3618_v42 = vadd.f32 -1.4531521, %v3586_v24  ;;  %v3267_v2 = vadd.f32 %v3236_v52, %v3170_v51  ;;  %v16740_v31 = vld [vmem:[#allocation82_spill] sm:$0xff] }
 0x320   : > { %v3333_v26 = vmul.f32 %v11059_v44, %v3299_v53  ;;  %v15871_v48 = vrot.slane %v11621_v38, 7  ;;  %v4188_v58 = vadd.f32 1.0, %v11520_v22  ;;  %vm4062_vm14 = vcmp.lt.f32.partialorder %v16737_v36, 0.0  ;;  %v16741_v22 = vld [vmem:[#allocation105_spill] sm:$0xff] }
 0x321   : > { %v3808_v4 = vadd.f32 0.2548296, %v3776_v29  ;;  %v16738_v34 = vsub.f32 0.0, %v11500_v57  ;;  %7118 = vrcp.f32 %v11503_v62  ;;  %v16739_v20 = vsub.f32 1.0, %v11477_v10 }
 0x322   : > { %v11643_v12 = vadd.f32 %v3333_v26, %v3267_v2  ;;  %v1504_v53 = vrot.slane %v11630_v19, 7  ;;  %vm1831_vm11 = vcmp.eq.s32.totalorder %v16740_v31, 1  ;;  %vm15898_vm9 = vcmp.eq.s32.totalorder %v16741_v22, 1  ;;  %v16779_v22 = vld [vmem:[#allocation87_spill] sm:$0xff]  ;;  %v16780_v31 = vld [vmem:[#allocation29_spill] sm:$0xff] }
 0x323   : > { %v3903_v61 = vmul.f32 %v16738_v34, %v11500_v57  ;;  %v4126_v24 = vsel %vm4062_vm14, %v11544_v41, %v16739_v20  ;;  %7120 = vpow2.f32 %v11512_v3  ;;  %v11650_v29 = vmul.f32 0.70710677, %v11447_v40  ;;  %v16744_v3 = vld [vmem:[#allocation36_spill] sm:$0xff] }
 0x324   : > { %v3874_v57 = vsub.f32 0.0, %v11488_v11  ;;  %v1862_v10 = vsel %vm1832_vm4, %v11483_v46, 0.0  ;;  %v3487_v62 = vadd.f32 1.0, %v3455_v14  ;;  %v3650_v41 = vmul.f32 %v11603_v6, %v3618_v42 }
 0x325   : > { %16742 = vst [vmem:[#allocation63_spill] sm:$0xff] %v11650_v29  ;;  %v11658_v52 = vmul.f32 0.70710677, %v11643_v12  ;;  %v11663_v51 = vsel %vm15875_vm12, %v1504_v53, %v15871_v48  ;;  %v11666_v13 = vmul.f32 %v4188_v58, %v16744_v3  ;;  %v4190_v0 = vadd.f32 1.0, %v4126_v24 }
 0x326   : > { %v3840_v2 = vmul.f32 %v11405_v16, %v3808_v4  ;;  %v3946_v26 = vmul.f32 1.442695, %v3903_v61  ;;  %v11670_v46 = vmul.f32 0.5, %v11252_v50  ;;  %v2214_v14 = vsel %vm15902_vm10, %v11443_v60, 0.0  ;;  %v16747_v4 = vld [vmem:[#allocation6_spill] sm:$0xff] }
 0x327   : > { %16743 = vst [vmem:[#allocation40_spill] sm:$0xff] %v11658_v52  ;;  %16745 = vst [vmem:[#allocation77_spill] sm:$0xff] %v11666_v13  ;;  %v1897_v42 = vmul.f32 %v9984_v23, %v1862_v10  ;;  %v11677_v36 = vand.u32 2147483647, %v11658_v52  ;;  %v11680_v34 = vand.u32 2147483647, %v11650_v29  ;;  %v3906_v58 = vmul.f32 %v3874_v57, %v11488_v11 }
 0x328   : > { %16746 = vst [vmem:[#allocation119_spill] sm:$0xff] %v11670_v46  ;;  %v2899_v16 = vsel %vm15903_vm7, %v11443_v60, 0.0  ;;  %v3203_v50 = vsel %vm15873_vm3, %v11443_v60, 0.0  ;;  %7122 = vrcp.f32 %v3487_v62  ;;  %v11690_v61 = vmul.f32 0.5, %v16747_v4  ;;  %v16748_v10 = vld [vmem:[#allocation21_spill] sm:$0xff]  ;;  %v16760_v52 = vld [vmem:[#allocation84_spill] sm:$0xff] }
 0x329   : > { %v3682_v20 = vadd.f32 1.4214138, %v3650_v41  ;;  %v3460_v24 = vmul.f32 0.3275911, %v11677_v36  ;;  %vm2663_vm14 = vcmp.eq.s32.totalorder %v16748_v10, 1  ;;  %v11695_v3 = vmul.f32 %v4190_v0, %v11497_v43 }
 0x32a   : > { %7124 = vpow2.f32 %v3946_v26  ;;  %v11697_v11 = vmul.f32 %v7117_v33, %v3840_v2  ;;  %v2249_v57 = vmul.f32 %v9992_v25, %v2214_v14  ;;  %v2935_v48 = vmul.f32 %v10020_v28, %v2899_v16  ;;  %v11707_v41 = vld [vmem:[%s15602_s7] ss:$0 sm:$0xff] }
 0x32b   : > { %16749 = vst [vmem:[#allocation9_spill] sm:$0xff] %v11695_v3  ;;  %v11702_v62 = vmul.f32 %v10029_v39, %v3203_v50  ;;  %v1928_v4 = vadd.f32 %v11707_v41, %v1897_v42  ;;  %v3492_v21 = vadd.f32 1.0, %v3460_v24  ;;  %v11711_v0 = vmul.f32 1.442695, %v3906_v58  ;;  %v7240_v33 = vld [vmem:[%s15596_s1 + $0x20] sm:$0xff]  ;;  %v11721_v16 = vpop.eup %7118 }
 0x32c   : > { %v6745_v2 = vadd.s32 4294967294, %v7240_v33  ;;  %v16750_v26 = vrot.slane %v11443_v60, 7  ;;  %16751 = vst [vmem:[#allocation79_spill] sm:$0xff] %v11721_v16  ;;  %v3714_v50 = vmul.f32 %v11603_v6, %v3682_v20  ;;  %v1861_v42 = vsel %vm1831_vm11, %v11529_v63, 0.0 }
 0x32d   : > { %7126 = vrcp.f32 %v3492_v21  ;;  %v2213_v58 = vsel %vm15898_vm9, %v11451_v49, 0.0  ;;  %v11730_v24 = vpop.eup %7120  ;;  %v2801_v21 = vsel %vm1832_vm4, %v11663_v51, 0.0  ;;  %v3106_v63 = vsel %vm1830_vm1, %v11663_v51, 0.0 }
 0x32e   : > { %v11719_v14 = vsel %vm15875_vm12, %v16750_v26, %v1504_v53  ;;  %16752 = vst [vmem:[#allocation108_spill] sm:$0xff] %v11730_v24  ;;  %vm5731_vm3 = vcmp.ge.s32.totalorder %v6745_v2, 0  ;;  %vm5763_vm0 = vcmp.lt.s32.totalorder %v6745_v2, 16  ;;  %v11733_v53 = vpop.permute.xlu1 %2607  ;;  %v1896_v26 = vmul.f32 %v9984_v23, %v1861_v42 }
 0x32f   : > { %vm5795_vm12 = vmand %vm5731_vm3, %vm5763_vm0  ;;  %v2280_v49 = vadd.f32 %v2249_v57, %v1928_v4  ;;  %v2332_v20 = vrot.slane %v11630_v19, 1  ;;  %v16753_v43 = vmov 0   ;;  %v2248_v46 = vmul.f32 %v9992_v25, %v2213_v58 }
 0x330   : > { %v5827_v33 = vsel %vm5795_vm12, 1, %v16753_v43  ;;  %v1927_v2 = vadd.f32 %v11707_v41, %v1896_v26  ;;  %v15879_v42 = vrot.slane %v11621_v38, 1  ;;  %v3746_v29 = vadd.f32 -0.28449672, %v3714_v50  ;;  %v16761_v43 = vld [vmem:[#allocation83_spill] sm:$0xff] }
 0x331   : > { %v3204_v3 = vsel %vm15886_vm13, %v11630_v19, 0.0  ;;  %5868 = vperm.xlu1 %7007, %v5827_v33   ;;  %v16754_v1 = vrot.slane %v11443_v60, 1  ;;  %vm2662_vm0 = vcmp.eq.s32.totalorder %v11733_v53, 1  ;;  %v2800_v58 = vsel %vm1831_vm11, %v11719_v14, 0.0  ;;  %v16781_v53 = vld [vmem:[#allocation5_spill] sm:$0xff] }
 0x332   : > { %v2279_v4 = vadd.f32 %v2248_v46, %v1927_v2  ;;  %v11757_v26 = vsel %vm15990_vm6, %v2332_v20, %v15879_v42  ;;  %v2693_v50 = vsel %vm2662_vm0, %v11567_v8, 0.0  ;;  %v11765_v33 = vpop.eup %7122  ;;  %v2837_v60 = vmul.f32 %v10018_v7, %v2801_v21 }
 0x333   : > { %v2333_v57 = vsel %vm15990_vm6, %v16754_v1, %v2332_v20  ;;  %16755 = vst [vmem:[#allocation112_spill] sm:$0xff] %v11765_v33  ;;  %v3141_v1 = vmul.f32 %v10027_v45, %v3106_v63  ;;  %v2729_v20 = vmul.f32 %v10006_v55, %v2693_v50  ;;  %v2900_v8 = vsel %vm15898_vm9, %v11630_v19, 0.0  ;;  %v16757_v33 = vld [vmem:[#allocation10_spill] sm:$0xff] }
 0x334   : > { %v2694_v46 = vsel %vm2663_vm14, %v2333_v57, 0.0  ;;  %v11772_v2 = vpop.eup %7124  ;;  %v2967_v5 = vadd.f32 %v2935_v48, %v11605_v54  ;;  %v3004_v21 = vsel %vm2661_vm8, %v2333_v57, 0.0  ;;  %vm1834_vm12 = vcmp.eq.s32.totalorder %v16757_v33, 1 }
 0x335   : > { %16756 = vst [vmem:[#allocation86_spill] sm:$0xff] %v11772_v2  ;;  %v2730_v42 = vmul.f32 %v10006_v55, %v2694_v46  ;;  %v2761_v63 = vadd.f32 %v2729_v20, %v2279_v4  ;;  %v2836_v13 = vmul.f32 %v10018_v7, %v2800_v58  ;;  %v3040_v50 = vmul.f32 %v10025_v9, %v3004_v21  ;;  %v16758_v2 = vld [vmem:[#allocation44_spill] sm:$0xff] }
 0x336   : > { %v3105_v46 = vsel %vm1829_vm5, %v11719_v14, 0.0  ;;  %5423 = vperm.xlu1 %7007, %v16758_v2   ;;  %v3238_v24 = vmul.f32 %v10029_v39, %v3204_v3  ;;  %v3005_v54 = vsel %vm2662_vm0, %v11757_v26, 0.0  ;;  %v16759_v58 = vld [vmem:[#allocation104_spill] sm:$0xff]  ;;  %v2936_v21 = vmul.f32 %v10020_v28, %v2900_v8 }
 0x337   : > { %v2762_v16 = vadd.f32 %v2730_v42, %v2280_v49  ;;  %v3140_v48 = vmul.f32 %v10027_v45, %v3105_v46  ;;  %v11793_v4 = vpop.eup %7126  ;;  %vm4064_vm3 = vcmp.lt.f32.partialorder %v16759_v58, 0.0  ;;  %v2868_v20 = vadd.f32 %v2836_v13, %v2761_v63 }
 0x338   : > { %v3072_v27 = vadd.f32 %v3040_v50, %v2967_v5  ;;  %v3268_v2 = vadd.f32 %v11702_v62, %v11617_v17  ;;  %vm1833_vm1 = vcmp.eq.s32.totalorder %v16760_v52, 1  ;;  %v3588_v3 = vmul.f32 1.0614054, %v11793_v4 }
 0x339   : > { %v11801_v49 = vadd.f32 %v2837_v60, %v2762_v16  ;;  %v3172_v42 = vadd.f32 %v3140_v48, %v11624_v18  ;;  %v3300_v46 = vsel %vm2659_vm2, %v2333_v57, 0.0  ;;  %vm15901_vm5 = vcmp.eq.s32.totalorder %v16761_v43, 1 }
 0x33a   : > { %v2968_v13 = vadd.f32 %v2936_v21, %v2868_v20  ;;  %v3041_v8 = vmul.f32 %v10025_v9, %v3005_v54  ;;  %v11808_v5 = vadd.f32 %v3141_v1, %v3072_v27  ;;  %v3301_v17 = vsel %vm2660_vm15, %v11757_v26, 0.0  ;;  %v11825_v1 = vld [vmem:[%s15600_s5] ss:$0 sm:$0xff] }
 0x33b   : > { %v3620_v62 = vadd.f32 -1.4531521, %v3588_v3  ;;  %v3269_v63 = vadd.f32 %v3238_v24, %v3172_v42  ;;  %v3334_v16 = vmul.f32 %v11059_v44, %v3300_v46  ;;  %v3335_v18 = vmul.f32 %v11059_v44, %v3301_v17  ;;  %v16768_v42 = vld [vmem:[#allocation33_spill] sm:$0xff] }
 0x33c   : > { %v16762_v32 = vsub.f32 1.0, %v11697_v11  ;;  %v11818_v60 = vmul.f32 0.70710677, %v11626_v37  ;;  %v11820_v50 = vadd.f32 %v3041_v8, %v2968_v13  ;;  %v11829_v24 = vadd.f32 %v11825_v1, %v16764_v30 }
 0x33d   : > { %v3652_v54 = vmul.f32 %v11793_v4, %v3620_v62  ;;  %v3876_v44 = vsub.f32 0.0, %v11677_v36  ;;  %v11833_v48 = vadd.f32 %v3334_v16, %v3268_v2  ;;  %v11835_v20 = vadd.f32 %v3335_v18, %v3269_v63 }
 0x33e   : > { %v4096_v57 = vsub.f32 0.0, %v16762_v32  ;;  %16763 = vst [vmem:[#allocation70_spill] sm:$0xff] %v11818_v60  ;;  %v3778_v21 = vmul.f32 %v11603_v6, %v3746_v29  ;;  %v11839_v27 = vmul.f32 0.5, %v11447_v40  ;;  %v11842_v3 = vmul.f32 0.5, %v11459_v59  ;;  %v16770_v29 = vld [vmem:[#allocation45_spill] sm:$0xff] }
 0x33f   : > { %16765 = vst [vmem:[#allocation26_spill] sm:$0xff] %v11835_v20  ;;  %v11846_v46 = vadd.f32 %v11825_v1, %v16768_v42  ;;  %7128 = vpow2.f32 %v11711_v0  ;;  %v3684_v13 = vadd.f32 1.4214138, %v3652_v54  ;;  %v1864_v2 = vsel %vm1834_vm12, %v11663_v51, 0.0 }
 0x340   : > { %16766 = vst [vmem:[#allocation82_spill] sm:$0xff] %v11839_v27  ;;  %16767 = vst [vmem:[#allocation36_spill] sm:$0xff] %v11842_v3  ;;  %v11853_v8 = vmul.f32 0.70710677, %v11835_v20  ;;  %vm15919_vm2 = vcmp.eq.s32.totalorder %v16770_v29, 1  ;;  %v16771_v59 = vsub.f32 0.0, %v11680_v34  ;;  %v16772_v63 = vmov %v16762_v32 }
 0x341   : > { %v3457_v40 = vmul.f32 0.3275911, %v11680_v34  ;;  %v3427_v62 = vand.u32 2147483647, %v11818_v60  ;;  %v15894_v0 = vrot.slane %v11829_v24, 7  ;;  %v4128_v51 = vsel %vm4064_vm3, %v4096_v57, %v16772_v63 }
 0x342   : > { %16769 = vst [vmem:[#allocation6_spill] sm:$0xff] %v11853_v8  ;;  %v3905_v17 = vmul.f32 %v16771_v59, %v11680_v34  ;;  %v3716_v16 = vmul.f32 %v11793_v4, %v3684_v13  ;;  %v3908_v18 = vmul.f32 %v3876_v44, %v11677_v36  ;;  %v11869_v32 = vand.u32 2147483647, %v11853_v8  ;;  %v16773_v44 = vld [vmem:[#allocation62_spill] sm:$0xff] }
 0x343   : > { %v3810_v30 = vadd.f32 0.2548296, %v3778_v21  ;;  %v1899_v54 = vmul.f32 %v9984_v23, %v1864_v2  ;;  %v1508_v34 = vrot.slane %v11846_v46, 7  ;;  %v1863_v42 = vsel %vm1833_vm1, %v11719_v14, 0.0 }
 0x344   : > { %v2216_v11 = vsel %vm15901_vm5, %v11621_v38, 0.0  ;;  %v2901_v36 = vsel %vm15902_vm10, %v11621_v38, 0.0  ;;  %v3205_v58 = vsel %vm15903_vm7, %v11621_v38, 0.0  ;;  %v3462_v57 = vmul.f32 0.3275911, %v11869_v32 }
 0x345   : > { %vm15941_vm15 = vcmp.eq.s32.totalorder %v16773_v44, 1  ;;  %v3459_v21 = vmul.f32 0.3275911, %v3427_v62  ;;  %v3875_v13 = vsub.f32 0.0, %v3427_v62  ;;  %vm16774_vm3 = vcmask 1040384   ;;  %v12180_v44 = vpop.permute.xlu0 %4493 }
 0x346   : > { %v11890_v14 = vsel %vm16774_vm3, %v1508_v34, %v15894_v0  ;;  %v16775_v2 = vrot.slane %v11621_v38, 7  ;;  %vm16776_vm13 = vmmov %vm16774_vm3  ;;  %v3748_v63 = vadd.f32 -0.28449672, %v3716_v16  ;;  %v3956_v27 = vmul.f32 1.442695, %v3908_v18 }
 0x347   : > { %v3494_v56 = vadd.f32 1.0, %v3462_v57  ;;  %v1898_v60 = vmul.f32 %v9984_v23, %v1863_v42  ;;  %v11898_v8 = vadd.f32 1.0, %v3457_v40  ;;  %v3842_v20 = vmul.f32 %v11603_v6, %v3810_v30  ;;  %v11916_v40 = vpop.permute.xlu1 %2613 }
 0x348   : > { %v11895_v59 = vsel %vm16776_vm13, %v16775_v2, %v1508_v34  ;;  %v11901_v3 = vmul.f32 1.442695, %v3905_v17  ;;  %v1930_v47 = vadd.f32 %v11707_v41, %v1899_v54  ;;  %v11904_v0 = vadd.f32 1.0, %v4128_v51 }
 0x349   : > { %v2251_v43 = vmul.f32 %v9992_v25, %v2216_v11  ;;  %v2937_v34 = vmul.f32 %v10020_v28, %v2901_v36  ;;  %v3239_v16 = vmul.f32 %v10029_v39, %v3205_v58  ;;  %v11909_v18 = vadd.f32 1.0, %v3459_v21  ;;  %v7129_v17 = vpop.eup %7128 }
 0x34a   : > { %v11911_v57 = vmul.f32 %v3875_v13, %v3427_v62  ;;  %7130 = vrcp.f32 %v3494_v56  ;;  %v3206_v6 = vsel %vm15898_vm9, %v11846_v46, 0.0  ;;  %v3780_v51 = vmul.f32 %v11793_v4, %v3748_v63 }
 0x34b   : > { %7132 = vpow2.f32 %v3956_v27  ;;  %v1929_v30 = vadd.f32 %v11707_v41, %v1898_v60  ;;  %v2215_v54 = vsel %vm15919_vm2, %v11630_v19, 0.0  ;;  %v11923_v42 = vmul.f32 %v7129_v17, %v3842_v20 }
 0x34c   : > { %v2250_v56 = vmul.f32 %v9992_v25, %v2215_v54  ;;  %v2282_v62 = vadd.f32 %v2251_v43, %v1930_v47  ;;  %v2336_v11 = vrot.slane %v11846_v46, 1  ;;  %v2803_v36 = vsel %vm1834_vm12, %v11890_v14, 0.0 }
 0x34d   : > { %v3240_v58 = vmul.f32 %v10029_v39, %v3206_v6  ;;  %v15896_v27 = vrot.slane %v11829_v24, 1  ;;  %vm2664_vm13 = vcmp.eq.s32.totalorder %v11916_v40, 1  ;;  %v16777_v19 = vrot.slane %v11621_v38, 1 }
 0x34e   : > { %v2281_v60 = vadd.f32 %v2250_v56, %v1929_v30  ;;  %v2695_v47 = vsel %vm2664_vm13, %v11757_v26, 0.0  ;;  %v2802_v43 = vsel %vm1833_vm1, %v11895_v59, 0.0  ;;  %v3812_v21 = vadd.f32 0.2548296, %v3780_v51 }
 0x34f   : > { %v2337_v20 = vsel %vm15990_vm6, %v16777_v19, %v2336_v11  ;;  %v11945_v13 = vsel %vm15990_vm6, %v2336_v11, %v15896_v27  ;;  %v2731_v38 = vmul.f32 %v10006_v55, %v2695_v47  ;;  %v3108_v63 = vsel %vm1832_vm4, %v11890_v14, 0.0  ;;  %v16778_v11 = vld [vmem:[#allocation11_spill] sm:$0xff] }
 0x350   : > { %v2696_v2 = vsel %vm15941_vm15, %v2337_v20, 0.0  ;;  %v2902_v6 = vsel %vm15919_vm2, %v11846_v46, 0.0  ;;  %v2969_v17 = vadd.f32 %v2937_v34, %v11801_v49  ;;  %v2839_v51 = vmul.f32 %v10018_v7, %v2803_v36 }
 0x351   : > { %v2732_v26 = vmul.f32 %v10006_v55, %v2696_v2  ;;  %v2763_v30 = vadd.f32 %v2731_v38, %v2281_v60  ;;  %v2838_v54 = vmul.f32 %v10018_v7, %v2802_v43  ;;  %v3006_v56 = vsel %vm2663_vm14, %v2337_v20, 0.0 }
 0x352   : > { %vm15946_vm3 = vcmp.eq.s32.totalorder %v16778_v11, 1  ;;  %v3007_v19 = vsel %vm2664_vm13, %v11945_v13, 0.0  ;;  %v3042_v47 = vmul.f32 %v10025_v9, %v3006_v56  ;;  %v3107_v49 = vsel %vm1831_vm11, %v11895_v59, 0.0 }
 0x353   : > { %v2764_v35 = vadd.f32 %v2732_v26, %v2282_v62  ;;  %v3143_v34 = vmul.f32 %v10027_v45, %v3108_v63  ;;  %v2870_v36 = vadd.f32 %v2838_v54, %v2763_v30  ;;  %v2938_v60 = vmul.f32 %v10020_v28, %v2902_v6 }
 0x354   : > { %v3142_v43 = vmul.f32 %v10027_v45, %v3107_v49  ;;  %v11973_v2 = vpop.eup %7130  ;;  %v3043_v38 = vmul.f32 %v10025_v9, %v3007_v19  ;;  %v3074_v26 = vadd.f32 %v3042_v47, %v2969_v17  ;;  %v3270_v56 = vadd.f32 %v3239_v16, %v11808_v5  ;;  %v11994_v16 = vld [vmem:[%s15601_s6 + $0x8] ss:$0 sm:$0xff] }
 0x355   : > { %v11975_v62 = vadd.f32 %v2839_v51, %v2764_v35  ;;  %v7133_v27 = vpop.eup %7132  ;;  %vm15920_vm4 = vcmp.eq.s32.totalorder %v16779_v22, 1  ;;  %vm4066_vm11 = vcmp.lt.f32.partialorder %v16780_v31, 0.0  ;;  %v3590_v63 = vmul.f32 1.0614054, %v11973_v2 }
 0x356   : > { %v2970_v30 = vadd.f32 %v2938_v60, %v2870_v36  ;;  %v3174_v6 = vadd.f32 %v3142_v43, %v11820_v50  ;;  %v3302_v54 = vsel %vm2661_vm8, %v2337_v20, 0.0  ;;  %v4034_v51 = vsub.f32 1.0, %v11923_v42 }
 0x357   : > { %v11986_v35 = vadd.f32 %v3143_v34, %v3074_v26  ;;  %v3303_v5 = vsel %vm2662_vm0, %v11945_v13, 0.0  ;;  %v3336_v17 = vmul.f32 %v11994_v16, %v3302_v54  ;;  %v3622_v19 = vadd.f32 -1.4531521, %v3590_v63 }
 0x358   : > { %v11997_v50 = vadd.f32 %v3043_v38, %v2970_v30  ;;  %v3271_v15 = vadd.f32 %v3240_v58, %v3174_v6  ;;  %v3337_v20 = vmul.f32 %v11994_v16, %v3303_v5  ;;  %v3844_v42 = vmul.f32 %v11793_v4, %v3812_v21  ;;  %v16783_v58 = vld [vmem:[#allocation85_spill] sm:$0xff]  ;;  %v16785_v38 = vld [vmem:[#allocation35_spill] sm:$0xff] }
 0x359   : > { %v3878_v47 = vsub.f32 0.0, %v11869_v32  ;;  %v12002_v49 = vadd.f32 %v3336_v17, %v3270_v56  ;;  %v12006_v34 = vadd.f32 %v11825_v1, %v16781_v53  ;;  %7134 = vrcp.f32 %v11898_v8  ;;  %v16792_v53 = vld [vmem:[#allocation20_spill] sm:$0xff]  ;;  %16808 = vst [vmem:[#allocation35_spill] sm:$0xff] %v12180_v44 }
 0x35a   : > { %v3954_v36 = vmul.f32 1.442695, %v11911_v57  ;;  %v3654_v60 = vmul.f32 %v11973_v2, %v3622_v19  ;;  %v12011_v43 = vadd.f32 %v3337_v20, %v3271_v15  ;;  %vm15950_vm8 = vcmp.eq.s32.totalorder %v16783_v58, 1 }
 0x35b   : > { %16782 = vst [vmem:[#allocation21_spill] sm:$0xff] %v12006_v34  ;;  %v12016_v4 = vmul.f32 %v11904_v0, %v11690_v61  ;;  %7136 = vpow2.f32 %v11901_v3  ;;  %v4098_v21 = vsub.f32 0.0, %v4034_v51  ;;  %v12021_v26 = vadd.f32 %v11825_v1, %v16785_v38 }
 0x35c   : > { %v12024_v8 = vmul.f32 0.5, %v11626_v37  ;;  %v12027_v57 = vmul.f32 0.70710677, %v11833_v48  ;;  %v1866_v56 = vsel %vm15946_vm3, %v11890_v14, 0.0  ;;  %v12033_v61 = vmul.f32 0.70710677, %v12011_v43 }
 0x35d   : > { %16784 = vst [vmem:[#allocation10_spill] sm:$0xff] %v12016_v4  ;;  %7138 = vrcp.f32 %v11909_v18  ;;  %v12036_v3 = vmul.f32 %v7133_v27, %v3844_v42  ;;  %v3910_v1 = vmul.f32 %v3878_v47, %v11869_v32  ;;  %v15899_v0 = vrot.slane %v12006_v34, 7  ;;  %v16788_v37 = vld [vmem:[#allocation107_spill] sm:$0xff]  ;;  %v7243_v42 = vld [vmem:[%s15596_s1 + $0x30] sm:$0xff] }
 0x35e   : > { %16786 = vst [vmem:[#allocation44_spill] sm:$0xff] %v12024_v8  ;;  %16787 = vst [vmem:[#allocation104_spill] sm:$0xff] %v12027_v57  ;;  %vm15942_vm0 = vcmp.eq.s32.totalorder %v16788_v37, 1  ;;  %7140 = vpow2.f32 %v3954_v36  ;;  %v12042_v63 = vmul.f32 0.5, %v11643_v12  ;;  %v3686_v30 = vadd.f32 1.4214138, %v3654_v60 }
 0x35f   : > { %v12045_v14 = vand.u32 2147483647, %v12033_v61  ;;  %v4130_v6 = vsel %vm4066_vm11, %v4098_v21, %v4034_v51  ;;  %v2218_v18 = vsel %vm15920_vm4, %v11829_v24, 0.0  ;;  %v1901_v32 = vmul.f32 %v9984_v23, %v1866_v56 }
 0x360   : > { %v1512_v27 = vrot.slane %v12021_v26, 7  ;;  %v12055_v54 = vand.u32 2147483647, %v12027_v57  ;;  %v2903_v5 = vsel %vm15901_vm5, %v11829_v24, 0.0  ;;  %v3207_v31 = vsel %vm15902_vm10, %v11829_v24, 0.0 }
 0x361   : > { %v3464_v51 = vmul.f32 0.3275911, %v12045_v14  ;;  %v3960_v15 = vmul.f32 1.442695, %v3910_v1  ;;  %vm16791_vm11 = vcmask 1040384   ;;  %v6747_v47 = vadd.s32 4294967294, %v7243_v42 }
 0x362   : > { %v12068_v20 = vsel %vm16791_vm11, %v1512_v27, %v15899_v0  ;;  %vm15952_vm9 = vcmp.eq.s32.totalorder %v16792_v53, 1  ;;  %v12074_v36 = vadd.f32 1.0, %v4130_v6  ;;  %v3718_v60 = vmul.f32 %v11973_v2, %v3686_v30  ;;  %v16806_v53 = vld [vmem:[#allocation46_spill] sm:$0xff] }
 0x363   : > { %v2253_v21 = vmul.f32 %v9992_v25, %v2218_v18  ;;  %v3496_v38 = vadd.f32 1.0, %v3464_v51  ;;  %v2939_v56 = vmul.f32 %v10020_v28, %v2903_v5  ;;  %v1932_v1 = vadd.f32 %v11707_v41, %v1901_v32  ;;  %v12086_v19 = vpop.eup %7134 }
 0x364   : > { %v2905_v0 = vsel %vm15920_vm4, %v12006_v34, 0.0  ;;  %v3209_v42 = vsel %vm15901_vm5, %v12006_v34, 0.0  ;;  %v12090_v30 = vmul.f32 %v10029_v39, %v3207_v31  ;;  %v1865_v18 = vsel %vm15950_vm8, %v11895_v59, 0.0  ;;  %v12108_v59 = vpop.permute.xlu1 %2619 }
 0x365   : > { %7142 = vrcp.f32 %v3496_v38  ;;  %v12095_v32 = vpop.eup %7136  ;;  %v16794_v5 = vsub.f32 1.0, %v12036_v3  ;;  %v3208_v12 = vsel %vm15919_vm2, %v12021_v26, 0.0  ;;  %vm5733_vm11 = vcmp.ge.s32.totalorder %v6747_v47, 0  ;;  %16795 = vst [vmem:[#allocation92_spill] sm:$0xff] %v12108_v59 }
 0x366   : > { %16793 = vst [vmem:[#allocation84_spill] sm:$0xff] %v12095_v32  ;;  %7144 = vpow2.f32 %v3960_v15  ;;  %v3750_v6 = vadd.f32 -0.28449672, %v3718_v60  ;;  %v2941_v31 = vmul.f32 %v10020_v28, %v2905_v0  ;;  %v12106_v38 = vmul.f32 %v10029_v39, %v3209_v42  ;;  %v12121_v42 = vpop.f32.mrb[26].mxu0 }
 0x367   : > { %v12099_v51 = vsub.f32 0.0, %v16794_v5  ;;  %vm5765_vm5 = vcmp.lt.s32.totalorder %v6747_v47, 16  ;;  %v12110_v17 = vpop.eup %7138  ;;  %v16796_v5 = vrot.slane %v11829_v24, 7  ;;  %vm16797_vm7 = vcmask 1040384   ;;  %16798 = vst [vmem:[#allocation33_spill] sm:$0xff] %v12121_v42  ;;  %v16805_v42 = vld [vmem:[#allocation109_spill] sm:$0xff] }
 0x368   : > { %vm5797_vm10 = vmand %vm5733_vm11, %vm5765_vm5  ;;  %v1900_v29 = vmul.f32 %v9984_v23, %v1865_v18  ;;  %v2217_v0 = vsel %vm15942_vm0, %v11846_v46, 0.0  ;;  %v2284_v60 = vadd.f32 %v2253_v21, %v1932_v1  ;;  %v12123_v47 = vpop.eup %7140  ;;  %v2805_v22 = vsel %vm15946_vm3, %v12068_v20, 0.0  ;;  %v12131_v18 = vpop.f32.mrb[27].mxu0 }
 0x369   : > { %v12115_v15 = vsel %vm16797_vm7, %v16796_v5, %v1512_v27  ;;  %16799 = vst [vmem:[#allocation29_spill] sm:$0xff] %v12123_v47  ;;  %v3242_v8 = vmul.f32 %v10029_v39, %v3208_v12  ;;  %v16800_v4 = vmov 0   ;;  %v2340_v5 = vrot.slane %v12021_v26, 1  ;;  %16801 = vst [vmem:[#allocation5_spill] sm:$0xff] %v12131_v18 }
 0x36a   : > { %v5829_v27 = vsel %vm5797_vm10, 1, %v16800_v4  ;;  %v1931_v46 = vadd.f32 %v11707_v41, %v1900_v29  ;;  %v2252_v21 = vmul.f32 %v9992_v25, %v2217_v0  ;;  %vm15940_vm7 = vcmp.eq.s32.totalorder %v12108_v59, 1  ;;  %v16803_v0 = vld [vmem:[#allocation88_spill] sm:$0xff] }
 0x36b   : > { %5874 = vperm.xlu1 %7007, %v5829_v27   ;;  %v3110_v11 = vsel %vm1834_vm12, %v12068_v20, 0.0  ;;  %v16802_v12 = vrot.slane %v11829_v24, 1  ;;  %v2697_v27 = vsel %vm15940_vm7, %v11945_v13, 0.0  ;;  %v2804_v29 = vsel %vm15950_vm8, %v12115_v15, 0.0 }
 0x36c   : > { %vm15955_vm10 = vcmp.eq.s32.totalorder %v16803_v0, 1  ;;  %v2283_v1 = vadd.f32 %v2252_v21, %v1931_v46  ;;  %v16804_v18 = vrot.slane %v12006_v34, 1  ;;  %vm15953_vm12 = vcmp.eq.s32.totalorder %v16805_v42, 1  ;;  %v16841_v42 = vld [vmem:[#allocation124_spill] sm:$0xff]  ;;  %v16845_v0 = vld [vmem:[#allocation43_spill] sm:$0xff] }
 0x36d   : > { %v2341_v39 = vsel %vm15990_vm6, %v16802_v12, %v2340_v5  ;;  %v2733_v12 = vmul.f32 %v10006_v55, %v2697_v27  ;;  %v3782_v13 = vmul.f32 %v11973_v2, %v3750_v6  ;;  %v2904_v58 = vsel %vm15942_vm0, %v12021_v26, 0.0  ;;  %v16807_v6 = vld [vmem:[#allocation40_spill] sm:$0xff] }
 0x36e   : > { %v2343_v33 = vsel %vm15990_vm6, %v2340_v5, %v16804_v18  ;;  %v2698_v24 = vsel %vm15952_vm9, %v2341_v39, 0.0  ;;  %v2971_v46 = vadd.f32 %v2939_v56, %v11975_v62  ;;  %v2841_v21 = vmul.f32 %v10018_v7, %v2805_v22 }
 0x36f   : > { %v2734_v57 = vmul.f32 %v10006_v55, %v2698_v24  ;;  %v2765_v5 = vadd.f32 %v2733_v12, %v2283_v1  ;;  %v2840_v18 = vmul.f32 %v10018_v7, %v2804_v29  ;;  %v3008_v27 = vsel %vm15941_vm15, %v2341_v39, 0.0  ;;  %5429 = vperm.xlu1 %7007, %v16806_v53   ;;  %v12168_v47 = vpop.eup %7142 }
 0x370   : > { %vm4068_vm5 = vcmp.lt.f32.partialorder %v16807_v6, 0.0  ;;  %v3145_v24 = vmul.f32 %v10027_v45, %v3110_v11  ;;  %v3009_v62 = vsel %vm15940_vm7, %v2343_v33, 0.0  ;;  %v3044_v22 = vmul.f32 %v10025_v9, %v3008_v27  ;;  %v7145_v56 = vpop.eup %7144  ;;  %v16819_v6 = vld [vmem:[#allocation36_spill] sm:$0xff] }
 0x371   : > { %v2766_v37 = vadd.f32 %v2734_v57, %v2284_v60  ;;  %v3592_v1 = vmul.f32 1.0614054, %v12168_v47  ;;  %v2872_v29 = vadd.f32 %v2840_v18, %v2765_v5  ;;  %v2940_v12 = vmul.f32 %v10020_v28, %v2904_v58 }
 0x372   : > { %v3109_v53 = vsel %vm1833_vm1, %v12115_v15, 0.0  ;;  %v3076_v11 = vadd.f32 %v3044_v22, %v2971_v46  ;;  %v3272_v60 = vadd.f32 %v12090_v30, %v11986_v35  ;;  %v3045_v32 = vmul.f32 %v10025_v9, %v3009_v62  ;;  %v12197_v30 = vpop.permute.xlu1 %2625 }
 0x373   : > { %v2873_v7 = vadd.f32 %v2841_v21, %v2766_v37  ;;  %v3144_v57 = vmul.f32 %v10027_v45, %v3109_v53  ;;  %v3624_v27 = vadd.f32 -1.4531521, %v3592_v1  ;;  %v2972_v59 = vadd.f32 %v2940_v12, %v2872_v29  ;;  %16811 = vst [vmem:[#allocation129_spill] sm:$0xff] %v12197_v30  ;;  %v16818_v12 = vld [vmem:[#allocation90_spill] sm:$0xff] }
 0x374   : > { %v3304_v58 = vsel %vm2663_vm14, %v2341_v39, 0.0  ;;  %v3177_v18 = vadd.f32 %v3145_v24, %v3076_v11  ;;  %v3305_v37 = vsel %vm2664_vm13, %v2343_v33, 0.0  ;;  %v3814_v46 = vadd.f32 0.2548296, %v3782_v13 }
 0x375   : > { %v12188_v5 = vadd.f32 %v2941_v31, %v2873_v7  ;;  %v3176_v52 = vadd.f32 %v3144_v57, %v11997_v50  ;;  %v3656_v21 = vmul.f32 %v12168_v47, %v3624_v27  ;;  %v12194_v22 = vadd.f32 %v3045_v32, %v2972_v59  ;;  %v12215_v31 = vpop.permute.xlu0 %4499 }
 0x376   : > { %v3338_v35 = vmul.f32 %v11994_v16, %v3304_v58  ;;  %v12200_v39 = vadd.f32 %v12106_v38, %v3177_v18  ;;  %v3339_v7 = vmul.f32 %v11994_v16, %v3305_v37  ;;  %v1867_v10 = vsel %vm15955_vm10, %v12115_v15, 0.0  ;;  %16814 = vst [vmem:[#allocation132_spill] sm:$0xff] %v12215_v31  ;;  %v12249_v27 = vpop.permute.xlu1 %2631  ;;  %v16823_v58 = vld [vmem:[#allocation13_spill] sm:$0xff] }
 0x377   : > { %16809 = vst [vmem:[#allocation46_spill] sm:$0xff] %v12188_v5  ;;  %16810 = vst [vmem:[#allocation40_spill] sm:$0xff] %v12194_v22  ;;  %v3273_v62 = vadd.f32 %v3242_v8, %v3176_v52  ;;  %v12207_v40 = vmul.f32 0.70710677, %v12002_v49  ;;  %v1902_v32 = vmul.f32 %v9984_v23, %v1867_v10  ;;  %v2219_v8 = vsel %vm15953_vm12, %v12021_v26, 0.0  ;;  %v16825_v10 = vld [vmem:[#allocation26_spill] sm:$0xff] }
 0x378   : > { %16812 = vst [vmem:[#allocation130_spill] sm:$0xff] %v12200_v39  ;;  %v12209_v50 = vadd.f32 %v3338_v35, %v3272_v60  ;;  %v3461_v38 = vmul.f32 0.3275911, %v12055_v54  ;;  %v16815_v16 = vsub.f32 0.0, %v12055_v54  ;;  %vm15951_vm14 = vcmp.eq.s32.totalorder %v12197_v30, 1  ;;  %16822 = vst [vmem:[#allocation135_spill] sm:$0xff] %v12249_v27 }
 0x379   : > { %v12221_v15 = vadd.f32 %v3339_v7, %v3273_v62  ;;  %v16817_v13 = vsub.f32 1.0, %v12036_v3  ;;  %v3846_v26 = vmul.f32 %v11973_v2, %v3814_v46  ;;  %v1933_v1 = vadd.f32 %v11707_v41, %v1902_v32  ;;  %v7244_v3 = vld [vmem:[%s15596_s1 + $0x40] sm:$0xff]  ;;  %v16838_v5 = vld [vmem:[#allocation72_spill] sm:$0xff] }
 0x37a   : > { %16813 = vst [vmem:[#allocation131_spill] sm:$0xff] %v12209_v50  ;;  %v3909_v59 = vmul.f32 %v16815_v16, %v12055_v54  ;;  %v2254_v29 = vmul.f32 %v9992_v25, %v2219_v8  ;;  %vm15934_vm1 = vcmp.eq.s32.totalorder %v16818_v12, 1  ;;  %v3688_v53 = vadd.f32 1.4214138, %v3656_v21 }
 0x37b   : > { %16816 = vst [vmem:[#allocation133_spill] sm:$0xff] %v12221_v15  ;;  %v4132_v24 = vsel %vm4068_vm5, %v12099_v51, %v16817_v13  ;;  %v12234_v54 = vmul.f32 0.70710677, %v12221_v15  ;;  %v2699_v11 = vsel %vm15951_vm14, %v2343_v33, 0.0  ;;  %v6749_v51 = vadd.s32 4294967294, %v7244_v3 }
 0x37c   : > { %v12243_v2 = vmul.f32 %v12074_v36, %v16819_v6  ;;  %v12246_v41 = vmul.f32 0.5, %v11833_v48  ;;  %v3431_v57 = vand.u32 2147483647, %v12207_v40  ;;  %v2285_v60 = vadd.f32 %v2254_v29, %v1933_v1  ;;  %v12257_v48 = vpop.permute.xlu0 %4891  ;;  %v16829_v1 = vld [vmem:[#allocation6_spill] sm:$0xff] }
 0x37d   : > { %vm15954_vm13 = vcmp.eq.s32.totalorder %v16823_v58, 1  ;;  %v3493_v33 = vadd.f32 1.0, %v3461_v38  ;;  %v12253_v52 = vand.u32 2147483647, %v12234_v54  ;;  %v2735_v18 = vmul.f32 %v10006_v55, %v2699_v11  ;;  %v12279_v11 = vpop.permute.xlu1 %2637 }
 0x37e   : > { %16820 = vst [vmem:[#allocation36_spill] sm:$0xff] %v12243_v2  ;;  %16821 = vst [vmem:[#allocation134_spill] sm:$0xff] %v12246_v41  ;;  %vm5735_vm11 = vcmp.ge.s32.totalorder %v6749_v51, 0  ;;  %v4196_v37 = vadd.f32 1.0, %v4132_v24  ;;  %v3958_v36 = vmul.f32 1.442695, %v3909_v59  ;;  %v4006_v21 = vmul.f32 %v7145_v56, %v3846_v26 }
 0x37f   : > { %v3880_v46 = vsub.f32 0.0, %v12045_v14  ;;  %vm5767_vm5 = vcmp.lt.s32.totalorder %v6749_v51, 16  ;;  %v3720_v35 = vmul.f32 %v12168_v47, %v3688_v53  ;;  %v3466_v62 = vmul.f32 0.3275911, %v12253_v52  ;;  %v16827_v56 = vld [vmem:[#allocation15_spill] sm:$0xff]  ;;  %16831 = vst [vmem:[#allocation137_spill] sm:$0xff] %v12279_v11 }
 0x380   : > { %v12261_v7 = vadd.f32 %v2735_v18, %v2285_v60  ;;  %vm5799_vm2 = vmand %vm5735_vm11, %vm5767_vm5  ;;  %v12264_v32 = vmul.f32 0.5, %v16825_v10  ;;  %v3463_v8 = vmul.f32 0.3275911, %v3431_v57  ;;  %v3879_v38 = vsub.f32 0.0, %v3431_v57  ;;  %v7245_v18 = vld [vmem:[%s15596_s1 + $0x48] sm:$0xff] }
 0x381   : > { %v5831_v16 = vsel %vm5799_vm2, 1, %v16800_v4  ;;  %7146 = vrcp.f32 %v3493_v33  ;;  %v12268_v59 = vmul.f32 0.70710677, %v12209_v50  ;;  %v3498_v13 = vadd.f32 1.0, %v3466_v62  ;;  %v16836_v11 = vld [vmem:[#allocation123_spill] sm:$0xff]  ;;  %v16896_v50 = vld [vmem:[#allocation108_spill] sm:$0xff] }
 0x382   : > { %16824 = vst [vmem:[#allocation136_spill] sm:$0xff] %v12261_v7  ;;  %5880 = vperm.xlu1 %7007, %v5831_v16   ;;  %v3573_v24 = vmul.f32 1.0614054, %v16827_v56  ;;  %v12272_v26 = vmul.f32 %v4196_v37, %v12042_v63  ;;  %7148 = vpow2.f32 %v3958_v36  ;;  %vm4070_vm11 = vcmp.lt.f32.partialorder %v16829_v1, 0.0  ;;  %v12287_v37 = vpop.permute.xlu0 %4897 }
 0x383   : > { %16826 = vst [vmem:[#allocation26_spill] sm:$0xff] %v12268_v59  ;;  %v3912_v29 = vmul.f32 %v3880_v46, %v12045_v14  ;;  %v12277_v53 = vmul.f32 0.5, %v12002_v49  ;;  %v4038_v3 = vsub.f32 1.0, %v4006_v21  ;;  %v3752_v51 = vadd.f32 -0.28449672, %v3720_v35 }
 0x384   : > { %16828 = vst [vmem:[#allocation15_spill] sm:$0xff] %v12272_v26  ;;  %7150 = vrcp.f32 %v3498_v13  ;;  %v3605_v6 = vadd.f32 -1.4531521, %v3573_v24  ;;  %v3495_v60 = vadd.f32 1.0, %v3463_v8  ;;  %v3911_v33 = vmul.f32 %v3879_v38, %v3431_v57  ;;  %v16833_v57 = vld [vmem:[#allocation126_spill] sm:$0xff] }
 0x385   : > { %16830 = vst [vmem:[#allocation6_spill] sm:$0xff] %v12277_v53  ;;  %v2220_v63 = vsel %vm15934_vm1, %v12006_v34, 0.0  ;;  %v6750_v14 = vadd.s32 4294967294, %v7245_v18  ;;  %v12290_v49 = vmul.f32 0.5, %v12011_v43  ;;  %v12293_v36 = vand.u32 2147483647, %v12268_v59 }
 0x386   : > { %v3637_v46 = vmul.f32 %v16827_v56, %v3605_v6  ;;  %v3575_v21 = vmul.f32 1.0614054, %v16833_v57  ;;  %v3964_v35 = vmul.f32 1.442695, %v3912_v29  ;;  %v1868_v62 = vsel %vm15954_vm13, %v12068_v20, 0.0  ;;  %v12307_v29 = vpop.permute.xlu1 %4406  ;;  %v16835_v18 = vld [vmem:[#allocation4_spill] sm:$0xff] }
 0x387   : > { %16832 = vst [vmem:[#allocation138_spill] sm:$0xff] %v12290_v49  ;;  %vm5736_vm2 = vcmp.ge.s32.totalorder %v6750_v14, 0  ;;  %vm5768_vm5 = vcmp.lt.s32.totalorder %v6750_v14, 16  ;;  %v4102_v10 = vsub.f32 0.0, %v4038_v3  ;;  %v3784_v8 = vmul.f32 %v12168_v47, %v3752_v51 }
 0x388   : > { %v3669_v38 = vadd.f32 1.4214138, %v3637_v46  ;;  %vm5800_vm4 = vmand %vm5736_vm2, %vm5768_vm5  ;;  %v3607_v43 = vadd.f32 -1.4531521, %v3575_v21  ;;  %7152 = vrcp.f32 %v3495_v60  ;;  %v12301_v16 = vmul.f32 1.442695, %v3911_v33 }
 0x389   : > { %v12304_v13 = vmul.f32 %v9992_v25, %v2220_v63  ;;  %v5832_v24 = vsel %vm5800_vm4, 1, %v16800_v4  ;;  %v3465_v20 = vmul.f32 0.3275911, %v12293_v36  ;;  %v3577_v14 = vmul.f32 1.0614054, %v16835_v18  ;;  %v12317_v63 = vpop.permute.xlu0 %4903  ;;  %v7246_v46 = vld [vmem:[%s15596_s1 + $0x50] sm:$0xff] }
 0x38a   : > { %v3701_v6 = vmul.f32 %v16827_v56, %v3669_v38  ;;  %5883 = vperm.xlu1 %7007, %v5832_v24   ;;  %v3639_v51 = vmul.f32 %v16833_v57, %v3607_v43  ;;  %7154 = vpow2.f32 %v3964_v35  ;;  %v12314_v60 = vmul.f32 %v9984_v23, %v1868_v62  ;;  %v12386_v23 = vpop.f32.mrb[28].mxu0 }
 0x38b   : > { %16834 = vst [vmem:[#allocation126_spill] sm:$0xff] %v12304_v13  ;;  %v3882_v33 = vsub.f32 0.0, %v12253_v52  ;;  %v6751_v21 = vadd.s32 4294967294, %v7246_v46  ;;  %v12322_v44 = vpop.eup %7146  ;;  %v12326_v38 = vsel %vm4070_vm11, %v4102_v10, %v4038_v3  ;;  %v3816_v43 = vadd.f32 0.2548296, %v3784_v8  ;;  %v16837_v10 = vld [vmem:[#allocation47_spill] sm:$0xff] }
 0x38c   : > { %v3733_v35 = vadd.f32 -0.28449672, %v3701_v6  ;;  %v3671_v24 = vadd.f32 1.4214138, %v3639_v51  ;;  %v12328_v62 = vpop.eup %7148  ;;  %v3609_v31 = vadd.f32 -1.4531521, %v3577_v14  ;;  %v12342_v14 = vpop.permute.xlu1 %4412 }
 0x38d   : > { %vm5737_vm4 = vcmp.ge.s32.totalorder %v6751_v21, 0  ;;  %vm5769_vm2 = vcmp.lt.s32.totalorder %v6751_v21, 16  ;;  %v3579_v12 = vmul.f32 1.0614054, %v16836_v11  ;;  %v12333_v22 = vadd.f32 1.0, %v3465_v20  ;;  %v12348_v30 = vpop.permute.xlu0 %4909  ;;  %16848 = vst [vmem:[#allocation4_spill] sm:$0xff] %v12386_v23 }
 0x38e   : > { %v12331_v39 = vpop.eup %7150  ;;  %v3765_v1 = vmul.f32 %v16827_v56, %v3733_v35  ;;  %v3703_v3 = vmul.f32 %v16833_v57, %v3671_v24  ;;  %5435 = vperm.xlu1 %7007, %v16837_v10   ;;  %vm5801_vm11 = vmand %vm5737_vm4, %vm5769_vm2  ;;  %v3641_v6 = vmul.f32 %v16835_v18, %v3609_v31  ;;  %v3848_v20 = vmul.f32 %v12168_v47, %v3816_v43  ;;  %v7247_v31 = vld [vmem:[%s15596_s1 + $0x58] sm:$0xff]  ;;  %v16839_v47 = vld [vmem:[#allocation64_spill] sm:$0xff] }
 0x38f   : > { %v3594_v8 = vmul.f32 1.0614054, %v12331_v39  ;;  %v5833_v51 = vsel %vm5801_vm11, 1, %v16800_v4  ;;  %v3611_v21 = vadd.f32 -1.4531521, %v3579_v12  ;;  %v3914_v46 = vmul.f32 %v3882_v33, %v12253_v52  ;;  %v16840_v33 = vld [vmem:[#allocation79_spill] sm:$0xff] }
 0x390   : > { %v3797_v45 = vadd.f32 0.2548296, %v3765_v1  ;;  %v3735_v35 = vadd.f32 -0.28449672, %v3703_v3  ;;  %vm4053_vm5 = vcmp.lt.f32.partialorder %v16838_v5, 0.0  ;;  %v6752_v28 = vadd.s32 4294967294, %v7247_v31 }
 0x391   : > { %v3626_v24 = vadd.f32 -1.4531521, %v3594_v8  ;;  %v3673_v10 = vadd.f32 1.4214138, %v3641_v6  ;;  %v3643_v9 = vmul.f32 %v16836_v11, %v3611_v21  ;;  %v3581_v1 = vmul.f32 1.0614054, %v16840_v33 }
 0x392   : > { %v3829_v12 = vmul.f32 %v16827_v56, %v3797_v45  ;;  %v3767_v52 = vmul.f32 %v16833_v57, %v3735_v35  ;;  %5886 = vperm.xlu1 %7007, %v5833_v51   ;;  %v12357_v3 = vpop.eup %7152  ;;  %vm5738_vm4 = vcmp.ge.s32.totalorder %v6752_v28, 0  ;;  %vm5770_vm2 = vcmp.lt.s32.totalorder %v6752_v28, 16  ;;  %v16842_v43 = vld [vmem:[#allocation52_spill] sm:$0xff]  ;;  %v16843_v35 = vld [vmem:[#allocation42_spill] sm:$0xff]  ;;  %v12394_v5 = vpop.f32.mrb[29].mxu0 }
 0x393   : > { %v3658_v8 = vmul.f32 %v12331_v39, %v3626_v24  ;;  %v3705_v6 = vmul.f32 %v16835_v18, %v3673_v10  ;;  %v3675_v21 = vadd.f32 1.4214138, %v3643_v9  ;;  %v3613_v45 = vadd.f32 -1.4531521, %v3581_v1  ;;  %vm5802_vm7 = vmand %vm5738_vm4, %vm5770_vm2  ;;  %v12365_v24 = vpop.permute.xlu1 %4418  ;;  %v16844_v9 = vld [vmem:[#allocation2_spill] sm:$0xff]  ;;  %16852 = vst [vmem:[#allocation47_spill] sm:$0xff] %v12394_v5 }
 0x394   : > { %v3989_v7 = vmul.f32 %v16841_v42, %v3829_v12  ;;  %v3799_v31 = vadd.f32 0.2548296, %v3767_v52  ;;  %v7155_v56 = vpop.eup %7154  ;;  %vm5175_vm11 = vcmp.lt.s32.totalorder %v16842_v43, 12  ;;  %vm4055_vm1 = vcmp.lt.f32.partialorder %v16843_v35, 0.0  ;;  %v12409_v53 = vpop.f32.mrb[30].mxu0 }
 0x395   : > { %v3690_v51 = vadd.f32 1.4214138, %v3658_v8  ;;  %v3968_v55 = vmul.f32 1.442695, %v3914_v46  ;;  %v3737_v25 = vadd.f32 -0.28449672, %v3705_v6  ;;  %v3707_v58 = vmul.f32 %v16836_v11, %v3675_v21  ;;  %v12375_v6 = vpop.permute.xlu0 %4915 }
 0x396   : > { %vm4502_vm15 = vcmp.eq.s32.totalorder %v16844_v9, 1  ;;  %v4021_v10 = vsub.f32 1.0, %v3989_v7  ;;  %v3831_v42 = vmul.f32 %v16833_v57, %v3799_v31  ;;  %v5834_v28 = vsel %vm5802_vm7, 1, %v16800_v4  ;;  %v16854_v46 = vld [vmem:[#allocation14_spill] sm:$0xff]  ;;  %16859 = vst [vmem:[#allocation79_spill] sm:$0xff] %v12409_v53 }
 0x397   : > { %v3645_v12 = vmul.f32 %v16840_v33, %v3613_v45  ;;  %v12371_v52 = vmul.f32 %v7155_v56, %v3848_v20  ;;  %vm16039_vm0 = vcmask 1045504   ;;  %v3769_v1 = vmul.f32 %v16835_v18, %v3737_v25  ;;  %5889 = vperm.xlu1 %7007, %v5834_v28   ;;  %v16846_v56 = vld [vmem:[#allocation69_spill] sm:$0xff]  ;;  %v16847_v28 = vld [vmem:[#allocation38_spill] sm:$0xff]  ;;  %v12392_v13 = vpop.permute.xlu1 %4424 }
 0x398   : > { %v3739_v8 = vadd.f32 -0.28449672, %v3707_v58  ;;  %v3722_v21 = vmul.f32 %v12331_v39, %v3690_v51  ;;  %v4085_v7 = vsub.f32 0.0, %v4021_v10  ;;  %v3991_v57 = vmul.f32 %v16845_v0, %v3831_v42  ;;  %v16849_v0 = vld [vmem:[#allocation121_spill] sm:$0xff]  ;;  %16851 = vst [vmem:[#allocation123_spill] sm:$0xff] %v12392_v13  ;;  %v16856_v42 = vld [vmem:[#allocation32_spill] sm:$0xff] }
 0x399   : > { %v3677_v31 = vadd.f32 1.4214138, %v3645_v12  ;;  %7156 = vpow2.f32 %v3968_v55  ;;  %vm4984_vm7 = vcmp.eq.s32.totalorder %v12257_v48, 1  ;;  %v3801_v20 = vadd.f32 0.2548296, %v3769_v1 }
 0x39a   : > { %v3771_v45 = vmul.f32 %v16836_v11, %v3739_v8  ;;  %vm4504_vm4 = vcmp.eq.s32.totalorder %v16846_v56, 1  ;;  %v4117_v25 = vsel %vm4053_vm5, %v4085_v7, %v4021_v10  ;;  %v4023_v58 = vsub.f32 1.0, %v3991_v57  ;;  %v16850_v8 = vld [vmem:[#allocation48_spill] sm:$0xff] }
 0x39b   : > { %v3709_v51 = vmul.f32 %v16840_v33, %v3677_v31  ;;  %vm4057_vm2 = vcmp.lt.f32.partialorder %v16849_v0, 0.0  ;;  %v4181_v55 = vadd.f32 1.0, %v4117_v25  ;;  %v3833_v12 = vmul.f32 %v16835_v18, %v3801_v20  ;;  %5441 = vperm.xlu1 %7007, %v16850_v8   ;;  %v16853_v31 = vld [vmem:[#allocation125_spill] sm:$0xff]  ;;  %v16857_v18 = vld [vmem:[#allocation128_spill] sm:$0xff]  ;;  %v5409_v8 = vpop.permute.xlu0 %5408 }
 0x39c   : > { %v3803_v1 = vadd.f32 0.2548296, %v3771_v45  ;;  %v3754_v10 = vadd.f32 -0.28449672, %v3722_v21  ;;  %v4087_v7 = vsub.f32 0.0, %v4023_v58  ;;  %vm4986_vm5 = vcmp.eq.s32.totalorder %v12287_v37, 1 }
 0x39d   : > { %v3741_v57 = vadd.f32 -0.28449672, %v3709_v51  ;;  %vm4059_vm3 = vcmp.lt.f32.partialorder %v16853_v31, 0.0  ;;  %v12399_v25 = vmul.f32 %v4181_v55, %v16854_v46  ;;  %v4598_v23 = vrot.slane %v16856_v42, 2  ;;  %v16858_v21 = vld [vmem:[#allocation8_spill] sm:$0xff]  ;;  %v16860_v46 = vld [vmem:[#allocation66_spill] sm:$0xff] }
 0x39e   : > { %v3993_v20 = vmul.f32 %v16857_v18, %v3833_v12  ;;  %v3835_v45 = vmul.f32 %v16836_v11, %v3803_v1  ;;  %v4119_v5 = vsel %vm4055_vm1, %v4087_v7, %v4023_v58  ;;  %vm16861_vm14 = vcmp.lt.s32.totalorder %v16842_v43, 8  ;;  %v12423_v12 = vpop.f32.mrb[31].mxu0  ;;  %v16871_v18 = vld [vmem:[#allocation80_spill] sm:$0xff]  ;;  %v16900_v37 = vld [vmem:[#allocation77_spill] sm:$0xff] }
 0x39f   : > { %16855 = vst [vmem:[#allocation72_spill] sm:$0xff] %v12399_v25  ;;  %v3773_v51 = vmul.f32 %v16840_v33, %v3741_v57  ;;  %v4599_v55 = vrot.slane %v12399_v25, 2  ;;  %vm16862_vm9 = vcmp.ge.s32.totalorder %v16842_v43, 4  ;;  %v16863_v11 = vmov 0  ;;  %16866 = vst [vmem:[#allocation42_spill] sm:$0xff] %v12423_v12 }
 0x3a0   : > { %vm12417_vm12 = vmand %vm16862_vm9, %vm16861_vm14  ;;  %v4183_v58 = vadd.f32 1.0, %v4119_v5  ;;  %vm5241_vm1 = vcmp.ge.s32.totalorder %v16842_v43, 12  ;;  %vm16867_vm13 = vcmp.ge.s32.totalorder %v16842_v43, 8  ;;  %v16868_v1 = vmov 0 }
 0x3a1   : > { %v16864_v11 = vsel %vm12417_vm12, 4294967295, %v16863_v11  ;;  %vm12429_vm10 = vmand %vm16867_vm13, %vm5175_vm11  ;;  %v3786_v7 = vmul.f32 %v12331_v39, %v3754_v10  ;;  %v4025_v57 = vsub.f32 1.0, %v3993_v20  ;;  %v3995_v34 = vmul.f32 %v16871_v18, %v3835_v45  ;;  %v16876_v20 = vld [vmem:[#allocation75_spill] sm:$0xff]  ;;  %v12452_v45 = vpop.permute.xlu1 %4430 }
 0x3a2   : > { %16865 = vst [vmem:[#allocation124_spill] sm:$0xff] %v16864_v11  ;;  %v16869_v1 = vsel %vm12429_vm10, 4294967295, %v16868_v1  ;;  %v3805_v5 = vadd.f32 0.2548296, %v3773_v51  ;;  %vm16872_vm14 = vcmp.lt.s32.totalorder %v16842_v43, 4  ;;  %v16873_v13 = vrot.slane %v16839_v47, 2 }
 0x3a3   : > { %16870 = vst [vmem:[#allocation2_spill] sm:$0xff] %v16869_v1  ;;  %vm4534_vm8 = vmand %vm16872_vm14, %vm4502_vm15  ;;  %v16874_v12 = vrot.slane %v16839_v47, 1  ;;  %v16875_v53 = vrot.slane %v12399_v25, 1  ;;  %v12449_v27 = vmul.f32 %v4183_v58, %v16876_v20  ;;  %vm5242_vm13 = vcmp.lt.s32.totalorder %v16842_v43, 16  ;;  %v12461_v59 = vpop.eup %7156 }
 0x3a4   : > { %v4602_v35 = vsel %vm16039_vm0, %v4599_v55, %v16873_v13  ;;  %16878 = vst [vmem:[#allocation69_spill] sm:$0xff] %v12452_v45  ;;  %vm5016_vm15 = vmand %vm12417_vm12, %vm4984_vm7  ;;  %v12459_v13 = vsel %vm16039_vm0, %v4598_v23, %v4599_v55  ;;  %v4089_v51 = vsub.f32 0.0, %v4025_v57  ;;  %v4027_v18 = vsub.f32 1.0, %v3995_v34  ;;  %v12474_v55 = vpop.permute.xlu0 %5859  ;;  %v16886_v34 = vld [vmem:[#allocation25_spill] sm:$0xff] }
 0x3a5   : > { %v5051_v10 = vsel %vm15990_vm6, %v16875_v53, %v16874_v12  ;;  %16877 = vst [vmem:[#allocation43_spill] sm:$0xff] %v12449_v27  ;;  %v4695_v9 = vsel %vm4534_vm8, %v4602_v35, 0.0  ;;  %16879 = vst [vmem:[#allocation121_spill] sm:$0xff] %v12459_v13  ;;  %v16880_v53 = vld [vmem:[#allocation18_spill] sm:$0xff]  ;;  %v16884_v35 = vld [vmem:[#allocation7_spill] sm:$0xff]  ;;  %v4603_v12 = vrot.slane %v12449_v27, 2  ;;  %v3837_v45 = vmul.f32 %v16840_v33, %v3805_v5 }
 0x3a6   : > { %vm16881_vm11 = vcmp.eq.s32.totalorder %v16880_v53, 1  ;;  %vm4508_vm8 = vcmp.eq.s32.totalorder %v16884_v35, 1  ;;  %v5144_v48 = vsel %vm5016_vm15, %v5051_v10, %v4695_v9  ;;  %vm5501_vm7 = vcmp.eq.s32.totalorder %v5409_v8, 1  ;;  %16885 = vst [vmem:[#allocation48_spill] sm:$0xff] %v12474_v55  ;;  %vm12484_vm15 = vmand %vm5241_vm1, %vm5242_vm13  ;;  %v7248_v9 = vld [vmem:[%s15596_s1 + $0x60] sm:$0xff] }
 0x3a7   : > { %vm12467_vm14 = vmand %vm12429_vm10, %vm16881_vm11  ;;  %vm4061_vm9 = vcmp.lt.f32.partialorder %v16886_v34, 0.0  ;;  %v4121_v20 = vsel %vm4057_vm2, %v4089_v51, %v4025_v57  ;;  %v4091_v53 = vsub.f32 0.0, %v4027_v18  ;;  %v16887_v10 = vmov 0 }
 0x3a8   : > { %v16888_v10 = vsel %vm12484_vm15, 4294967295, %v16887_v10  ;;  %v6753_v23 = vadd.s32 4294967294, %v7248_v9  ;;  %vm16890_vm2 = vcmp.lt.s32.totalorder %v16842_v43, 4  ;;  %v16891_v33 = vrot.slane %v16847_v28, 2  ;;  %vm5018_vm1 = vmand %vm12417_vm12, %vm4986_vm5 }
 0x3a9   : > { %16889 = vst [vmem:[#allocation125_spill] sm:$0xff] %v16888_v10  ;;  %vm4536_vm11 = vmand %vm16890_vm2, %vm4504_vm4  ;;  %v16892_v57 = vrot.slane %v16847_v28, 1  ;;  %v16893_v5 = vrot.slane %v12449_v27, 1  ;;  %v4185_v55 = vadd.f32 1.0, %v4121_v20  ;;  %v16894_v56 = vrot.slane %v16839_v47, 2 }
 0x3aa   : > { %v4606_v0 = vsel %vm16039_vm0, %v4603_v12, %v16891_v33  ;;  %v4123_v33 = vsel %vm4059_vm3, %v4091_v53, %v4027_v18  ;;  %v3997_v49 = vmul.f32 %v16896_v50, %v3837_v45  ;;  %v4613_v13 = vrot.slane %v16900_v37, 2  ;;  %vm5533_vm5 = vmand %vm12484_vm15, %vm5501_vm7 }
 0x3ab   : > { %v5055_v51 = vsel %vm15990_vm6, %v16893_v5, %v16892_v57  ;;  %v4697_v15 = vsel %vm4536_vm11, %v4606_v0, 0.0  ;;  %v12511_v9 = vsel %vm16039_vm0, %v16894_v56, %v4603_v12  ;;  %v16897_v57 = vld [vmem:[#allocation37_spill] sm:$0xff]  ;;  %v16898_v0 = vld [vmem:[#allocation122_spill] sm:$0xff]  ;;  %v15964_v41 = vrot.slane %v16856_v42, 7  ;;  %v12527_v12 = vpop.permute.xlu1 %4436 }
 0x3ac   : > { %16895 = vst [vmem:[#allocation14_spill] sm:$0xff] %v12511_v9  ;;  %vm4510_vm4 = vcmp.eq.s32.totalorder %v16897_v57, 1  ;;  %v12517_v20 = vsel %vm5018_vm1, %v5055_v51, %v4697_v15  ;;  %v12520_v5 = vmul.f32 %v4185_v55, %v16898_v0  ;;  %v3818_v31 = vadd.f32 0.2548296, %v3786_v7  ;;  %v5415_v51 = vpop.permute.xlu0 %5414  ;;  %v16906_v7 = vld [vmem:[#allocation120_spill] sm:$0xff]  ;;  %v17033_v9 = vld [vmem:[#allocation30_spill] sm:$0xff] }
 0x3ad   : > { %v4187_v18 = vadd.f32 1.0, %v4123_v33  ;;  %v4029_v50 = vsub.f32 1.0, %v3997_v49  ;;  %v5210_v15 = vsel %vm12467_vm14, %v12399_v25, %v5144_v48  ;;  %v16901_v53 = vrot.slane %v12399_v25, 7  ;;  %v16916_v49 = vld [vmem:[#allocation9_spill] sm:$0xff] }
 0x3ae   : > { %16899 = vst [vmem:[#allocation128_spill] sm:$0xff] %v12520_v5  ;;  %v4607_v45 = vrot.slane %v12520_v5, 2  ;;  %v15965_v55 = vrot.slane %v12520_v5, 1  ;;  %vm16902_vm3 = vcmask 1040384   ;;  %vm5739_vm13 = vcmp.ge.s32.totalorder %v6753_v23, 0 }
 0x3af   : > { %v5566_v8 = vsel %vm16902_vm3, %v15964_v41, %v16901_v53  ;;  %vm16903_vm7 = vcmp.eq.s32.totalorder %v16860_v46, 1  ;;  %v12548_v58 = vmul.f32 %v4187_v18, %v16906_v7  ;;  %v15966_v48 = vrot.slane %v16900_v37, 1 }
 0x3b0   : > { %vm12543_vm11 = vmand %vm16890_vm2, %vm16903_vm7  ;;  %v4093_v56 = vsub.f32 0.0, %v4029_v50  ;;  %v12551_v33 = vsel %vm5533_vm5, %v5566_v8, %v5210_v15  ;;  %v16909_v0 = vrot.slane %v16858_v21, 2  ;;  %v16910_v46 = vrot.slane %v16858_v21, 1 }
 0x3b1   : > { %16907 = vst [vmem:[#allocation66_spill] sm:$0xff] %v12548_v58  ;;  %16908 = vst [vmem:[#allocation80_spill] sm:$0xff] %v12551_v33  ;;  %vm16911_vm14 = vcmp.eq.s32.totalorder %v12317_v63, 1  ;;  %v16912_v18 = vrot.slane %v16847_v28, 2  ;;  %vm5771_vm5 = vcmp.lt.s32.totalorder %v6753_v23, 16  ;;  %v4611_v7 = vrot.slane %v12548_v58, 2 }
 0x3b2   : > { %v4610_v53 = vsel %vm16039_vm0, %v4607_v45, %v16909_v0  ;;  %v5059_v41 = vsel %vm15990_vm6, %v15965_v55, %v16910_v46  ;;  %vm5020_vm1 = vmand %vm12417_vm12, %vm16911_vm14  ;;  %v15967_v0 = vrot.slane %v12548_v58, 1  ;;  %vm4990_vm3 = vcmp.eq.s32.totalorder %v12348_v30, 1  ;;  %v12582_v55 = vpop.permute.xlu1 %4442  ;;  %v16922_v30 = vld [vmem:[#allocation56_spill] sm:$0xff] }
 0x3b3   : > { %v12568_v15 = vsel %vm16039_vm0, %v16912_v18, %v4607_v45  ;;  %v4699_v8 = vsel %vm12543_vm11, %v4610_v53, 0.0  ;;  %vm5803_vm7 = vmand %vm5739_vm13, %vm5771_vm5  ;;  %v3850_v63 = vmul.f32 %v12331_v39, %v3818_v31  ;;  %v4125_v45 = vsel %vm4061_vm9, %v4093_v56, %v4029_v50  ;;  %v7250_v33 = vld [vmem:[%s15596_s1 + $0x70] sm:$0xff] }
 0x3b4   : > { %16913 = vst [vmem:[#allocation75_spill] sm:$0xff] %v12568_v15  ;;  %v12577_v46 = vsel %vm5020_vm1, %v5059_v41, %v4699_v8  ;;  %v5835_v18 = vsel %vm5803_vm7, 1, %v16800_v4  ;;  %vm4540_vm11 = vmand %vm16890_vm2, %vm4508_vm8  ;;  %v4614_v23 = vsel %vm16039_vm0, %v4611_v7, %v4613_v13  ;;  %v5063_v39 = vsel %vm15990_vm6, %v15967_v0, %v15966_v48  ;;  %v12608_v8 = vpop.permute.xlu0 %5865  ;;  %v16924_v0 = vld [vmem:[#allocation112_spill] sm:$0xff] }
 0x3b5   : > { %v4189_v41 = vadd.f32 1.0, %v4125_v45  ;;  %v16914_v34 = vrot.slane %v16858_v21, 2  ;;  %5892 = vperm.xlu1 %7007, %v5835_v18   ;;  %v4701_v50 = vsel %vm4540_vm11, %v4614_v23, 0.0  ;;  %vm5022_vm9 = vmand %vm12417_vm12, %vm4990_vm3  ;;  %v15970_v56 = vrot.slane %v16916_v49, 2  ;;  %16917 = vst [vmem:[#allocation7_spill] sm:$0xff] %v12608_v8  ;;  %v16918_v45 = vld [vmem:[#allocation19_spill] sm:$0xff] }
 0x3b6   : > { %v15969_v53 = vrot.slane %v16916_v49, 1  ;;  %vm16919_vm8 = vcmp.eq.s32.totalorder %v16918_v45, 1  ;;  %v12618_v18 = vsel %vm5022_vm9, %v5063_v39, %v4701_v50  ;;  %vm4992_vm14 = vcmp.eq.s32.totalorder %v12375_v6, 1  ;;  %vm16925_vm1 = vmmov %vm16890_vm2  ;;  %v12648_v57 = vpop.permute.xlu1 %4448 }
 0x3b7   : > { %v12599_v31 = vsel %vm16039_vm0, %v16914_v34, %v4611_v7  ;;  %vm12614_vm13 = vmand %vm12429_vm10, %vm16919_vm8  ;;  %v12621_v23 = vmul.f32 %v4189_v41, %v16922_v30  ;;  %v7249_v34 = vld [vmem:[%s15596_s1 + $0x68] sm:$0xff]  ;;  %v12628_v45 = vmul.f32 %v12461_v59, %v3850_v63  ;;  %v3583_v35 = vmul.f32 1.0614054, %v16924_v0 }
 0x3b8   : > { %16915 = vst [vmem:[#allocation18_spill] sm:$0xff] %v12599_v31  ;;  %v6754_v48 = vadd.s32 4294967294, %v7249_v34  ;;  %v5212_v39 = vsel %vm12614_vm13, %v12449_v27, %v12517_v20  ;;  %vm12640_vm5 = vmand %vm16925_vm1, %vm4510_vm4  ;;  %v15971_v20 = vrot.slane %v12449_v27, 7  ;;  %vm5503_vm11 = vcmp.eq.s32.totalorder %v5415_v51, 1  ;;  %v17130_v31 = vld [vmem:[#allocation3_spill] sm:$0xff] }
 0x3b9   : > { %16923 = vst [vmem:[#allocation25_spill] sm:$0xff] %v12621_v23  ;;  %v4615_v59 = vrot.slane %v12621_v23, 2  ;;  %v15968_v63 = vrot.slane %v12621_v23, 1  ;;  %v3615_v30 = vadd.f32 -1.4531521, %v3583_v35  ;;  %vm5535_vm4 = vmand %vm12484_vm15, %vm5503_vm11  ;;  %7158 = vpow2.f32 %v12301_v16 }
 0x3ba   : > { %vm5740_vm3 = vcmp.ge.s32.totalorder %v6754_v48, 0  ;;  %vm5772_vm7 = vcmp.lt.s32.totalorder %v6754_v48, 16  ;;  %v3585_v7 = vmul.f32 1.0614054, %v12086_v19  ;;  %vm5024_vm9 = vmand %vm12417_vm12, %vm4992_vm14  ;;  %vm16930_vm8 = vcmask 1040384  }
 0x3bb   : > { %vm5804_vm2 = vmand %vm5740_vm3, %vm5772_vm7  ;;  %v4618_v34 = vsel %vm16039_vm0, %v4615_v59, %v15970_v56  ;;  %v5067_v41 = vsel %vm15990_vm6, %v15968_v63, %v15969_v53  ;;  %v12661_v48 = vsel %vm16039_vm0, %v4613_v13, %v4615_v59  ;;  %v3647_v63 = vmul.f32 %v16924_v0, %v3615_v30  ;;  %v5421_v53 = vpop.permute.xlu0 %5420 }
 0x3bc   : > { %16928 = vst [vmem:[#allocation108_spill] sm:$0xff] %v12661_v48  ;;  %v5836_v51 = vsel %vm5804_vm2, 1, %v16800_v4  ;;  %v4703_v35 = vsel %vm12640_vm5, %v4618_v34, 0.0  ;;  %v16929_v13 = vrot.slane %v16839_v47, 7  ;;  %v4198_v16 = vadd.f32 1.0, %v12326_v38  ;;  %vm16940_vm11 = vmmov %vm16930_vm8 }
 0x3bd   : > { %5895 = vperm.xlu1 %7007, %v5836_v51   ;;  %v12680_v56 = vsel %vm5024_vm9, %v5067_v41, %v4703_v35  ;;  %v3617_v6 = vadd.f32 -1.4531521, %v3585_v7  ;;  %7160 = vrcp.f32 %v12333_v22  ;;  %v16932_v34 = vsub.f32 0.0, %v12293_v36  ;;  %v12711_v35 = vpop.permute.xlu1 %4454 }
 0x3be   : > { %v5570_v59 = vsel %vm16930_vm8, %v16929_v13, %v15971_v20  ;;  %v3679_v51 = vadd.f32 1.4214138, %v3647_v63  ;;  %v6755_v13 = vadd.s32 4294967294, %v7250_v33  ;;  %v16933_v20 = vld [vmem:[#allocation22_spill] sm:$0xff]  ;;  %vm4072_vm1 = vcmp.lt.f32.partialorder %v12033_v61, 0.0 }
 0x3bf   : > { %v12682_v50 = vsel %vm5535_vm4, %v5570_v59, %v5212_v39  ;;  %v3913_v30 = vmul.f32 %v16932_v34, %v12293_v36  ;;  %vm16934_vm13 = vcmp.eq.s32.totalorder %v16933_v20, 1  ;;  %v16937_v22 = vsub.f32 1.0, %v12371_v52  ;;  %v16938_v20 = vld [vmem:[#allocation49_spill] sm:$0xff]  ;;  %v12719_v38 = vpop.permute.xlu0 %5871 }
 0x3c0   : > { %16931 = vst [vmem:[#allocation37_spill] sm:$0xff] %v12682_v50  ;;  %vm12695_vm14 = vmand %vm12429_vm10, %vm16934_vm13  ;;  %v3649_v41 = vmul.f32 %v12086_v19, %v3617_v6  ;;  %v3587_v63 = vmul.f32 1.0614054, %v12110_v17  ;;  %v3711_v33 = vmul.f32 %v16924_v0, %v3679_v51  ;;  %vm5741_vm5 = vcmp.ge.s32.totalorder %v6755_v13, 0 }
 0x3c1   : > { %v4104_v39 = vsub.f32 0.0, %v16937_v22  ;;  %5447 = vperm.xlu1 %7007, %v16938_v20   ;;  %vm5773_vm3 = vcmp.lt.s32.totalorder %v6755_v13, 16  ;;  %v5214_v7 = vsel %vm12695_vm14, %v12520_v5, %v12577_v46  ;;  %v15973_v6 = vrot.slane %v16847_v28, 7  ;;  %v7251_v13 = vld [vmem:[%s15596_s1 + $0x78] sm:$0xff]  ;;  %16939 = vst [vmem:[#allocation122_spill] sm:$0xff] %v12719_v38 }
 0x3c2   : > { %v3681_v59 = vadd.f32 1.4214138, %v3649_v41  ;;  %vm5805_vm7 = vmand %vm5741_vm5, %vm5773_vm3  ;;  %v3619_v34 = vadd.f32 -1.4531521, %v3587_v63  ;;  %v15972_v22 = vrot.slane %v12520_v5, 7  ;;  %vm5505_vm2 = vcmp.eq.s32.totalorder %v5421_v53, 1 }
 0x3c3   : > { %v3743_v36 = vadd.f32 -0.28449672, %v3711_v33  ;;  %v5837_v51 = vsel %vm5805_vm7, 1, %v16800_v4  ;;  %v6756_v20 = vadd.s32 4294967294, %v7251_v13  ;;  %vm5537_vm4 = vmand %vm12484_vm15, %vm5505_vm2  ;;  %v3589_v53 = vmul.f32 1.0614054, %v12322_v44  ;;  %v12746_v38 = vpop.eup %7158 }
 0x3c4   : > { %v3713_v46 = vmul.f32 %v12086_v19, %v3681_v59  ;;  %v3651_v41 = vmul.f32 %v12110_v17, %v3619_v34  ;;  %v5574_v63 = vsel %vm16940_vm11, %v15973_v6, %v15972_v22  ;;  %v16941_v33 = vld [vmem:[#allocation65_spill] sm:$0xff]  ;;  %v12749_v8 = vmul.f32 %v4198_v16, %v12264_v32  ;;  %v16948_v13 = vld [vmem:[#allocation68_spill] sm:$0xff]  ;;  %v16956_v5 = vld [vmem:[#allocation50_spill] sm:$0xff] }
 0x3c5   : > { %vm16942_vm9 = vcmp.eq.s32.totalorder %v16941_v33, 1  ;;  %v3775_v59 = vmul.f32 %v16924_v0, %v3743_v36  ;;  %5898 = vperm.xlu1 %7007, %v5837_v51   ;;  %v12740_v34 = vsel %vm5537_vm4, %v5574_v63, %v5214_v7  ;;  %vm5742_vm13 = vcmp.ge.s32.totalorder %v6756_v20, 0  ;;  %v12754_v36 = vld [vmem:[%s15602_s7] ss:$0 sm:$0xff] }
 0x3c6   : > { %vm12735_vm8 = vmand %vm12429_vm10, %vm16942_vm9  ;;  %16945 = vst [vmem:[#allocation120_spill] sm:$0xff] %v12740_v34  ;;  %vm5774_vm14 = vcmp.lt.s32.totalorder %v6756_v20, 16  ;;  %v3745_v22 = vadd.f32 -0.28449672, %v3713_v46  ;;  %v3683_v6 = vadd.f32 1.4214138, %v3651_v41  ;;  %v12758_v7 = vadd.f32 %v12754_v36, %v12314_v60  ;;  %v12761_v46 = vpop.permute.xlu1 %4460 }
 0x3c7   : > { %vm5806_vm5 = vmand %vm5742_vm13, %vm5774_vm14  ;;  %v3621_v50 = vadd.f32 -1.4531521, %v3589_v53  ;;  %v5216_v33 = vsel %vm12735_vm8, %v12548_v58, %v12618_v18  ;;  %16946 = vst [vmem:[#allocation19_spill] sm:$0xff] %v12749_v8  ;;  %v3807_v51 = vadd.f32 0.2548296, %v3775_v59  ;;  %v16947_v18 = vld [vmem:[#allocation34_spill] sm:$0xff]  ;;  %v12767_v53 = vpop.eup %7160 }
 0x3c8   : > { %v5838_v20 = vsel %vm5806_vm5, 1, %v16800_v4  ;;  %vm4063_vm3 = vcmp.lt.f32.partialorder %v16947_v18, 0.0  ;;  %v3966_v41 = vmul.f32 1.442695, %v3913_v30  ;;  %v3777_v32 = vmul.f32 %v12086_v19, %v3745_v22 }
 0x3c9   : > { %v3715_v16 = vmul.f32 %v12110_v17, %v3683_v6  ;;  %v3653_v63 = vmul.f32 %v12322_v44, %v3621_v50  ;;  %vm16949_vm7 = vcmp.eq.s32.totalorder %v16948_v13, 1  ;;  %v16952_v59 = vsub.f32 1.0, %v12371_v52  ;;  %5901 = vperm.xlu1 %7007, %v5838_v20   ;;  %v5427_v13 = vpop.permute.xlu0 %5426  ;;  %v16954_v52 = vld [vmem:[#allocation63_spill] sm:$0xff] }
 0x3ca   : > { %vm12773_vm2 = vmand %vm12429_vm10, %vm16949_vm7  ;;  %v16953_v22 = vsub.f32 1.0, %v12628_v45  ;;  %v3839_v50 = vmul.f32 %v16924_v0, %v3807_v51  ;;  %v3591_v34 = vmul.f32 1.0614054, %v12357_v3  ;;  %vm4074_vm11 = vcmp.lt.f32.partialorder %v12234_v54, 0.0 }
 0x3cb   : > { %v4136_v30 = vsel %vm4072_vm1, %v4104_v39, %v16952_v59  ;;  %v3809_v25 = vadd.f32 0.2548296, %v3777_v32  ;;  %v3747_v42 = vadd.f32 -0.28449672, %v3715_v16  ;;  %v3685_v28 = vadd.f32 1.4214138, %v3653_v63 }
 0x3cc   : > { %v4106_v6 = vsub.f32 0.0, %v16953_v22  ;;  %vm4065_vm1 = vcmp.lt.f32.partialorder %v16954_v52, 0.0  ;;  %v16955_v39 = vld [vmem:[#allocation86_spill] sm:$0xff]  ;;  %v3623_v22 = vadd.f32 -1.4531521, %v3591_v34  ;;  %v15983_v0 = vrot.slane %v16858_v21, 7 }
 0x3cd   : > { %v3999_v59 = vmul.f32 %v16955_v39, %v3839_v50  ;;  %v15982_v51 = vrot.slane %v12548_v58, 7  ;;  %v3841_v20 = vmul.f32 %v12086_v19, %v3809_v25  ;;  %v3779_v32 = vmul.f32 %v12110_v17, %v3747_v42  ;;  %5453 = vperm.xlu1 %7007, %v16956_v5   ;;  %v7253_v19 = vld [vmem:[%s15596_s1 + $0x80] sm:$0xff]  ;;  %v12809_v42 = vpop.permute.xlu1 %4466  ;;  %v16958_v25 = vld [vmem:[#allocation84_spill] sm:$0xff] }
 0x3ce   : > { %v3717_v16 = vmul.f32 %v12322_v44, %v3685_v28  ;;  %vm5507_vm4 = vcmp.eq.s32.totalorder %v5427_v13, 1  ;;  %v3655_v61 = vmul.f32 %v12357_v3, %v3623_v22  ;;  %vm16957_vm9 = vcmask 1040384  }
 0x3cf   : > { %v4031_v63 = vsub.f32 1.0, %v3999_v59  ;;  %v5578_v34 = vsel %vm16957_vm9, %v15983_v0, %v15982_v51  ;;  %vm5539_vm8 = vmand %vm12484_vm15, %vm5507_vm4  ;;  %v6757_v28 = vadd.s32 4294967294, %v7253_v19  ;;  %v4001_v5 = vmul.f32 %v16958_v25, %v3841_v20  ;;  %v16960_v59 = vld [vmem:[#allocation70_spill] sm:$0xff] }
 0x3d0   : > { %v3811_v50 = vadd.f32 0.2548296, %v3779_v32  ;;  %v3749_v13 = vadd.f32 -0.28449672, %v3717_v16  ;;  %v12812_v39 = vsel %vm5539_vm8, %v5578_v34, %v5216_v33  ;;  %vm4067_vm13 = vcmp.lt.f32.partialorder %v16960_v59, 0.0  ;;  %v16961_v34 = vld [vmem:[#allocation29_spill] sm:$0xff] }
 0x3d1   : > { %16959 = vst [vmem:[#allocation56_spill] sm:$0xff] %v12812_v39  ;;  %v4095_v22 = vsub.f32 0.0, %v4031_v63  ;;  %v3687_v51 = vadd.f32 1.4214138, %v3655_v61  ;;  %vm5743_vm14 = vcmp.ge.s32.totalorder %v6757_v28, 0  ;;  %vm5775_vm5 = vcmp.lt.s32.totalorder %v6757_v28, 16 }
 0x3d2   : > { %v4033_v0 = vsub.f32 1.0, %v4001_v5  ;;  %v3843_v21 = vmul.f32 %v12110_v17, %v3811_v50  ;;  %v3781_v58 = vmul.f32 %v12322_v44, %v3749_v13  ;;  %vm5807_vm7 = vmand %vm5743_vm14, %vm5775_vm5  ;;  %v3593_v19 = vmul.f32 1.0614054, %v12767_v53  ;;  %v16962_v17 = vld [vmem:[#allocation104_spill] sm:$0xff]  ;;  %v12832_v13 = vpop.permute.xlu1 %4472  ;;  %v16977_v59 = vld [vmem:[#allocation61_spill] sm:$0xff] }
 0x3d3   : > { %7162 = vpow2.f32 %v3966_v41  ;;  %v4127_v20 = vsel %vm4063_vm3, %v4095_v22, %v4031_v63  ;;  %v3719_v33 = vmul.f32 %v12357_v3, %v3687_v51  ;;  %v5839_v32 = vsel %vm5807_vm7, 1, %v16800_v4  ;;  %v12830_v51 = vpop.permute.xlu0 %5877  ;;  %16965 = vst [vmem:[#allocation22_spill] sm:$0xff] %v12832_v13  ;;  %v16966_v22 = vld [vmem:[#allocation119_spill] sm:$0xff] }
 0x3d4   : > { %v4191_v16 = vadd.f32 1.0, %v4127_v20  ;;  %v4097_v61 = vsub.f32 0.0, %v4033_v0  ;;  %v4003_v28 = vmul.f32 %v16961_v34, %v3843_v21  ;;  %v3813_v25 = vadd.f32 0.2548296, %v3781_v58  ;;  %5904 = vperm.xlu1 %7007, %v5839_v32   ;;  %16964 = vst [vmem:[#allocation112_spill] sm:$0xff] %v12830_v51  ;;  %v16994_v13 = vld [vmem:[#allocation131_spill] sm:$0xff] }
 0x3d5   : > { %vm4069_vm4 = vcmp.lt.f32.partialorder %v16962_v17, 0.0  ;;  %v12824_v5 = vadd.f32 1.0, %v4136_v30  ;;  %v16963_v50 = vsub.f32 1.0, %v12628_v45  ;;  %v3751_v41 = vadd.f32 -0.28449672, %v3719_v33  ;;  %v16981_v17 = vld [vmem:[#allocation94_spill] sm:$0xff] }
 0x3d6   : > { %v3625_v63 = vadd.f32 -1.4531521, %v3593_v19  ;;  %v12835_v20 = vmul.f32 %v4191_v16, %v16966_v22  ;;  %v4129_v21 = vsel %vm4065_vm1, %v4097_v61, %v4033_v0  ;;  %v4035_v58 = vsub.f32 1.0, %v4003_v28  ;;  %v7254_v19 = vld [vmem:[%s15596_s1 + $0x88] sm:$0xff]  ;;  %v16968_v0 = vld [vmem:[#allocation10_spill] sm:$0xff]  ;;  %v17017_v51 = vld [vmem:[#allocation21_spill] sm:$0xff] }
 0x3d7   : > { %v4138_v18 = vsel %vm4074_vm11, %v4106_v6, %v16963_v50  ;;  %v3845_v30 = vmul.f32 %v12322_v44, %v3813_v25  ;;  %vm4501_vm3 = vcmp.eq.s32.totalorder %v12307_v29, 1  ;;  %v4193_v45 = vadd.f32 1.0, %v4129_v21  ;;  %v16969_v61 = vld [vmem:[#allocation82_spill] sm:$0xff]  ;;  %v17008_v39 = vld [vmem:[#allocation135_spill] sm:$0xff] }
 0x3d8   : > { %16967 = vst [vmem:[#allocation49_spill] sm:$0xff] %v12835_v20  ;;  %v3783_v54 = vmul.f32 %v12357_v3, %v3751_v41  ;;  %v3657_v6 = vmul.f32 %v12767_v53, %v3625_v63  ;;  %v6758_v33 = vadd.s32 4294967294, %v7254_v19  ;;  %vm4503_vm11 = vcmp.eq.s32.totalorder %v12342_v14, 1 }
 0x3d9   : > { %v15987_v52 = vrot.slane %v12835_v20, 2  ;;  %v15989_v32 = vrot.slane %v16968_v0, 2  ;;  %v4099_v16 = vsub.f32 0.0, %v4035_v58  ;;  %v4005_v44 = vmul.f32 %v12328_v62, %v3845_v30  ;;  %v17054_v0 = vld [vmem:[#allocation85_spill] sm:$0xff] }
 0x3da   : > { %vm4505_vm1 = vcmp.eq.s32.totalorder %v12365_v24, 1  ;;  %v12852_v34 = vmul.f32 %v4193_v45, %v16969_v61  ;;  %v3815_v28 = vadd.f32 0.2548296, %v3783_v54  ;;  %v3689_v25 = vadd.f32 1.4214138, %v3657_v6  ;;  %v5433_v54 = vpop.permute.xlu0 %5432  ;;  %v12867_v6 = vpop.permute.xlu1 %4478 }
 0x3db   : > { %vm5744_vm9 = vcmp.ge.s32.totalorder %v6758_v33, 0  ;;  %vm4071_vm8 = vcmp.lt.f32.partialorder %v12207_v40, 0.0  ;;  %v16971_v50 = vrot.slane %v16916_v49, 2  ;;  %v4131_v62 = vsel %vm4067_vm13, %v4099_v16, %v4035_v58  ;;  %16972 = vst [vmem:[#allocation34_spill] sm:$0xff] %v12867_v6 }
 0x3dc   : > { %16970 = vst [vmem:[#allocation65_spill] sm:$0xff] %v12852_v34  ;;  %v4037_v63 = vsub.f32 1.0, %v4005_v44  ;;  %vm5776_vm14 = vcmp.lt.s32.totalorder %v6758_v33, 16  ;;  %v15988_v22 = vrot.slane %v12852_v34, 2  ;;  %v4195_v21 = vadd.f32 1.0, %v4131_v62 }
 0x3dd   : > { %v12860_v41 = vsel %vm16039_vm0, %v16971_v50, %v15987_v52  ;;  %v3847_v45 = vmul.f32 %v12357_v3, %v3815_v28  ;;  %vm5808_vm5 = vmand %vm5744_vm9, %vm5776_vm14  ;;  %v3721_v61 = vmul.f32 %v12767_v53, %v3689_v25  ;;  %v7163_v58 = vpop.eup %7162  ;;  %v16974_v3 = vld [vmem:[#allocation44_spill] sm:$0xff]  ;;  %v15991_v28 = vrot.slane %v12621_v23, 7  ;;  %v16976_v25 = vld [vmem:[#allocation111_spill] sm:$0xff] }
 0x3de   : > { %v4101_v19 = vsub.f32 0.0, %v4037_v63  ;;  %v5840_v50 = vsel %vm5808_vm5, 1, %v16800_v4  ;;  %v12877_v33 = vsel %vm16039_vm0, %v15989_v32, %v15988_v22  ;;  %v12880_v16 = vmul.f32 %v4195_v21, %v16974_v3  ;;  %v16978_v22 = vld [vmem:[#allocation91_spill] sm:$0xff] }
 0x3df   : > { %16973 = vst [vmem:[#allocation68_spill] sm:$0xff] %v12877_v33  ;;  %v4007_v44 = vmul.f32 %v12746_v38, %v3847_v45  ;;  %5907 = vperm.xlu1 %7007, %v5840_v50   ;;  %vm16024_vm13 = vcmp.eq.s32.totalorder %v16976_v25, 1  ;;  %v4202_v62 = vadd.f32 1.0, %v4138_v18  ;;  %v3753_v30 = vadd.f32 -0.28449672, %v3721_v61  ;;  %v16984_v61 = vld [vmem:[#allocation33_spill] sm:$0xff]  ;;  %v12931_v18 = vpop.permute.xlu1 %4484 }
 0x3e0   : > { %16975 = vst [vmem:[#allocation63_spill] sm:$0xff] %v12880_v16  ;;  %v4133_v52 = vsel %vm4069_vm4, %v4101_v19, %v4037_v63  ;;  %vm5509_vm7 = vcmp.eq.s32.totalorder %v5433_v54, 1  ;;  %vm16040_vm14 = vcmp.eq.s32.totalorder %v16978_v22, 1  ;;  %v15994_v21 = vrot.slane %v12880_v16, 2  ;;  %v12910_v19 = vld [vmem:[%s15600_s5] ss:$0 sm:$0xff] }
 0x3e1   : > { %v4197_v3 = vadd.f32 1.0, %v4133_v52  ;;  %v4039_v32 = vsub.f32 1.0, %v4007_v44  ;;  %v16979_v38 = vrot.slane %v16900_v37, 7  ;;  %vm16980_vm5 = vcmask 1040384   ;;  %vm5541_vm6 = vmand %vm12484_vm15, %vm5509_vm7  ;;  %v16987_v44 = vld [vmem:[#allocation134_spill] sm:$0xff]  ;;  %16991 = vst [vmem:[#allocation70_spill] sm:$0xff] %v12931_v18 }
 0x3e2   : > { %v3785_v63 = vmul.f32 %v12767_v53, %v3753_v30  ;;  %v16982_v52 = vsel %vm12773_vm2, %v12621_v23, %v12680_v56  ;;  %v12914_v50 = vadd.f32 %v12910_v19, %v16984_v61  ;;  %v16985_v30 = vrot.slane %v12243_v2, 2  ;;  %v16992_v61 = vld [vmem:[#allocation138_spill] sm:$0xff]  ;;  %v17042_v2 = vld [vmem:[#allocation113_spill] sm:$0xff] }
 0x3e3   : > { %v5582_v45 = vsel %vm16980_vm5, %v16979_v38, %v15991_v28  ;;  %v12924_v56 = vmul.f32 %v4197_v3, %v16987_v44  ;;  %v4103_v38 = vsub.f32 0.0, %v4039_v32  ;;  %v12935_v6 = vmul.f32 %v12824_v5, %v16992_v61 }
 0x3e4   : > { %v12905_v54 = vsel %vm5541_vm6, %v5582_v45, %v16982_v52  ;;  %v12921_v60 = vsel %vm16039_vm0, %v16985_v30, %v15994_v21  ;;  %v16989_v45 = vld [vmem:[#allocation51_spill] sm:$0xff]  ;;  %v16990_v52 = vld [vmem:[#allocation5_spill] sm:$0xff]  ;;  %vm16996_vm6 = vcmp.lt.s32.totalorder %v16842_v43, 4  ;;  %v16997_v3 = vmov 0 }
 0x3e5   : > { %16983 = vst [vmem:[#allocation86_spill] sm:$0xff] %v12905_v54  ;;  %16986 = vst [vmem:[#allocation50_spill] sm:$0xff] %v12921_v60  ;;  %5459 = vperm.xlu1 %7007, %v16989_v45   ;;  %v12929_v28 = vadd.f32 %v12910_v19, %v16990_v52  ;;  %v12938_v54 = vmul.f32 0.5, %v16994_v13  ;;  %v16995_v30 = vld [vmem:[#allocation133_spill] sm:$0xff]  ;;  %v3817_v44 = vadd.f32 0.2548296, %v3785_v63  ;;  %v4135_v63 = vsel %vm4071_vm8, %v4103_v38, %v4039_v32 }
 0x3e6   : > { %16988 = vst [vmem:[#allocation84_spill] sm:$0xff] %v12924_v56  ;;  %16993 = vst [vmem:[#allocation29_spill] sm:$0xff] %v12935_v6  ;;  %v4170_v21 = vmul.f32 0.5, %v16995_v30  ;;  %v17000_v45 = vld [vmem:[#allocation23_spill] sm:$0xff]  ;;  %v17001_v52 = vld [vmem:[#allocation26_spill] sm:$0xff]  ;;  %v17004_v29 = vmov 0  ;;  %v12993_v30 = vpop.permute.xlu0 %4918 }
 0x3e7   : > { %vm12945_vm2 = vmand %vm16996_vm6, %vm4501_vm3  ;;  %vm16034_vm7 = vcmp.eq.s32.totalorder %v17000_v45, 1  ;;  %vm4073_vm5 = vcmp.lt.f32.partialorder %v17001_v52, 0.0  ;;  %v16001_v61 = vrot.slane %v12924_v56, 2  ;;  %vm16033_vm3 = vcmp.eq.s32.totalorder %v17008_v39, 1 }
 0x3e8   : > { %v16998_v3 = vsel %vm12945_vm2, 4294967295, %v16997_v3  ;;  %vm17003_vm4 = vmmov %vm16996_vm6  ;;  %v12966_v18 = vmul.f32 %v4202_v62, %v4170_v21  ;;  %v17010_v13 = vmov 0  ;;  %v4199_v40 = vadd.f32 1.0, %v4135_v63  ;;  %v17015_v63 = vld [vmem:[#allocation6_spill] sm:$0xff] }
 0x3e9   : > { %16999 = vst [vmem:[#allocation104_spill] sm:$0xff] %v16998_v3  ;;  %vm12958_vm9 = vmand %vm17003_vm4, %vm4503_vm11  ;;  %v3849_v32 = vmul.f32 %v12767_v53, %v3817_v44  ;;  %v17013_v21 = vrot.slane %v12272_v26, 2  ;;  %v1516_v14 = vrot.slane %v12929_v28, 7  ;;  %v17018_v56 = vrot.slane %v17017_v51, 7  ;;  %v17034_v3 = vld [vmem:[#allocation110_spill] sm:$0xff] }
 0x3ea   : > { %v17005_v29 = vsel %vm12958_vm9, 4294967295, %v17004_v29  ;;  %17007 = vst [vmem:[#allocation82_spill] sm:$0xff] %v12966_v18  ;;  %vm17009_vm11 = vmmov %vm17003_vm4  ;;  %v12996_v18 = vmul.f32 %v4199_v40, %v17015_v63  ;;  %v2221_v24 = vsel %vm16024_vm13, %v12929_v28, 0.0  ;;  %v17022_v40 = vld [vmem:[#allocation126_spill] sm:$0xff]  ;;  %vm17024_vm6 = vcmp.eq.s32.totalorder %v16977_v59, 1 }
 0x3eb   : > { %17006 = vst [vmem:[#allocation119_spill] sm:$0xff] %v17005_v29  ;;  %vm12976_vm4 = vmand %vm17009_vm11, %vm4505_vm1  ;;  %v12989_v38 = vsel %vm16039_vm0, %v17013_v21, %v16001_v61  ;;  %v4009_v53 = vmul.f32 %v7163_v58, %v3849_v32  ;;  %vm17019_vm1 = vcmask 1040384   ;;  %v17020_v21 = vrot.slane %v12914_v50, 7  ;;  %v13011_v58 = vpop.permute.xlu1 %4490 }
 0x3ec   : > { %v17011_v13 = vsel %vm12976_vm4, 4294967295, %v17010_v13  ;;  %17014 = vst [vmem:[#allocation91_spill] sm:$0xff] %v12989_v38  ;;  %17016 = vst [vmem:[#allocation33_spill] sm:$0xff] %v12996_v18  ;;  %v1517_v37 = vsel %vm17019_vm1, %v17018_v56, %v1516_v14  ;;  %v2286_v63 = vadd.f32 %v17022_v40, %v12758_v7  ;;  %v16021_v32 = vrot.slane %v12996_v18, 2  ;;  %v17027_v7 = vld [vmem:[#allocation88_spill] sm:$0xff] }
 0x3ed   : > { %17012 = vst [vmem:[#allocation44_spill] sm:$0xff] %v17011_v13  ;;  %vm17021_vm8 = vmmov %vm17019_vm1  ;;  %v4041_v44 = vsub.f32 1.0, %v4009_v53  ;;  %v1869_v62 = vsel %vm16040_vm14, %v1517_v37, 0.0  ;;  %vm17025_vm11 = vcmp.eq.s32.totalorder %v16981_v17, 1  ;;  %v2344_v26 = vrot.slane %v12929_v28, 1  ;;  %v17031_v13 = vld [vmem:[#allocation13_spill] sm:$0xff] }
 0x3ee   : > { %v1519_v61 = vsel %vm17021_vm8, %v1516_v14, %v17020_v21  ;;  %17023 = vst [vmem:[#allocation134_spill] sm:$0xff] %v13011_v58  ;;  %v2222_v14 = vsel %vm17025_vm11, %v12914_v50, 0.0  ;;  %v17026_v21 = vld [vmem:[#allocation28_spill] sm:$0xff]  ;;  %vm17028_vm1 = vcmp.eq.s32.totalorder %v17027_v7, 1  ;;  %vm4511_vm8 = vcmp.eq.s32.totalorder %v12527_v12, 1 }
 0x3ef   : > { %v1870_v56 = vsel %vm17024_vm6, %v1519_v61, 0.0  ;;  %v1904_v23 = vmul.f32 %v17026_v21, %v1869_v62  ;;  %v2806_v40 = vsel %vm17028_vm1, %v1517_v37, 0.0  ;;  %v17029_v53 = vrot.slane %v12749_v8, 2  ;;  %v13042_v8 = vpop.permute.xlu0 %4921  ;;  %v13057_v52 = vpop.permute.xlu1 %4496 }
 0x3f0   : > { %v4105_v15 = vsub.f32 0.0, %v4041_v44  ;;  %vm17032_vm6 = vcmp.eq.s32.totalorder %v17031_v13, 1  ;;  %v2842_v62 = vmul.f32 %v17033_v9, %v2806_v40  ;;  %v1905_v29 = vmul.f32 %v17026_v21, %v1870_v56  ;;  %17037 = vst [vmem:[#allocation5_spill] sm:$0xff] %v13042_v8  ;;  %v17041_v56 = vld [vmem:[#allocation69_spill] sm:$0xff]  ;;  %17043 = vst [vmem:[#allocation138_spill] sm:$0xff] %v13057_v52 }
 0x3f1   : > { %v13031_v58 = vsel %vm16039_vm0, %v17029_v53, %v16021_v32  ;;  %v2807_v16 = vsel %vm17032_vm6, %v1519_v61, 0.0  ;;  %v1935_v5 = vadd.f32 %v12754_v36, %v1904_v23  ;;  %v2256_v10 = vmul.f32 %v17034_v3, %v2221_v24  ;;  %v17038_v53 = vld [vmem:[#allocation123_spill] sm:$0xff]  ;;  %v17051_v52 = vld [vmem:[#allocation129_spill] sm:$0xff] }
 0x3f2   : > { %17030 = vst [vmem:[#allocation51_spill] sm:$0xff] %v13031_v58  ;;  %v17035_v47 = vrot.slane %v17017_v51, 1  ;;  %vm17036_vm11 = vcmask 1046528   ;;  %vm4507_vm1 = vcmp.eq.s32.totalorder %v17038_v53, 1  ;;  %v4137_v32 = vsel %vm4073_vm5, %v4105_v15, %v4041_v44  ;;  %v17044_v44 = vld [vmem:[#allocation136_spill] sm:$0xff] }
 0x3f3   : > { %v17039_v27 = vrot.slane %v12914_v50, 1  ;;  %vm17040_vm6 = vmmov %vm17036_vm11  ;;  %v2843_v24 = vmul.f32 %v17033_v9, %v2807_v16  ;;  %vm4509_vm13 = vcmp.eq.s32.totalorder %v17041_v56, 1  ;;  %v4201_v51 = vadd.f32 1.0, %v4137_v32  ;;  %v17047_v16 = vld [vmem:[#allocation20_spill] sm:$0xff]  ;;  %v17050_v32 = vld [vmem:[#allocation115_spill] sm:$0xff] }
 0x3f4   : > { %v2345_v18 = vsel %vm17036_vm11, %v17035_v47, %v2344_v26  ;;  %v2287_v47 = vadd.f32 %v2256_v10, %v1935_v5  ;;  %vm17048_vm11 = vcmp.eq.s32.totalorder %v17047_v16, 1  ;;  %v17094_v56 = vld [vmem:[#allocation47_spill] sm:$0xff]  ;;  %v17125_v58 = vrot.slane %v12914_v50, 7 }
 0x3f5   : > { %v2347_v40 = vsel %vm17040_vm6, %v2344_v26, %v17039_v27  ;;  %v2700_v23 = vsel %vm16034_vm7, %v2345_v18, 0.0  ;;  %v2874_v27 = vadd.f32 %v2842_v62, %v17044_v44  ;;  %v17045_v26 = vld [vmem:[#allocation109_spill] sm:$0xff]  ;;  %v3010_v59 = vsel %vm17048_vm11, %v2345_v18, 0.0  ;;  %v17053_v44 = vld [vmem:[#allocation116_spill] sm:$0xff] }
 0x3f6   : > { %v2701_v34 = vsel %vm16033_vm3, %v2347_v40, 0.0  ;;  %v2736_v1 = vmul.f32 %v17042_v2, %v2700_v23  ;;  %vm17046_vm5 = vcmp.eq.s32.totalorder %v17045_v26, 1  ;;  %v13068_v10 = vmul.f32 %v4201_v51, %v12938_v54  ;;  %v17058_v26 = vld [vmem:[#allocation46_spill] sm:$0xff] }
 0x3f7   : > { %v2737_v15 = vmul.f32 %v17042_v2, %v2701_v34  ;;  %v2906_v13 = vsel %vm17046_vm5, %v12929_v28, 0.0  ;;  %vm17052_vm3 = vcmp.eq.s32.totalorder %v17051_v52, 1  ;;  %v3046_v39 = vmul.f32 %v17053_v44, %v3010_v59  ;;  %v13085_v52 = vpop.permute.xlu0 %5438 }
 0x3f8   : > { %17049 = vst [vmem:[#allocation131_spill] sm:$0xff] %v13068_v10  ;;  %v2768_v5 = vadd.f32 %v2736_v1, %v2286_v63  ;;  %v2942_v23 = vmul.f32 %v17050_v32, %v2906_v13  ;;  %v3011_v34 = vsel %vm17052_vm3, %v2347_v40, 0.0  ;;  %vm17055_vm5 = vcmp.eq.s32.totalorder %v17054_v0, 1  ;;  %v17056_v13 = vld [vmem:[#allocation11_spill] sm:$0xff] }
 0x3f9   : > { %v13074_v62 = vadd.f32 %v2737_v15, %v2287_v47  ;;  %v3047_v8 = vmul.f32 %v17053_v44, %v3011_v34  ;;  %v3111_v16 = vsel %vm17055_vm5, %v1517_v37, 0.0  ;;  %v16041_v54 = vrot.slane %v13068_v10, 2  ;;  %v17059_v15 = vld [vmem:[#allocation117_spill] sm:$0xff]  ;;  %v17060_v34 = vld [vmem:[#allocation107_spill] sm:$0xff] }
 0x3fa   : > { %v13081_v51 = vadd.f32 %v2843_v24, %v2768_v5  ;;  %v2974_v1 = vadd.f32 %v2942_v23, %v2874_v27  ;;  %vm17057_vm11 = vcmp.eq.s32.totalorder %v17056_v13, 1  ;;  %v3078_v47 = vadd.f32 %v3046_v39, %v17058_v26  ;;  %v17064_v39 = vld [vmem:[#allocation62_spill] sm:$0xff]  ;;  %v17067_v5 = vld [vmem:[#allocation40_spill] sm:$0xff] }
 0x3fb   : > { %v3112_v63 = vsel %vm17057_vm11, %v1519_v61, 0.0  ;;  %v3146_v7 = vmul.f32 %v17059_v15, %v3111_v16  ;;  %vm17061_vm3 = vcmp.eq.s32.totalorder %v17060_v34, 1  ;;  %v17062_v0 = vrot.slane %v12935_v6, 2  ;;  %v13105_v16 = vpop.permute.xlu1 %4888  ;;  %v17069_v34 = vld [vmem:[#allocation92_spill] sm:$0xff]  ;;  %v13162_v53 = vpop.permute.xlu0 %4924 }
 0x3fc   : > { %v3147_v59 = vmul.f32 %v17059_v15, %v3112_v63  ;;  %v3210_v37 = vsel %vm17061_vm3, %v12929_v28, 0.0  ;;  %v1936_v61 = vadd.f32 %v12754_v36, %v1905_v29  ;;  %v13101_v27 = vadd.f32 %v3047_v8, %v2974_v1  ;;  %17066 = vst [vmem:[#allocation23_spill] sm:$0xff] %v13105_v16  ;;  %v17068_v28 = vld [vmem:[#allocation118_spill] sm:$0xff]  ;;  %v13126_v29 = vld [vmem:[%s15601_s6 + $0x8] ss:$0 sm:$0xff]  ;;  %17085 = vst [vmem:[#allocation6_spill] sm:$0xff] %v13162_v53 }
 0x3fd   : > { %v13098_v24 = vsel %vm16039_vm0, %v17062_v0, %v16041_v54  ;;  %vm17065_vm5 = vcmp.eq.s32.totalorder %v17064_v39, 1  ;;  %v3178_v23 = vadd.f32 %v3146_v7, %v17067_v5  ;;  %v3244_v63 = vmul.f32 %v17068_v28, %v3210_v37  ;;  %v17071_v0 = vld [vmem:[#allocation96_spill] sm:$0xff]  ;;  %v17076_v37 = vld [vmem:[#allocation114_spill] sm:$0xff] }
 0x3fe   : > { %17063 = vst [vmem:[#allocation133_spill] sm:$0xff] %v13098_v24  ;;  %v3306_v26 = vsel %vm17065_vm5, %v2345_v18, 0.0  ;;  %v13108_v13 = vadd.f32 %v3147_v59, %v3078_v47  ;;  %vm17070_vm11 = vcmp.eq.s32.totalorder %v17069_v34, 1  ;;  %vm17072_vm0 = vcmp.lt.s32.totalorder %v16842_v43, 4  ;;  %v17075_v34 = vld [vmem:[#allocation93_spill] sm:$0xff]  ;;  %v17084_v5 = vld [vmem:[#allocation4_spill] sm:$0xff] }
 0x3ff   : > { %v3307_v10 = vsel %vm17070_vm11, %v2347_v40, 0.0  ;;  %vm13118_vm14 = vmand %vm17072_vm0, %vm4511_vm8  ;;  %v2257_v18 = vmul.f32 %v17034_v3, %v2222_v14  ;;  %v3340_v7 = vmul.f32 %v13126_v29, %v3306_v26  ;;  %v16042_v40 = vrot.slane %v12835_v20, 1  ;;  %v7257_v14 = vld [vmem:[%s15596_s1 + $0x90] sm:$0xff]  ;;  %v13251_v6 = vpop.permute.xlu0 %4927 }
 0x400   : > { %vm4993_vm5 = vcmp.eq.s32.totalorder %v12993_v30, 1  ;;  %v4704_v12 = vsel %vm13118_vm14, %v12860_v41, 0.0  ;;  %v3275_v1 = vadd.f32 %v3244_v63, %v3178_v23  ;;  %v3341_v47 = vmul.f32 %v13126_v29, %v3307_v10  ;;  %v17081_v30 = vld [vmem:[#allocation130_spill] sm:$0xff]  ;;  %17117 = vst [vmem:[#allocation136_spill] sm:$0xff] %v13251_v6 }
 0x401   : > { %vm5025_vm0 = vmand %vm12417_vm12, %vm4993_vm5  ;;  %v6759_v59 = vadd.s32 4294967294, %v7257_v14  ;;  %vm17077_vm3 = vcmp.lt.s32.totalorder %v16842_v43, 4  ;;  %v17078_v41 = vmov 0  ;;  %v3371_v10 = vadd.f32 %v3340_v7, %v17081_v30 }
 0x402   : > { %vm13146_vm14 = vmand %vm17077_vm3, %vm4507_vm1  ;;  %v17082_v39 = vrot.slane %v16916_v49, 1  ;;  %v13158_v23 = vadd.f32 %v12910_v19, %v17084_v5  ;;  %v13160_v63 = vadd.f32 %v2257_v18, %v1936_v61  ;;  %v17087_v8 = vmov 0  ;;  %v17091_v61 = vld [vmem:[#allocation90_spill] sm:$0xff]  ;;  %v13186_v5 = vpop.permute.xlu1 %4894 }
 0x403   : > { %v17079_v41 = vsel %vm13146_vm14, 4294967295, %v17078_v41  ;;  %vm17083_vm5 = vmmov %vm17040_vm6  ;;  %v13172_v7 = vadd.f32 %v3341_v47, %v3275_v1  ;;  %vm5777_vm11 = vcmp.lt.s32.totalorder %v6759_v59, 16  ;;  %vm17092_vm7 = vcmp.eq.s32.totalorder %v17091_v61, 1  ;;  %17095 = vst [vmem:[#allocation30_spill] sm:$0xff] %v13186_v5  ;;  %v17096_v1 = vld [vmem:[#allocation67_spill] sm:$0xff] }
 0x404   : > { %17080 = vst [vmem:[#allocation26_spill] sm:$0xff] %v17079_v41  ;;  %v5069_v26 = vsel %vm17083_vm5, %v17082_v39, %v16042_v40  ;;  %vm17086_vm1 = vmmov %vm17077_vm3  ;;  %vm5745_vm5 = vcmp.ge.s32.totalorder %v6759_v59, 0  ;;  %v2907_v18 = vsel %vm17092_vm7, %v12914_v50, 0.0  ;;  %v13180_v30 = vmul.f32 0.70710677, %v3371_v10  ;;  %v17101_v47 = vld [vmem:[#allocation87_spill] sm:$0xff] }
 0x405   : > { %vm13168_vm3 = vmand %vm17086_vm1, %vm4509_vm13  ;;  %v13174_v14 = vsel %vm5025_vm0, %v5069_v26, %v4704_v12  ;;  %v13184_v39 = vadd.f32 %v12910_v19, %v17094_v56  ;;  %vm17097_vm0 = vcmp.eq.s32.totalorder %v12582_v55, 1  ;;  %v17098_v12 = vmov 0 }
 0x406   : > { %v17088_v8 = vsel %vm13168_vm3, 4294967295, %v17087_v8  ;;  %17090 = vst [vmem:[#allocation126_spill] sm:$0xff] %v13174_v14  ;;  %17093 = vst [vmem:[#allocation28_spill] sm:$0xff] %v13180_v30  ;;  %vm4519_vm7 = vcmp.eq.s32.totalorder %v12761_v46, 1  ;;  %v13202_v26 = vmul.f32 0.70710677, %v13172_v7 }
 0x407   : > { %17089 = vst [vmem:[#allocation21_spill] sm:$0xff] %v17088_v8  ;;  %vm5809_vm6 = vmand %vm5745_vm5, %vm5777_vm11  ;;  %vm17102_vm11 = vcmp.eq.s32.totalorder %v17101_v47, 1  ;;  %vm17103_vm5 = vcmp.eq.s32.totalorder %v12648_v57, 1  ;;  %v17105_v40 = vmov 0  ;;  %v17110_v57 = vmov 0  ;;  %v13280_v8 = vpop.permute.xlu1 %4900 }
 0x408   : > { %vm13193_vm8 = vmand %vm17086_vm1, %vm17097_vm0  ;;  %v3211_v59 = vsel %vm17102_vm11, %v12914_v50, 0.0  ;;  %v5841_v56 = vsel %vm5809_vm6, 1, %v16800_v4  ;;  %vm17108_vm6 = vcmp.eq.s32.totalorder %v12711_v35, 1  ;;  %v3436_v47 = vand.u32 2147483647, %v13202_v26  ;;  %17129 = vst [vmem:[#allocation116_spill] sm:$0xff] %v13280_v8 }
 0x409   : > { %v17099_v12 = vsel %vm13193_vm8, 4294967295, %v17098_v12  ;;  %vm17104_vm0 = vmmov %vm17086_vm1  ;;  %5910 = vperm.xlu1 %7007, %v5841_v56   ;;  %v2943_v56 = vmul.f32 %v17050_v32, %v2907_v18  ;;  %v17114_v35 = vmov 0  ;;  %v3245_v54 = vmul.f32 %v17068_v28, %v3211_v59  ;;  %v17134_v8 = vld [vmem:[#allocation16_spill] sm:$0xff] }
 0x40a   : > { %17100 = vst [vmem:[#allocation110_spill] sm:$0xff] %v17099_v12  ;;  %vm13215_vm1 = vmand %vm17104_vm0, %vm17103_vm5  ;;  %v3435_v14 = vand.u32 2147483647, %v13180_v30  ;;  %v1520_v18 = vrot.slane %v13184_v39, 7  ;;  %v3468_v38 = vmul.f32 0.3275911, %v3436_v47 }
 0x40b   : > { %v17106_v40 = vsel %vm13215_vm1, 4294967295, %v17105_v40  ;;  %vm17109_vm5 = vmmov %vm17104_vm0  ;;  %v17121_v59 = vmov 0  ;;  %v17127_v48 = vrot.slane %v13158_v23, 7  ;;  %v13291_v5 = vmul.f32 0.5, %v3371_v10 }
 0x40c   : > { %17107 = vst [vmem:[#allocation123_spill] sm:$0xff] %v17106_v40  ;;  %vm13231_vm0 = vmand %vm17109_vm5, %vm17108_vm6  ;;  %vm17118_vm6 = vcmp.eq.s32.totalorder %v17071_v0, 1  ;;  %v3500_v41 = vadd.f32 1.0, %v3468_v38  ;;  %v3467_v40 = vmul.f32 0.3275911, %v3435_v14  ;;  %v3883_v30 = vsub.f32 0.0, %v3435_v14 }
 0x40d   : > { %v17111_v57 = vsel %vm13231_vm0, 4294967295, %v17110_v57  ;;  %vm17113_vm13 = vmmov %vm17109_vm5  ;;  %v2224_v46 = vsel %vm17118_vm6, %v13158_v23, 0.0  ;;  %vm17126_vm0 = vcmask 1040384   ;;  %17133 = vst [vmem:[#allocation85_spill] sm:$0xff] %v13291_v5  ;;  %v17135_v24 = vrot.slane %v12914_v50, 1 }
 0x40e   : > { %17112 = vst [vmem:[#allocation69_spill] sm:$0xff] %v17111_v57  ;;  %vm13244_vm11 = vmand %vm17113_vm13, %vm4519_vm7  ;;  %v2348_v57 = vrot.slane %v13184_v39, 1  ;;  %vm17119_vm13 = vcmp.eq.s32.totalorder %v12809_v42, 1  ;;  %7164 = vrcp.f32 %v3500_v41  ;;  %v13313_v41 = vpop.permute.xlu0 %5444  ;;  %v3915_v33 = vmul.f32 %v3883_v30, %v3435_v14 }
 0x40f   : > { %v17115_v35 = vsel %vm13244_vm11, 4294967295, %v17114_v35  ;;  %vm17120_vm7 = vmmov %vm17109_vm5  ;;  %vm17124_vm11 = vcmp.eq.s32.totalorder %v16981_v17, 1  ;;  %17140 = vst [vmem:[#allocation11_spill] sm:$0xff] %v13313_v41  ;;  %v13327_v41 = vpop.permute.xlu1 %4906 }
 0x410   : > { %17116 = vst [vmem:[#allocation113_spill] sm:$0xff] %v17115_v35  ;;  %vm13264_vm5 = vmand %vm17120_vm7, %vm17119_vm13  ;;  %v2909_v55 = vsel %vm17124_vm11, %v13158_v23, 0.0  ;;  %v1521_v35 = vsel %vm17126_vm0, %v17125_v58, %v1520_v18  ;;  %vm4512_vm13 = vcmp.eq.s32.totalorder %v17130_v31, 1  ;;  %vm17131_vm11 = vcmp.eq.s32.totalorder %v17075_v34, 1 }
 0x411   : > { %v17122_v59 = vsel %vm13264_vm5, 4294967295, %v17121_v59  ;;  %vm17128_vm6 = vmmov %vm17126_vm0  ;;  %v1871_v60 = vsel %vm17131_vm11, %v1521_v35, 0.0  ;;  %vm17132_vm0 = vcmp.eq.s32.totalorder %v17076_v37, 1  ;;  %v13299_v38 = vmul.f32 %v17050_v32, %v2909_v55  ;;  %17144 = vst [vmem:[#allocation46_spill] sm:$0xff] %v13327_v41 }
 0x412   : > { %17123 = vst [vmem:[#allocation115_spill] sm:$0xff] %v17122_v59  ;;  %v13278_v42 = vsel %vm17128_vm6, %v1520_v18, %v17127_v48  ;;  %v2223_v58 = vsel %vm17132_vm0, %v13184_v39, 0.0  ;;  %v13294_v48 = vmul.f32 %v17034_v3, %v2224_v46  ;;  %v1906_v18 = vmul.f32 %v17026_v21, %v1871_v60 }
 0x413   : > { %vm17136_vm6 = vcmask 1046528   ;;  %v2258_v10 = vmul.f32 %v17034_v3, %v2223_v58  ;;  %v17137_v46 = vrot.slane %v13158_v23, 1  ;;  %vm17139_vm0 = vcmp.eq.s32.totalorder %v17096_v1, 1 }
 0x414   : > { %v2349_v59 = vsel %vm17136_vm6, %v17135_v24, %v2348_v57  ;;  %v1937_v6 = vadd.f32 %v12754_v36, %v1906_v18  ;;  %vm17138_vm11 = vmmov %vm17136_vm6  ;;  %v3884_v55 = vsub.f32 0.0, %v3436_v47  ;;  %vm17141_vm7 = vcmp.eq.s32.totalorder %v17091_v61, 1 }
 0x415   : > { %v13309_v5 = vsel %vm17138_vm11, %v2348_v57, %v17137_v46  ;;  %v2702_v60 = vsel %vm17139_vm0, %v2349_v59, 0.0  ;;  %v3213_v50 = vsel %vm17141_vm7, %v13158_v23, 0.0  ;;  %vm17142_vm6 = vcmp.eq.s32.totalorder %v16978_v22, 1 }
 0x416   : > { %v2738_v24 = vmul.f32 %v17042_v2, %v2702_v60  ;;  %v2808_v3 = vsel %vm17142_vm6, %v1521_v35, 0.0  ;;  %v3499_v58 = vadd.f32 1.0, %v3467_v40  ;;  %v13321_v18 = vadd.f32 %v2258_v10, %v1937_v6 }
 0x417   : > { %v2844_v57 = vmul.f32 %v17033_v9, %v2808_v3  ;;  %vm17143_vm11 = vcmp.eq.s32.totalorder %v16976_v25, 1  ;;  %v2975_v60 = vadd.f32 %v2943_v56, %v13081_v51  ;;  %vm17145_vm7 = vcmp.eq.s32.totalorder %v17000_v45, 1  ;;  %v17146_v3 = vld [vmem:[#allocation88_spill] sm:$0xff] }
 0x418   : > { %v2908_v46 = vsel %vm17143_vm11, %v13184_v39, 0.0  ;;  %v13330_v61 = vadd.f32 %v2738_v24, %v13160_v63  ;;  %v3012_v12 = vsel %vm17145_vm7, %v2349_v59, 0.0  ;;  %vm17147_vm0 = vcmp.eq.s32.totalorder %v17146_v3, 1  ;;  %v17148_v63 = vld [vmem:[#allocation109_spill] sm:$0xff]  ;;  %v13378_v3 = vpop.permute.xlu1 %4912 }
 0x419   : > { %v2876_v6 = vadd.f32 %v2844_v57, %v13074_v62  ;;  %v2944_v40 = vmul.f32 %v17050_v32, %v2908_v46  ;;  %v3048_v10 = vmul.f32 %v17053_v44, %v3012_v12  ;;  %v3113_v16 = vsel %vm17147_vm0, %v1521_v35, 0.0  ;;  %v17150_v57 = vld [vmem:[#allocation20_spill] sm:$0xff]  ;;  %v13352_v46 = vpop.permute.xlu0 %4930  ;;  %17164 = vst [vmem:[#allocation62_spill] sm:$0xff] %v13378_v3 }
 0x41a   : > { %v3916_v53 = vmul.f32 %v3884_v55, %v3436_v47  ;;  %v3148_v14 = vmul.f32 %v17059_v15, %v3113_v16  ;;  %vm17149_vm6 = vcmp.eq.s32.totalorder %v17148_v63, 1  ;;  %v3276_v51 = vadd.f32 %v3245_v54, %v13108_v13  ;;  %17152 = vst [vmem:[#allocation117_spill] sm:$0xff] %v13352_v46  ;;  %v17153_v16 = vld [vmem:[#allocation129_spill] sm:$0xff]  ;;  %v17155_v54 = vld [vmem:[#allocation10_spill] sm:$0xff] }
 0x41b   : > { %v3212_v30 = vsel %vm17149_vm6, %v13184_v39, 0.0  ;;  %v13345_v56 = vadd.f32 %v2944_v40, %v2876_v6  ;;  %v13347_v24 = vadd.f32 %v3048_v10, %v2975_v60  ;;  %vm17151_vm11 = vcmp.eq.s32.totalorder %v17150_v57, 1  ;;  %v17163_v10 = vld [vmem:[#allocation5_spill] sm:$0xff] }
 0x41c   : > { %v3246_v62 = vmul.f32 %v17068_v28, %v3212_v30  ;;  %v3308_v12 = vsel %vm17151_vm11, %v2349_v59, 0.0  ;;  %v3180_v47 = vadd.f32 %v3148_v14, %v13101_v27  ;;  %vm17154_vm7 = vcmp.eq.s32.totalorder %v17153_v16, 1  ;;  %v13380_v14 = vpop.eup %7164 }
 0x41d   : > { %v3309_v35 = vsel %vm17154_vm7, %v13309_v5, 0.0  ;;  %v3342_v39 = vmul.f32 %v13126_v29, %v3308_v12  ;;  %v17156_v13 = vrot.slane %v17155_v54, 2  ;;  %v17157_v55 = vrot.slane %v12835_v20, 2  ;;  %v7258_v12 = vld [vmem:[%s15596_s1 + $0x98] sm:$0xff] }
 0x41e   : > { %vm17158_vm0 = vcmask 1045504   ;;  %vm17159_vm6 = vcmp.lt.s32.totalorder %v16842_v43, 4  ;;  %vm17162_vm5 = vcmp.eq.s32.totalorder %v17134_v8, 1  ;;  %v3343_v6 = vmul.f32 %v13126_v29, %v3309_v35 }
 0x41f   : > { %v4622_v60 = vsel %vm17158_vm0, %v17157_v55, %v17156_v13  ;;  %vm13368_vm11 = vmand %vm17159_vm6, %vm4512_vm13  ;;  %v1872_v27 = vsel %vm17162_vm5, %v13278_v42, 0.0  ;;  %v16065_v40 = vrot.slane %v17155_v54, 1  ;;  %vm4994_vm7 = vcmp.eq.s32.totalorder %v17163_v10, 1 }
 0x420   : > { %v3277_v31 = vadd.f32 %v3246_v62, %v3180_v47  ;;  %v13382_v30 = vadd.f32 %v3342_v39, %v3276_v51  ;;  %v4705_v57 = vsel %vm13368_vm11, %v4622_v60, 0.0  ;;  %vm5026_vm13 = vmand %vm12417_vm12, %vm4994_vm7  ;;  %v6760_v16 = vadd.s32 4294967294, %v7258_v12  ;;  %v7259_v62 = vld [vmem:[%s15596_s1 + $0xf8] sm:$0xff]  ;;  %v17167_v39 = vld [vmem:[#allocation79_spill] sm:$0xff] }
 0x421   : > { %v3596_v35 = vmul.f32 1.0614054, %v13380_v14  ;;  %v17165_v13 = vrot.slane %v12835_v20, 1  ;;  %vm17166_vm5 = vcmask 1046528   ;;  %v6772_v47 = vadd.s32 4294967294, %v7259_v62  ;;  %v17168_v60 = vld [vmem:[#allocation17_spill] sm:$0xff] }
 0x422   : > { %v13402_v55 = vadd.f32 %v12910_v19, %v17167_v39  ;;  %v3970_v59 = vmul.f32 1.442695, %v3915_v33  ;;  %v13405_v10 = vadd.f32 %v3343_v6, %v3277_v31  ;;  %v13408_v12 = vmul.f32 0.70710677, %v13382_v30 }
 0x423   : > { %v5071_v51 = vsel %vm17166_vm5, %v17165_v13, %v16065_v40  ;;  %v3628_v13 = vadd.f32 -1.4531521, %v3596_v35  ;;  %vm5746_vm6 = vcmp.ge.s32.totalorder %v6760_v16, 0  ;;  %vm5778_vm11 = vcmp.lt.s32.totalorder %v6760_v16, 16  ;;  %v13412_v40 = vpop.permute.xlu0 %4933  ;;  %v13424_v16 = vpop.permute.xlu1 %5405  ;;  %v17172_v35 = vld [vmem:[#allocation137_spill] sm:$0xff] }
 0x424   : > { %17169 = vst [vmem:[#allocation40_spill] sm:$0xff] %v13408_v12  ;;  %v13410_v63 = vsel %vm5026_vm13, %v5071_v51, %v4705_v57  ;;  %vm5758_vm7 = vcmp.ge.s32.totalorder %v6772_v47, 0  ;;  %17170 = vst [vmem:[#allocation118_spill] sm:$0xff] %v13412_v40  ;;  %7166 = vrcp.f32 %v3499_v58  ;;  %v13415_v62 = vmul.f32 %v17068_v28, %v3213_v50 }
 0x425   : > { %v13418_v39 = vmul.f32 0.70710677, %v13405_v10  ;;  %v3437_v33 = vand.u32 2147483647, %v13408_v12  ;;  %vm5810_vm5 = vmand %vm5746_vm6, %vm5778_vm11  ;;  %v3660_v6 = vmul.f32 %v13380_v14, %v3628_v13  ;;  %vm5790_vm13 = vcmp.lt.s32.totalorder %v6772_v47, 16  ;;  %17171 = vst [vmem:[#allocation92_spill] sm:$0xff] %v13424_v16 }
 0x426   : > { %v5842_v31 = vsel %vm5810_vm5, 1, %v16800_v4  ;;  %vm16079_vm0 = vcmp.eq.s32.totalorder %v17172_v35, 1  ;;  %7168 = vpow2.f32 %v3970_v59  ;;  %v3972_v50 = vmul.f32 1.442695, %v3916_v53  ;;  %vm5822_vm6 = vmand %vm5758_vm7, %vm5790_vm13  ;;  %v17173_v13 = vld [vmem:[#allocation61_spill] sm:$0xff] }
 0x427   : > { %v1907_v58 = vmul.f32 %v17026_v21, %v1872_v27  ;;  %v3438_v51 = vand.u32 2147483647, %v13418_v39  ;;  %5913 = vperm.xlu1 %7007, %v5842_v31   ;;  %v3692_v12 = vadd.f32 1.4214138, %v3660_v6  ;;  %vm17174_vm11 = vcmp.eq.s32.totalorder %v17173_v13, 1  ;;  %v17175_v27 = vld [vmem:[#allocation13_spill] sm:$0xff]  ;;  %v13456_v43 = vpop.permute.xlu1 %5856 }
 0x428   : > { %v2809_v3 = vsel %vm17174_vm11, %v13278_v42, 0.0  ;;  %v5854_v57 = vsel %vm5822_vm6, 1, %v16800_v4  ;;  %v16073_v16 = vrot.slane %v13402_v55, 1  ;;  %v3469_v40 = vmul.f32 0.3275911, %v3437_v33  ;;  %v13445_v4 = vpop.permute.xlu0 %5450 }
 0x429   : > { %v3470_v41 = vmul.f32 0.3275911, %v3438_v51  ;;  %v3885_v59 = vsub.f32 0.0, %v3437_v33  ;;  %v3886_v53 = vsub.f32 0.0, %v3438_v51  ;;  %5949 = vperm.xlu0 %7006, %v5854_v57   ;;  %v3724_v21 = vmul.f32 %v13380_v14, %v3692_v12  ;;  %v17181_v57 = vld [vmem:[#allocation53_spill] sm:$0xff] }
 0x42a   : > { %vm17176_vm5 = vcmp.eq.s32.totalorder %v17175_v27, 1  ;;  %vm17177_vm7 = vcmask 1046528   ;;  %v17178_v31 = vrot.slane %v13402_v55, 7  ;;  %vm17179_vm13 = vcmask 1040384  }
 0x42b   : > { %v3114_v47 = vsel %vm17176_vm5, %v13278_v42, 0.0  ;;  %v2984_v6 = vsel %vm17177_vm7, %v16073_v16, 0.0  ;;  %7170 = vpow2.f32 %v3972_v50  ;;  %v3502_v11 = vadd.f32 1.0, %v3470_v41  ;;  %5465 = vperm.xlu1 %7007, %v17181_v57  }
 0x42c   : > { %v3086_v46 = vsel %vm17179_vm13, %v17178_v31, 0.0  ;;  %v3918_v54 = vmul.f32 %v3886_v53, %v3438_v51  ;;  %vm17180_vm6 = vcmp.eq.s32.totalorder %v17071_v0, 1  ;;  %v3756_v42 = vadd.f32 -0.28449672, %v3724_v21 }
 0x42d   : > { %v2911_v12 = vsel %vm17180_vm6, %v13402_v55, 0.0  ;;  %v2845_v27 = vmul.f32 %v17033_v9, %v2809_v3  ;;  %vm17182_vm11 = vcmp.eq.s32.totalorder %v17168_v60, 1  ;;  %vm17183_vm5 = vcmp.eq.s32.totalorder %v17075_v34, 1 }
 0x42e   : > { %v3016_v16 = vsel %vm17182_vm11, %v2984_v6, 0.0  ;;  %v3117_v31 = vsel %vm17183_vm5, %v3086_v46, 0.0  ;;  %v13459_v41 = vmul.f32 %v17059_v15, %v3114_v47  ;;  %v13461_v50 = vadd.f32 1.0, %v3469_v40  ;;  %v13470_v46 = vpop.eup %7166 }
 0x42f   : > { %7172 = vrcp.f32 %v3502_v11  ;;  %v13463_v51 = vmul.f32 %v3885_v59, %v3437_v33  ;;  %v3788_v53 = vmul.f32 %v13380_v14, %v3756_v42  ;;  %v3976_v21 = vmul.f32 1.442695, %v3918_v54  ;;  %17185 = vst [vmem:[#allocation93_spill] sm:$0xff] %v13470_v46  ;;  %v17186_v11 = vld [vmem:[#allocation42_spill] sm:$0xff]  ;;  %v17187_v42 = vld [vmem:[#allocation135_spill] sm:$0xff]  ;;  %v13504_v46 = vpop.permute.xlu1 %5411 }
 0x430   : > { %v2947_v3 = vmul.f32 %v17050_v32, %v2911_v12  ;;  %vm17184_vm7 = vcmp.eq.s32.totalorder %v16981_v17, 1  ;;  %v13473_v0 = vmul.f32 %v17053_v44, %v3016_v16  ;;  %v13476_v40 = vmul.f32 %v17059_v15, %v3117_v31  ;;  %v13490_v17 = vpop.permute.xlu0 %4936  ;;  %v13492_v31 = vpop.eup %7168  ;;  %17191 = vst [vmem:[#allocation4_spill] sm:$0xff] %v13504_v46 }
 0x431   : > { %v3215_v57 = vsel %vm17184_vm7, %v13402_v55, 0.0  ;;  %v13480_v33 = vadd.f32 %v12910_v19, %v17186_v11  ;;  %v1938_v54 = vadd.f32 %v12754_v36, %v1907_v58  ;;  %v3820_v59 = vadd.f32 0.2548296, %v3788_v53  ;;  %17189 = vst [vmem:[#allocation130_spill] sm:$0xff] %v13492_v31 }
 0x432   : > { %v2703_v47 = vsel %vm16079_vm0, %v13309_v5, 0.0  ;;  %v2877_v12 = vadd.f32 %v2845_v27, %v13330_v61  ;;  %vm17188_vm13 = vcmp.eq.s32.totalorder %v17187_v42, 1  ;;  %v3249_v61 = vmul.f32 %v17068_v28, %v3215_v57 }
 0x433   : > { %v3013_v16 = vsel %vm17188_vm13, %v13309_v5, 0.0  ;;  %v2290_v19 = vadd.f32 %v13294_v48, %v1938_v54  ;;  %v2352_v11 = vrot.slane %v13480_v33, 1  ;;  %v2739_v36 = vmul.f32 %v17042_v2, %v2703_v47 }
 0x434   : > { %v2774_v58 = vrot.slane %v13480_v33, 7  ;;  %v3852_v53 = vmul.f32 %v13380_v14, %v3820_v59  ;;  %vm17190_vm6 = vcmp.eq.s32.totalorder %v17076_v37, 1  ;;  %v2977_v27 = vadd.f32 %v13299_v38, %v2877_v12  ;;  %v13535_v46 = vpop.permute.xlu0 %4939 }
 0x435   : > { %v2910_v5 = vsel %vm17190_vm6, %v13480_v33, 0.0  ;;  %v17192_v48 = vrot.slane %v13158_v23, 1  ;;  %vm17193_vm11 = vcmask 1046528   ;;  %v2771_v47 = vadd.f32 %v2739_v36, %v13321_v18  ;;  %v7171_v18 = vpop.eup %7170 }
 0x436   : > { %v17194_v31 = vrot.slane %v13158_v23, 7  ;;  %vm17195_vm5 = vcmask 1040384   ;;  %v17196_v57 = vrot.slane %v13402_v55, 7  ;;  %vm17198_vm13 = vcmp.eq.s32.totalorder %v17168_v60, 1 }
 0x437   : > { %v2353_v54 = vsel %vm17193_vm11, %v17192_v48, %v2352_v11  ;;  %vm17197_vm7 = vmmov %vm17195_vm5  ;;  %vm17199_vm6 = vcmp.eq.s32.totalorder %v17075_v34, 1  ;;  %vm17200_vm0 = vcmp.eq.s32.totalorder %v17134_v8, 1  ;;  %v3049_v48 = vmul.f32 %v17053_v44, %v3013_v16 }
 0x438   : > { %v2775_v14 = vsel %vm17195_vm5, %v17194_v31, %v2774_v58  ;;  %v2777_v59 = vsel %vm17197_vm7, %v2774_v58, %v17196_v57  ;;  %v2704_v37 = vsel %vm17198_vm13, %v2353_v54, 0.0  ;;  %vm17201_vm11 = vcmp.eq.s32.totalorder %v17096_v1, 1 }
 0x439   : > { %v2810_v38 = vsel %vm17199_vm6, %v2775_v14, 0.0  ;;  %v2811_v12 = vsel %vm17200_vm0, %v2777_v59, 0.0  ;;  %v3312_v23 = vsel %vm17201_vm11, %v2984_v6, 0.0  ;;  %v2740_v31 = vmul.f32 %v17042_v2, %v2704_v37  ;;  %vm17204_vm0 = vmmov %vm17201_vm11  ;;  %v13537_v6 = vpop.eup %7172 }
 0x43a   : > { %v2846_v36 = vmul.f32 %v17033_v9, %v2810_v38  ;;  %v2847_v58 = vmul.f32 %v17033_v9, %v2811_v12  ;;  %v2946_v60 = vmul.f32 %v17050_v32, %v2910_v5  ;;  %v17202_v34 = vrot.slane %v13402_v55, 1 }
 0x43b   : > { %vm17203_vm5 = vcmask 1046528   ;;  %v3014_v8 = vsel %vm17204_vm0, %v2353_v54, 0.0  ;;  %v3081_v16 = vadd.f32 %v3049_v48, %v13345_v56  ;;  %v2772_v2 = vadd.f32 %v2740_v31, %v2290_v19 }
 0x43c   : > { %v2981_v57 = vsel %vm17203_vm5, %v2352_v11, %v17202_v34  ;;  %v2878_v37 = vadd.f32 %v2846_v36, %v2771_v47  ;;  %vm17205_vm7 = vcmp.eq.s32.totalorder %v17172_v35, 1  ;;  %v3050_v32 = vmul.f32 %v17053_v44, %v3014_v8  ;;  %v13548_v11 = vpop.permute.xlu1 %5862 }
 0x43d   : > { %v3015_v9 = vsel %vm17205_vm7, %v2981_v57, 0.0  ;;  %v13542_v5 = vmul.f32 %v7171_v18, %v3852_v53  ;;  %v3598_v55 = vmul.f32 1.0614054, %v13537_v6  ;;  %vm17206_vm13 = vcmp.eq.s32.totalorder %v16978_v22, 1 }
 0x43e   : > { %v3051_v1 = vmul.f32 %v17053_v44, %v3015_v9  ;;  %v3115_v56 = vsel %vm17206_vm13, %v2775_v14, 0.0  ;;  %v2879_v38 = vadd.f32 %v2847_v58, %v2772_v2  ;;  %v2978_v12 = vadd.f32 %v2946_v60, %v2878_v37 }
 0x43f   : > { %v3082_v19 = vadd.f32 %v3050_v32, %v2977_v27  ;;  %vm17207_vm6 = vcmp.eq.s32.totalorder %v17173_v13, 1  ;;  %v3630_v47 = vadd.f32 -1.4531521, %v3598_v55  ;;  %7174 = vpow2.f32 %v3976_v21  ;;  %v17212_v32 = vld [vmem:[#allocation71_spill] sm:$0xff]  ;;  %v17238_v55 = vld [vmem:[#allocation8_spill] sm:$0xff] }
 0x440   : > { %v3116_v35 = vsel %vm17207_vm6, %v2777_v59, 0.0  ;;  %v3150_v53 = vmul.f32 %v17059_v15, %v3115_v56  ;;  %v3346_v18 = vmul.f32 %v13126_v29, %v3312_v23  ;;  %v2979_v44 = vadd.f32 %v2947_v3, %v2879_v38  ;;  %v13559_v59 = vpop.permute.xlu0 %5456 }
 0x441   : > { %v3151_v48 = vmul.f32 %v17059_v15, %v3116_v35  ;;  %v3083_v31 = vadd.f32 %v3051_v1, %v2978_v12  ;;  %v3153_v22 = vmul.f32 0.0, %v17059_v15  ;;  %v3662_v14 = vmul.f32 %v13537_v6, %v3630_v47 }
 0x442   : > { %v3181_v27 = vadd.f32 %v13459_v41, %v13347_v24  ;;  %v3182_v36 = vadd.f32 %v3150_v53, %v3081_v16  ;;  %v4044_v21 = vsub.f32 1.0, %v13542_v5  ;;  %v3084_v58 = vadd.f32 %v13473_v0, %v2979_v44  ;;  %v13570_v41 = vpop.permute.xlu1 %5417 }
 0x443   : > { %v3183_v13 = vadd.f32 %v3151_v48, %v3082_v19  ;;  %v3184_v60 = vadd.f32 %v13476_v40, %v3083_v31  ;;  %vm17208_vm11 = vcmp.eq.s32.totalorder %v16976_v25, 1  ;;  %v3694_v15 = vadd.f32 1.4214138, %v3662_v14  ;;  %17209 = vst [vmem:[#allocation47_spill] sm:$0xff] %v13570_v41 }
 0x444   : > { %v3214_v3 = vsel %vm17208_vm11, %v13480_v33, 0.0  ;;  %v3250_v34 = vmul.f32 0.0, %v17068_v28  ;;  %v3278_v24 = vadd.f32 %v13415_v62, %v3181_v27  ;;  %v3185_v8 = vadd.f32 %v3153_v22, %v3084_v58  ;;  %v13598_v1 = vpop.permute.xlu0 %4942  ;;  %v17220_v22 = vld [vmem:[#allocation36_spill] sm:$0xff]  ;;  %v17222_v27 = vld [vmem:[#allocation65_spill] sm:$0xff] }
 0x445   : > { %v3248_v23 = vmul.f32 %v17068_v28, %v3214_v3  ;;  %v3280_v16 = vadd.f32 %v3249_v61, %v3183_v13  ;;  %vm17210_vm5 = vcmp.eq.s32.totalorder %v17000_v45, 1  ;;  %vm17211_vm0 = vcmp.eq.s32.totalorder %v17187_v42, 1  ;;  %v17214_v28 = vld [vmem:[#allocation2_spill] sm:$0xff]  ;;  %17217 = vst [vmem:[#allocation67_spill] sm:$0xff] %v13598_v1  ;;  %v17225_v3 = vld [vmem:[#allocation43_spill] sm:$0xff] }
 0x446   : > { %v3310_v0 = vsel %vm17210_vm5, %v2353_v54, 0.0  ;;  %v3311_v40 = vsel %vm17211_vm0, %v2981_v57, 0.0  ;;  %v3726_v2 = vmul.f32 %v13537_v6, %v3694_v15  ;;  %v3281_v37 = vadd.f32 %v3250_v34, %v3184_v60  ;;  %v13614_v48 = vpop.permute.xlu1 %5868 }
 0x447   : > { %v3279_v33 = vadd.f32 %v3248_v23, %v3182_v36  ;;  %v3344_v9 = vmul.f32 %v13126_v29, %v3310_v0  ;;  %vm17213_vm7 = vcmp.eq.s32.totalorder %v17212_v32, 1  ;;  %vm4076_vm6 = vcmp.lt.f32.partialorder %v13202_v26, 0.0  ;;  %17219 = vst [vmem:[#allocation16_spill] sm:$0xff] %v13614_v48  ;;  %v17227_v23 = vld [vmem:[#allocation64_spill] sm:$0xff]  ;;  %v17242_v48 = vld [vmem:[#allocation59_spill] sm:$0xff] }
 0x448   : > { %vm13582_vm13 = vmand %vm12429_vm10, %vm17213_vm7  ;;  %v3282_v45 = vadd.f32 %v3250_v34, %v3185_v8  ;;  %v3345_v42 = vmul.f32 %v13126_v29, %v3311_v40  ;;  %v3347_v61 = vmul.f32 0.0, %v13126_v29  ;;  %v13589_v54 = vadd.f32 %v3346_v18, %v3280_v16  ;;  %v17230_v40 = vld [vmem:[#allocation128_spill] sm:$0xff] }
 0x449   : > { %7176 = vrcp.f32 %v13461_v50  ;;  %v3758_v57 = vadd.f32 -0.28449672, %v3726_v2  ;;  %v13592_v5 = vadd.f32 %v3344_v9, %v3278_v24  ;;  %v7175_v50 = vpop.eup %7174  ;;  %v4108_v19 = vsub.f32 0.0, %v4044_v21 }
 0x44a   : > { %v13600_v56 = vadd.f32 %v3345_v42, %v3279_v33  ;;  %v13602_v38 = vadd.f32 %v3347_v61, %v3281_v37  ;;  %v13604_v12 = vadd.f32 %v3347_v61, %v3282_v45  ;;  %v13607_v29 = vmul.f32 0.70710677, %v13589_v54  ;;  %v17232_v33 = vld [vmem:[#allocation38_spill] sm:$0xff] }
 0x44b   : > { %v3790_v35 = vmul.f32 %v13537_v6, %v3758_v57  ;;  %v3974_v47 = vmul.f32 1.442695, %v13463_v51  ;;  %v13612_v53 = vmul.f32 0.70710677, %v13592_v5  ;;  %v17221_v14 = vrot.slane %v17220_v22, 2  ;;  %v13652_v57 = vpop.permute.xlu0 %4945 }
 0x44c   : > { %17218 = vst [vmem:[#allocation3_spill] sm:$0xff] %v13607_v29  ;;  %v13617_v18 = vmul.f32 0.70710677, %v13600_v56  ;;  %v13620_v44 = vmul.f32 0.70710677, %v13602_v38  ;;  %v17223_v36 = vrot.slane %v17222_v27, 2 }
 0x44d   : > { %v13623_v31 = vmul.f32 0.70710677, %v13604_v12  ;;  %vm17224_vm11 = vcmask 1045504   ;;  %v3822_v13 = vadd.f32 0.2548296, %v3790_v35  ;;  %v17226_v15 = vrot.slane %v17225_v3, 1 }
 0x44e   : > { %v13630_v51 = vsel %vm17224_vm11, %v17223_v36, %v17221_v14  ;;  %v3439_v58 = vand.u32 2147483647, %v13612_v53  ;;  %v3441_v60 = vand.u32 2147483647, %v13607_v29  ;;  %v17228_v34 = vrot.slane %v17227_v23, 1  ;;  %17235 = vst [vmem:[#allocation88_spill] sm:$0xff] %v13652_v57 }
 0x44f   : > { %vm17229_vm5 = vcmask 1046528   ;;  %v3440_v8 = vand.u32 2147483647, %v13617_v18  ;;  %v3442_v16 = vand.u32 2147483647, %v13620_v44  ;;  %v17231_v2 = vrot.slane %v17230_v40, 1  ;;  %v13663_v40 = vpop.permute.xlu1 %5423 }
 0x450   : > { %v13639_v24 = vsel %vm17229_vm5, %v17228_v34, %v17226_v15  ;;  %v3443_v0 = vand.u32 2147483647, %v13623_v31  ;;  %v17233_v37 = vrot.slane %v17232_v33, 1  ;;  %vm17234_vm0 = vmmov %vm17229_vm5  ;;  %v3854_v32 = vmul.f32 %v13537_v6, %v3822_v13  ;;  %v17236_v15 = vld [vmem:[#allocation66_spill] sm:$0xff]  ;;  %17241 = vst [vmem:[#allocation20_spill] sm:$0xff] %v13663_v40 }
 0x451   : > { %v3471_v45 = vmul.f32 0.3275911, %v3439_v58  ;;  %v3473_v42 = vmul.f32 0.3275911, %v3441_v60  ;;  %v3887_v61 = vsub.f32 0.0, %v3439_v58  ;;  %v17237_v34 = vrot.slane %v17236_v15, 1  ;;  %vm17240_vm7 = vmmov %vm17234_vm0 }
 0x452   : > { %v13649_v9 = vsel %vm17234_vm0, %v17233_v37, %v17231_v2  ;;  %v3472_v35 = vmul.f32 0.3275911, %v3440_v8  ;;  %v3474_v14 = vmul.f32 0.3275911, %v3442_v16  ;;  %v3475_v36 = vmul.f32 0.3275911, %v3443_v0 }
 0x453   : > { %v17239_v25 = vrot.slane %v17238_v55, 1  ;;  %v4140_v2 = vsel %vm4076_vm6, %v4108_v19, %v4044_v21  ;;  %v4014_v37 = vmul.f32 %v7175_v50, %v3854_v32  ;;  %v3503_v6 = vadd.f32 1.0, %v3471_v45  ;;  %v13666_v15 = vpop.eup %7176  ;;  %v13668_v45 = vpop.permute.xlu0 %5462 }
 0x454   : > { %v3888_v13 = vsub.f32 0.0, %v3440_v8  ;;  %vm4514_vm11 = vcmp.eq.s32.totalorder %v17242_v48, 1  ;;  %v3504_v57 = vadd.f32 1.0, %v3472_v35  ;;  %v3506_v3 = vadd.f32 1.0, %v3474_v14  ;;  %17243 = vst [vmem:[#allocation129_spill] sm:$0xff] %v13666_v15  ;;  %v13671_v40 = vpop.permute.xlu1 %5874 }
 0x455   : > { %v13659_v29 = vsel %vm17240_vm7, %v17239_v25, %v17237_v34  ;;  %v3507_v41 = vadd.f32 1.0, %v3475_v36  ;;  %v3889_v33 = vsub.f32 0.0, %v3441_v60  ;;  %v4046_v55 = vsub.f32 1.0, %v4014_v37 }
 0x456   : > { %7178 = vrcp.f32 %v3503_v6  ;;  %v3890_v25 = vsub.f32 0.0, %v3442_v16  ;;  %v3891_v34 = vsub.f32 0.0, %v3443_v0  ;;  %v3505_v1 = vadd.f32 1.0, %v3473_v42 }
 0x457   : > { %7180 = vrcp.f32 %v3504_v57  ;;  %v3919_v26 = vmul.f32 %v3887_v61, %v3439_v58  ;;  %v3920_v21 = vmul.f32 %v3888_v13, %v3440_v8  ;;  %v4110_v50 = vsub.f32 0.0, %v4046_v55  ;;  %v17256_v57 = vld [vmem:[#allocation6_spill] sm:$0xff] }
 0x458   : > { %7182 = vpow2.f32 %v3974_v47  ;;  %v3922_v19 = vmul.f32 %v3890_v25, %v3442_v16  ;;  %v3923_v32 = vmul.f32 %v3891_v34, %v3443_v0  ;;  %v4204_v35 = vadd.f32 1.0, %v4140_v2  ;;  %v17257_v2 = vld [vmem:[#allocation23_spill] sm:$0xff]  ;;  %v13727_v13 = vpop.permute.xlu1 %5429  ;;  %v17258_v34 = vld [vmem:[#allocation10_spill] sm:$0xff] }
 0x459   : > { %7184 = vrcp.f32 %v3506_v3  ;;  %v3978_v14 = vmul.f32 1.442695, %v3919_v26  ;;  %v3980_v36 = vmul.f32 1.442695, %v3920_v21  ;;  %v4172_v15 = vmul.f32 0.5, %v13172_v7  ;;  %v17261_v21 = vld [vmem:[#allocation124_spill] sm:$0xff] }
 0x45a   : > { %7186 = vrcp.f32 %v3507_v41  ;;  %v3921_v37 = vmul.f32 %v3889_v33, %v3441_v60  ;;  %v3984_v6 = vmul.f32 1.442695, %v3922_v19  ;;  %vm4078_vm6 = vcmp.lt.f32.partialorder %v13418_v39, 0.0  ;;  %v15455_v60 = vld [vmem:[%s15604_s9] ss:$0 sm:$0xff] }
 0x45b   : > { %7188 = vrcp.f32 %v3505_v1  ;;  %v3986_v47 = vmul.f32 1.442695, %v3923_v32  ;;  %v16087_v58 = vrot.slane %v16916_v49, 7  ;;  %v4142_v8 = vsel %vm4078_vm6, %v4110_v50, %v4046_v55  ;;  %v17262_v50 = vld [vmem:[#allocation32_spill] sm:$0xff] }
 0x45c   : > { %v13676_v16 = vmul.f32 0.5, %v13382_v30  ;;  %v13679_v3 = vmul.f32 0.5, %v13405_v10  ;;  %7190 = vpow2.f32 %v3978_v14  ;;  %v13681_v7 = vmul.f32 %v4204_v35, %v4172_v15  ;;  %v13693_v30 = vpop.permute.xlu0 %4948  ;;  %v7260_v15 = vld [vmem:[%s15596_s1 + $0xa0] sm:$0xff] }
 0x45d   : > { %7192 = vpow2.f32 %v3980_v36  ;;  %v13684_v41 = vmul.f32 0.5, %v13592_v5  ;;  %v16086_v39 = vrot.slane %v12835_v20, 7  ;;  %v13687_v1 = vmul.f32 1.442695, %v3921_v37  ;;  %v17265_v37 = vld [vmem:[#allocation68_spill] sm:$0xff] }
 0x45e   : > { %17244 = vst [vmem:[#allocation5_spill] sm:$0xff] %v13676_v16  ;;  %17245 = vst [vmem:[#allocation79_spill] sm:$0xff] %v13681_v7  ;;  %7194 = vpow2.f32 %v3984_v6  ;;  %v13690_v55 = vmul.f32 0.5, %v13589_v54  ;;  %vm5511_vm5 = vcmp.eq.s32.totalorder %v13085_v52, 1  ;;  %v13695_v10 = vadd.f32 1.0, %v4142_v8  ;;  %v17250_v52 = vld [vmem:[#allocation52_spill] sm:$0xff] }
 0x45f   : > { %17246 = vst [vmem:[#allocation17_spill] sm:$0xff] %v13684_v41  ;;  %7196 = vpow2.f32 %v3986_v47  ;;  %vm17248_vm0 = vcmask 1040384   ;;  %vm5543_vm7 = vmand %vm12484_vm15, %vm5511_vm5  ;;  %v5072_v0 = vrot.slane %v17222_v27, 1  ;;  %vm17251_vm6 = vcmp.lt.s32.totalorder %v17250_v52, 4 }
 0x460   : > { %17247 = vst [vmem:[#allocation137_spill] sm:$0xff] %v13690_v55  ;;  %v5586_v5 = vsel %vm17248_vm0, %v16087_v58, %v16086_v39  ;;  %v13705_v54 = vpop.eup %7178  ;;  %vm13711_vm3 = vmand %vm17251_vm6, %vm4514_vm11  ;;  %v17254_v42 = vsel %vm13582_vm13, %v12835_v20, %v13410_v63  ;;  %vm4995_vm5 = vcmp.eq.s32.totalorder %v17256_v57, 1  ;;  %v6761_v48 = vadd.s32 4294967294, %v7260_v15  ;;  %v17271_v15 = vld [vmem:[#allocation136_spill] sm:$0xff]  ;;  %v17279_v55 = vld [vmem:[#allocation73_spill] sm:$0xff] }
 0x461   : > { %v13720_v61 = vsel %vm5543_vm7, %v5586_v5, %v17254_v42  ;;  %vm4983_vm0 = vcmp.eq.s32.totalorder %v17257_v2, 1  ;;  %v13729_v25 = vpop.eup %7180  ;;  %v3599_v62 = vmul.f32 1.0614054, %v13705_v54  ;;  %v17259_v26 = vrot.slane %v17258_v34, 1  ;;  %vm5027_vm11 = vmand %vm12417_vm12, %vm4995_vm5 }
 0x462   : > { %17255 = vst [vmem:[#allocation61_spill] sm:$0xff] %v13720_v61  ;;  %vm17260_vm13 = vcmask 1046528   ;;  %v5047_v19 = vrot.slane %v17262_v50, 1  ;;  %v4707_v32 = vsel %vm13711_vm3, %v13630_v51, 0.0  ;;  %v13741_v35 = vpop.eup %7182  ;;  %v3600_v14 = vmul.f32 1.0614054, %v13729_v25  ;;  %vm5015_vm5 = vmand %vm12417_vm12, %vm4983_vm0 }
 0x463   : > { %v5073_v63 = vsel %vm17260_vm13, %v17259_v26, %v5072_v0  ;;  %17263 = vst [vmem:[#allocation13_spill] sm:$0xff] %v13741_v35  ;;  %v17266_v6 = vsel %vm13193_vm8, %v17265_v37, 0.0  ;;  %vm5747_vm7 = vcmp.ge.s32.totalorder %v6761_v48, 0  ;;  %vm5779_vm6 = vcmp.lt.s32.totalorder %v6761_v48, 16  ;;  %v13752_v8 = vpop.eup %7184  ;;  %v17268_v51 = vld [vmem:[#allocation72_spill] sm:$0xff]  ;;  %v17272_v26 = vld [vmem:[#allocation31_spill] sm:$0xff] }
 0x464   : > { %v13748_v47 = vsel %vm5027_vm11, %v5073_v63, %v17266_v6  ;;  %v3631_v5 = vadd.f32 -1.4531521, %v3599_v62  ;;  %vm5811_vm13 = vmand %vm5747_vm7, %vm5779_vm6  ;;  %v17269_v33 = vrot.slane %v17268_v51, 1  ;;  %vm17270_vm3 = vcmask 1046528   ;;  %v13759_v2 = vpop.eup %7186  ;;  %v17275_v62 = vld [vmem:[#allocation121_spill] sm:$0xff] }
 0x465   : > { %17267 = vst [vmem:[#allocation53_spill] sm:$0xff] %v13748_v47  ;;  %v16088_v57 = vrot.slane %v17220_v22, 1  ;;  %vm4996_vm14 = vcmp.eq.s32.totalorder %v17271_v15, 1  ;;  %vm4516_vm8 = vcmp.eq.s32.totalorder %v17272_v26, 1  ;;  %v3632_v48 = vadd.f32 -1.4531521, %v3600_v14  ;;  %vm17278_vm11 = vmmov %vm17270_vm3 }
 0x466   : > { %v5049_v42 = vsel %vm17270_vm3, %v5047_v19, %v17269_v33  ;;  %v3602_v63 = vmul.f32 1.0614054, %v13752_v8  ;;  %v17273_v36 = vmov 0   ;;  %v17276_v39 = vsel %vm12945_vm2, %v17275_v62, 0.0  ;;  %vm5028_vm0 = vmand %vm12417_vm12, %vm4996_vm14  ;;  %v13772_v19 = vpop.permute.xlu0 %4951  ;;  %v13774_v33 = vpop.eup %7188 }
 0x467   : > { %v5843_v37 = vsel %vm5811_vm13, 1, %v17273_v36  ;;  %v13768_v58 = vsel %vm5015_vm5, %v5049_v42, %v17276_v39  ;;  %17277 = vst [vmem:[#allocation42_spill] sm:$0xff] %v13774_v33  ;;  %v3663_v15 = vmul.f32 %v13705_v54, %v3631_v5  ;;  %v3603_v14 = vmul.f32 1.0614054, %v13759_v2  ;;  %v7261_v39 = vld [vmem:[%s15596_s1 + $0xa8] sm:$0xff]  ;;  %v13784_v62 = vpop.eup %7190 }
 0x468   : > { %5916 = vperm.xlu1 %7007, %v5843_v37   ;;  %v5075_v6 = vsel %vm17278_vm11, %v5072_v0, %v16088_v57  ;;  %v6762_v42 = vadd.s32 4294967294, %v7261_v39  ;;  %vm17280_vm2 = vcmp.eq.s32.totalorder %v17279_v55, 1  ;;  %v3664_v37 = vmul.f32 %v13729_v25, %v3632_v48  ;;  %v17283_v0 = vld [vmem:[#allocation30_spill] sm:$0xff]  ;;  %v13796_v57 = vpop.permute.xlu1 %5880  ;;  %v13798_v33 = vpop.eup %7192 }
 0x469   : > { %vm13790_vm14 = vmand %vm12429_vm10, %vm17280_vm2  ;;  %v3634_v16 = vadd.f32 -1.4531521, %v3602_v63  ;;  %v5156_v35 = vsel %vm5028_vm0, %v5075_v6, %v4707_v32  ;;  %vm4985_vm7 = vcmp.eq.s32.totalorder %v17283_v0, 1  ;;  %v3695_v39 = vadd.f32 1.4214138, %v3663_v15  ;;  %v13802_v55 = vpop.eup %7194  ;;  %v17285_v63 = vld [vmem:[#allocation14_spill] sm:$0xff] }
 0x46a   : > { %v3635_v61 = vadd.f32 -1.4531521, %v3603_v14  ;;  %vm5748_vm6 = vcmp.ge.s32.totalorder %v6762_v42, 0  ;;  %vm5780_vm5 = vcmp.lt.s32.totalorder %v6762_v42, 16  ;;  %vm5017_vm13 = vmand %vm12417_vm12, %vm4985_vm7  ;;  %v3696_v20 = vadd.f32 1.4214138, %v3664_v37  ;;  %v13815_v14 = vpop.eup %7196  ;;  %v13824_v5 = vpop.permute.xlu0 %5468 }
 0x46b   : > { %v3666_v48 = vmul.f32 %v13752_v8, %v3634_v16  ;;  %vm5812_vm3 = vmand %vm5748_vm6, %vm5780_vm5  ;;  %v17286_v6 = vsel %vm12958_vm9, %v17285_v63, 0.0  ;;  %v5222_v15 = vsel %vm13790_vm14, %v17222_v27, %v5156_v35  ;;  %v3727_v42 = vmul.f32 %v13705_v54, %v3695_v39  ;;  %v17289_v39 = vld [vmem:[#allocation63_spill] sm:$0xff] }
 0x46c   : > { %v13810_v0 = vsel %vm5017_vm13, %v13639_v24, %v17286_v6  ;;  %v3667_v37 = vmul.f32 %v13759_v2, %v3635_v61  ;;  %v5844_v16 = vsel %vm5812_vm3, 1, %v17273_v36  ;;  %v3728_v32 = vmul.f32 %v13729_v25, %v3696_v20  ;;  %v17287_v6 = vld [vmem:[#allocation11_spill] sm:$0xff]  ;;  %v17288_v61 = vld [vmem:[#allocation116_spill] sm:$0xff] }
 0x46d   : > { %v3698_v63 = vadd.f32 1.4214138, %v3666_v48  ;;  %5919 = vperm.xlu1 %7007, %v5844_v16   ;;  %v16096_v24 = vrot.slane %v17222_v27, 7  ;;  %vm5513_vm9 = vcmp.eq.s32.totalorder %v17287_v6, 1  ;;  %v3759_v35 = vadd.f32 -0.28449672, %v3727_v42 }
 0x46e   : > { %v3699_v7 = vadd.f32 1.4214138, %v3667_v37  ;;  %vm5545_vm0 = vmand %vm12484_vm15, %vm5513_vm9  ;;  %vm4987_vm11 = vcmp.eq.s32.totalorder %v17288_v61, 1  ;;  %v5076_v41 = vrot.slane %v17289_v39, 1  ;;  %v3760_v47 = vadd.f32 -0.28449672, %v3728_v32  ;;  %v13839_v37 = vpop.permute.xlu1 %5883  ;;  %v13880_v26 = vpop.permute.xlu0 %4954 }
 0x46f   : > { %v3730_v20 = vmul.f32 %v13752_v8, %v3698_v63  ;;  %v17290_v48 = vrot.slane %v17258_v34, 7  ;;  %vm17291_vm2 = vcmask 1040384   ;;  %vm5019_vm14 = vmand %vm12417_vm12, %vm4987_vm11  ;;  %v17292_v42 = vld [vmem:[#allocation117_spill] sm:$0xff]  ;;  %v3791_v6 = vmul.f32 %v13705_v54, %v3759_v35  ;;  %v17295_v27 = vld [vmem:[#allocation75_spill] sm:$0xff]  ;;  %17308 = vst [vmem:[#allocation2_spill] sm:$0xff] %v13880_v26 }
 0x470   : > { %vm4997_vm7 = vcmp.eq.s32.totalorder %v17292_v42, 1  ;;  %v3731_v61 = vmul.f32 %v13759_v2, %v3699_v7  ;;  %v17296_v49 = vsel %vm12976_vm4, %v17295_v27, 0.0  ;;  %v17298_v35 = vrot.slane %v17220_v22, 1 }
 0x471   : > { %v5590_v16 = vsel %vm17291_vm2, %v17290_v48, %v16096_v24  ;;  %v13850_v34 = vsel %vm5019_vm14, %v13649_v9, %v17296_v49  ;;  %vm5029_vm6 = vmand %vm12417_vm12, %vm4997_vm7  ;;  %v3792_v48 = vmul.f32 %v13729_v25, %v3760_v47  ;;  %v3762_v42 = vadd.f32 -0.28449672, %v3730_v20  ;;  %v17297_v24 = vld [vmem:[#allocation54_spill] sm:$0xff] }
 0x472   : > { %v13843_v32 = vsel %vm5545_vm0, %v5590_v16, %v5222_v15  ;;  %5471 = vperm.xlu1 %7007, %v17297_v24   ;;  %vm17299_vm5 = vcmask 1046528   ;;  %v7262_v15 = vld [vmem:[%s15596_s1 + $0xb0] sm:$0xff]  ;;  %vm17300_vm4 = vcmp.lt.s32.totalorder %v17250_v52, 4  ;;  %v3823_v9 = vadd.f32 0.2548296, %v3791_v6  ;;  %v17304_v20 = vld [vmem:[#allocation50_spill] sm:$0xff] }
 0x473   : > { %17293 = vst [vmem:[#allocation135_spill] sm:$0xff] %v13843_v32  ;;  %v5077_v7 = vsel %vm17299_vm5, %v17298_v35, %v5076_v41  ;;  %v6763_v27 = vadd.s32 4294967294, %v7262_v15  ;;  %vm13866_vm13 = vmand %vm17300_vm4, %vm4516_vm8  ;;  %v3763_v47 = vadd.f32 -0.28449672, %v3731_v61  ;;  %v17305_v16 = vsel %vm13215_vm1, %v17304_v20, 0.0  ;;  %v17307_v35 = vld [vmem:[#allocation46_spill] sm:$0xff] }
 0x474   : > { %v13874_v63 = vsel %vm5029_vm6, %v5077_v7, %v17305_v16  ;;  %vm4989_vm3 = vcmp.eq.s32.totalorder %v17307_v35, 1  ;;  %v3824_v32 = vadd.f32 0.2548296, %v3792_v48  ;;  %v3794_v15 = vmul.f32 %v13752_v8, %v3762_v42  ;;  %v17309_v24 = vld [vmem:[#allocation26_spill] sm:$0xff]  ;;  %v17313_v42 = vld [vmem:[#allocation15_spill] sm:$0xff] }
 0x475   : > { %17306 = vst [vmem:[#allocation71_spill] sm:$0xff] %v13874_v63  ;;  %vm5749_vm9 = vcmp.ge.s32.totalorder %v6763_v27, 0  ;;  %vm5781_vm0 = vcmp.lt.s32.totalorder %v6763_v27, 16  ;;  %vm5021_vm8 = vmand %vm12417_vm12, %vm4989_vm3  ;;  %v3855_v6 = vmul.f32 %v13705_v54, %v3823_v9  ;;  %v3795_v61 = vmul.f32 %v13759_v2, %v3763_v47  ;;  %v17311_v7 = vld [vmem:[#allocation18_spill] sm:$0xff]  ;;  %v17317_v63 = vld [vmem:[#allocation39_spill] sm:$0xff] }
 0x476   : > { %vm5813_vm11 = vmand %vm5749_vm9, %vm5781_vm0  ;;  %vm17310_vm1 = vnez %v17309_v24  ;;  %v17314_v16 = vrot.slane %v17313_v42, 2  ;;  %v17315_v27 = vrot.slane %v17289_v39, 2  ;;  %vm17316_vm2 = vcmask 1045504  }
 0x477   : > { %v17312_v20 = vsel %vm17310_vm1, %v17311_v7, 0.0  ;;  %vm4518_vm14 = vcmp.eq.s32.totalorder %v17317_v63, 1  ;;  %v3856_v54 = vmul.f32 %v13729_v25, %v3824_v32  ;;  %v3826_v9 = vadd.f32 0.2548296, %v3794_v15  ;;  %v13901_v7 = vpop.permute.xlu1 %5435  ;;  %v17318_v32 = vld [vmem:[#allocation118_spill] sm:$0xff] }
 0x478   : > { %v13889_v48 = vsel %vm5021_vm8, %v13659_v29, %v17312_v20  ;;  %v4630_v35 = vsel %vm17316_vm2, %v17315_v27, %v17314_v16  ;;  %v5845_v47 = vsel %vm5813_vm11, 1, %v17273_v36  ;;  %vm5693_vm6 = vcmp.lt.s32.totalorder %v17250_v52, 20  ;;  %v17319_v16 = vld [vmem:[#allocation62_spill] sm:$0xff]  ;;  %v6145_v63 = vld [vmem:[%s15603_s8 + $0x10] sm:$0xf] }
 0x479   : > { %v4709_v24 = vsel %vm13866_vm13, %v4630_v35, 0.0  ;;  %v4015_v29 = vmul.f32 %v13784_v62, %v3855_v6  ;;  %vm4079_vm5 = vcmp.lt.f32.partialorder %v13612_v53, 0.0  ;;  %v3827_v20 = vadd.f32 0.2548296, %v3795_v61  ;;  %5922 = vperm.xlu1 %7007, %v5845_v47   ;;  %v7263_v62 = vld [vmem:[%s15596_s1 + $0xb8] sm:$0xff] }
 0x47a   : > { %v16097_v25 = vrot.slane %v17313_v42, 1  ;;  %vm4998_vm4 = vcmp.eq.s32.totalorder %v17318_v32, 1  ;;  %v13910_v15 = vmul.f32 %v13798_v33, %v3856_v54  ;;  %v3858_v49 = vmul.f32 %v13752_v8, %v3826_v9  ;;  %v17321_v8 = vld [vmem:[#allocation25_spill] sm:$0xff] }
 0x47b   : > { %vm5030_vm13 = vmand %vm12417_vm12, %vm4998_vm4  ;;  %v6764_v6 = vadd.s32 4294967294, %v7263_v62  ;;  %vm4991_vm3 = vcmp.eq.s32.totalorder %v17319_v16, 1  ;;  %v4047_v61 = vsub.f32 1.0, %v4015_v29  ;;  %v3859_v27 = vmul.f32 %v13759_v2, %v3827_v20  ;;  %v17323_v54 = vld [vmem:[#allocation77_spill] sm:$0xff]  ;;  %v13932_v2 = vpop.permute.xlu0 %4957  ;;  %v17327_v20 = vld [vmem:[#allocation74_spill] sm:$0xff] }
 0x47c   : > { %vm17320_vm9 = vcmask 1046528   ;;  %vm5023_vm0 = vmand %vm12417_vm12, %vm4991_vm3  ;;  %v17322_v35 = vrot.slane %v17321_v8, 1  ;;  %v17324_v9 = vrot.slane %v17323_v54, 1  ;;  %vm4082_vm11 = vcmp.lt.f32.partialorder %v13620_v44, 0.0  ;;  %17326 = vst [vmem:[#allocation64_spill] sm:$0xff] %v13932_v2  ;;  %v13954_v2 = vpop.permute.xlu1 %5886 }
 0x47d   : > { %v5079_v33 = vsel %vm17320_vm9, %v5076_v41, %v16097_v25  ;;  %vm17325_vm8 = vmmov %vm17320_vm9  ;;  %v4018_v32 = vmul.f32 %v13802_v55, %v3858_v49  ;;  %vm5750_vm1 = vcmp.ge.s32.totalorder %v6764_v6, 0  ;;  %vm17328_vm2 = vcmp.eq.s32.totalorder %v17327_v20, 1  ;;  %v17333_v55 = vld [vmem:[#allocation108_spill] sm:$0xff]  ;;  %17335 = vst [vmem:[#allocation59_spill] sm:$0xff] %v13954_v2  ;;  %v17336_v41 = vld [vmem:[#allocation95_spill] sm:$0xff] }
 0x47e   : > { %v5065_v47 = vsel %vm17325_vm8, %v17324_v9, %v17322_v35  ;;  %v5158_v29 = vsel %vm5030_vm13, %v5079_v33, %v4709_v24  ;;  %vm13938_vm4 = vmand %vm12429_vm10, %vm17328_vm2  ;;  %v16100_v62 = vsub.f32 1.0, %v13910_v15  ;;  %v4019_v16 = vmul.f32 %v13815_v14, %v3859_v27  ;;  %v17331_v35 = vld [vmem:[#allocation21_spill] sm:$0xff]  ;;  %v17353_v2 = vld [vmem:[#allocation7_spill] sm:$0xff] }
 0x47f   : > { %vm5782_vm3 = vcmp.lt.s32.totalorder %v6764_v6, 16  ;;  %vm17332_vm9 = vnez %v17331_v35  ;;  %v4111_v33 = vsub.f32 0.0, %v4047_v61  ;;  %v4050_v9 = vsub.f32 1.0, %v4018_v32  ;;  %v6143_v32 = vld [vmem:[%s15603_s8] sm:$0xff] }
 0x480   : > { %v17334_v24 = vsel %vm17332_vm9, %v17333_v55, 0.0  ;;  %vm5814_vm13 = vmand %vm5750_vm1, %vm5782_vm3  ;;  %v5224_v20 = vsel %vm13938_vm4, %v17289_v39, %v5158_v29  ;;  %v13957_v14 = vmul.f32 0.5, %v13600_v56  ;;  %v4051_v6 = vsub.f32 1.0, %v4019_v16  ;;  %v6144_v29 = vld [vmem:[%s15603_s8 + $0x8] sm:$0xff]  ;;  %v17340_v55 = vld [vmem:[#allocation48_spill] sm:$0xff] }
 0x481   : > { %v13948_v49 = vsel %vm5023_vm0, %v5065_v47, %v17334_v24  ;;  %v5846_v27 = vsel %vm5814_vm13, 1, %v17273_v36  ;;  %v16101_v47 = vrot.slane %v17289_v39, 7  ;;  %vm17337_vm0 = vcmp.eq.s32.totalorder %v17336_v41, 1  ;;  %v14009_v39 = vpop.permute.xlu0 %5474 }
 0x482   : > { %vm13971_vm8 = vmand %vm12429_vm10, %vm17337_vm0  ;;  %v4178_v16 = vmul.f32 0.5, %v13602_v38  ;;  %vm4083_vm1 = vcmp.lt.f32.partialorder %v13623_v31, 0.0  ;;  %v4114_v35 = vsub.f32 0.0, %v4050_v9  ;;  %5925 = vperm.xlu1 %7007, %v5846_v27   ;;  %vm5515_vm2 = vcmp.eq.s32.totalorder %v13445_v4, 1  ;;  %v17343_v27 = vld [vmem:[#allocation97_spill] sm:$0xff]  ;;  %17349 = vst [vmem:[#allocation52_spill] sm:$0xff] %v14009_v39 }
 0x483   : > { %v13981_v24 = vsub.f32 0.0, %v16100_v62  ;;  %v4115_v41 = vsub.f32 0.0, %v4051_v6  ;;  %v4179_v25 = vmul.f32 0.5, %v13604_v12  ;;  %v17341_v26 = vrot.slane %v17220_v22, 7  ;;  %vm5547_vm9 = vmand %vm12484_vm15, %vm5515_vm2  ;;  %v17347_v62 = vld [vmem:[#allocation12_spill] sm:$0xff] }
 0x484   : > { %vm17342_vm3 = vcmask 1040384   ;;  %vm17344_vm13 = vcmp.eq.s32.totalorder %v17343_v27, 1  ;;  %v14003_v12 = vsel %vm4079_vm5, %v4111_v33, %v4047_v61  ;;  %v6992_v27 = vpack.c.bf16 %v6144_v29, %v6143_v32  ;;  %v17354_v61 = vld [vmem:[#allocation92_spill] sm:$0xff]  ;;  %v17363_v29 = vld [vmem:[#allocation55_spill] sm:$0xff] }
 0x485   : > { %v5594_v38 = vsel %vm17342_vm3, %v17341_v26, %v16101_v47  ;;  %vm13995_vm0 = vmand %vm12429_vm10, %vm17344_vm13  ;;  %v4146_v26 = vsel %vm4082_vm11, %v4114_v35, %v4050_v9  ;;  %vm17350_vm2 = vcmp.lt.s32.totalorder %v17250_v52, 4  ;;  %v4147_v53 = vsel %vm4083_vm1, %v4115_v41, %v4051_v6  ;;  %v17355_v33 = vld [vmem:[#allocation84_spill] sm:$0xff]  ;;  %v7264_v35 = vld [vmem:[%s15596_s1 + $0xc0] sm:$0xff] }
 0x486   : > { %v14007_v47 = vsel %vm5547_vm9, %v5594_v38, %v5224_v20  ;;  %vm14015_vm3 = vmand %vm17350_vm2, %vm4518_vm14  ;;  %v4210_v44 = vadd.f32 1.0, %v4146_v26  ;;  %vm5500_vm5 = vcmp.eq.s32.totalorder %v17354_v61, 1  ;;  %v5080_v9 = vrot.slane %v17355_v33, 1  ;;  %v17356_v20 = vld [vmem:[#allocation76_spill] sm:$0xff]  ;;  %5477 = vperm.xlu1 %7007, %v17363_v29   ;;  %6993 = vmatprep.subr.bf16.mxu1 %v6992_v27  ;;  %v14049_v38 = vpop.permute.xlu1 %5889 }
 0x487   : > { %17348 = vst [vmem:[#allocation125_spill] sm:$0xff] %v14007_v47  ;;  %vm17357_vm11 = vcmp.eq.s32.totalorder %v17356_v20, 1  ;;  %v17358_v32 = vmov 0  ;;  %vm17360_vm1 = vcmp.ge.s32.totalorder %v17250_v52, 16  ;;  %v4211_v6 = vadd.f32 1.0, %v4147_v53  ;;  %17364 = vst [vmem:[#allocation6_spill] sm:$0xff] %v14049_v38  ;;  %6995 = vmatpush3.bf16.msra.mxu1 %v6992_v27 }
 0x488   : > { %vm14031_vm14 = vmand %vm12429_vm10, %vm17357_vm11  ;;  %vm4999_vm2 = vcmp.eq.s32.totalorder %v13490_v17, 1  ;;  %v6765_v41 = vadd.s32 4294967294, %v7264_v35  ;;  %v14051_v26 = vmul.f32 %v4210_v44, %v4178_v16  ;;  %v17365_v20 = vrot.slane %v17313_v42, 1  ;;  %v17367_v17 = vld [vmem:[#allocation19_spill] sm:$0xff]  ;;  %v17373_v44 = vld [vmem:[#allocation69_spill] sm:$0xff] }
 0x489   : > { %v17359_v32 = vsel %vm14031_vm14, 4294967295, %v17358_v32  ;;  %vm14039_vm9 = vmand %vm17360_vm1, %vm5693_vm6  ;;  %vm17366_vm6 = vcmask 1046528   ;;  %vm6250_vm13 = vcmask 1043456   ;;  %v17368_v29 = vrot.slane %v17367_v17, 2  ;;  %v17375_v27 = vld [vmem:[#allocation91_spill] sm:$0xff] }
 0x48a   : > { %v5081_v53 = vsel %vm17366_vm6, %v17365_v20, %v5080_v9  ;;  %vm5031_vm1 = vmand %vm12417_vm12, %vm4999_vm2  ;;  %v17369_v47 = vrot.slane %v17355_v33, 2  ;;  %vm17370_vm4 = vcmask 1045504   ;;  %v14063_v39 = vmul.f32 %v4211_v6, %v4179_v25  ;;  %6936 = vmatprep.subr.msk.mxu1 %vm6250_vm13, %v6145_v63  ;;  %v17377_v25 = vld [vmem:[#allocation98_spill] sm:$0xff] }
 0x48b   : > { %vm14069_vm7 = vmand %vm12484_vm15, %vm5500_vm5  ;;  %vm17374_vm2 = vnez %v17373_v44  ;;  %vm5751_vm6 = vcmp.ge.s32.totalorder %v6765_v41, 0  ;;  %vm5783_vm11 = vcmp.lt.s32.totalorder %v6765_v41, 16  ;;  %v16106_v61 = vrot.slane %v14051_v26, 2  ;;  %v7265_v44 = vld [vmem:[%s15596_s1 + $0xc8] sm:$0xff]  ;;  %6937 = vmatpush3.msk.msra.mxu1 %vm6250_vm13, %v6145_v63 }
 0x48c   : > { %v4634_v35 = vsel %vm17370_vm4, %v17369_v47, %v17368_v29  ;;  %v17376_v20 = vsel %vm17374_vm2, %v17375_v27, 0.0  ;;  %vm17378_vm4 = vcmp.eq.s32.totalorder %v17377_v25, 1  ;;  %vm5815_vm5 = vmand %vm5751_vm6, %vm5783_vm11  ;;  %v16108_v41 = vrot.slane %v14063_v39, 2  ;;  %v17385_v25 = vld [vmem:[#allocation4_spill] sm:$0xff] }
 0x48d   : > { %v14077_v38 = vsel %vm5031_vm1, %v5081_v53, %v17376_v20  ;;  %vm14084_vm14 = vmand %vm12429_vm10, %vm17378_vm4  ;;  %v4711_v6 = vsel %vm14015_vm3, %v4634_v35, 0.0  ;;  %v5082_v53 = vrot.slane %v17367_v17, 1  ;;  %vm5000_vm1 = vcmp.eq.s32.totalorder %v13535_v46, 1  ;;  %v14104_v35 = vpop.permute.xlu0 %4960  ;;  %v17414_v46 = vld [vmem:[#allocation80_spill] sm:$0xff] }
 0x48e   : > { %v5847_v29 = vsel %vm5815_vm5, 1, %v17273_v36  ;;  %vm5032_vm2 = vmand %vm12417_vm12, %vm5000_vm1  ;;  %v6766_v27 = vadd.s32 4294967294, %v7265_v44  ;;  %v5211_v22 = vsel %vm13995_vm0, %v17227_v23, %v13810_v0  ;;  %vm17381_vm3 = vcmp.eq.s32.totalorder %v13456_v43, 1  ;;  %v17389_v44 = vld [vmem:[#allocation122_spill] sm:$0xff] }
 0x48f   : > { %5928 = vperm.xlu1 %7007, %v5847_v29   ;;  %vm14110_vm11 = vmand %vm14039_vm9, %vm17381_vm3  ;;  %vm17384_vm6 = vcmask 1046528   ;;  %vm5502_vm4 = vcmp.eq.s32.totalorder %v17385_v25, 1  ;;  %v17386_v0 = vrot.slane %v17227_v23, 7  ;;  %v17387_v4 = vrot.slane %v17268_v51, 7  ;;  %v14138_v25 = vpop.permute.xlu1 %5441 }
 0x490   : > { %v5083_v20 = vsel %vm17384_vm6, %v5080_v9, %v5082_v53  ;;  %vm17388_vm0 = vcmask 1040384   ;;  %v5209_v29 = vsel %vm13971_vm8, %v17262_v50, %v13768_v58  ;;  %vm17390_vm13 = vcmask 1045504   ;;  %vm5534_vm6 = vmand %vm12484_vm15, %vm5502_vm4 }
 0x491   : > { %v5568_v43 = vsel %vm17388_vm0, %v17387_v4, %v17386_v0  ;;  %v14134_v9 = vsel %vm17390_vm13, %v16106_v61, %v16108_v41  ;;  %v5160_v63 = vsel %vm5032_vm2, %v5083_v20, %v4711_v6  ;;  %vm5752_vm1 = vcmp.ge.s32.totalorder %v6766_v27, 0  ;;  %v17395_v20 = vld [vmem:[#allocation89_spill] sm:$0xff] }
 0x492   : > { %vm5784_vm3 = vcmp.lt.s32.totalorder %v6766_v27, 16  ;;  %v17391_v56 = vsub.f32 1.0, %v13910_v15  ;;  %vm17392_vm8 = vcmp.lt.f32.partialorder %v13617_v18, 0.0  ;;  %v14147_v0 = vsel %vm5534_vm6, %v5568_v43, %v5211_v22  ;;  %v7267_v15 = vld [vmem:[%s15596_s1 + $0xd8] sm:$0xff] }
 0x493   : > { %vm5816_vm0 = vmand %vm5752_vm1, %vm5784_vm3  ;;  %v17393_v4 = vrot.slane %v17262_v50, 7  ;;  %vm17394_vm2 = vcmask 1040384   ;;  %v6015_v27 = vrot.slane %v17262_v50, 6  ;;  %vm17396_vm13 = vcmp.eq.s32.totalorder %v17340_v55, 1  ;;  %v17403_v55 = vld [vmem:[#allocation112_spill] sm:$0xff] }
 0x494   : > { %v14145_v58 = vsel %vm17392_vm8, %v13981_v24, %v17391_v56  ;;  %vm14158_vm5 = vmand %vm14039_vm9, %vm17396_vm13  ;;  %v5848_v18 = vsel %vm5816_vm0, 1, %v17273_v36  ;;  %vm16111_vm1 = vcmask 162816   ;;  %v6016_v22 = vrot.slane %v17268_v51, 6 }
 0x495   : > { %v5659_v6 = vsel %vm17394_vm2, 0.0, %v17393_v4  ;;  %vm17399_vm3 = vcmp.eq.s32.totalorder %v17347_v62, 1  ;;  %vm17400_vm6 = vcmp.lt.s32.totalorder %v17250_v52, 4  ;;  %5931 = vperm.xlu1 %7007, %v5848_v18   ;;  %vm17404_vm13 = vcmask 1041408   ;;  %v17417_v18 = vld [vmem:[#allocation67_spill] sm:$0xff]  ;;  %v17451_v62 = vld [vmem:[#allocation88_spill] sm:$0xff] }
 0x496   : > { %v5660_v24 = vsel %vm14069_vm7, %v5659_v6, %v5209_v29  ;;  %vm14170_vm8 = vmand %vm17400_vm6, %vm17399_vm3  ;;  %v6110_v43 = vsel %vm17404_vm13, 0.0, %v6015_v27  ;;  %vm17405_vm0 = vnez %v17359_v32  ;;  %v16109_v29 = vrot.slane %v17313_v42, 7  ;;  %v14194_v32 = vpop.permute.xlu0 %4963 }
 0x497   : > { %v5226_v16 = vsel %vm17405_vm0, %v17355_v33, %v5160_v63  ;;  %v16107_v51 = vrot.slane %v17355_v33, 7  ;;  %vm17406_vm7 = vcmp.eq.s32.totalorder %v17353_v2, 1  ;;  %v6111_v56 = vsel %vm14110_vm11, %v6110_v43, %v5660_v24  ;;  %vm17409_vm6 = vmmov %vm17404_vm13  ;;  %v17410_v63 = vld [vmem:[#allocation78_spill] sm:$0xff]  ;;  %v7266_v43 = vld [vmem:[%s15596_s1 + $0xd0] sm:$0xff] }
 0x498   : > { %vm14185_vm3 = vmand %vm14039_vm9, %vm17406_vm7  ;;  %v6017_v4 = vsel %vm17409_vm6, %v6015_v27, %v6016_v22  ;;  %vm5517_vm13 = vcmp.eq.s32.totalorder %v13559_v59, 1  ;;  %vm5953_vm0 = vcmp.eq.s32.totalorder %v13548_v11, 1  ;;  %vm17411_vm2 = vcmp.eq.s32.totalorder %v17410_v63, 1  ;;  %6938 = vmatprep.mubr.msk.f32.mxu1 %vm16111_vm1, %v6111_v56  ;;  %v17416_v59 = vld [vmem:[#allocation33_spill] sm:$0xff] }
 0x499   : > { %vm14200_vm4 = vmand %vm12429_vm10, %vm17411_vm2  ;;  %v17412_v2 = vmov 0  ;;  %v6112_v6 = vsel %vm14158_vm5, %v6017_v4, %v17414_v46  ;;  %vm17415_vm11 = vcmask 1040384   ;;  %v5084_v27 = vrot.slane %v17416_v59, 1  ;;  %v17421_v4 = vld [vmem:[#allocation38_spill] sm:$0xff]  ;;  %v17422_v46 = vld [vmem:[#allocation47_spill] sm:$0xff] }
 0x49a   : > { %v17413_v2 = vsel %vm14200_vm4, 4294967295, %v17412_v2  ;;  %v5598_v11 = vsel %vm17415_vm11, %v16109_v29, %v16107_v51  ;;  %vm5549_vm7 = vmand %vm12484_vm15, %vm5517_vm13  ;;  %vm5001_vm2 = vcmp.eq.s32.totalorder %v17417_v18, 1  ;;  %6939 = vmatmul.mubr.msk.f32.vlgmr.msra.gmra.mrb[0].mxu1 %vm16111_vm1, %v6112_v6  ;;  %v6767_v56 = vadd.s32 4294967294, %v7266_v43  ;;  %v17423_v6 = vld [vmem:[#allocation57_spill] sm:$0xff]  ;;  %v17426_v43 = vld [vmem:[#allocation43_spill] sm:$0xff] }
 0x49b   : > { %v14218_v24 = vsel %vm5549_vm7, %v5598_v11, %v5226_v16  ;;  %vm14222_vm5 = vmand %vm14039_vm9, %vm5953_vm0  ;;  %v5213_v63 = vsel %vm14084_vm14, %v17421_v4, %v13850_v34  ;;  %vm5504_vm6 = vcmp.eq.s32.totalorder %v17422_v46, 1  ;;  %v14234_v16 = vpop.permute.xlu1 %5892  ;;  %5483 = vperm.xlu1 %7007, %v17423_v6   ;;  %vm17424_vm13 = vcmask 1046528   ;;  %v17428_v51 = vld [vmem:[#allocation113_spill] sm:$0xff]  ;;  %v17430_v6 = vld [vmem:[#allocation51_spill] sm:$0xff] }
 0x49c   : > { %17418 = vst [vmem:[#allocation23_spill] sm:$0xff] %v14218_v24  ;;  %v5085_v11 = vsel %vm17424_vm13, %v5082_v53, %v5084_v27  ;;  %vm5033_vm0 = vmand %vm12417_vm12, %vm5001_vm2  ;;  %v17425_v18 = vrot.slane %v17421_v4, 7  ;;  %v17427_v61 = vrot.slane %v17426_v43, 7  ;;  %v6018_v34 = vrot.slane %v17227_v23, 6  ;;  %v17432_v53 = vld [vmem:[#allocation29_spill] sm:$0xff] }
 0x49d   : > { %v6020_v46 = vrot.slane %v17426_v43, 6  ;;  %vm17429_vm14 = vnez %v17428_v51  ;;  %vm5753_vm7 = vcmp.ge.s32.totalorder %v6767_v56, 0  ;;  %vm5785_vm13 = vcmp.lt.s32.totalorder %v6767_v56, 16  ;;  %vm5536_vm2 = vmand %vm12484_vm15, %vm5504_vm6 }
 0x49e   : > { %v5572_v47 = vsel %vm17415_vm11, %v17427_v61, %v17425_v18  ;;  %v17431_v41 = vsel %vm17429_vm14, %v17430_v6, 0.0  ;;  %v17433_v24 = vrot.slane %v17432_v53, 2  ;;  %v17434_v33 = vrot.slane %v17416_v59, 2  ;;  %vm5817_vm1 = vmand %vm5753_vm7, %vm5785_vm13 }
 0x49f   : > { %v14253_v29 = vsel %vm5033_vm0, %v5085_v11, %v17431_v41  ;;  %vm17435_vm11 = vcmask 1045504   ;;  %v5664_v23 = vsel %vm5536_vm2, %v5572_v47, %v5213_v63  ;;  %vm17436_vm4 = vcmask 1041408   ;;  %v17438_v11 = vld [vmem:[#allocation99_spill] sm:$0xff]  ;;  %v14282_v63 = vpop.permute.xlu0 %5480  ;;  %v17443_v47 = vld [vmem:[#allocation100_spill] sm:$0xff] }
 0x4a0   : > { %v4638_v61 = vsel %vm17435_vm11, %v17434_v33, %v17433_v24  ;;  %v6019_v18 = vsel %vm17436_vm4, %v6016_v22, %v6018_v34  ;;  %vm17437_vm12 = vmmov %vm17436_vm4  ;;  %vm17439_vm0 = vcmp.eq.s32.totalorder %v17438_v11, 1  ;;  %v5849_v43 = vsel %vm5817_vm1, 1, %v17273_v36  ;;  %v17442_v22 = vld [vmem:[#allocation37_spill] sm:$0xff]  ;;  %v17456_v11 = vld [vmem:[#allocation8_spill] sm:$0xff] }
 0x4a1   : > { %v6021_v51 = vsel %vm17437_vm12, %v6018_v34, %v6020_v46  ;;  %v4713_v41 = vsel %vm14170_vm8, %v4638_v61, 0.0  ;;  %vm14270_vm6 = vmand %vm12429_vm10, %vm17439_vm0  ;;  %v6113_v33 = vsel %vm14222_vm5, %v6019_v18, %v14147_v0  ;;  %v5086_v50 = vrot.slane %v17432_v53, 1  ;;  %5934 = vperm.xlu1 %7007, %v5849_v43   ;;  %v17452_v61 = vld [vmem:[#allocation16_spill] sm:$0xff]  ;;  %v17488_v0 = vld [vmem:[#allocation82_spill] sm:$0xff] }
 0x4a2   : > { %v6114_v24 = vsel %vm14185_vm3, %v6021_v51, %v17442_v22  ;;  %vm17444_vm12 = vcmp.eq.s32.totalorder %v17443_v47, 1  ;;  %vm17447_vm1 = vcmp.eq.s32.totalorder %v17389_v44, 1  ;;  %vm17450_vm3 = vcmask 162816  }
 0x4a3   : > { %vm14288_vm4 = vmand %vm12429_vm10, %vm17444_vm12  ;;  %6941 = vmatprep.mubr.msk.f32.mxu1 %vm17450_vm3, %v6113_v33  ;;  %vm5002_vm5 = vcmp.eq.s32.totalorder %v17451_v62, 1  ;;  %v6768_v6 = vadd.s32 4294967294, %v7267_v15  ;;  %vm5955_vm14 = vcmp.eq.s32.totalorder %v17452_v61, 1  ;;  %v16119_v44 = vrot.slane %v17367_v17, 7  ;;  %v14317_v33 = vpop.permute.xlu1 %5895 }
 0x4a4   : > { %vm14296_vm8 = vmand %vm14039_vm9, %vm17447_vm1  ;;  %vm17454_vm13 = vcmask 1046528   ;;  %vm17455_vm2 = vnez %v17261_v21  ;;  %v16116_v51 = vrot.slane %v17416_v59, 7  ;;  %v5215_v43 = vsel %vm14270_vm6, %v17456_v11, %v13889_v48  ;;  %v17463_v48 = vld [vmem:[#allocation20_spill] sm:$0xff] }
 0x4a5   : > { %vm17453_vm7 = vmmov %vm17450_vm3  ;;  %v5087_v18 = vsel %vm17454_vm13, %v5084_v27, %v5086_v50  ;;  %vm17457_vm12 = vcmp.eq.s32.totalorder %v17395_v20, 1  ;;  %vm17458_vm1 = vcmp.lt.s32.totalorder %v17250_v52, 4  ;;  %vm5506_vm6 = vcmp.eq.s32.totalorder %v17463_v48, 1 }
 0x4a6   : > { %6942 = vmatmul.mubr.msk.f32.gmra.mrb[2].mxu1 %vm17453_vm7, %v6114_v24  ;;  %vm5034_vm11 = vmand %vm17455_vm2, %vm5002_vm5  ;;  %vm5754_vm5 = vcmp.ge.s32.totalorder %v6768_v6, 0  ;;  %vm5786_vm7 = vcmp.lt.s32.totalorder %v6768_v6, 16  ;;  %vm17464_vm0 = vcmp.eq.s32.totalorder %v17403_v55, 1  ;;  %v17465_v20 = vmov 0  ;;  %v17470_v55 = vld [vmem:[#allocation128_spill] sm:$0xff] }
 0x4a7   : > { %vm14323_vm3 = vmand %vm17458_vm1, %vm17457_vm12  ;;  %v5162_v22 = vsel %vm5034_vm11, %v5087_v18, %v4713_v41  ;;  %vm17467_vm11 = vnez %v17413_v2  ;;  %v17469_v47 = vrot.slane %v17456_v11, 7  ;;  %v17471_v62 = vrot.slane %v17470_v55, 7  ;;  %v17474_v18 = vld [vmem:[#allocation131_spill] sm:$0xff] }
 0x4a8   : > { %vm14329_vm13 = vmand %vm14039_vm9, %vm5955_vm14  ;;  %v5228_v41 = vsel %vm17467_vm11, %v17416_v59, %v5162_v22  ;;  %vm17468_vm14 = vcmask 1040384   ;;  %v6022_v6 = vrot.slane %v17421_v4, 6  ;;  %v6024_v2 = vrot.slane %v17470_v55, 6  ;;  %v14373_v55 = vpop.permute.xlu0 %4966 }
 0x4a9   : > { %vm14338_vm10 = vmand %vm14039_vm9, %vm17464_vm0  ;;  %v5602_v56 = vsel %vm17468_vm14, %v16119_v44, %v16116_v51  ;;  %vm17473_vm0 = vcmp.eq.s32.totalorder %v13668_v45, 1  ;;  %v5088_v22 = vrot.slane %v17474_v18, 1  ;;  %v7268_v45 = vld [vmem:[%s15596_s1 + $0xe0] sm:$0xff]  ;;  %v17483_v51 = vld [vmem:[#allocation133_spill] sm:$0xff]  ;;  %v16125_v24 = vrot.slane %v17488_v0, 2 }
 0x4aa   : > { %v17466_v20 = vsel %vm14338_vm10, 4294967295, %v17465_v20  ;;  %vm5818_vm12 = vmand %vm5754_vm5, %vm5786_vm7  ;;  %vm5003_vm7 = vcmp.eq.s32.totalorder %v13693_v30, 1  ;;  %v6026_v34 = vrot.slane %v17456_v11, 6  ;;  %v16117_v11 = vrot.slane %v17474_v18, 7  ;;  %v17557_v44 = vld [vmem:[#allocation49_spill] sm:$0xff] }
 0x4ab   : > { %vm17472_vm1 = vmmov %vm17468_vm14  ;;  %v5850_v61 = vsel %vm5818_vm12, 1, %v17273_v36  ;;  %vm17475_vm14 = vcmask 1041408   ;;  %vm5957_vm12 = vcmp.eq.s32.totalorder %v13671_v40, 1  ;;  %7198 = vpow2.f32 %v13687_v1 }
 0x4ac   : > { %v5576_v15 = vsel %vm17472_vm1, %v17471_v62, %v17469_v47  ;;  %vm5551_vm5 = vmand %vm12484_vm15, %vm17473_vm0  ;;  %5937 = vperm.xlu1 %7007, %v5850_v61   ;;  %v6023_v4 = vsel %vm17475_vm14, %v6020_v46, %v6022_v6  ;;  %v6769_v47 = vadd.s32 4294967294, %v7268_v45  ;;  %v17476_v62 = vld [vmem:[#allocation138_spill] sm:$0xff]  ;;  %v17480_v46 = vld [vmem:[#allocation120_spill] sm:$0xff] }
 0x4ad   : > { %v14364_v48 = vsel %vm5551_vm5, %v5602_v56, %v5228_v41  ;;  %vm5538_vm11 = vmand %vm12484_vm15, %vm5506_vm6  ;;  %vm4531_vm1 = vcmp.eq.s32.totalorder %v17476_v62, 1  ;;  %v6115_v41 = vsel %vm14329_vm13, %v6023_v4, %v5664_v23  ;;  %vm17478_vm6 = vcmask 1046528   ;;  %v17481_v45 = vld [vmem:[#allocation115_spill] sm:$0xff]  ;;  %v17527_v62 = vld [vmem:[#allocation9_spill] sm:$0xff] }
 0x4ae   : > { %v5666_v30 = vsel %vm5538_vm11, %v5576_v15, %v5215_v43  ;;  %vm17477_vm0 = vmmov %vm17475_vm14  ;;  %v5089_v61 = vsel %vm17478_vm6, %v5086_v50, %v5088_v22  ;;  %vm17479_vm14 = vcmask 162816   ;;  %vm17482_vm10 = vnez %v17481_v45  ;;  %v14398_v50 = vpop.permute.xlu1 %5447 }
 0x4af   : > { %v6025_v56 = vsel %vm17477_vm0, %v6022_v6, %v6024_v2  ;;  %vm5035_vm5 = vmand %vm17455_vm2, %vm5003_vm7  ;;  %6944 = vmatprep.mubr.msk.f32.mxu1 %vm17479_vm14, %v6115_v41  ;;  %v17484_v43 = vsel %vm17482_vm10, %v17483_v51, 0.0  ;;  %vm5755_vm13 = vcmp.ge.s32.totalorder %v6769_v47, 0  ;;  %vm5787_vm11 = vcmp.lt.s32.totalorder %v6769_v47, 16  ;;  %v7269_v51 = vld [vmem:[%s15596_s1 + $0xe8] sm:$0xff]  ;;  %v17489_v47 = vld [vmem:[#allocation58_spill] sm:$0xff] }
 0x4b0   : > { %v6116_v40 = vsel %vm14296_vm8, %v6025_v56, %v17480_v46  ;;  %v14390_v15 = vsel %vm5035_vm5, %v5089_v61, %v17484_v43  ;;  %vm14394_vm0 = vmand %vm14039_vm9, %vm5957_vm12  ;;  %v16124_v6 = vrot.slane %v17488_v0, 1  ;;  %vm5004_vm10 = vcmp.eq.s32.totalorder %v13772_v19, 1  ;;  %5489 = vperm.xlu1 %7007, %v17489_v47   ;;  %v17493_v46 = vld [vmem:[#allocation66_spill] sm:$0xff] }
 0x4b1   : > { %vm17487_vm7 = vmmov %vm17479_vm14  ;;  %v6770_v4 = vadd.s32 4294967294, %v7269_v51  ;;  %v5217_v19 = vsel %vm14288_vm4, %v17323_v54, %v13948_v49  ;;  %vm5508_vm12 = vcmp.eq.s32.totalorder %v13727_v13, 1  ;;  %v17492_v61 = vrot.slane %v17323_v54, 7 }
 0x4b2   : > { %6945 = vmatmul.mubr.msk.f32.gmra.mrb[4].mxu1 %vm17487_vm7, %v6116_v40  ;;  %vm5819_vm6 = vmand %vm5755_vm13, %vm5787_vm11  ;;  %v17494_v40 = vrot.slane %v17493_v46, 7  ;;  %vm17495_vm5 = vcmask 1040384   ;;  %v17496_v43 = vrot.slane %v17474_v18, 2  ;;  %vm17497_vm14 = vcmask 1045504  }
 0x4b3   : > { %v5851_v41 = vsel %vm5819_vm6, 1, %v17273_v36  ;;  %vm14411_vm8 = vmand %vm17455_vm2, %vm5004_vm10  ;;  %vm17498_vm13 = vcmask 1046528   ;;  %vm5756_vm11 = vcmp.ge.s32.totalorder %v6770_v4, 0  ;;  %vm5788_vm4 = vcmp.lt.s32.totalorder %v6770_v4, 16 }
 0x4b4   : > { %v5580_v45 = vsel %vm17495_vm5, %v17494_v40, %v17492_v61  ;;  %v4642_v51 = vsel %vm17497_vm14, %v17496_v43, %v16125_v24  ;;  %v5091_v47 = vsel %vm17498_vm13, %v5088_v22, %v16124_v6  ;;  %vm5540_vm7 = vmand %vm12484_vm15, %vm5508_vm12  ;;  %v6028_v61 = vrot.slane %v17493_v46, 6  ;;  %v14439_v40 = vpop.permute.xlu0 %4969  ;;  %v17499_v43 = vld [vmem:[#allocation81_spill] sm:$0xff]  ;;  %5940 = vperm.xlu1 %7007, %v5851_v41  }
 0x4b5   : > { %v4715_v13 = vsel %vm14323_vm3, %v4642_v51, 0.0  ;;  %vm5820_vm6 = vmand %vm5756_vm11, %vm5788_vm4  ;;  %v5668_v49 = vsel %vm5540_vm7, %v5580_v45, %v5217_v19  ;;  %vm17500_vm10 = vcmp.eq.s32.totalorder %v17499_v43, 1  ;;  %vm17501_vm5 = vnez %v17214_v28  ;;  %v14460_v43 = vpop.permute.xlu1 %5898  ;;  %v17515_v41 = vld [vmem:[#allocation93_spill] sm:$0xff] }
 0x4b6   : > { %vm14445_vm14 = vmand %vm17501_vm5, %vm17500_vm10  ;;  %v5164_v27 = vsel %vm14411_vm8, %v5091_v47, %v4715_v13  ;;  %v5852_v4 = vsel %vm5820_vm6, 1, %v17273_v36  ;;  %v16118_v19 = vrot.slane %v17432_v53, 7  ;;  %vm17504_vm3 = vcmask 1041408   ;;  %v17506_v47 = vld [vmem:[#allocation56_spill] sm:$0xff] }
 0x4b7   : > { %v6027_v46 = vsel %vm17504_vm3, %v6024_v2, %v6026_v34  ;;  %vm17505_vm12 = vmmov %vm17504_vm3  ;;  %v5230_v51 = vsel %vm14445_vm14, %v17474_v18, %v5164_v27  ;;  %vm5521_vm13 = vcmp.eq.s32.totalorder %v13824_v5, 1  ;;  %vm17507_vm8 = vnez %v17466_v20  ;;  %v17509_v5 = vld [vmem:[#allocation24_spill] sm:$0xff]  ;;  %v17516_v27 = vld [vmem:[#allocation70_spill] sm:$0xff] }
 0x4b8   : > { %v6029_v45 = vsel %vm17505_vm12, %v6026_v34, %v6028_v61  ;;  %v6117_v56 = vsel %vm14394_vm0, %v6027_v46, %v5666_v30  ;;  %vm17508_vm11 = vcmask 1040384   ;;  %vm5553_vm4 = vmand %vm12484_vm15, %vm5521_vm13  ;;  %vm5959_vm7 = vcmp.eq.s32.totalorder %v13796_v57, 1  ;;  %v7270_v57 = vld [vmem:[%s15596_s1 + $0xf0] sm:$0xff]  ;;  %5943 = vperm.xlu1 %7007, %v5852_v4  }
 0x4b9   : > { %v6118_v13 = vsel %vm17507_vm8, %v6029_v45, %v17506_v47  ;;  %v5606_v2 = vsel %vm17508_vm11, %v16118_v19, %v16117_v11  ;;  %vm17510_vm6 = vcmp.eq.s32.totalorder %v17509_v5, 1  ;;  %v4207_v20 = vadd.f32 1.0, %v14003_v12  ;;  %vm14500_vm12 = vmand %vm14039_vm9, %vm5959_vm7  ;;  %v17531_v5 = vld [vmem:[#allocation17_spill] sm:$0xff]  ;;  %v17553_v11 = vld [vmem:[#allocation10_spill] sm:$0xff] }
 0x4ba   : > { %vm14479_vm0 = vmand %vm17501_vm5, %vm17510_vm6  ;;  %vm17513_vm10 = vcmask 162816   ;;  %v14485_v23 = vsel %vm5553_vm4, %v5606_v2, %v5230_v51  ;;  %v3595_v34 = vmul.f32 1.0614054, %v17515_v41  ;;  %v6771_v22 = vadd.s32 4294967294, %v7270_v57  ;;  %v17537_v12 = vld [vmem:[#allocation129_spill] sm:$0xff] }
 0x4bb   : > { %6947 = vmatprep.mubr.msk.f32.mxu1 %vm17513_vm10, %v6117_v56  ;;  %17514 = vst [vmem:[#allocation124_spill] sm:$0xff] %v14485_v23  ;;  %vm4527_vm14 = vcmp.eq.s32.totalorder %v17516_v27, 1  ;;  %v14494_v46 = vmul.f32 %v13695_v10, %v13679_v3  ;;  %v4208_v45 = vadd.f32 1.0, %v14145_v58  ;;  %vm17517_vm3 = vmmov %vm17513_vm10  ;;  %vm5960_vm13 = vcmp.eq.s32.totalorder %v13839_v37, 1  ;;  %v14515_v58 = vpop.permute.xlu0 %5486  ;;  %v17545_v56 = vld [vmem:[#allocation101_spill] sm:$0xff]  ;;  %v17588_v27 = vld [vmem:[#allocation36_spill] sm:$0xff] }
 0x4bc   : > { %6948 = vmatmul.mubr.msk.f32.gmra.mrb[6].mxu1 %vm17517_vm3, %v6118_v13  ;;  %v6030_v51 = vrot.slane %v17323_v54, 6  ;;  %vm17520_vm8 = vcmp.lt.s32.totalorder %v17250_v52, 4  ;;  %v17521_v3 = vmov 0  ;;  %v3627_v10 = vadd.f32 -1.4531521, %v3595_v34  ;;  %v17526_v54 = vld [vmem:[#allocation126_spill] sm:$0xff] }
 0x4bd   : > { %vm14511_vm11 = vmand %vm17520_vm8, %vm4531_vm1  ;;  %vm5757_vm4 = vcmp.ge.s32.totalorder %v6771_v22, 0  ;;  %vm5789_vm7 = vcmp.lt.s32.totalorder %v6771_v22, 16  ;;  %vm17525_vm10 = vcmask 1041408   ;;  %v5219_v47 = vsel %vm14479_vm0, %v17527_v62, %v17526_v54  ;;  %v14547_v22 = vpop.permute.xlu1 %5901  ;;  %v17628_v23 = vld [vmem:[#allocation63_spill] sm:$0xff] }
 0x4be   : > { %v17522_v3 = vsel %vm14511_vm11, 4294967295, %v17521_v3  ;;  %vm14517_vm6 = vmand %vm5757_vm4, %vm5789_vm7  ;;  %v6031_v1 = vsel %vm17525_vm10, %v6028_v61, %v6030_v51  ;;  %vm5510_vm1 = vcmp.eq.s32.totalorder %v13901_v7, 1  ;;  %v17528_v4 = vrot.slane %v17527_v62, 7 }
 0x4bf   : > { %v17529_v13 = vrot.slane %v17321_v8, 7  ;;  %vm17530_vm3 = vcmask 1040384   ;;  %v14533_v34 = vmul.f32 %v4207_v20, %v17531_v5  ;;  %v3659_v57 = vmul.f32 %v17515_v41, %v3627_v10  ;;  %vm14540_vm8 = vmand %vm14039_vm9, %vm5960_vm13  ;;  %v17536_v10 = vld [vmem:[#allocation59_spill] sm:$0xff] }
 0x4c0   : > { %v6119_v7 = vsel %vm14500_vm12, %v6031_v1, %v5668_v49  ;;  %v6032_v30 = vrot.slane %v17321_v8, 6  ;;  %v14550_v20 = vmul.f32 %v4208_v45, %v13957_v14  ;;  %vm17535_vm0 = vcmask 162816   ;;  %vm5542_vm13 = vmand %vm12484_vm15, %vm5510_vm1  ;;  %v17538_v1 = vld [vmem:[#allocation127_spill] sm:$0xff]  ;;  %v17539_v8 = vld [vmem:[#allocation60_spill] sm:$0xff] }
 0x4c1   : > { %v5584_v2 = vsel %vm17530_vm3, %v17529_v13, %v17528_v4  ;;  %17532 = vst [vmem:[#allocation32_spill] sm:$0xff] %v14533_v34  ;;  %6950 = vmatprep.mubr.msk.f32.mxu1 %vm17535_vm0, %v6119_v7  ;;  %vm5961_vm4 = vcmp.eq.s32.totalorder %v17536_v10, 1  ;;  %v3597_v49 = vmul.f32 1.0614054, %v17537_v12  ;;  %vm4528_vm12 = vcmp.eq.s32.totalorder %v17538_v1, 1  ;;  %5495 = vperm.xlu1 %7007, %v17539_v8   ;;  %vm17540_vm7 = vmmov %vm17525_vm10  ;;  %v17541_v13 = vld [vmem:[#allocation86_spill] sm:$0xff] }
 0x4c2   : > { %v3691_v54 = vadd.f32 1.4214138, %v3659_v57  ;;  %v5853_v14 = vsel %vm14517_vm6, 1, %v17273_v36  ;;  %v5670_v45 = vsel %vm5542_vm13, %v5584_v2, %v5219_v47  ;;  %v6033_v4 = vsel %vm17540_vm7, %v6030_v51, %v6032_v30  ;;  %vm14571_vm10 = vmand %vm14039_vm9, %vm5961_vm4  ;;  %v17544_v8 = vld [vmem:[#allocation6_spill] sm:$0xff]  ;;  %v17549_v47 = vld [vmem:[#allocation79_spill] sm:$0xff] }
 0x4c3   : > { %v6120_v5 = vsel %vm14540_vm8, %v6033_v4, %v17541_v13  ;;  %v3629_v10 = vadd.f32 -1.4531521, %v3597_v49  ;;  %vm5962_vm1 = vcmp.eq.s32.totalorder %v17544_v8, 1  ;;  %v6034_v57 = vrot.slane %v17527_v62, 6  ;;  %vm17550_vm8 = vmmov %vm17535_vm0  ;;  %v14590_v4 = vpop.permute.xlu0 %4972 }
 0x4c4   : > { %vm17546_vm6 = vcmp.eq.s32.totalorder %v17545_v56, 1  ;;  %v3723_v51 = vmul.f32 %v17515_v41, %v3691_v54  ;;  %6951 = vmatmul.mubr.msk.f32.gmra.mrb[8].mxu1 %vm17550_vm8, %v6120_v5  ;;  %vm17551_vm0 = vmmov %vm17540_vm7  ;;  %v17552_v56 = vld [vmem:[#allocation53_spill] sm:$0xff]  ;;  %vm5512_vm13 = vcmp.eq.s32.totalorder %v14138_v25, 1  ;;  %v17558_v36 = vrot.slane %v17557_v44, 7 }
 0x4c5   : > { %vm14581_vm3 = vmand %vm17501_vm5, %vm17546_vm6  ;;  %v3661_v62 = vmul.f32 %v17537_v12, %v3629_v10  ;;  %v6035_v13 = vsel %vm17551_vm0, %v6032_v30, %v6034_v57  ;;  %5946 = vperm.xlu1 %7007, %v5853_v14   ;;  %v17556_v10 = vrot.slane %v17553_v11, 7  ;;  %vm17559_vm7 = vcmask 1040384   ;;  %v14615_v14 = vpop.permute.xlu1 %5453 }
 0x4c6   : > { %v5221_v19 = vsel %vm14581_vm3, %v17553_v11, %v17552_v56  ;;  %v3755_v54 = vadd.f32 -0.28449672, %v3723_v51  ;;  %vm14603_vm4 = vmand %vm14039_vm9, %vm5962_vm1  ;;  %v6121_v30 = vsel %vm14571_vm10, %v6035_v13, %v5670_v45  ;;  %v6036_v25 = vrot.slane %v17557_v44, 6  ;;  %v14623_v45 = vpop.eup %7198 }
 0x4c7   : > { %v5588_v56 = vsel %vm17559_vm7, %v17558_v36, %v17556_v10  ;;  %v3693_v8 = vadd.f32 1.4214138, %v3661_v62  ;;  %vm17560_vm6 = vmmov %vm17550_vm8  ;;  %v16120_v51 = vrot.slane %v14494_v46, 2  ;;  %v16121_v37 = vrot.slane %v14494_v46, 1  ;;  %v14656_v5 = vpop.permute.xlu0 %4975 }
 0x4c8   : > { %6953 = vmatprep.mubr.msk.f32.mxu1 %vm17560_vm6, %v6121_v30  ;;  %vm5544_vm10 = vmand %vm12484_vm15, %vm5512_vm13  ;;  %vm5963_vm1 = vcmp.eq.s32.totalorder %v14234_v16, 1  ;;  %vm17561_vm3 = vcmp.lt.s32.totalorder %v17250_v52, 4  ;;  %v3787_v7 = vmul.f32 %v17515_v41, %v3755_v54  ;;  %v6037_v13 = vsel %vm17551_vm0, %v6034_v57, %v6036_v25  ;;  %v17564_v16 = vld [vmem:[#allocation61_spill] sm:$0xff] }
 0x4c9   : > { %vm14629_vm8 = vmand %vm17561_vm3, %vm4527_vm14  ;;  %v5672_v62 = vsel %vm5544_vm10, %v5588_v56, %v5221_v19  ;;  %v4651_v30 = vrot.slane %v14533_v34, 2  ;;  %v3725_v10 = vmul.f32 %v17537_v12, %v3693_v8  ;;  %v6122_v36 = vsel %vm14603_vm4, %v6037_v13, %v17564_v16  ;;  %v17569_v56 = vld [vmem:[#allocation90_spill] sm:$0xff]  ;;  %v17573_v8 = vld [vmem:[#allocation41_spill] sm:$0xff]  ;;  %v14688_v2 = vpop.permute.xlu1 %5904 }
 0x4ca   : > { %vm14642_vm13 = vmand %vm14039_vm9, %vm5963_vm1  ;;  %v5100_v49 = vrot.slane %v14533_v34, 1  ;;  %vm5009_vm14 = vcmp.eq.s32.totalorder %v14373_v55, 1  ;;  %v3819_v19 = vadd.f32 0.2548296, %v3787_v7  ;;  %vm5964_vm10 = vcmp.eq.s32.totalorder %v14317_v33, 1  ;;  %v17574_v7 = vld [vmem:[#allocation28_spill] sm:$0xff] }
 0x4cb   : > { %vm17567_vm7 = vmmov %vm17560_vm6  ;;  %vm17568_vm6 = vcmask 1045504   ;;  %v6038_v54 = vrot.slane %v17553_v11, 6  ;;  %vm17570_vm1 = vcmp.eq.s32.totalorder %v17569_v56, 1  ;;  %v3757_v13 = vadd.f32 -0.28449672, %v3725_v10  ;;  %v17576_v56 = vld [vmem:[#allocation27_spill] sm:$0xff] }
 0x4cc   : > { %6954 = vmatmul.mubr.msk.f32.gmra.mrb[10].mxu1 %vm17567_vm7, %v6122_v36  ;;  %v4652_v57 = vsel %vm17568_vm6, %v16120_v51, %v4651_v30  ;;  %vm5041_vm4 = vmand %vm17455_vm2, %vm5009_vm14  ;;  %vm17575_vm14 = vcmask 1046528   ;;  %v16123_v36 = vrot.slane %v14550_v20, 2  ;;  %vm17577_vm6 = vcmp.eq.s32.totalorder %v17576_v56, 1  ;;  %v17580_v10 = vld [vmem:[#allocation2_spill] sm:$0xff] }
 0x4cd   : > { %vm14662_vm3 = vmand %vm17501_vm5, %vm17570_vm1  ;;  %v4720_v16 = vsel %vm14629_vm8, %v4652_v57, 0.0  ;;  %v5101_v11 = vsel %vm17575_vm14, %v16121_v37, %v5100_v49  ;;  %v3851_v61 = vmul.f32 %v17515_v41, %v3819_v19  ;;  %v16122_v37 = vrot.slane %v14550_v20, 1  ;;  %v17595_v51 = vld [vmem:[#allocation22_spill] sm:$0xff]  ;;  %v14748_v24 = vpop.permute.xlu1 %5907 }
 0x4ce   : > { %vm14678_vm1 = vmand %vm17501_vm5, %vm17577_vm6  ;;  %v14684_v44 = vsel %vm5041_vm4, %v5101_v11, %v4720_v16  ;;  %vm17582_vm14 = vcmp.lt.s32.totalorder %v17250_v52, 4  ;;  %v3789_v56 = vmul.f32 %v17537_v12, %v3757_v13  ;;  %vm17583_vm4 = vcmask 1045504   ;;  %v17585_v11 = vld [vmem:[#allocation64_spill] sm:$0xff]  ;;  %v17600_v55 = vld [vmem:[#allocation42_spill] sm:$0xff] }
 0x4cf   : > { %vm17581_vm8 = vmmov %vm17551_vm0  ;;  %v4654_v19 = vsel %vm17583_vm4, %v4651_v30, %v16123_v36  ;;  %vm5006_vm0 = vcmp.eq.s32.totalorder %v17585_v11, 1  ;;  %v17598_v36 = vld [vmem:[#allocation106_spill] sm:$0xff]  ;;  %v17771_v21 = vrot.slane %v14550_v20, 2 }
 0x4d0   : > { %v6039_v57 = vsel %vm17581_vm8, %v6036_v25, %v6038_v54  ;;  %vm4560_vm6 = vmand %vm17582_vm14, %vm4528_vm12  ;;  %vm5010_vm8 = vcmp.eq.s32.totalorder %v14439_v40, 1  ;;  %v17584_v25 = vld [vmem:[#allocation130_spill] sm:$0xff]  ;;  %vm17586_vm12 = vcmask 1046528   ;;  %v3821_v40 = vadd.f32 0.2548296, %v3789_v56  ;;  %v17596_v56 = vld [vmem:[#allocation40_spill] sm:$0xff] }
 0x4d1   : > { %v6123_v41 = vsel %vm14642_vm13, %v6039_v57, %v5672_v62  ;;  %v4011_v16 = vmul.f32 %v17584_v25, %v3851_v61  ;;  %v4721_v1 = vsel %vm4560_vm6, %v4654_v19, 0.0  ;;  %v5103_v13 = vsel %vm17586_vm12, %v5100_v49, %v16122_v37  ;;  %vm5042_vm13 = vmand %vm17455_vm2, %vm5010_vm8  ;;  %v17587_v62 = vld [vmem:[#allocation71_spill] sm:$0xff]  ;;  %v17597_v37 = vld [vmem:[#allocation52_spill] sm:$0xff] }
 0x4d2   : > { %6956 = vmatprep.mubr.msk.f32.mxu1 %vm17567_vm7, %v6123_v41  ;;  %v5223_v30 = vsel %vm14678_vm1, %v17588_v27, %v17587_v62  ;;  %vm14717_vm14 = vmand %vm14039_vm9, %vm5964_vm10  ;;  %v5170_v57 = vsel %vm5042_vm13, %v5103_v13, %v4721_v1  ;;  %vm5514_vm7 = vcmp.eq.s32.totalorder %v14398_v50, 1  ;;  %v17591_v49 = vrot.slane %v17588_v27, 7  ;;  %v17592_v41 = vld [vmem:[#allocation65_spill] sm:$0xff]  ;;  %v14736_v13 = vpop.permute.xlu0 %5492 }
 0x4d3   : > { %v17593_v19 = vrot.slane %v17592_v41, 7  ;;  %vm17594_vm6 = vcmask 1040384   ;;  %vm4077_vm4 = vcmp.lt.f32.partialorder %v17596_v56, 0.0  ;;  %v4043_v33 = vsub.f32 1.0, %v4011_v16  ;;  %vm5546_vm10 = vmand %vm12484_vm15, %vm5514_vm7 }
 0x4d4   : > { %v6040_v62 = vrot.slane %v17592_v41, 6  ;;  %v5236_v50 = vsel %vm14662_vm3, %v14533_v34, %v5170_v57  ;;  %v16127_v1 = vrot.slane %v14494_v46, 7  ;;  %v16126_v16 = vrot.slane %v14533_v34, 7 }
 0x4d5   : > { %v5592_v25 = vsel %vm17594_vm6, %v17593_v19, %v17591_v49  ;;  %v3853_v49 = vmul.f32 %v17537_v12, %v3821_v40  ;;  %vm5527_vm12 = vcmp.eq.s32.totalorder %v14515_v58, 1  ;;  %v4107_v41 = vsub.f32 0.0, %v4043_v33  ;;  %v17601_v12 = vld [vmem:[#allocation13_spill] sm:$0xff]  ;;  %v17602_v40 = vld [vmem:[#allocation135_spill] sm:$0xff] }
 0x4d6   : > { %v5674_v19 = vsel %vm5546_vm10, %v5592_v25, %v5223_v30  ;;  %vm17599_vm7 = vcmask 1041408   ;;  %vm5559_vm3 = vmand %vm12484_vm15, %vm5527_vm12  ;;  %vm5965_vm6 = vcmp.eq.s32.totalorder %v14460_v43, 1  ;;  %v3601_v57 = vmul.f32 1.0614054, %v17600_v55  ;;  %v17604_v25 = vld [vmem:[#allocation102_spill] sm:$0xff] }
 0x4d7   : > { %v6041_v6 = vsel %vm17599_vm7, %v6038_v54, %v6040_v62  ;;  %v4013_v30 = vmul.f32 %v17601_v12, %v3853_v49  ;;  %vm17603_vm7 = vcmask 1040384   ;;  %vm17605_vm12 = vcmp.eq.s32.totalorder %v17604_v25, 1  ;;  %v17611_v12 = vld [vmem:[#allocation83_spill] sm:$0xff]  ;;  %v17615_v25 = vld [vmem:[#allocation34_spill] sm:$0xff] }
 0x4d8   : > { %v6124_v58 = vsel %vm14717_vm14, %v6041_v6, %v17602_v40  ;;  %v5618_v54 = vsel %vm17603_vm7, %v16127_v1, %v16126_v16  ;;  %vm14764_vm13 = vmand %vm17501_vm5, %vm17605_vm12  ;;  %vm17608_vm10 = vcmp.lt.f32.partialorder %v17574_v7, 0.0  ;;  %vm17609_vm14 = vcmask 162816  }
 0x4d9   : > { %v4139_v49 = vsel %vm17608_vm10, %v4107_v41, %v4043_v33  ;;  %6957 = vmatmul.mubr.msk.f32.gmra.mrb[12].mxu1 %vm17609_vm14, %v6124_v58  ;;  %v14772_v6 = vsel %vm5559_vm3, %v5618_v54, %v5236_v50  ;;  %v3633_v61 = vadd.f32 -1.4531521, %v3601_v57  ;;  %vm17612_vm7 = vcmp.eq.s32.totalorder %v17611_v12, 1  ;;  %vm14788_vm3 = vmand %vm14039_vm9, %vm5965_vm6  ;;  %v14834_v33 = vpop.permute.xlu1 %5459  ;;  %v17658_v57 = vld [vmem:[#allocation103_spill] sm:$0xff] }
 0x4da   : > { %17610 = vst [vmem:[#allocation110_spill] sm:$0xff] %v14772_v6  ;;  %vm14778_vm1 = vmand %vm17501_vm5, %vm17612_vm7  ;;  %v4203_v16 = vadd.f32 1.0, %v4139_v49  ;;  %v4045_v7 = vsub.f32 1.0, %v4013_v30  ;;  %v6042_v41 = vrot.slane %v17588_v27, 6  ;;  %vm17618_vm10 = vcmp.eq.s32.totalorder %v17573_v8, 1  ;;  %v14809_v8 = vpop.permute.xlu0 %4978  ;;  %v17622_v27 = vld [vmem:[#allocation85_spill] sm:$0xff] }
 0x4db   : > { %vm17619_vm14 = vcmp.lt.s32.totalorder %v17250_v52, 4  ;;  %v3665_v43 = vmul.f32 %v17600_v55, %v3633_v61  ;;  %vm5966_vm8 = vcmp.eq.s32.totalorder %v14547_v22, 1  ;;  %v5225_v30 = vsel %vm14764_vm13, %v17313_v42, %v14077_v38 }
 0x4dc   : > { %vm14797_vm7 = vmand %vm17619_vm14, %vm17618_vm10  ;;  %vm5516_vm6 = vcmp.eq.s32.totalorder %v14615_v14, 1  ;;  %v14812_v58 = vmul.f32 %v4203_v16, %v17622_v27  ;;  %vm17623_vm10 = vcmp.eq.s32.totalorder %v17580_v10, 1  ;;  %v4109_v49 = vsub.f32 0.0, %v4045_v7 }
 0x4dd   : > { %vm14818_vm14 = vmand %vm17455_vm2, %vm17623_vm10  ;;  %vm17626_vm12 = vcmask 1041408   ;;  %v17627_v38 = vrot.slane %v17313_v42, 7  ;;  %v17629_v14 = vrot.slane %v17628_v23, 7  ;;  %vm17630_vm13 = vcmask 1040384  }
 0x4de   : > { %v6043_v61 = vsel %vm17626_vm12, %v6040_v62, %v6042_v41  ;;  %v3697_v1 = vadd.f32 1.4214138, %v3665_v43  ;;  %vm5548_vm10 = vmand %vm12484_vm15, %vm5516_vm6  ;;  %v16131_v27 = vrot.slane %v17628_v23, 6  ;;  %v17631_v62 = vld [vmem:[#allocation132_spill] sm:$0xff]  ;;  %v4643_v6 = vrot.slane %v14812_v58, 2 }
 0x4df   : > { %v5596_v12 = vsel %vm17630_vm13, %v17629_v14, %v17627_v38  ;;  %v6125_v16 = vsel %vm14788_vm3, %v6043_v61, %v5674_v19  ;;  %v5092_v34 = vrot.slane %v14812_v58, 1  ;;  %vm14843_vm3 = vmand %vm17455_vm2, %vm5006_vm0  ;;  %v16132_v50 = vrot.slane %v14812_v58, 7  ;;  %v17635_v61 = vld [vmem:[#allocation87_spill] sm:$0xff]  ;;  %v14949_v19 = vpop.permute.xlu1 %5910 }
 0x4e0   : > { %v4141_v43 = vsel %vm4077_vm4, %v4109_v49, %v4045_v7  ;;  %vm17634_vm6 = vcmask 162816   ;;  %vm17636_vm13 = vcmp.eq.s32.totalorder %v17635_v61, 1  ;;  %v17637_v38 = vmov 0  ;;  %vm14864_vm0 = vmand %vm14039_vm9, %vm5966_vm8 }
 0x4e1   : > { %6959 = vmatprep.mubr.msk.f32.mxu1 %vm17634_vm6, %v6125_v16  ;;  %vm14855_vm12 = vmand %vm17501_vm5, %vm17636_vm13  ;;  %v4205_v11 = vadd.f32 1.0, %v4141_v43  ;;  %v3729_v14 = vmul.f32 %v17600_v55, %v3697_v1  ;;  %v14868_v7 = vsel %vm5548_vm10, %v5596_v12, %v5225_v30  ;;  %vm17641_vm4 = vcmask 1041408  }
 0x4e2   : > { %v17638_v38 = vsel %vm14855_vm12, 4294967295, %v17637_v38  ;;  %v6045_v49 = vsel %vm17641_vm4, %v6042_v41, %v16131_v27  ;;  %vm17642_vm6 = vcmp.eq.s32.totalorder %v17595_v51, 1  ;;  %vm17643_vm13 = vcmp.lt.s32.totalorder %v17250_v52, 4 }
 0x4e3   : > { %vm4555_vm11 = vmand %vm17643_vm13, %vm17642_vm6  ;;  %v17644_v1 = vrot.slane %v17488_v0, 2  ;;  %vm17645_vm12 = vcmask 1045504   ;;  %v17646_v16 = vrot.slane %v17488_v0, 1  ;;  %vm17647_vm8 = vcmask 1046528  }
 0x4e4   : > { %v17648_v30 = vrot.slane %v17549_v47, 2  ;;  %vm17649_vm10 = vmmov %vm17645_vm12  ;;  %v17650_v61 = vrot.slane %v17549_v47, 1  ;;  %vm17654_vm6 = vcmp.eq.s32.totalorder %v17597_v37, 1  ;;  %v5619_v56 = vrot.slane %v14550_v20, 7 }
 0x4e5   : > { %v4644_v22 = vsel %vm17645_vm12, %v17644_v1, %v4643_v6  ;;  %v5093_v43 = vsel %vm17647_vm8, %v17646_v16, %v5092_v34  ;;  %vm17651_vm4 = vmmov %vm17647_vm8  ;;  %v17652_v1 = vrot.slane %v17488_v0, 7  ;;  %vm17653_vm12 = vcmask 1040384   ;;  %v17657_v16 = vld [vmem:[#allocation5_spill] sm:$0xff] }
 0x4e6   : > { %v4646_v12 = vsel %vm17649_vm10, %v4643_v6, %v17648_v30  ;;  %v5095_v41 = vsel %vm17651_vm4, %v5092_v34, %v17650_v61  ;;  %v4716_v51 = vsel %vm4555_vm11, %v4644_v22, 0.0  ;;  %vm14900_vm13 = vmand %vm12484_vm15, %vm17654_vm6  ;;  %v14905_v34 = vmul.f32 %v4205_v11, %v17657_v16  ;;  %v14907_v22 = vpop.permute.xlu0 %4981 }
 0x4e7   : > { %v4717_v27 = vsel %vm14797_vm7, %v4646_v12, 0.0  ;;  %v5610_v10 = vsel %vm17653_vm12, %v17652_v1, %v16132_v50  ;;  %vm17659_vm11 = vcmp.eq.s32.totalorder %v17658_v57, 1  ;;  %vm17662_vm8 = vcmp.eq.s32.totalorder %v17598_v36, 1  ;;  %v17666_v1 = vld [vmem:[#allocation125_spill] sm:$0xff] }
 0x4e8   : > { %vm14913_vm7 = vmand %vm17501_vm5, %vm17659_vm11  ;;  %vm17663_vm10 = vcmp.lt.s32.totalorder %v17250_v52, 4  ;;  %v14927_v11 = vsel %vm14818_vm14, %v5093_v43, %v4716_v51  ;;  %v5166_v12 = vsel %vm14843_vm3, %v5095_v41, %v4717_v27  ;;  %v3761_v61 = vadd.f32 -0.28449672, %v3729_v14 }
 0x4e9   : > { %vm14921_vm4 = vmand %vm17663_vm10, %vm17662_vm8  ;;  %v6126_v16 = vsel %vm14864_vm0, %v6045_v49, %v17666_v1  ;;  %v5232_v36 = vsel %vm14778_vm1, %v14812_v58, %v5166_v12  ;;  %v4647_v57 = vrot.slane %v14905_v34, 2  ;;  %v5096_v50 = vrot.slane %v14905_v34, 1  ;;  %v17674_v49 = vld [vmem:[#allocation96_spill] sm:$0xff] }
 0x4ea   : > { %vm17667_vm12 = vcmp.eq.s32.totalorder %v14104_v35, 1  ;;  %v5613_v27 = vrot.slane %v14905_v34, 7  ;;  %vm17670_vm3 = vcmask 162816   ;;  %v14953_v40 = vsel %vm14900_vm13, %v5610_v10, %v5232_v36 }
 0x4eb   : > { %vm14943_vm14 = vmand %vm17455_vm2, %vm17667_vm12  ;;  %6960 = vmatmul.mubr.msk.f32.gmra.mrb[14].mxu1 %vm17670_vm3, %v6126_v16  ;;  %vm17671_vm1 = vcmp.eq.s32.totalorder %v14194_v32, 1  ;;  %v3793_v14 = vmul.f32 %v17600_v55, %v3761_v61  ;;  %vm17675_vm11 = vcmp.eq.s32.totalorder %v17674_v49, 1  ;;  %vm17678_vm8 = vcmp.eq.s32.totalorder %v17615_v25, 1 }
 0x4ec   : > { %vm14959_vm0 = vmand %vm17455_vm2, %vm17671_vm1  ;;  %v17679_v32 = vrot.slane %v17549_v47, 2  ;;  %vm17680_vm3 = vcmask 1045504   ;;  %v17681_v41 = vrot.slane %v17549_v47, 1  ;;  %vm17682_vm1 = vcmask 1046528  }
 0x4ed   : > { %vm14970_vm13 = vmand %vm17501_vm5, %vm17675_vm11  ;;  %v17683_v6 = vrot.slane %v14494_v46, 2  ;;  %v17685_v61 = vrot.slane %v14494_v46, 1  ;;  %v17687_v36 = vrot.slane %v17549_v47, 7  ;;  %v17698_v54 = vmov 0 }
 0x4ee   : > { %vm4557_vm12 = vmand %vm17663_vm10, %vm17678_vm8  ;;  %v4648_v43 = vsel %vm17680_vm3, %v17679_v32, %v4647_v57  ;;  %v5097_v51 = vsel %vm17682_vm1, %v17681_v41, %v5096_v50  ;;  %vm17688_vm8 = vcmask 1040384   ;;  %vm17689_vm10 = vcmp.eq.s32.totalorder %v14282_v63, 1 }
 0x4ef   : > { %vm17684_vm6 = vmmov %vm17680_vm3  ;;  %v4718_v25 = vsel %vm4557_vm12, %v4648_v43, 0.0  ;;  %v5614_v49 = vsel %vm17688_vm8, %v17687_v36, %v5613_v27  ;;  %v3825_v32 = vadd.f32 0.2548296, %v3793_v14  ;;  %v5108_v41 = vrot.slane %v14063_v39, 1  ;;  %v5499_v14 = vpop.permute.xlu0 %5498 }
 0x4f0   : > { %v4650_v12 = vsel %vm17684_vm6, %v4647_v57, %v17683_v6  ;;  %vm17686_vm11 = vmmov %vm17682_vm1  ;;  %v15008_v37 = vsel %vm14943_vm14, %v5097_v51, %v4718_v25  ;;  %vm5013_vm1 = vcmp.eq.s32.totalorder %v14809_v8, 1  ;;  %v17696_v6 = vld [vmem:[#allocation105_spill] sm:$0xff]  ;;  %v6046_v8 = vrot.slane %v17313_v42, 6  ;;  %v17701_v51 = vld [vmem:[#allocation35_spill] sm:$0xff]  ;;  %v5914_v25 = vpop.permute.xlu1 %5913 }
 0x4f1   : > { %v5099_v1 = vsel %vm17686_vm11, %v5096_v50, %v17685_v61  ;;  %v4719_v16 = vsel %vm14921_vm4, %v4650_v12, 0.0  ;;  %vm15001_vm3 = vmand %vm12484_vm15, %vm17689_vm10  ;;  %v17692_v50 = vld [vmem:[#allocation3_spill] sm:$0xff]  ;;  %vm17693_vm4 = vcmp.eq.s32.totalorder %v14688_v2, 1  ;;  %vm17697_vm11 = vcmp.eq.s32.totalorder %v17696_v6, 1 }
 0x4f2   : > { %v5168_v43 = vsel %vm14959_vm0, %v5099_v1, %v4719_v16  ;;  %vm15016_vm12 = vmand %vm14039_vm9, %vm17693_vm4  ;;  %vm17700_vm0 = vnez %v17638_v38  ;;  %v3857_v35 = vmul.f32 %v17600_v55, %v3825_v32  ;;  %vm5968_vm10 = vcmp.eq.s32.totalorder %v14748_v24, 1  ;;  %v17711_v16 = vld [vmem:[#allocation45_spill] sm:$0xff]  ;;  %v17721_v24 = vld [vmem:[#allocation134_spill] sm:$0xff] }
 0x4f3   : > { %vm15026_vm14 = vmand %vm17501_vm5, %vm17697_vm11  ;;  %v5234_v2 = vsel %vm17700_vm0, %v14905_v34, %v5168_v43  ;;  %vm17702_vm11 = vcmp.eq.s32.totalorder %v17631_v62, 1  ;;  %vm17703_vm6 = vcmp.lt.s32.totalorder %v17250_v52, 4  ;;  %v17706_v38 = vrot.slane %v14051_v26, 1  ;;  %v5950_v12 = vpop.permute.xlu0 %5949 }
 0x4f4   : > { %v17699_v54 = vsel %vm15026_vm14, 4294967295, %v17698_v54  ;;  %vm5045_vm8 = vmand %vm17455_vm2, %vm5013_vm1  ;;  %v15049_v55 = vsel %vm15001_vm3, %v5614_v49, %v5234_v2  ;;  %vm17707_vm1 = vcmask 1046528   ;;  %v17708_v42 = vrot.slane %v14063_v39, 2 }
 0x4f5   : > { %vm15043_vm14 = vmand %vm17703_vm6, %vm17702_vm11  ;;  %v5109_v61 = vsel %vm17707_vm1, %v17706_v38, %v5108_v41  ;;  %vm17709_vm0 = vcmask 1045504   ;;  %vm17712_vm6 = vcmp.eq.s32.totalorder %v17711_v16, 1  ;;  %v4017_v49 = vmul.f32 %v14623_v45, %v3857_v35  ;;  %v17732_v16 = vld [vmem:[#allocation23_spill] sm:$0xff] }
 0x4f6   : > { %v4693_v1 = vsel %vm17709_vm0, %v17708_v42, 0.0  ;;  %vm17710_vm4 = vmmov %vm17707_vm1  ;;  %vm17715_vm1 = vnez %v17522_v3  ;;  %v17717_v43 = vrot.slane %v17628_v23, 6  ;;  %v5227_v3 = vsel %vm14913_vm7, %v17367_v17, %v14253_v29 }
 0x4f7   : > { %v5142_v62 = vsel %vm17710_vm4, %v5108_v41, 0.0  ;;  %vm15062_vm11 = vmand %vm17501_vm5, %vm17712_vm6  ;;  %v17716_v57 = vsel %vm17715_vm1, %v14134_v9, 0.0  ;;  %vm17718_vm4 = vcmask 1041408   ;;  %v4725_v6 = vsel %vm15043_vm14, %v4693_v1, 0.0 }
 0x4f8   : > { %v15072_v32 = vsel %vm5045_vm8, %v5109_v61, %v17716_v57  ;;  %v6047_v41 = vsel %vm17718_vm4, %v17717_v43, %v6046_v8  ;;  %vm15084_vm6 = vmand %vm14039_vm9, %vm5968_vm10  ;;  %vm5014_vm8 = vcmp.eq.s32.totalorder %v14907_v22, 1  ;;  %vm5518_vm14 = vcmp.eq.s32.totalorder %v14834_v33, 1  ;;  %v5466_v43 = vpop.permute.xlu1 %5465 }
 0x4f9   : > { %v6127_v9 = vsel %vm15016_vm12, %v6047_v41, %v14868_v7  ;;  %v4049_v23 = vsub.f32 1.0, %v4017_v49  ;;  %vm17722_vm10 = vcmask 162816   ;;  %vm5046_vm4 = vmand %vm17455_vm2, %vm5014_vm8  ;;  %v17723_v63 = vrot.slane %v17367_v17, 7  ;;  %v17724_v7 = vld [vmem:[#allocation84_spill] sm:$0xff] }
 0x4fa   : > { %6962 = vmatprep.mubr.msk.f32.mxu1 %vm17722_vm10, %v6127_v9  ;;  %v17725_v2 = vrot.slane %v17724_v7, 7  ;;  %vm17726_vm12 = vcmask 1040384   ;;  %v6048_v35 = vrot.slane %v17724_v7, 6  ;;  %v5623_v29 = vrot.slane %v14051_v26, 7  ;;  %vm5550_vm1 = vmand %vm12484_vm15, %vm5518_vm14  ;;  %v17738_v9 = vld [vmem:[#allocation94_spill] sm:$0xff] }
 0x4fb   : > { %v5174_v33 = vsel %vm5046_vm4, %v5142_v62, %v4725_v6  ;;  %v5625_v30 = vrot.slane %v14063_v39, 7  ;;  %vm5531_vm10 = vcmp.eq.s32.totalorder %v5499_v14, 1  ;;  %vm5969_vm8 = vcmp.eq.s32.totalorder %v14949_v19, 1  ;;  %v17728_v62 = vld [vmem:[#allocation107_spill] sm:$0xff] }
 0x4fc   : > { %v5600_v22 = vsel %vm17726_vm12, %v17725_v2, %v17723_v63  ;;  %v4113_v38 = vsub.f32 0.0, %v4049_v23  ;;  %vm17727_vm0 = vcmask 1041408   ;;  %v5240_v1 = vsel %vm14970_vm13, %v14063_v39, %v5174_v33  ;;  %vm5563_vm4 = vmand %vm12484_vm15, %vm5531_vm10 }
 0x4fd   : > { %v5678_v61 = vsel %vm5550_vm1, %v5600_v22, %v5227_v3  ;;  %v6049_v42 = vsel %vm17727_vm0, %v6046_v8, %v6048_v35  ;;  %vm17729_vm12 = vcmp.eq.s32.totalorder %v17728_v62, 1  ;;  %vm17733_vm0 = vcmask 1040384  }
 0x4fe   : > { %vm15123_vm14 = vmand %vm17501_vm5, %vm17729_vm12  ;;  %v6128_v49 = vsel %vm15084_vm6, %v6049_v42, %v17732_v16  ;;  %v5626_v10 = vsel %vm17733_vm0, %v5623_v29, %v5625_v30  ;;  %v6074_v8 = vrot.slane %v14051_v26, 6  ;;  %v6076_v57 = vrot.slane %v14063_v39, 6 }
 0x4ff   : > { %vm17734_vm13 = vcmp.lt.f32.partialorder %v17692_v50, 0.0  ;;  %vm17735_vm1 = vcmask 162816   ;;  %v15138_v6 = vsel %vm5563_vm4, %v5626_v10, %v5240_v1  ;;  %vm15144_vm6 = vmand %vm14039_vm9, %vm5969_vm8  ;;  %vm5982_vm10 = vcmp.eq.s32.totalorder %v5950_v12, 1 }
 0x500   : > { %v4145_v41 = vsel %vm17734_vm13, %v4113_v38, %v4049_v23  ;;  %6963 = vmatmul.mubr.msk.f32.gmra.mrb[16].mxu1 %vm17735_vm1, %v6128_v49  ;;  %vm5970_vm12 = vcmp.eq.s32.totalorder %v5914_v25, 1  ;;  %vm17739_vm0 = vcmp.eq.s32.totalorder %v17738_v9, 1  ;;  %vm17742_vm4 = vcmask 1041408   ;;  %vm15163_vm8 = vmand %vm14039_vm9, %vm5982_vm10 }
 0x501   : > { %vm15152_vm7 = vmand %vm17501_vm5, %vm17739_vm0  ;;  %v4209_v50 = vadd.f32 1.0, %v4145_v41  ;;  %v15159_v19 = vsel %vm17742_vm4, %v6074_v8, %v6076_v57  ;;  %v6050_v25 = vrot.slane %v17367_v17, 6  ;;  %vm17745_vm13 = vnez %v17699_v54  ;;  %v17751_v54 = vld [vmem:[#allocation137_spill] sm:$0xff] }
 0x502   : > { %v5229_v23 = vsel %vm17745_vm13, %v17432_v53, %v14390_v15  ;;  %v6142_v63 = vsel %vm15163_vm8, %v15159_v19, %v15138_v6  ;;  %vm15178_vm1 = vmand %vm14039_vm9, %vm5970_vm12  ;;  %vm5520_vm10 = vcmp.eq.s32.totalorder %v5466_v43, 1  ;;  %v17748_v2 = vrot.slane %v17432_v53, 7  ;;  %v7271_v19 = vld [vmem:[%s7384_s18 + $0x8] sm:$0xff] }
 0x503   : > { %v17749_v17 = vrot.slane %v17416_v59, 7  ;;  %vm17750_vm0 = vcmask 1040384   ;;  %v6052_v15 = vrot.slane %v17416_v59, 6  ;;  %v15189_v33 = vmul.f32 %v4209_v50, %v17751_v54  ;;  %vm5552_vm12 = vmand %vm12484_vm15, %vm5520_vm10 }
 0x504   : > { %v6051_v30 = vsel %vm17742_vm4, %v6048_v35, %v6050_v25  ;;  %v6054_v12 = vrot.slane %v17432_v53, 6  ;;  %v5231_v38 = vsel %vm15062_vm11, %v17488_v0, %v14927_v11  ;;  %vm17752_vm13 = vcmp.eq.s32.totalorder %v17701_v51, 1  ;;  %vm17756_vm10 = vmmov %vm17742_vm4 }
 0x505   : > { %v5604_v22 = vsel %vm17750_vm0, %v17749_v17, %v17748_v2  ;;  %vm17753_vm0 = vcmp.lt.s32.totalorder %v17250_v52, 4  ;;  %v6129_v35 = vsel %vm15144_vm6, %v6051_v30, %v5678_v61  ;;  %v6053_v1 = vsel %vm17756_vm10, %v6050_v25, %v6052_v15 }
 0x506   : > { %vm15203_vm3 = vmand %vm17753_vm0, %vm17752_vm13  ;;  %v5680_v42 = vsel %vm5552_vm12, %v5604_v22, %v5229_v23  ;;  %v17757_v53 = vrot.slane %v17488_v0, 7  ;;  %v17758_v62 = vrot.slane %v17474_v18, 7  ;;  %vm17759_vm4 = vcmask 1040384   ;;  %v17782_v22 = vld [vmem:[#allocation109_spill] sm:$0xff] }
 0x507   : > { %v4655_v51 = vrot.slane %v15189_v33, 2  ;;  %v5104_v49 = vrot.slane %v15189_v33, 1  ;;  %vm17760_vm13 = vcmp.eq.s32.totalorder %v14590_v4, 1  ;;  %v5621_v10 = vrot.slane %v15189_v33, 7 }
 0x508   : > { %v15215_v16 = vsel %vm17759_vm4, %v17758_v62, %v17757_v53  ;;  %vm15223_vm0 = vmand %vm17455_vm2, %vm17760_vm13  ;;  %vm17763_vm6 = vcmask 162816   ;;  %v6130_v57 = vsel %vm15178_vm1, %v6053_v1, %v14364_v48  ;;  %vm17764_vm12 = vcmp.eq.s32.totalorder %v14656_v5, 1 }
 0x509   : > { %6965 = vmatprep.mubr.msk.f32.mxu1 %vm17763_vm6, %v6129_v35  ;;  %vm15236_vm10 = vmand %vm17455_vm2, %vm17764_vm12  ;;  %vm17768_vm13 = vcmask 1041408   ;;  %v6056_v41 = vrot.slane %v17474_v18, 6  ;;  %v6058_v45 = vrot.slane %v17488_v0, 6  ;;  %v5233_v48 = vsel %vm15123_vm14, %v17549_v47, %v15008_v37 }
 0x50a   : > { %vm17767_vm4 = vmmov %vm17763_vm6  ;;  %v6055_v43 = vsel %vm17768_vm13, %v6052_v15, %v6054_v12  ;;  %vm17769_vm1 = vcmp.eq.s32.totalorder %v17721_v24, 1  ;;  %vm17770_vm2 = vcmp.lt.s32.totalorder %v17250_v52, 4  ;;  %vm17772_vm12 = vcmask 1045504  }
 0x50b   : > { %6966 = vmatmul.mubr.msk.f32.gmra.mrb[18].mxu1 %vm17767_vm4, %v6130_v57  ;;  %vm4561_vm6 = vmand %vm17770_vm2, %vm17769_vm1  ;;  %v4656_v5 = vsel %vm17772_vm12, %v17771_v21, %v4655_v51  ;;  %v17773_v9 = vrot.slane %v14550_v20, 1  ;;  %vm17774_vm4 = vcmask 1046528   ;;  %v17775_v50 = vrot.slane %v14051_v26, 2 }
 0x50c   : > { %vm17776_vm13 = vmmov %vm17772_vm12  ;;  %v17777_v23 = vrot.slane %v14051_v26, 1  ;;  %v4722_v24 = vsel %vm4561_vm6, %v4656_v5, 0.0  ;;  %vm17779_vm1 = vcmask 1040384   ;;  %vm17780_vm2 = vcmp.eq.s32.totalorder %v14736_v13, 1 }
 0x50d   : > { %v5105_v18 = vsel %vm17774_vm4, %v17773_v9, %v5104_v49  ;;  %v4658_v25 = vsel %vm17776_vm13, %v4655_v51, %v17775_v50  ;;  %vm17778_vm8 = vmmov %vm17774_vm4  ;;  %v5622_v2 = vsel %vm17779_vm1, %v5619_v56, %v5621_v10  ;;  %vm17781_vm4 = vcmask 1041408  }
 0x50e   : > { %v5107_v7 = vsel %vm17778_vm8, %v5104_v49, %v17777_v23  ;;  %v4723_v52 = vsel %vm15203_vm3, %v4658_v25, 0.0  ;;  %vm5561_vm12 = vmand %vm12484_vm15, %vm17780_vm2  ;;  %v6057_v17 = vsel %vm17781_vm4, %v6054_v12, %v6056_v41  ;;  %vm17783_vm13 = vcmp.eq.s32.totalorder %v17782_v22, 1  ;;  %v17790_v49 = vld [vmem:[#allocation111_spill] sm:$0xff] }
 0x50f   : > { %vm15278_vm8 = vmand %vm17501_vm5, %vm17783_vm13  ;;  %v15284_v54 = vsel %vm15223_vm0, %v5105_v18, %v4722_v24  ;;  %v5172_v13 = vsel %vm15236_vm10, %v5107_v7, %v4723_v52  ;;  %v17787_v59 = vrot.slane %v17549_v47, 7  ;;  %v17788_v12 = vrot.slane %v14812_v58, 7  ;;  %v17798_v18 = vld [vmem:[#allocation32_spill] sm:$0xff] }
 0x510   : > { %vm17786_vm3 = vmmov %vm17781_vm4  ;;  %v5238_v1 = vsel %vm15152_vm7, %v15189_v33, %v5172_v13  ;;  %v6060_v53 = vrot.slane %v14812_v58, 6  ;;  %v6062_v62 = vrot.slane %v17549_v47, 6  ;;  %v5235_v51 = vsel %vm15278_vm8, %v14494_v46, %v14684_v44 }
 0x511   : > { %v6059_v30 = vsel %vm17786_vm3, %v6056_v41, %v6058_v45  ;;  %vm17789_vm6 = vmmov %vm17779_vm1  ;;  %vm17791_vm0 = vcmp.eq.s32.totalorder %v17790_v49, 1  ;;  %v15311_v57 = vsel %vm5561_vm12, %v5622_v2, %v5238_v1  ;;  %v17794_v39 = vrot.slane %v14494_v46, 7 }
 0x512   : > { %v5612_v35 = vsel %vm17789_vm6, %v17788_v12, %v17787_v59  ;;  %vm15307_vm10 = vmand %vm17501_vm5, %vm17791_vm0  ;;  %v6064_v4 = vrot.slane %v14905_v34, 6  ;;  %v6066_v41 = vrot.slane %v14494_v46, 6  ;;  %v17799_v50 = vrot.slane %v17798_v18, 7  ;;  %v5917_v12 = vpop.permute.xlu1 %5916 }
 0x513   : > { %vm17795_vm7 = vmmov %vm17779_vm1  ;;  %v5237_v9 = vsel %vm15307_vm10, %v14550_v20, %v15284_v54  ;;  %v6068_v7 = vrot.slane %v17798_v18, 6  ;;  %v6070_v24 = vrot.slane %v14550_v20, 6  ;;  %v6072_v52 = vrot.slane %v15189_v33, 6 }
 0x514   : > { %v5616_v58 = vsel %vm17795_vm7, %v5613_v27, %v17794_v39  ;;  %vm17796_vm1 = vmmov %vm17786_vm3  ;;  %v17801_v27 = vld [vmem:[#allocation114_spill] sm:$0xff] }
 0x515   : > { %v6061_v21 = vsel %vm17796_vm1, %v6058_v45, %v6060_v53  ;;  %vm17797_vm2 = vmmov %vm17796_vm1  ;;  %vm17802_vm4 = vcmp.eq.s32.totalorder %v17801_v27, 1  ;;  %v15360_v13 = vsel %vm17796_vm1, %v6070_v24, %v6072_v52 }
 0x516   : > { %v6063_v5 = vsel %vm17797_vm2, %v6060_v53, %v6062_v62  ;;  %vm17800_vm12 = vmmov %vm17789_vm6  ;;  %v5920_v33 = vpop.permute.xlu1 %5919 }
 0x517   : > { %v15331_v25 = vsel %vm17800_vm12, %v17799_v50, %v5619_v56  ;;  %vm15337_vm13 = vmand %vm17501_vm5, %vm17802_vm4  ;;  %vm5971_vm12 = vcmp.eq.s32.totalorder %v5917_v12, 1  ;;  %v7274_v50 = vld [vmem:[%s7384_s18 + $0x10] sm:$0xff] }
 0x518   : > { %vm17805_vm3 = vmmov %vm17796_vm1  ;;  %v5239_v56 = vsel %vm15337_vm13, %v14051_v26, %v15072_v32 }
 0x519   : > { %v6065_v45 = vsel %vm17805_vm3, %v6062_v62, %v6064_v4  ;;  %vm17806_vm6 = vmmov %vm17796_vm1  ;;  %vm17811_vm3 = vcmask 162816  }
 0x51a   : > { %v6067_v23 = vsel %vm17806_vm6, %v6064_v4, %v6066_v41  ;;  %vm17807_vm0 = vmmov %vm17795_vm7  ;;  %vm5972_vm6 = vcmp.eq.s32.totalorder %v5920_v33, 1  ;;  %v5472_v53 = vpop.permute.xlu1 %5471 }
 0x51b   : > { %v15352_v28 = vsel %vm17807_vm0, %v5621_v10, %v5623_v29  ;;  %vm17808_vm5 = vmmov %vm17796_vm1  ;;  %v17812_v10 = vld [vmem:[#allocation124_spill] sm:$0xff] }
 0x51c   : > { %v6069_v2 = vsel %vm17808_vm5, %v6066_v41, %v6068_v7  ;;  %vm17809_vm7 = vmmov %vm17796_vm1 }
 0x51d   : > { %v15357_v22 = vsel %vm17809_vm7, %v6068_v7, %v6070_v24  ;;  %vm17810_vm2 = vmmov %vm17796_vm1  ;;  %vm5522_vm7 = vcmp.eq.s32.totalorder %v5472_v53, 1  ;;  %v7275_v7 = vld [vmem:[%s7384_s18 + $0x28] sm:$0xff] }
 0x51e   : > { %v15365_v59 = vsel %vm17810_vm2, %v6072_v52, %v6074_v8  ;;  %vm6003_vm4 = vmand %vm14039_vm9, %vm5971_vm12 }
 0x51f   : > { %v6131_v29 = vsel %vm6003_vm4, %v6055_v43, %v5680_v42  ;;  %vm6004_vm0 = vmand %vm14039_vm9, %vm5972_vm6  ;;  %v5923_v42 = vpop.permute.xlu1 %5922 }
 0x520   : > { %6968 = vmatprep.mubr.msk.f32.mxu1 %vm17811_vm3, %v6131_v29  ;;  %v6132_v1 = vsel %vm6004_vm0, %v6057_v17, %v17812_v10  ;;  %vm17813_vm5 = vmmov %vm17811_vm3  ;;  %vm5973_vm2 = vcmp.eq.s32.totalorder %v5923_v42, 1  ;;  %v7278_v29 = vld [vmem:[%s7384_s18 + $0x30] sm:$0xff]  ;;  %v7279_v42 = vld [vmem:[%s7384_s18 + $0x48] sm:$0xff] }
 0x521   : > { %6969 = vmatmul.mubr.msk.f32.gmra.mrb[20].mxu1 %vm17813_vm5, %v6132_v1  ;;  %vm5554_vm1 = vmand %vm12484_vm15, %vm5522_vm7 }
 0x522   : > { %v5682_v8 = vsel %vm5554_vm1, %v15215_v16, %v5231_v38  ;;  %vm6005_vm12 = vmand %vm14039_vm9, %vm5973_vm2 }
 0x523   : > { %v6133_v43 = vsel %vm6005_vm12, %v6059_v30, %v5682_v8  ;;  %vm17814_vm4 = vmmov %vm17811_vm3  ;;  %v5926_v17 = vpop.permute.xlu1 %5925  ;;  %v17819_v30 = vld [vmem:[#allocation110_spill] sm:$0xff] }
 0x524   : > { %6971 = vmatprep.mubr.msk.f32.mxu1 %vm17814_vm4, %v6133_v43  ;;  %vm5974_vm3 = vcmp.eq.s32.totalorder %v5926_v17, 1  ;;  %vm17815_vm0 = vmmov %vm17814_vm4  ;;  %v7280_v17 = vld [vmem:[%s7384_s18 + $0x40] sm:$0xff] }
 0x525   : > { %vm6006_vm6 = vmand %vm14039_vm9, %vm5974_vm3 }
 0x526   : > { %v6134_v36 = vsel %vm6006_vm6, %v6061_v21, %v14953_v40  ;;  %vm17816_vm2 = vmmov %vm17815_vm0 }
 0x527   : > { %v5478_v62 = vpop.permute.xlu1 %5477  ;;  %6972 = vmatmul.mubr.msk.f32.gmra.mrb[22].mxu1 %vm17815_vm0, %v6134_v36  ;;  %vm17817_vm3 = vmmov %vm17815_vm0 }
 0x528   : > { %vm5524_vm11 = vcmp.eq.s32.totalorder %v5478_v62, 1  ;;  %vm17821_vm10 = vmmov %vm17816_vm2 }
 0x529   : > { %vm5556_vm5 = vmand %vm12484_vm15, %vm5524_vm11 }
 0x52a   : > { %v5684_v0 = vsel %vm5556_vm5, %v5612_v35, %v5233_v48  ;;  %vm17818_vm5 = vmmov %vm17816_vm2 }
 0x52b   : > { %v5929_v11 = vpop.permute.xlu1 %5928 }
 0x52c   : > { %vm5975_vm7 = vcmp.eq.s32.totalorder %v5929_v11, 1 }
 0x52d   : > { %vm6007_vm1 = vmand %vm14039_vm9, %vm5975_vm7 }
 0x52e   : > { %v6135_v38 = vsel %vm6007_vm1, %v6063_v5, %v5684_v0 }
 0x52f   : > { %v5932_v40 = vpop.permute.xlu1 %5931  ;;  %6974 = vmatprep.mubr.msk.f32.mxu1 %vm17816_vm2, %v6135_v38 }
 0x530   : > { %vm5976_vm12 = vcmp.eq.s32.totalorder %v5932_v40, 1  ;;  %v7281_v40 = vld [vmem:[%s7384_s18 + $0x58] sm:$0xff] }
 0x531   : > { %vm6008_vm4 = vmand %vm14039_vm9, %vm5976_vm12 }
 0x532   : > { %v6136_v16 = vsel %vm6008_vm4, %v6065_v45, %v15049_v55 }
 0x533   : > { %v5484_v14 = vpop.permute.xlu1 %5483  ;;  %6975 = vmatmul.mubr.msk.f32.gmra.mrb[24].mxu1 %vm17817_vm3, %v6136_v16 }
 0x534   : > { %vm5526_vm14 = vcmp.eq.s32.totalorder %v5484_v14, 1  ;;  %v7282_v14 = vld [vmem:[%s7384_s18 + $0x50] sm:$0xff] }
 0x535   : > { %vm5558_vm6 = vmand %vm12484_vm15, %vm5526_vm14 }
 0x536   : > { %v5686_v47 = vsel %vm5558_vm6, %v5616_v58, %v5235_v51  ;;  %vm17820_vm14 = vmmov %vm17816_vm2 }
 0x537   : > { %v5935_v37 = vpop.permute.xlu1 %5934 }
 0x538   : > { %vm5977_vm0 = vcmp.eq.s32.totalorder %v5935_v37, 1 }
 0x539   : > { %vm6009_vm11 = vmand %vm14039_vm9, %vm5977_vm0 }
 0x53a   : > { %v6137_v48 = vsel %vm6009_vm11, %v6067_v23, %v5686_v47 }
 0x53b   : > { %6977 = vmatprep.mubr.msk.f32.mxu1 %vm17818_vm5, %v6137_v48  ;;  %v5938_v55 = vpop.permute.xlu1 %5937 }
 0x53c   : > { %vm5978_vm7 = vcmp.eq.s32.totalorder %v5938_v55, 1 }
 0x53d   : > { %vm6010_vm1 = vmand %vm14039_vm9, %vm5978_vm7 }
 0x53e   : > { %v6138_v35 = vsel %vm6010_vm1, %v6069_v2, %v17819_v30 }
 0x53f   : > { %v5490_v15 = vpop.permute.xlu1 %5489  ;;  %6978 = vmatmul.mubr.msk.f32.gmra.mrb[26].mxu1 %vm17816_vm2, %v6138_v35  ;;  %v7283_v35 = vld [vmem:[%s7384_s18 + $0x68] sm:$0xff] }
 0x540   : > { %vm5528_vm8 = vcmp.eq.s32.totalorder %v5490_v15, 1 }
 0x541   : > { %vm5560_vm12 = vmand %vm12484_vm15, %vm5528_vm8 }
 0x542   : > { %v5688_v46 = vsel %vm5560_vm12, %v15331_v25, %v5237_v9  ;;  %v7273_v9 = vld [vmem:[%s7384_s18 + $0x18] sm:$0xff] }
 0x543   : > { %v5941_v44 = vpop.permute.xlu1 %5940 }
 0x544   : > { %vm5979_vm4 = vcmp.eq.s32.totalorder %v5941_v44, 1 }
 0x545   : > { %vm6011_vm3 = vmand %vm14039_vm9, %vm5979_vm4 }
 0x546   : > { %v6139_v51 = vsel %vm6011_vm3, %v15357_v22, %v5688_v46  ;;  %v7284_v46 = vld [vmem:[%s7384_s18 + $0x60] sm:$0xff] }
 0x547   : > { %v5944_v49 = vpop.permute.xlu1 %5943  ;;  %6980 = vmatprep.mubr.msk.f32.mxu1 %vm17820_vm14, %v6139_v51 }
 0x548   : > { %vm5980_vm6 = vcmp.eq.s32.totalorder %v5944_v49, 1 }
 0x549   : > { %vm6012_vm0 = vmand %vm14039_vm9, %vm5980_vm6 }
 0x54a   : > { %v6140_v61 = vsel %vm6012_vm0, %v15360_v13, %v15311_v57 }
 0x54b   : > { %v5496_v20 = vpop.permute.xlu1 %5495  ;;  %6981 = vmatmul.mubr.msk.f32.gmra.mrb[28].mxu1 %vm17821_vm10, %v6140_v61 }
 0x54c   : > { %vm5530_vm11 = vcmp.eq.s32.totalorder %v5496_v20, 1 }
 0x54d   : > { %vm5562_vm5 = vmand %vm12484_vm15, %vm5530_vm11 }
 0x54e   : > { %v5690_v54 = vsel %vm5562_vm5, %v15352_v28, %v5239_v56  ;;  %vm17823_vm15 = vmmov %vm17816_vm2  ;;  %v7276_v56 = vld [vmem:[%s7384_s18 + $0x20] sm:$0xff] }
 0x54f   : > { %v5947_v39 = vpop.permute.xlu1 %5946 }
 0x550   : > { %vm5981_vm7 = vcmp.eq.s32.totalorder %v5947_v39, 1 }
 0x551   : > { %vm6013_vm1 = vmand %vm14039_vm9, %vm5981_vm7  ;;  %vm17824_vm9 = vcmask 80896  }
 0x552   : > { %v6141_v57 = vsel %vm6013_vm1, %v15365_v59, %v5690_v54  ;;  %vm17825_vm13 = vmmov %vm17824_vm9  ;;  %v7277_v59 = vld [vmem:[%s7384_s18 + $0x38] sm:$0xff] }
 0x553   : > { %6983 = vmatprep.mubr.msk.f32.mxu1 %vm17816_vm2, %v6141_v57  ;;  %vm17826_vm12 = vmmov %vm17824_vm9  ;;  %v7285_v54 = vld [vmem:[%s7384_s18 + $0x78] sm:$0xff]  ;;  %v7286_v57 = vld [vmem:[%s7384_s18 + $0x70] sm:$0xff] }
 0x554   : > { %6984 = vmatmul.mubr.msk.f32.gmra.mrb[30].mxu1 %vm17823_vm15, %v6142_v63  ;;  %v7272_v63 = vld [vmem:[%s7384_s18] sm:$0xff]  ;;  %vm17827_vm4 = vmmov %vm17824_vm9 }
 0x555   : > { %vm17828_vm3 = vmmov %vm17827_vm4 }
 0x556   : > { %vm17829_vm14 = vmmov %vm17828_vm3 }
 0x557   : > { %vm17830_vm6 = vmmov %vm17828_vm3 }
 0x558   : > { %vm17831_vm0 = vmmov %vm17828_vm3 }
 0x559   : > { %vm17832_vm10 = vmmov %vm17831_vm0 }
 0x55a   : > { %vm17833_vm11 = vmmov %vm17831_vm0 }
 0x55b   : > { %vm17834_vm5 = vmmov %vm17831_vm0 }
 0x55c   : > { %vm17835_vm7 = vmmov %vm17831_vm0 }
 0x55d   : > { %vm17836_vm1 = vmmov %vm17831_vm0 }
 0x55e   : > { %vm17837_vm2 = vmmov %vm17831_vm0 }
 0x55f   : > { %vm17838_vm8 = vmmov %vm17831_vm0 }
 0x560   : > { %vm17839_vm15 = vmmov %vm17831_vm0 }
 0x56d   : > { %v6940_v26 = vpop.f32.mrb[0].mxu1 }
 0x56e   : > { %v6326_v31 = vadd.f32 %v6940_v26, %v15455_v60  ;;  %v6320_v32 = vpop.f32.mrb[1].mxu1 }
 0x56f   : > { %v6321_v6 = vadd.f32 %v15455_v60, %v6320_v32 }
 0x570   : > { %v6480_v3 = vadd.f32 %v7271_v19, %v6326_v31 }
 0x571   : > { %v6479_v58 = vadd.f32 %v7272_v63, %v6321_v6 }
 0x572   : > { %6512 = vst.msk [vmem:[%s15463_s27 + $0x8] sm:$0xff] %vm17824_vm9, %v6480_v3  ;;  %v7287_v3 = vld [vmem:[%s7384_s18 + $0x88] sm:$0xff]  ;;  %vm17840_vm9 = vmmov %vm17831_vm0 }
 0x573   : > { %6511 = vst.msk [vmem:[%s15463_s27] sm:$0xff] %vm17825_vm13, %v6479_v58  ;;  %v7288_v58 = vld [vmem:[%s7384_s18 + $0x80] sm:$0xff]  ;;  %vm17841_vm13 = vmmov %vm17831_vm0 }
 0x579   : > { %v6943_v4 = vpop.f32.mrb[2].mxu1 }
 0x57a   : > { %v6336_v41 = vadd.f32 %v6943_v4, %v15455_v60  ;;  %v6330_v21 = vpop.f32.mrb[3].mxu1 }
 0x57b   : > { %v6331_v5 = vadd.f32 %v15455_v60, %v6330_v21 }
 0x57c   : > { %v6482_v18 = vadd.f32 %v7273_v9, %v6336_v41 }
 0x57d   : > { %v6481_v25 = vadd.f32 %v7274_v50, %v6331_v5 }
 0x57e   : > { %6514 = vst.msk [vmem:[%s15463_s27 + $0x18] sm:$0xff] %vm17826_vm12, %v6482_v18  ;;  %v7289_v18 = vld [vmem:[%s7384_s18 + $0x98] sm:$0xff]  ;;  %vm17842_vm12 = vmmov %vm17831_vm0 }
 0x57f   : > { %6513 = vst.msk [vmem:[%s15463_s27 + $0x10] sm:$0xff] %vm17827_vm4, %v6481_v25  ;;  %v7290_v25 = vld [vmem:[%s7384_s18 + $0x90] sm:$0xff]  ;;  %vm17843_vm4 = vmmov %vm17831_vm0 }
 0x585   : > { %v6946_v27 = vpop.f32.mrb[4].mxu1 }
 0x586   : > { %v6346_v34 = vadd.f32 %v6946_v27, %v15455_v60  ;;  %v6340_v45 = vpop.f32.mrb[5].mxu1 }
 0x587   : > { %v6341_v23 = vadd.f32 %v15455_v60, %v6340_v45 }
 0x588   : > { %v6484_v24 = vadd.f32 %v7275_v7, %v6346_v34 }
 0x589   : > { %v6483_v28 = vadd.f32 %v7276_v56, %v6341_v23 }
 0x58a   : > { %6516 = vst.msk [vmem:[%s15463_s27 + $0x28] sm:$0xff] %vm17828_vm3, %v6484_v24  ;;  %v7291_v24 = vld [vmem:[%s7384_s18 + $0xa8] sm:$0xff]  ;;  %vm17844_vm3 = vmmov %vm17831_vm0 }
 0x58b   : > { %6515 = vst.msk [vmem:[%s15463_s27 + $0x20] sm:$0xff] %vm17829_vm14, %v6483_v28  ;;  %v7292_v28 = vld [vmem:[%s7384_s18 + $0xa0] sm:$0xff]  ;;  %vm17845_vm14 = vmmov %vm17831_vm0 }
 0x58f   : > { %v6949_v52 = vpop.f32.mrb[6].mxu1 }
 0x590   : > { %v6356_v2 = vadd.f32 %v6949_v52, %v15455_v60  ;;  %v6350_v22 = vpop.f32.mrb[7].mxu1 }
 0x591   : > { %v6351_v13 = vadd.f32 %v15455_v60, %v6350_v22 }
 0x592   : > { %v6486_v12 = vadd.f32 %v7277_v59, %v6356_v2 }
 0x593   : > { %v6485_v33 = vadd.f32 %v7278_v29, %v6351_v13 }
 0x594   : > { %6518 = vst.msk [vmem:[%s15463_s27 + $0x38] sm:$0xff] %vm17830_vm6, %v6486_v12  ;;  %v7293_v12 = vld [vmem:[%s7384_s18 + $0xb8] sm:$0xff]  ;;  %vm17846_vm6 = vmmov %vm17831_vm0 }
 0x595   : > { %6517 = vst.msk [vmem:[%s15463_s27 + $0x30] sm:$0xff] %vm17831_vm0, %v6485_v33  ;;  %v7294_v33 = vld [vmem:[%s7384_s18 + $0xb0] sm:$0xff] }
 0x597   : > { %v6952_v10 = vpop.f32.mrb[8].mxu1 }
 0x598   : > { %v6366_v1 = vadd.f32 %v6952_v10, %v15455_v60  ;;  %v6360_v53 = vpop.f32.mrb[9].mxu1 }
 0x599   : > { %v6361_v8 = vadd.f32 %v15455_v60, %v6360_v53 }
 0x59a   : > { %v6488_v43 = vadd.f32 %v7279_v42, %v6366_v1 }
 0x59b   : > { %v6487_v36 = vadd.f32 %v7280_v17, %v6361_v8 }
 0x59c   : > { %6520 = vst.msk [vmem:[%s15463_s27 + $0x48] sm:$0xff] %vm17832_vm10, %v6488_v43  ;;  %v7295_v43 = vld [vmem:[%s7384_s18 + $0xc8] sm:$0xff]  ;;  %vm17847_vm10 = vmmov %vm17831_vm0 }
 0x59d   : > { %6519 = vst.msk [vmem:[%s15463_s27 + $0x40] sm:$0xff] %vm17833_vm11, %v6487_v36  ;;  %v7296_v36 = vld [vmem:[%s7384_s18 + $0xc0] sm:$0xff]  ;;  %vm17848_vm11 = vmmov %vm17831_vm0 }
 0x59f   : > { %v6955_v62 = vpop.f32.mrb[10].mxu1 }
 0x5a0   : > { %v6376_v0 = vadd.f32 %v6955_v62, %v15455_v60  ;;  %v6370_v11 = vpop.f32.mrb[11].mxu1 }
 0x5a1   : > { %v6371_v38 = vadd.f32 %v15455_v60, %v6370_v11 }
 0x5a2   : > { %v6490_v16 = vadd.f32 %v7281_v40, %v6376_v0 }
 0x5a3   : > { %v6489_v47 = vadd.f32 %v7282_v14, %v6371_v38 }
 0x5a4   : > { %6522 = vst.msk [vmem:[%s15463_s27 + $0x58] sm:$0xff] %vm17834_vm5, %v6490_v16  ;;  %v7297_v16 = vld [vmem:[%s7384_s18 + $0xd8] sm:$0xff]  ;;  %vm17849_vm5 = vmmov %vm17831_vm0 }
 0x5a5   : > { %6521 = vst.msk [vmem:[%s15463_s27 + $0x50] sm:$0xff] %vm17835_vm7, %v6489_v47  ;;  %v7298_v47 = vld [vmem:[%s7384_s18 + $0xd0] sm:$0xff]  ;;  %vm17850_vm7 = vmmov %vm17831_vm0 }
 0x5ac   : > { %v6958_v37 = vpop.f32.mrb[12].mxu1 }
 0x5ad   : > { %v6386_v48 = vadd.f32 %v6958_v37, %v15455_v60  ;;  %v6380_v55 = vpop.f32.mrb[13].mxu1 }
 0x5ae   : > { %v6381_v30 = vadd.f32 %v15455_v60, %v6380_v55 }
 0x5af   : > { %v6492_v15 = vadd.f32 %v7283_v35, %v6386_v48 }
 0x5b0   : > { %v6491_v44 = vadd.f32 %v7284_v46, %v6381_v30 }
 0x5b1   : > { %6524 = vst.msk [vmem:[%s15463_s27 + $0x68] sm:$0xff] %vm17836_vm1, %v6492_v15  ;;  %v7299_v15 = vld [vmem:[%s7384_s18 + $0xe8] sm:$0xff]  ;;  %vm17851_vm1 = vmmov %vm17831_vm0 }
 0x5b2   : > { %6523 = vst.msk [vmem:[%s15463_s27 + $0x60] sm:$0xff] %vm17837_vm2, %v6491_v44  ;;  %v7300_v44 = vld [vmem:[%s7384_s18 + $0xe0] sm:$0xff]  ;;  %vm17852_vm2 = vmmov %vm17831_vm0 }
 0x5be   : > { %v6961_v51 = vpop.f32.mrb[14].mxu1 }
 0x5bf   : > { %v6396_v49 = vadd.f32 %v6961_v51, %v15455_v60  ;;  %v6390_v61 = vpop.f32.mrb[15].mxu1 }
 0x5c0   : > { %v6391_v20 = vadd.f32 %v15455_v60, %v6390_v61 }
 0x5c1   : > { %v6494_v39 = vadd.f32 %v7285_v54, %v6396_v49 }
 0x5c2   : > { %v6493_v26 = vadd.f32 %v7286_v57, %v6391_v20 }
 0x5c3   : > { %6526 = vst.msk [vmem:[%s15463_s27 + $0x78] sm:$0xff] %vm17838_vm8, %v6494_v39  ;;  %v7301_v39 = vld [vmem:[%s7384_s18 + $0xf8] sm:$0xff]  ;;  %vm17853_vm8 = vmmov %vm17831_vm0 }
 0x5c4   : > { %6525 = vst.msk [vmem:[%s15463_s27 + $0x70] sm:$0xff] %vm17839_vm15, %v6493_v26  ;;  %v7302_v26 = vld [vmem:[%s7384_s18 + $0xf0] sm:$0xff]  ;;  %vm17854_vm15 = vmmov %vm17831_vm0 }
 0x5d3   : > { %v6964_v31 = vpop.f32.mrb[16].mxu1 }
 0x5d4   : > { %v6406_v32 = vadd.f32 %v6964_v31, %v15455_v60  ;;  %v6400_v6 = vpop.f32.mrb[17].mxu1 }
 0x5d5   : > { %v6401_v19 = vadd.f32 %v15455_v60, %v6400_v6 }
 0x5d6   : > { %v6496_v63 = vadd.f32 %v7287_v3, %v6406_v32 }
 0x5d7   : > { %v6495_v4 = vadd.f32 %v7288_v58, %v6401_v19 }
 0x5d8   : > { %6528 = vst.msk [vmem:[%s15463_s27 + $0x88] sm:$0xff] %vm17840_vm9, %v6496_v63 }
 0x5d9   : > { %6527 = vst.msk [vmem:[%s15463_s27 + $0x80] sm:$0xff] %vm17841_vm13, %v6495_v4 }
 0x5de   : > { %v6967_v41 = vpop.f32.mrb[18].mxu1 }
 0x5df   : > { %v6416_v21 = vadd.f32 %v6967_v41, %v15455_v60  ;;  %v6410_v5 = vpop.f32.mrb[19].mxu1 }
 0x5e0   : > { %v6411_v9 = vadd.f32 %v15455_v60, %v6410_v5 }
 0x5e1   : > { %v6498_v50 = vadd.f32 %v7289_v18, %v6416_v21 }
 0x5e2   : > { %v6497_v27 = vadd.f32 %v7290_v25, %v6411_v9 }
 0x5e3   : > { %6530 = vst.msk [vmem:[%s15463_s27 + $0x98] sm:$0xff] %vm17842_vm12, %v6498_v50 }
 0x5e4   : > { %6529 = vst.msk [vmem:[%s15463_s27 + $0x90] sm:$0xff] %vm17843_vm4, %v6497_v27 }
 0x5f4   : > { %v6970_v34 = vpop.f32.mrb[20].mxu1 }
 0x5f5   : > { %v6426_v45 = vadd.f32 %v6970_v34, %v15455_v60  ;;  %v6420_v23 = vpop.f32.mrb[21].mxu1 }
 0x5f6   : > { %v6421_v7 = vadd.f32 %v15455_v60, %v6420_v23 }
 0x5f7   : > { %v6500_v56 = vadd.f32 %v7291_v24, %v6426_v45 }
 0x5f8   : > { %v6499_v52 = vadd.f32 %v7292_v28, %v6421_v7 }
 0x5f9   : > { %6532 = vst.msk [vmem:[%s15463_s27 + $0xa8] sm:$0xff] %vm17844_vm3, %v6500_v56 }
 0x5fa   : > { %6531 = vst.msk [vmem:[%s15463_s27 + $0xa0] sm:$0xff] %vm17845_vm14, %v6499_v52  ;;  %v6973_v2 = vpop.f32.mrb[22].mxu1 }
 0x5fb   : > { %v6436_v22 = vadd.f32 %v6973_v2, %v15455_v60  ;;  %v6430_v13 = vpop.f32.mrb[23].mxu1 }
 0x5fc   : > { %v6431_v59 = vadd.f32 %v15455_v60, %v6430_v13 }
 0x5fd   : > { %v6502_v29 = vadd.f32 %v7293_v12, %v6436_v22 }
 0x5fe   : > { %v6501_v10 = vadd.f32 %v7294_v33, %v6431_v59 }
 0x5ff   : > { %6534 = vst.msk [vmem:[%s15463_s27 + $0xb8] sm:$0xff] %vm17846_vm6, %v6502_v29 }
 0x600   : > { %6533 = vst.msk [vmem:[%s15463_s27 + $0xb0] sm:$0xff] %vm17831_vm0, %v6501_v10 }
 0x606   : > { %v6976_v1 = vpop.f32.mrb[24].mxu1 }
 0x607   : > { %v6446_v53 = vadd.f32 %v6976_v1, %v15455_v60  ;;  %v6440_v8 = vpop.f32.mrb[25].mxu1 }
 0x608   : > { %v6441_v42 = vadd.f32 %v15455_v60, %v6440_v8 }
 0x609   : > { %v6504_v17 = vadd.f32 %v7295_v43, %v6446_v53 }
 0x60a   : > { %v6503_v62 = vadd.f32 %v7296_v36, %v6441_v42 }
 0x60b   : > { %6536 = vst.msk [vmem:[%s15463_s27 + $0xc8] sm:$0xff] %vm17847_vm10, %v6504_v17 }
 0x60c   : > { %6535 = vst.msk [vmem:[%s15463_s27 + $0xc0] sm:$0xff] %vm17848_vm11, %v6503_v62 }
 0x612   : > { %v6979_v0 = vpop.f32.mrb[26].mxu1 }
 0x613   : > { %v6456_v11 = vadd.f32 %v6979_v0, %v15455_v60  ;;  %v6450_v38 = vpop.f32.mrb[27].mxu1 }
 0x614   : > { %v6451_v40 = vadd.f32 %v15455_v60, %v6450_v38 }
 0x615   : > { %v6506_v14 = vadd.f32 %v7297_v16, %v6456_v11 }
 0x616   : > { %v6505_v37 = vadd.f32 %v7298_v47, %v6451_v40 }
 0x617   : > { %6538 = vst.msk [vmem:[%s15463_s27 + $0xd8] sm:$0xff] %vm17849_vm5, %v6506_v14 }
 0x618   : > { %6537 = vst.msk [vmem:[%s15463_s27 + $0xd0] sm:$0xff] %vm17850_vm7, %v6505_v37 }
 0x61e   : > { %v6982_v48 = vpop.f32.mrb[28].mxu1 }
 0x61f   : > { %v6466_v55 = vadd.f32 %v6982_v48, %v15455_v60  ;;  %v6460_v30 = vpop.f32.mrb[29].mxu1 }
 0x620   : > { %v6461_v35 = vadd.f32 %v15455_v60, %v6460_v30 }
 0x621   : > { %v6508_v46 = vadd.f32 %v7299_v15, %v6466_v55 }
 0x622   : > { %v6507_v51 = vadd.f32 %v7300_v44, %v6461_v35 }
 0x623   : > { %6540 = vst.msk [vmem:[%s15463_s27 + $0xe8] sm:$0xff] %vm17851_vm1, %v6508_v46 }
 0x624   : > { %6539 = vst.msk [vmem:[%s15463_s27 + $0xe0] sm:$0xff] %vm17852_vm2, %v6507_v51 }
 0x627   : > { %v6985_v49 = vpop.f32.mrb[30].mxu1 }
 0x628   : > { %v6476_v61 = vadd.f32 %v6985_v49, %v15455_v60  ;;  %v6470_v20 = vpop.f32.mrb[31].mxu1 }
 0x629   : > { %v6471_v54 = vadd.f32 %v15455_v60, %v6470_v20 }
 0x62a   : > { %v6510_v57 = vadd.f32 %v7301_v39, %v6476_v61 }
 0x62b   : > { %v6509_v31 = vadd.f32 %v7302_v26, %v6471_v54 }
 0x62c   : > { %6542 = vst.msk [vmem:[%s15463_s27 + $0xf8] sm:$0xff] %vm17853_vm8, %v6510_v57 }
 0x62d   : > { %6541 = vst.msk [vmem:[%s15463_s27 + $0xf0] sm:$0xff] %vm17854_vm15, %v6509_v31 }
 0x62e PF: > { %s20_s13 = sadd.s32 1, %s7309_s13  }
 0x62f   : > { %p17_p4 = scmp.ge.s32.totalorder %s20_s13, 4  }
 0x631   :  { %19 = sbr.rel (!%p17_p4) target bundleno = 1 (0x1), region = 90 }

</bundles_post_ra>
